<compile_context>
chip_gen: v6e
topology: v6e:2x2x1
jax: 0.10.0
libtpu: 0.0.40
codegen_flags: <defaults>
</compile_context>

<pallas_src>
import math

import jax
import jax.numpy as jnp
from jax.experimental import pallas as pl
from jax.experimental.pallas import tpu as pltpu

# ----------------------------- configuration ------------------------------ #
B = 2                       # batch
SIG_LEN = 601               # waveform samples (model input is (B, SIG_LEN + 1))
N_FFT = 127
HOP = 40
FRAME_W = 128               # n_fft zero-padded to a lane-friendly width
N_FREQ = N_FFT // 2 + 1                       # 64
N_FRAMES = 1 + SIG_LEN // HOP                 # 16 (torch.stft, center=True)
PAD_SIG = 768               # reflect-padded (727) signal zero-padded to 768
PATCH = 8
D_PATCHES = PATCH * PATCH                     # 64
N_PATCHES = (N_FREQ // PATCH) * (N_FRAMES // PATCH)   # 16
D_MODEL = 32
N_HEAD = 4
HEAD_DIM = D_MODEL // N_HEAD                  # 8
D_FF = 64
N_LAYERS = 2
SEQ = N_PATCHES + 1                           # 17 (use_time = 1)
HID1, HID2 = 512, 128
LN_EPS = 1e-5
NBLK = B * (N_FRAMES // PATCH)                # 4 (batch x time-block groups)
LOG_SCALE = 2.0 / math.log(10.0)              # 20*log10(power)/10 == 2*log10


# --------------------------- fused forward kernel -------------------------- #
def fused_kernel(time_ref, framesT_ref, basis_ref, lp_w_ref, emb_ref, pe_ref,
                 ln_ref, attn_w_ref, attn_b_ref, attn_wo_ref,
                 ffn_w1_ref, ffn_b_ref, ffn_w2_ref,
                 h1_b_ref, h2_b_ref, h3_w_ref, h3_b_ref,
                 h1_w_hbm, h2_w_hbm,
                 o_ref,
                 h1w_vmem, h2w_vmem, dma_sem):
    # Kick off the big MLP-head weight fetch immediately; it overlaps with the
    # STFT + transformer compute and is waited on just before the head.
    cp1 = pltpu.make_async_copy(h1_w_hbm, h1w_vmem, dma_sem.at[0])
    cp2 = pltpu.make_async_copy(h2_w_hbm, h2w_vmem, dma_sem.at[1])
    cp1.start()
    cp2.start()

    # --- STFT: one (128,128)@(128,32) matmul covers both batches -----------
    y = jnp.dot(basis_ref[...], framesT_ref[...],
                preferred_element_type=jnp.float32)            # (128, 32)
    re = y[0:N_FREQ, :]
    im = y[N_FREQ:2 * N_FREQ, :]
    power = re * re + im * im                                  # (64, 32)
    # rows = frequencies in patch-major order (row kr*8+fb <-> freq fb*8+kr),
    # cols = frames b*16 + t.  Floor avoids -inf on exact-zero power.
    logspec = LOG_SCALE * jnp.log(jnp.maximum(power, 1e-30))

    # --- unfold 8x8 patching: 32 aligned (8,8) block copies ------------------
    # X[g*8+fb, kr*8+kc] = logspec[kr*8+fb, g*8+kc],  g = b*2 + tb
    row_groups = []
    for g in range(NBLK):
        row_groups.append(jnp.concatenate(
            [logspec[kr * PATCH:(kr + 1) * PATCH, g * PATCH:(g + 1) * PATCH]
             for kr in range(PATCH)], axis=1))                 # (8, 64)
    xpatch = jnp.concatenate(row_groups, axis=0)               # (32, 64)

    # --- patch projection (both batches in one matmul) ----------------------
    toks = jnp.dot(xpatch, lp_w_ref[...],
                   preferred_element_type=jnp.float32) + emb_ref[0:1, :]  # (32,32)

    scale = 1.0 / math.sqrt(HEAD_DIM)

    def layer_norm(z, w, bias):
        mu = jnp.mean(z, axis=-1, keepdims=True)
        zc = z - mu
        var = jnp.mean(zc * zc, axis=-1, keepdims=True)
        return zc * jax.lax.rsqrt(var + LN_EPS) * w + bias

    def encoder_layer(z, l):
        lnp = ln_ref[l]                                        # (4, D)
        zn = layer_norm(z, lnp[0:1, :], lnp[1:2, :])
        ab = attn_b_ref[l]                                     # (2, 3D)
        qkv = jnp.dot(zn, attn_w_ref[l],
                      preferred_element_type=jnp.float32) + ab[0:1, :]
        heads = []
        for hi in range(N_HEAD):
            q = qkv[:, hi * HEAD_DIM:(hi + 1) * HEAD_DIM]
            k = qkv[:, D_MODEL + hi * HEAD_DIM:D_MODEL + (hi + 1) * HEAD_DIM]
            v = qkv[:, 2 * D_MODEL + hi * HEAD_DIM:
                    2 * D_MODEL + (hi + 1) * HEAD_DIM]
            s = jax.lax.dot_general(q, k, (((1,), (1,)), ((), ())),
                                    preferred_element_type=jnp.float32) * scale
            s = s - jnp.max(s, axis=-1, keepdims=True)
            p = jnp.exp(s)
            p = p / jnp.sum(p, axis=-1, keepdims=True)         # exact softmax
            heads.append(jnp.dot(p, v, preferred_element_type=jnp.float32))
        attn = jnp.concatenate(heads, axis=-1)
        attn = jnp.dot(attn, attn_wo_ref[l],
                       preferred_element_type=jnp.float32) + ab[1:2, 0:D_MODEL]
        z = z + attn
        zn2 = layer_norm(z, lnp[2:3, :], lnp[3:4, :])
        fbias = ffn_b_ref[l]                                   # (2, D_FF)
        hmid = jnp.maximum(
            jnp.dot(zn2, ffn_w1_ref[l],
                    preferred_element_type=jnp.float32) + fbias[0:1, :], 0.0)
        ff = jnp.dot(hmid, ffn_w2_ref[l],
                     preferred_element_type=jnp.float32) + fbias[1:2, 0:D_MODEL]
        return z + ff

    # --- per-batch: time token, PE, 2 encoder layers, flatten ---------------
    flat_rows = []
    for b in range(B):
        traw = time_ref[b]                                     # SMEM scalar
        t = jnp.where(traw == -10000.0, 0.0, traw) * 0.01
        temb = t * emb_ref[1:2, :] + emb_ref[2:3, :]           # (1, D)
        xb = jnp.concatenate(
            [temb, toks[b * N_PATCHES:(b + 1) * N_PATCHES, :]],
            axis=0) + pe_ref[...]                              # (SEQ, D)
        for l in range(N_LAYERS):
            xb = encoder_layer(xb, l)
        # torch.flatten(x, 1): lane-concat of the 17 token rows -> (1, 544)
        flat_rows.append(jnp.concatenate([xb[s:s + 1, :] for s in range(SEQ)],
                                         axis=1))
    flat = jnp.concatenate(flat_rows, axis=0)                  # (B, SEQ*D)

    # --- MLP head; weights arrive via the overlapped DMA --------------------
    cp1.wait()
    h = jnp.maximum(
        jnp.dot(flat, h1w_vmem[...],
                preferred_element_type=jnp.float32) + h1_b_ref[...], 0.0)
    cp2.wait()
    h = jnp.maximum(
        jnp.dot(h, h2w_vmem[...],
                preferred_element_type=jnp.float32) + h2_b_ref[...], 0.0)
    out = jnp.dot(h, h3_w_ref[...],
                  preferred_element_type=jnp.float32) + h3_b_ref[...]  # (B, 1)
    o_ref[...] = out


def pallas_forward(time, framesT, P):
    vmem = pltpu.MemorySpace.VMEM
    smem = pltpu.MemorySpace.SMEM
    weights_vmem = [P["basis"], P["lp_w"], P["emb"], P["pe"], P["ln"],
                    P["attn_w"], P["attn_b"], P["attn_wo"],
                    P["ffn_w1"], P["ffn_b"], P["ffn_w2"],
                    P["h1_b"], P["h2_b"], P["h3_w"], P["h3_b"]]
    in_specs = ([pl.BlockSpec(memory_space=smem),      # time (B,) scalars
                 pl.BlockSpec(memory_space=vmem)]      # framesT
                + [pl.BlockSpec(memory_space=vmem) for _ in weights_vmem]
                + [pl.BlockSpec(memory_space=pl.ANY),  # h1_w stays in HBM
                   pl.BlockSpec(memory_space=pl.ANY)]) # h2_w stays in HBM
    return pl.pallas_call(
        fused_kernel,
        in_specs=in_specs,
        out_specs=pl.BlockSpec(memory_space=vmem),
        out_shape=jax.ShapeDtypeStruct((B, 1), jnp.float32),
        scratch_shapes=[pltpu.VMEM((SEQ * D_MODEL, HID1), jnp.float32),
                        pltpu.VMEM((HID1, HID2), jnp.float32),
                        pltpu.SemaphoreType.DMA((2,))],
    )(time, framesT, *weights_vmem, P["h1_w"], P["h2_w"])


# ------------------------------ params ------------------------------------- #
def init_params(key):
    ks = jax.random.split(key, 64)
    it = iter(ks)

    def nrm(shape, s=0.05):
        return (s * jax.random.normal(next(it), shape)).astype(jnp.float32)

    P = {}
    # STFT basis: rows = [cos | -sin] over frequencies in patch-major order
    # (row kr*8+fb holds freq fb*8+kr), cols = sample index n (127 -> 128 pad;
    # the zero column makes the 128th frame sample inert).  Hann window and
    # torchaudio Spectrogram(normalized=True) 1/||w|| factor folded in.
    w = 0.5 - 0.5 * jnp.cos(
        2.0 * jnp.pi * jnp.arange(N_FFT, dtype=jnp.float32) / N_FFT)
    n = jnp.arange(N_FFT, dtype=jnp.float32)[None, :]
    f = jnp.arange(N_FREQ, dtype=jnp.float32)[:, None]
    ang = 2.0 * jnp.pi * f * n / N_FFT
    norm = 1.0 / jnp.sqrt(jnp.sum(w * w))
    cos_t = (jnp.cos(ang) * w[None, :]) * norm                  # (64, 127)
    sin_t = (-jnp.sin(ang) * w[None, :]) * norm
    r = jnp.arange(N_FREQ)
    perm = (r % PATCH) * PATCH + r // PATCH
    basis = jnp.concatenate([cos_t[perm], sin_t[perm]], axis=0)  # (128, 127)
    P["basis"] = jnp.pad(basis, ((0, 0), (0, FRAME_W - N_FFT))
                         ).astype(jnp.float32)                   # (128, 128)

    P["lp_w"] = nrm((D_PATCHES, D_MODEL))
    lp_b, time_w, time_b = nrm((1, D_MODEL)), nrm((1, D_MODEL)), nrm((1, D_MODEL))
    P["emb"] = jnp.concatenate([lp_b, time_w, time_b], axis=0)   # (3, D)
    P["pe"] = jax.random.uniform(next(it), (SEQ, D_MODEL), jnp.float32,
                                 -0.02, 0.02)

    ln_l, aw_l, ab_l, awo_l, fw1_l, fb_l, fw2_l = [], [], [], [], [], [], []
    for _ in range(N_LAYERS):
        wq, wk, wv = (nrm((D_MODEL, D_MODEL)), nrm((D_MODEL, D_MODEL)),
                      nrm((D_MODEL, D_MODEL)))
        bq, bk, bv = nrm((D_MODEL,)), nrm((D_MODEL,)), nrm((D_MODEL,))
        wo, bo = nrm((D_MODEL, D_MODEL)), nrm((D_MODEL,))
        w1, b1 = nrm((D_MODEL, D_FF)), nrm((D_FF,))
        w2, b2 = nrm((D_FF, D_MODEL)), nrm((D_MODEL,))
        ln_l.append(jnp.stack([jnp.ones(D_MODEL), jnp.zeros(D_MODEL),
                               jnp.ones(D_MODEL), jnp.zeros(D_MODEL)]
                              ).astype(jnp.float32))
        aw_l.append(jnp.concatenate([wq, wk, wv], axis=1))            # (32, 96)
        ab_l.append(jnp.stack(
            [jnp.concatenate([bq, bk, bv]),
             jnp.concatenate([bo, jnp.zeros(2 * D_MODEL)])]))          # (2, 96)
        awo_l.append(wo)
        fw1_l.append(w1)
        fb_l.append(jnp.stack(
            [b1, jnp.concatenate([b2, jnp.zeros(D_FF - D_MODEL)])]))   # (2, 64)
        fw2_l.append(w2)
    P["ln"] = jnp.stack(ln_l)
    P["attn_w"] = jnp.stack(aw_l)
    P["attn_b"] = jnp.stack(ab_l).astype(jnp.float32)
    P["attn_wo"] = jnp.stack(awo_l)
    P["ffn_w1"] = jnp.stack(fw1_l)
    P["ffn_b"] = jnp.stack(fb_l).astype(jnp.float32)
    P["ffn_w2"] = jnp.stack(fw2_l)

    # MLP head.  h1_w row index = s*D_MODEL + d with s in this kernel's
    # sequence order (time token, then patches in tb*8+fb order).
    P["h1_w"] = nrm((SEQ * D_MODEL, HID1))
    P["h1_b"] = nrm((1, HID1))
    P["h2_w"] = nrm((HID1, HID2))
    P["h2_b"] = nrm((1, HID2))
    P["h3_w"] = nrm((HID2, 1))
    P["h3_b"] = nrm((1, 1))
    return P


# ------------------------------ forward ------------------------------------ #
def forward(x, P):
    time = x[:, -1]                                              # (B,)
    sig = x[:, :-1]                                              # (B, 601)

    # torch.stft center=True reflect pad + zero pad to a lane-friendly width.
    pad = N_FFT // 2
    padded = jnp.pad(sig, ((0, 0), (pad, pad)), mode="reflect")  # (B, 727)
    padded = jnp.pad(padded, ((0, 0), (0, PAD_SIG - padded.shape[1])))

    # Framing done in XLA (tiny glue); columns ordered b*N_FRAMES + t.
    frames = jnp.stack([padded[:, t * HOP:t * HOP + FRAME_W]
                        for t in range(N_FRAMES)], axis=1)       # (B, 16, 128)
    framesT = frames.reshape(B * N_FRAMES, FRAME_W).T            # (128, 32)

    return pallas_forward(time, framesT, P)                      # (B, 1)


# TODO(synk): use_rms branch of the reference forward references an undefined
# `rms` variable and is omitted (use_rms=0); dropouts are identity (eval mode);
# class_token / visualize_patching plotting are unused in the forward.

if __name__ == "__main__":
    key = jax.random.PRNGKey(0)
    pkey, xkey = jax.random.split(key)
    params = init_params(pkey)
    x = jax.random.normal(xkey, (B, SIG_LEN + 1), dtype=jnp.float32)

    out = jax.jit(lambda inp: forward(inp, params))(x)
    out = jax.block_until_ready(out)
    assert out.shape == (B, 1), out.shape
    assert bool(jnp.all(jnp.isfinite(out)))
    print("KERNEL_OK")
</pallas_src>

<mosaic_0001>
module attributes {stable_mosaic.version = 11 : i64} {
  func.func @fused_kernel(%arg0: memref<2xf32, #tpu.memory_space<smem>>, %arg1: memref<128x32xf32, #tpu.memory_space<vmem>>, %arg2: memref<128x128xf32, #tpu.memory_space<vmem>>, %arg3: memref<64x32xf32, #tpu.memory_space<vmem>>, %arg4: memref<3x32xf32, #tpu.memory_space<vmem>>, %arg5: memref<17x32xf32, #tpu.memory_space<vmem>>, %arg6: memref<2x4x32xf32, #tpu.memory_space<vmem>>, %arg7: memref<2x32x96xf32, #tpu.memory_space<vmem>>, %arg8: memref<2x2x96xf32, #tpu.memory_space<vmem>>, %arg9: memref<2x32x32xf32, #tpu.memory_space<vmem>>, %arg10: memref<2x32x64xf32, #tpu.memory_space<vmem>>, %arg11: memref<2x2x64xf32, #tpu.memory_space<vmem>>, %arg12: memref<2x64x32xf32, #tpu.memory_space<vmem>>, %arg13: memref<1x512xf32, #tpu.memory_space<vmem>>, %arg14: memref<1x128xf32, #tpu.memory_space<vmem>>, %arg15: memref<128x1xf32, #tpu.memory_space<vmem>>, %arg16: memref<1x1xf32, #tpu.memory_space<vmem>>, %arg17: memref<544x512xf32, #tpu.memory_space<any>>, %arg18: memref<512x128xf32, #tpu.memory_space<any>>, %arg19: memref<2x1xf32, #tpu.memory_space<vmem>>, %arg20: memref<544x512xf32, #tpu.memory_space<vmem>>, %arg21: memref<512x128xf32, #tpu.memory_space<vmem>>, %arg22: memref<2x!tpu.dma_semaphore, #tpu.memory_space<semaphore_mem>>) attributes {dimension_semantics = [], scalar_prefetch = 0 : i64, scratch_operands = 3 : i64, tpu.core_type = #tpu.core_type<tc>} {
    %c0_i32 = arith.constant 0 : i32
    %0 = tpu.memref_slice %arg22[%c0_i32] : memref<2x!tpu.dma_semaphore, #tpu.memory_space<semaphore_mem>> -> memref<1x!tpu.dma_semaphore, #tpu.memory_space<semaphore_mem>>
    %1 = tpu.memref_squeeze %0 : memref<1x!tpu.dma_semaphore, #tpu.memory_space<semaphore_mem>> -> memref<!tpu.dma_semaphore, #tpu.memory_space<semaphore_mem>>
    tpu.enqueue_dma source(%arg17 : memref<544x512xf32, #tpu.memory_space<any>>) target(%arg20 : memref<544x512xf32, #tpu.memory_space<vmem>>) target_semaphore(%1 : memref<!tpu.dma_semaphore, #tpu.memory_space<semaphore_mem>>)
    %c1_i32 = arith.constant 1 : i32
    %2 = tpu.memref_slice %arg22[%c1_i32] : memref<2x!tpu.dma_semaphore, #tpu.memory_space<semaphore_mem>> -> memref<1x!tpu.dma_semaphore, #tpu.memory_space<semaphore_mem>>
    %3 = tpu.memref_squeeze %2 : memref<1x!tpu.dma_semaphore, #tpu.memory_space<semaphore_mem>> -> memref<!tpu.dma_semaphore, #tpu.memory_space<semaphore_mem>>
    tpu.enqueue_dma source(%arg18 : memref<512x128xf32, #tpu.memory_space<any>>) target(%arg21 : memref<512x128xf32, #tpu.memory_space<vmem>>) target_semaphore(%3 : memref<!tpu.dma_semaphore, #tpu.memory_space<semaphore_mem>>)
    %c0 = arith.constant 0 : index
    %c0_0 = arith.constant 0 : index
    %4 = vector.load %arg2[%c0, %c0_0] : memref<128x128xf32, #tpu.memory_space<vmem>>, vector<128x128xf32>
    %c0_1 = arith.constant 0 : index
    %c0_2 = arith.constant 0 : index
    %5 = vector.load %arg1[%c0_1, %c0_2] : memref<128x32xf32, #tpu.memory_space<vmem>>, vector<128x32xf32>
    %cst = arith.constant dense<0.000000e+00> : vector<128x32xf32>
    %6 = tpu.matmul %4, %5, %cst {dimension_numbers = #tpu.dot_dimension_numbers<[1], [0], [0], [1], [0, 0, 1, 1], [], []>} : vector<128x128xf32>, vector<128x32xf32>, vector<128x32xf32> -> vector<128x32xf32>
    %7 = vector.extract_strided_slice %6 {offsets = [0, 0], sizes = [64, 32], strides = [1, 1]} : vector<128x32xf32> to vector<64x32xf32>
    %8 = vector.extract_strided_slice %6 {offsets = [64, 0], sizes = [64, 32], strides = [1, 1]} : vector<128x32xf32> to vector<64x32xf32>
    %9 = arith.mulf %7, %7 : vector<64x32xf32>
    %10 = arith.mulf %8, %8 : vector<64x32xf32>
    %11 = arith.addf %9, %10 : vector<64x32xf32>
    %cst_3 = arith.constant 1.000000e-30 : f32
    %12 = vector.broadcast %cst_3 : f32 to vector<64x32xf32>
    %13 = arith.maximumf %11, %12 : vector<64x32xf32>
    %14 = math.log %13 : vector<64x32xf32>
    %cst_4 = arith.constant 0.868588984 : f32
    %15 = vector.broadcast %cst_4 : f32 to vector<64x32xf32>
    %16 = arith.mulf %15, %14 : vector<64x32xf32>
    %17 = vector.extract_strided_slice %16 {offsets = [0, 0], sizes = [8, 8], strides = [1, 1]} : vector<64x32xf32> to vector<8x8xf32>
    %18 = vector.extract_strided_slice %16 {offsets = [8, 0], sizes = [8, 8], strides = [1, 1]} : vector<64x32xf32> to vector<8x8xf32>
    %19 = vector.extract_strided_slice %16 {offsets = [16, 0], sizes = [8, 8], strides = [1, 1]} : vector<64x32xf32> to vector<8x8xf32>
    %20 = vector.extract_strided_slice %16 {offsets = [24, 0], sizes = [8, 8], strides = [1, 1]} : vector<64x32xf32> to vector<8x8xf32>
    %21 = vector.extract_strided_slice %16 {offsets = [32, 0], sizes = [8, 8], strides = [1, 1]} : vector<64x32xf32> to vector<8x8xf32>
    %22 = vector.extract_strided_slice %16 {offsets = [40, 0], sizes = [8, 8], strides = [1, 1]} : vector<64x32xf32> to vector<8x8xf32>
    %23 = vector.extract_strided_slice %16 {offsets = [48, 0], sizes = [8, 8], strides = [1, 1]} : vector<64x32xf32> to vector<8x8xf32>
    %24 = vector.extract_strided_slice %16 {offsets = [56, 0], sizes = [8, 8], strides = [1, 1]} : vector<64x32xf32> to vector<8x8xf32>
    %25 = tpu.concatenate %17, %18, %19, %20, %21, %22, %23, %24 in 1 : vector<8x8xf32>, vector<8x8xf32>, vector<8x8xf32>, vector<8x8xf32>, vector<8x8xf32>, vector<8x8xf32>, vector<8x8xf32>, vector<8x8xf32> -> vector<8x64xf32>
    %26 = vector.extract_strided_slice %16 {offsets = [0, 8], sizes = [8, 8], strides = [1, 1]} : vector<64x32xf32> to vector<8x8xf32>
    %27 = vector.extract_strided_slice %16 {offsets = [8, 8], sizes = [8, 8], strides = [1, 1]} : vector<64x32xf32> to vector<8x8xf32>
    %28 = vector.extract_strided_slice %16 {offsets = [16, 8], sizes = [8, 8], strides = [1, 1]} : vector<64x32xf32> to vector<8x8xf32>
    %29 = vector.extract_strided_slice %16 {offsets = [24, 8], sizes = [8, 8], strides = [1, 1]} : vector<64x32xf32> to vector<8x8xf32>
    %30 = vector.extract_strided_slice %16 {offsets = [32, 8], sizes = [8, 8], strides = [1, 1]} : vector<64x32xf32> to vector<8x8xf32>
    %31 = vector.extract_strided_slice %16 {offsets = [40, 8], sizes = [8, 8], strides = [1, 1]} : vector<64x32xf32> to vector<8x8xf32>
    %32 = vector.extract_strided_slice %16 {offsets = [48, 8], sizes = [8, 8], strides = [1, 1]} : vector<64x32xf32> to vector<8x8xf32>
    %33 = vector.extract_strided_slice %16 {offsets = [56, 8], sizes = [8, 8], strides = [1, 1]} : vector<64x32xf32> to vector<8x8xf32>
    %34 = tpu.concatenate %26, %27, %28, %29, %30, %31, %32, %33 in 1 : vector<8x8xf32>, vector<8x8xf32>, vector<8x8xf32>, vector<8x8xf32>, vector<8x8xf32>, vector<8x8xf32>, vector<8x8xf32>, vector<8x8xf32> -> vector<8x64xf32>
    %35 = vector.extract_strided_slice %16 {offsets = [0, 16], sizes = [8, 8], strides = [1, 1]} : vector<64x32xf32> to vector<8x8xf32>
    %36 = vector.extract_strided_slice %16 {offsets = [8, 16], sizes = [8, 8], strides = [1, 1]} : vector<64x32xf32> to vector<8x8xf32>
    %37 = vector.extract_strided_slice %16 {offsets = [16, 16], sizes = [8, 8], strides = [1, 1]} : vector<64x32xf32> to vector<8x8xf32>
    %38 = vector.extract_strided_slice %16 {offsets = [24, 16], sizes = [8, 8], strides = [1, 1]} : vector<64x32xf32> to vector<8x8xf32>
    %39 = vector.extract_strided_slice %16 {offsets = [32, 16], sizes = [8, 8], strides = [1, 1]} : vector<64x32xf32> to vector<8x8xf32>
    %40 = vector.extract_strided_slice %16 {offsets = [40, 16], sizes = [8, 8], strides = [1, 1]} : vector<64x32xf32> to vector<8x8xf32>
    %41 = vector.extract_strided_slice %16 {offsets = [48, 16], sizes = [8, 8], strides = [1, 1]} : vector<64x32xf32> to vector<8x8xf32>
    %42 = vector.extract_strided_slice %16 {offsets = [56, 16], sizes = [8, 8], strides = [1, 1]} : vector<64x32xf32> to vector<8x8xf32>
    %43 = tpu.concatenate %35, %36, %37, %38, %39, %40, %41, %42 in 1 : vector<8x8xf32>, vector<8x8xf32>, vector<8x8xf32>, vector<8x8xf32>, vector<8x8xf32>, vector<8x8xf32>, vector<8x8xf32>, vector<8x8xf32> -> vector<8x64xf32>
    %44 = vector.extract_strided_slice %16 {offsets = [0, 24], sizes = [8, 8], strides = [1, 1]} : vector<64x32xf32> to vector<8x8xf32>
    %45 = vector.extract_strided_slice %16 {offsets = [8, 24], sizes = [8, 8], strides = [1, 1]} : vector<64x32xf32> to vector<8x8xf32>
    %46 = vector.extract_strided_slice %16 {offsets = [16, 24], sizes = [8, 8], strides = [1, 1]} : vector<64x32xf32> to vector<8x8xf32>
    %47 = vector.extract_strided_slice %16 {offsets = [24, 24], sizes = [8, 8], strides = [1, 1]} : vector<64x32xf32> to vector<8x8xf32>
    %48 = vector.extract_strided_slice %16 {offsets = [32, 24], sizes = [8, 8], strides = [1, 1]} : vector<64x32xf32> to vector<8x8xf32>
    %49 = vector.extract_strided_slice %16 {offsets = [40, 24], sizes = [8, 8], strides = [1, 1]} : vector<64x32xf32> to vector<8x8xf32>
    %50 = vector.extract_strided_slice %16 {offsets = [48, 24], sizes = [8, 8], strides = [1, 1]} : vector<64x32xf32> to vector<8x8xf32>
    %51 = vector.extract_strided_slice %16 {offsets = [56, 24], sizes = [8, 8], strides = [1, 1]} : vector<64x32xf32> to vector<8x8xf32>
    %52 = tpu.concatenate %44, %45, %46, %47, %48, %49, %50, %51 in 1 : vector<8x8xf32>, vector<8x8xf32>, vector<8x8xf32>, vector<8x8xf32>, vector<8x8xf32>, vector<8x8xf32>, vector<8x8xf32>, vector<8x8xf32> -> vector<8x64xf32>
    %53 = tpu.concatenate %25, %34, %43, %52 in 0 : vector<8x64xf32>, vector<8x64xf32>, vector<8x64xf32>, vector<8x64xf32> -> vector<32x64xf32>
    %c0_5 = arith.constant 0 : index
    %c0_6 = arith.constant 0 : index
    %54 = vector.load %arg3[%c0_5, %c0_6] : memref<64x32xf32, #tpu.memory_space<vmem>>, vector<64x32xf32>
    %cst_7 = arith.constant dense<0.000000e+00> : vector<32x32xf32>
    %55 = tpu.matmul %53, %54, %cst_7 {dimension_numbers = #tpu.dot_dimension_numbers<[1], [0], [0], [1], [0, 0, 1, 1], [], []>} : vector<32x64xf32>, vector<64x32xf32>, vector<32x32xf32> -> vector<32x32xf32>
    %c0_8 = arith.constant 0 : index
    %c0_9 = arith.constant 0 : index
    %56 = vector.load %arg4[%c0_8, %c0_9] : memref<3x32xf32, #tpu.memory_space<vmem>>, vector<1x32xf32>
    %57 = vector.broadcast %56 : vector<1x32xf32> to vector<32x32xf32>
    %58 = arith.addf %55, %57 : vector<32x32xf32>
    %c0_10 = arith.constant 0 : index
    %59 = memref.load %arg0[%c0_10] : memref<2xf32, #tpu.memory_space<smem>>
    %cst_11 = arith.constant -1.000000e+04 : f32
    %60 = arith.cmpf oeq, %59, %cst_11 : f32
    %cst_12 = arith.constant 0.000000e+00 : f32
    %61 = arith.select %60, %cst_12, %59 : f32
    %cst_13 = arith.constant 0.00999999977 : f32
    %62 = arith.mulf %61, %cst_13 : f32
    %c1 = arith.constant 1 : index
    %c0_14 = arith.constant 0 : index
    %63 = vector.load %arg4[%c1, %c0_14] : memref<3x32xf32, #tpu.memory_space<vmem>>, vector<1x32xf32>
    %64 = vector.broadcast %62 : f32 to vector<1x32xf32>
    %65 = arith.mulf %64, %63 : vector<1x32xf32>
    %c2 = arith.constant 2 : index
    %c0_15 = arith.constant 0 : index
    %66 = vector.load %arg4[%c2, %c0_15] : memref<3x32xf32, #tpu.memory_space<vmem>>, vector<1x32xf32>
    %67 = arith.addf %65, %66 : vector<1x32xf32>
    %68 = vector.extract_strided_slice %58 {offsets = [0, 0], sizes = [16, 32], strides = [1, 1]} : vector<32x32xf32> to vector<16x32xf32>
    %69 = tpu.concatenate %67, %68 in 0 : vector<1x32xf32>, vector<16x32xf32> -> vector<17x32xf32>
    %c0_16 = arith.constant 0 : index
    %c0_17 = arith.constant 0 : index
    %70 = vector.load %arg5[%c0_16, %c0_17] : memref<17x32xf32, #tpu.memory_space<vmem>>, vector<17x32xf32>
    %71 = arith.addf %69, %70 : vector<17x32xf32>
    %c0_18 = arith.constant 0 : index
    %c0_19 = arith.constant 0 : index
    %c0_20 = arith.constant 0 : index
    %72 = vector.load %arg6[%c0_18, %c0_19, %c0_20] : memref<2x4x32xf32, #tpu.memory_space<vmem>>, vector<1x4x32xf32>
    %73 = vector.shape_cast %72 : vector<1x4x32xf32> to vector<4x32xf32>
    %74 = vector.extract_strided_slice %73 {offsets = [0, 0], sizes = [1, 32], strides = [1, 1]} : vector<4x32xf32> to vector<1x32xf32>
    %75 = vector.extract_strided_slice %73 {offsets = [1, 0], sizes = [1, 32], strides = [1, 1]} : vector<4x32xf32> to vector<1x32xf32>
    %cst_21 = arith.constant dense<0.000000e+00> : vector<17xf32>
    %76 = vector.multi_reduction <add>, %71, %cst_21 [1] : vector<17x32xf32> to vector<17xf32>
    %77 = vector.shape_cast %76 : vector<17xf32> to vector<17x1xf32>
    %cst_22 = arith.constant 3.200000e+01 : f32
    %78 = vector.broadcast %cst_22 : f32 to vector<17x1xf32>
    %79 = arith.divf %77, %78 : vector<17x1xf32>
    %80 = vector.broadcast %79 : vector<17x1xf32> to vector<17x32xf32>
    %81 = arith.subf %71, %80 : vector<17x32xf32>
    %82 = arith.mulf %81, %81 : vector<17x32xf32>
    %cst_23 = arith.constant dense<0.000000e+00> : vector<17xf32>
    %83 = vector.multi_reduction <add>, %82, %cst_23 [1] : vector<17x32xf32> to vector<17xf32>
    %84 = vector.shape_cast %83 : vector<17xf32> to vector<17x1xf32>
    %cst_24 = arith.constant 3.200000e+01 : f32
    %85 = vector.broadcast %cst_24 : f32 to vector<17x1xf32>
    %86 = arith.divf %84, %85 : vector<17x1xf32>
    %cst_25 = arith.constant 9.99999974E-6 : f32
    %87 = vector.broadcast %cst_25 : f32 to vector<17x1xf32>
    %88 = arith.addf %86, %87 : vector<17x1xf32>
    %89 = math.rsqrt %88 : vector<17x1xf32>
    %90 = vector.broadcast %89 : vector<17x1xf32> to vector<17x32xf32>
    %91 = arith.mulf %81, %90 : vector<17x32xf32>
    %92 = vector.broadcast %74 : vector<1x32xf32> to vector<17x32xf32>
    %93 = arith.mulf %91, %92 : vector<17x32xf32>
    %94 = vector.broadcast %75 : vector<1x32xf32> to vector<17x32xf32>
    %95 = arith.addf %93, %94 : vector<17x32xf32>
    %c0_26 = arith.constant 0 : index
    %c0_27 = arith.constant 0 : index
    %c0_28 = arith.constant 0 : index
    %96 = vector.load %arg8[%c0_26, %c0_27, %c0_28] : memref<2x2x96xf32, #tpu.memory_space<vmem>>, vector<1x2x96xf32>
    %97 = vector.shape_cast %96 : vector<1x2x96xf32> to vector<2x96xf32>
    %c0_29 = arith.constant 0 : index
    %c0_30 = arith.constant 0 : index
    %c0_31 = arith.constant 0 : index
    %98 = vector.load %arg7[%c0_29, %c0_30, %c0_31] : memref<2x32x96xf32, #tpu.memory_space<vmem>>, vector<1x32x96xf32>
    %99 = vector.shape_cast %98 : vector<1x32x96xf32> to vector<32x96xf32>
    %cst_32 = arith.constant dense<0.000000e+00> : vector<17x96xf32>
    %100 = tpu.matmul %95, %99, %cst_32 {dimension_numbers = #tpu.dot_dimension_numbers<[1], [0], [0], [1], [0, 0, 1, 1], [], []>} : vector<17x32xf32>, vector<32x96xf32>, vector<17x96xf32> -> vector<17x96xf32>
    %101 = vector.extract_strided_slice %97 {offsets = [0, 0], sizes = [1, 96], strides = [1, 1]} : vector<2x96xf32> to vector<1x96xf32>
    %102 = vector.broadcast %101 : vector<1x96xf32> to vector<17x96xf32>
    %103 = arith.addf %100, %102 : vector<17x96xf32>
    %104 = vector.extract_strided_slice %103 {offsets = [0, 0], sizes = [17, 8], strides = [1, 1]} : vector<17x96xf32> to vector<17x8xf32>
    %105 = vector.extract_strided_slice %103 {offsets = [0, 32], sizes = [17, 8], strides = [1, 1]} : vector<17x96xf32> to vector<17x8xf32>
    %106 = vector.extract_strided_slice %103 {offsets = [0, 64], sizes = [17, 8], strides = [1, 1]} : vector<17x96xf32> to vector<17x8xf32>
    %cst_33 = arith.constant dense<0.000000e+00> : vector<17x17xf32>
    %107 = tpu.matmul %104, %105, %cst_33 {dimension_numbers = #tpu.dot_dimension_numbers<[1], [1], [0], [0], [0, 0, 1, 0], [], []>} : vector<17x8xf32>, vector<17x8xf32>, vector<17x17xf32> -> vector<17x17xf32>
    %cst_34 = arith.constant 0.353553385 : f32
    %108 = vector.broadcast %cst_34 : f32 to vector<17x17xf32>
    %109 = arith.mulf %107, %108 : vector<17x17xf32>
    %cst_35 = arith.constant dense<0xFF800000> : vector<17xf32>
    %110 = vector.multi_reduction <maximumf>, %109, %cst_35 [1] : vector<17x17xf32> to vector<17xf32>
    %111 = vector.shape_cast %110 : vector<17xf32> to vector<17x1xf32>
    %112 = vector.broadcast %111 : vector<17x1xf32> to vector<17x17xf32>
    %113 = arith.subf %109, %112 : vector<17x17xf32>
    %114 = math.exp %113 : vector<17x17xf32>
    %cst_36 = arith.constant dense<0.000000e+00> : vector<17xf32>
    %115 = vector.multi_reduction <add>, %114, %cst_36 [1] : vector<17x17xf32> to vector<17xf32>
    %116 = vector.shape_cast %115 : vector<17xf32> to vector<17x1xf32>
    %117 = vector.broadcast %116 : vector<17x1xf32> to vector<17x17xf32>
    %118 = arith.divf %114, %117 : vector<17x17xf32>
    %cst_37 = arith.constant dense<0.000000e+00> : vector<17x8xf32>
    %119 = tpu.matmul %118, %106, %cst_37 {dimension_numbers = #tpu.dot_dimension_numbers<[1], [0], [0], [1], [0, 0, 1, 1], [], []>} : vector<17x17xf32>, vector<17x8xf32>, vector<17x8xf32> -> vector<17x8xf32>
    %120 = vector.extract_strided_slice %103 {offsets = [0, 8], sizes = [17, 8], strides = [1, 1]} : vector<17x96xf32> to vector<17x8xf32>
    %121 = vector.extract_strided_slice %103 {offsets = [0, 40], sizes = [17, 8], strides = [1, 1]} : vector<17x96xf32> to vector<17x8xf32>
    %122 = vector.extract_strided_slice %103 {offsets = [0, 72], sizes = [17, 8], strides = [1, 1]} : vector<17x96xf32> to vector<17x8xf32>
    %cst_38 = arith.constant dense<0.000000e+00> : vector<17x17xf32>
    %123 = tpu.matmul %120, %121, %cst_38 {dimension_numbers = #tpu.dot_dimension_numbers<[1], [1], [0], [0], [0, 0, 1, 0], [], []>} : vector<17x8xf32>, vector<17x8xf32>, vector<17x17xf32> -> vector<17x17xf32>
    %cst_39 = arith.constant 0.353553385 : f32
    %124 = vector.broadcast %cst_39 : f32 to vector<17x17xf32>
    %125 = arith.mulf %123, %124 : vector<17x17xf32>
    %cst_40 = arith.constant dense<0xFF800000> : vector<17xf32>
    %126 = vector.multi_reduction <maximumf>, %125, %cst_40 [1] : vector<17x17xf32> to vector<17xf32>
    %127 = vector.shape_cast %126 : vector<17xf32> to vector<17x1xf32>
    %128 = vector.broadcast %127 : vector<17x1xf32> to vector<17x17xf32>
    %129 = arith.subf %125, %128 : vector<17x17xf32>
    %130 = math.exp %129 : vector<17x17xf32>
    %cst_41 = arith.constant dense<0.000000e+00> : vector<17xf32>
    %131 = vector.multi_reduction <add>, %130, %cst_41 [1] : vector<17x17xf32> to vector<17xf32>
    %132 = vector.shape_cast %131 : vector<17xf32> to vector<17x1xf32>
    %133 = vector.broadcast %132 : vector<17x1xf32> to vector<17x17xf32>
    %134 = arith.divf %130, %133 : vector<17x17xf32>
    %cst_42 = arith.constant dense<0.000000e+00> : vector<17x8xf32>
    %135 = tpu.matmul %134, %122, %cst_42 {dimension_numbers = #tpu.dot_dimension_numbers<[1], [0], [0], [1], [0, 0, 1, 1], [], []>} : vector<17x17xf32>, vector<17x8xf32>, vector<17x8xf32> -> vector<17x8xf32>
    %136 = vector.extract_strided_slice %103 {offsets = [0, 16], sizes = [17, 8], strides = [1, 1]} : vector<17x96xf32> to vector<17x8xf32>
    %137 = vector.extract_strided_slice %103 {offsets = [0, 48], sizes = [17, 8], strides = [1, 1]} : vector<17x96xf32> to vector<17x8xf32>
    %138 = vector.extract_strided_slice %103 {offsets = [0, 80], sizes = [17, 8], strides = [1, 1]} : vector<17x96xf32> to vector<17x8xf32>
    %cst_43 = arith.constant dense<0.000000e+00> : vector<17x17xf32>
    %139 = tpu.matmul %136, %137, %cst_43 {dimension_numbers = #tpu.dot_dimension_numbers<[1], [1], [0], [0], [0, 0, 1, 0], [], []>} : vector<17x8xf32>, vector<17x8xf32>, vector<17x17xf32> -> vector<17x17xf32>
    %cst_44 = arith.constant 0.353553385 : f32
    %140 = vector.broadcast %cst_44 : f32 to vector<17x17xf32>
    %141 = arith.mulf %139, %140 : vector<17x17xf32>
    %cst_45 = arith.constant dense<0xFF800000> : vector<17xf32>
    %142 = vector.multi_reduction <maximumf>, %141, %cst_45 [1] : vector<17x17xf32> to vector<17xf32>
    %143 = vector.shape_cast %142 : vector<17xf32> to vector<17x1xf32>
    %144 = vector.broadcast %143 : vector<17x1xf32> to vector<17x17xf32>
    %145 = arith.subf %141, %144 : vector<17x17xf32>
    %146 = math.exp %145 : vector<17x17xf32>
    %cst_46 = arith.constant dense<0.000000e+00> : vector<17xf32>
    %147 = vector.multi_reduction <add>, %146, %cst_46 [1] : vector<17x17xf32> to vector<17xf32>
    %148 = vector.shape_cast %147 : vector<17xf32> to vector<17x1xf32>
    %149 = vector.broadcast %148 : vector<17x1xf32> to vector<17x17xf32>
    %150 = arith.divf %146, %149 : vector<17x17xf32>
    %cst_47 = arith.constant dense<0.000000e+00> : vector<17x8xf32>
    %151 = tpu.matmul %150, %138, %cst_47 {dimension_numbers = #tpu.dot_dimension_numbers<[1], [0], [0], [1], [0, 0, 1, 1], [], []>} : vector<17x17xf32>, vector<17x8xf32>, vector<17x8xf32> -> vector<17x8xf32>
    %152 = vector.extract_strided_slice %103 {offsets = [0, 24], sizes = [17, 8], strides = [1, 1]} : vector<17x96xf32> to vector<17x8xf32>
    %153 = vector.extract_strided_slice %103 {offsets = [0, 56], sizes = [17, 8], strides = [1, 1]} : vector<17x96xf32> to vector<17x8xf32>
    %154 = vector.extract_strided_slice %103 {offsets = [0, 88], sizes = [17, 8], strides = [1, 1]} : vector<17x96xf32> to vector<17x8xf32>
    %cst_48 = arith.constant dense<0.000000e+00> : vector<17x17xf32>
    %155 = tpu.matmul %152, %153, %cst_48 {dimension_numbers = #tpu.dot_dimension_numbers<[1], [1], [0], [0], [0, 0, 1, 0], [], []>} : vector<17x8xf32>, vector<17x8xf32>, vector<17x17xf32> -> vector<17x17xf32>
    %cst_49 = arith.constant 0.353553385 : f32
    %156 = vector.broadcast %cst_49 : f32 to vector<17x17xf32>
    %157 = arith.mulf %155, %156 : vector<17x17xf32>
    %cst_50 = arith.constant dense<0xFF800000> : vector<17xf32>
    %158 = vector.multi_reduction <maximumf>, %157, %cst_50 [1] : vector<17x17xf32> to vector<17xf32>
    %159 = vector.shape_cast %158 : vector<17xf32> to vector<17x1xf32>
    %160 = vector.broadcast %159 : vector<17x1xf32> to vector<17x17xf32>
    %161 = arith.subf %157, %160 : vector<17x17xf32>
    %162 = math.exp %161 : vector<17x17xf32>
    %cst_51 = arith.constant dense<0.000000e+00> : vector<17xf32>
    %163 = vector.multi_reduction <add>, %162, %cst_51 [1] : vector<17x17xf32> to vector<17xf32>
    %164 = vector.shape_cast %163 : vector<17xf32> to vector<17x1xf32>
    %165 = vector.broadcast %164 : vector<17x1xf32> to vector<17x17xf32>
    %166 = arith.divf %162, %165 : vector<17x17xf32>
    %cst_52 = arith.constant dense<0.000000e+00> : vector<17x8xf32>
    %167 = tpu.matmul %166, %154, %cst_52 {dimension_numbers = #tpu.dot_dimension_numbers<[1], [0], [0], [1], [0, 0, 1, 1], [], []>} : vector<17x17xf32>, vector<17x8xf32>, vector<17x8xf32> -> vector<17x8xf32>
    %168 = tpu.concatenate %119, %135, %151, %167 in 1 : vector<17x8xf32>, vector<17x8xf32>, vector<17x8xf32>, vector<17x8xf32> -> vector<17x32xf32>
    %c0_53 = arith.constant 0 : index
    %c0_54 = arith.constant 0 : index
    %c0_55 = arith.constant 0 : index
    %169 = vector.load %arg9[%c0_53, %c0_54, %c0_55] : memref<2x32x32xf32, #tpu.memory_space<vmem>>, vector<1x32x32xf32>
    %170 = vector.shape_cast %169 : vector<1x32x32xf32> to vector<32x32xf32>
    %cst_56 = arith.constant dense<0.000000e+00> : vector<17x32xf32>
    %171 = tpu.matmul %168, %170, %cst_56 {dimension_numbers = #tpu.dot_dimension_numbers<[1], [0], [0], [1], [0, 0, 1, 1], [], []>} : vector<17x32xf32>, vector<32x32xf32>, vector<17x32xf32> -> vector<17x32xf32>
    %172 = vector.extract_strided_slice %97 {offsets = [1, 0], sizes = [1, 32], strides = [1, 1]} : vector<2x96xf32> to vector<1x32xf32>
    %173 = vector.broadcast %172 : vector<1x32xf32> to vector<17x32xf32>
    %174 = arith.addf %171, %173 : vector<17x32xf32>
    %175 = arith.addf %71, %174 : vector<17x32xf32>
    %176 = vector.extract_strided_slice %73 {offsets = [2, 0], sizes = [1, 32], strides = [1, 1]} : vector<4x32xf32> to vector<1x32xf32>
    %177 = vector.extract_strided_slice %73 {offsets = [3, 0], sizes = [1, 32], strides = [1, 1]} : vector<4x32xf32> to vector<1x32xf32>
    %cst_57 = arith.constant dense<0.000000e+00> : vector<17xf32>
    %178 = vector.multi_reduction <add>, %175, %cst_57 [1] : vector<17x32xf32> to vector<17xf32>
    %179 = vector.shape_cast %178 : vector<17xf32> to vector<17x1xf32>
    %cst_58 = arith.constant 3.200000e+01 : f32
    %180 = vector.broadcast %cst_58 : f32 to vector<17x1xf32>
    %181 = arith.divf %179, %180 : vector<17x1xf32>
    %182 = vector.broadcast %181 : vector<17x1xf32> to vector<17x32xf32>
    %183 = arith.subf %175, %182 : vector<17x32xf32>
    %184 = arith.mulf %183, %183 : vector<17x32xf32>
    %cst_59 = arith.constant dense<0.000000e+00> : vector<17xf32>
    %185 = vector.multi_reduction <add>, %184, %cst_59 [1] : vector<17x32xf32> to vector<17xf32>
    %186 = vector.shape_cast %185 : vector<17xf32> to vector<17x1xf32>
    %cst_60 = arith.constant 3.200000e+01 : f32
    %187 = vector.broadcast %cst_60 : f32 to vector<17x1xf32>
    %188 = arith.divf %186, %187 : vector<17x1xf32>
    %cst_61 = arith.constant 9.99999974E-6 : f32
    %189 = vector.broadcast %cst_61 : f32 to vector<17x1xf32>
    %190 = arith.addf %188, %189 : vector<17x1xf32>
    %191 = math.rsqrt %190 : vector<17x1xf32>
    %192 = vector.broadcast %191 : vector<17x1xf32> to vector<17x32xf32>
    %193 = arith.mulf %183, %192 : vector<17x32xf32>
    %194 = vector.broadcast %176 : vector<1x32xf32> to vector<17x32xf32>
    %195 = arith.mulf %193, %194 : vector<17x32xf32>
    %196 = vector.broadcast %177 : vector<1x32xf32> to vector<17x32xf32>
    %197 = arith.addf %195, %196 : vector<17x32xf32>
    %c0_62 = arith.constant 0 : index
    %c0_63 = arith.constant 0 : index
    %c0_64 = arith.constant 0 : index
    %198 = vector.load %arg11[%c0_62, %c0_63, %c0_64] : memref<2x2x64xf32, #tpu.memory_space<vmem>>, vector<1x2x64xf32>
    %199 = vector.shape_cast %198 : vector<1x2x64xf32> to vector<2x64xf32>
    %c0_65 = arith.constant 0 : index
    %c0_66 = arith.constant 0 : index
    %c0_67 = arith.constant 0 : index
    %200 = vector.load %arg10[%c0_65, %c0_66, %c0_67] : memref<2x32x64xf32, #tpu.memory_space<vmem>>, vector<1x32x64xf32>
    %201 = vector.shape_cast %200 : vector<1x32x64xf32> to vector<32x64xf32>
    %cst_68 = arith.constant dense<0.000000e+00> : vector<17x64xf32>
    %202 = tpu.matmul %197, %201, %cst_68 {dimension_numbers = #tpu.dot_dimension_numbers<[1], [0], [0], [1], [0, 0, 1, 1], [], []>} : vector<17x32xf32>, vector<32x64xf32>, vector<17x64xf32> -> vector<17x64xf32>
    %203 = vector.extract_strided_slice %199 {offsets = [0, 0], sizes = [1, 64], strides = [1, 1]} : vector<2x64xf32> to vector<1x64xf32>
    %204 = vector.broadcast %203 : vector<1x64xf32> to vector<17x64xf32>
    %205 = arith.addf %202, %204 : vector<17x64xf32>
    %cst_69 = arith.constant 0.000000e+00 : f32
    %206 = vector.broadcast %cst_69 : f32 to vector<17x64xf32>
    %207 = arith.maximumf %205, %206 : vector<17x64xf32>
    %c0_70 = arith.constant 0 : index
    %c0_71 = arith.constant 0 : index
    %c0_72 = arith.constant 0 : index
    %208 = vector.load %arg12[%c0_70, %c0_71, %c0_72] : memref<2x64x32xf32, #tpu.memory_space<vmem>>, vector<1x64x32xf32>
    %209 = vector.shape_cast %208 : vector<1x64x32xf32> to vector<64x32xf32>
    %cst_73 = arith.constant dense<0.000000e+00> : vector<17x32xf32>
    %210 = tpu.matmul %207, %209, %cst_73 {dimension_numbers = #tpu.dot_dimension_numbers<[1], [0], [0], [1], [0, 0, 1, 1], [], []>} : vector<17x64xf32>, vector<64x32xf32>, vector<17x32xf32> -> vector<17x32xf32>
    %211 = vector.extract_strided_slice %199 {offsets = [1, 0], sizes = [1, 32], strides = [1, 1]} : vector<2x64xf32> to vector<1x32xf32>
    %212 = vector.broadcast %211 : vector<1x32xf32> to vector<17x32xf32>
    %213 = arith.addf %210, %212 : vector<17x32xf32>
    %214 = arith.addf %175, %213 : vector<17x32xf32>
    %c1_74 = arith.constant 1 : index
    %c0_75 = arith.constant 0 : index
    %c0_76 = arith.constant 0 : index
    %215 = vector.load %arg6[%c1_74, %c0_75, %c0_76] : memref<2x4x32xf32, #tpu.memory_space<vmem>>, vector<1x4x32xf32>
    %216 = vector.shape_cast %215 : vector<1x4x32xf32> to vector<4x32xf32>
    %217 = vector.extract_strided_slice %216 {offsets = [0, 0], sizes = [1, 32], strides = [1, 1]} : vector<4x32xf32> to vector<1x32xf32>
    %218 = vector.extract_strided_slice %216 {offsets = [1, 0], sizes = [1, 32], strides = [1, 1]} : vector<4x32xf32> to vector<1x32xf32>
    %cst_77 = arith.constant dense<0.000000e+00> : vector<17xf32>
    %219 = vector.multi_reduction <add>, %214, %cst_77 [1] : vector<17x32xf32> to vector<17xf32>
    %220 = vector.shape_cast %219 : vector<17xf32> to vector<17x1xf32>
    %cst_78 = arith.constant 3.200000e+01 : f32
    %221 = vector.broadcast %cst_78 : f32 to vector<17x1xf32>
    %222 = arith.divf %220, %221 : vector<17x1xf32>
    %223 = vector.broadcast %222 : vector<17x1xf32> to vector<17x32xf32>
    %224 = arith.subf %214, %223 : vector<17x32xf32>
    %225 = arith.mulf %224, %224 : vector<17x32xf32>
    %cst_79 = arith.constant dense<0.000000e+00> : vector<17xf32>
    %226 = vector.multi_reduction <add>, %225, %cst_79 [1] : vector<17x32xf32> to vector<17xf32>
    %227 = vector.shape_cast %226 : vector<17xf32> to vector<17x1xf32>
    %cst_80 = arith.constant 3.200000e+01 : f32
    %228 = vector.broadcast %cst_80 : f32 to vector<17x1xf32>
    %229 = arith.divf %227, %228 : vector<17x1xf32>
    %cst_81 = arith.constant 9.99999974E-6 : f32
    %230 = vector.broadcast %cst_81 : f32 to vector<17x1xf32>
    %231 = arith.addf %229, %230 : vector<17x1xf32>
    %232 = math.rsqrt %231 : vector<17x1xf32>
    %233 = vector.broadcast %232 : vector<17x1xf32> to vector<17x32xf32>
    %234 = arith.mulf %224, %233 : vector<17x32xf32>
    %235 = vector.broadcast %217 : vector<1x32xf32> to vector<17x32xf32>
    %236 = arith.mulf %234, %235 : vector<17x32xf32>
    %237 = vector.broadcast %218 : vector<1x32xf32> to vector<17x32xf32>
    %238 = arith.addf %236, %237 : vector<17x32xf32>
    %c1_82 = arith.constant 1 : index
    %c0_83 = arith.constant 0 : index
    %c0_84 = arith.constant 0 : index
    %239 = vector.load %arg8[%c1_82, %c0_83, %c0_84] : memref<2x2x96xf32, #tpu.memory_space<vmem>>, vector<1x2x96xf32>
    %240 = vector.shape_cast %239 : vector<1x2x96xf32> to vector<2x96xf32>
    %c1_85 = arith.constant 1 : index
    %c0_86 = arith.constant 0 : index
    %c0_87 = arith.constant 0 : index
    %241 = vector.load %arg7[%c1_85, %c0_86, %c0_87] : memref<2x32x96xf32, #tpu.memory_space<vmem>>, vector<1x32x96xf32>
    %242 = vector.shape_cast %241 : vector<1x32x96xf32> to vector<32x96xf32>
    %cst_88 = arith.constant dense<0.000000e+00> : vector<17x96xf32>
    %243 = tpu.matmul %238, %242, %cst_88 {dimension_numbers = #tpu.dot_dimension_numbers<[1], [0], [0], [1], [0, 0, 1, 1], [], []>} : vector<17x32xf32>, vector<32x96xf32>, vector<17x96xf32> -> vector<17x96xf32>
    %244 = vector.extract_strided_slice %240 {offsets = [0, 0], sizes = [1, 96], strides = [1, 1]} : vector<2x96xf32> to vector<1x96xf32>
    %245 = vector.broadcast %244 : vector<1x96xf32> to vector<17x96xf32>
    %246 = arith.addf %243, %245 : vector<17x96xf32>
    %247 = vector.extract_strided_slice %246 {offsets = [0, 0], sizes = [17, 8], strides = [1, 1]} : vector<17x96xf32> to vector<17x8xf32>
    %248 = vector.extract_strided_slice %246 {offsets = [0, 32], sizes = [17, 8], strides = [1, 1]} : vector<17x96xf32> to vector<17x8xf32>
    %249 = vector.extract_strided_slice %246 {offsets = [0, 64], sizes = [17, 8], strides = [1, 1]} : vector<17x96xf32> to vector<17x8xf32>
    %cst_89 = arith.constant dense<0.000000e+00> : vector<17x17xf32>
    %250 = tpu.matmul %247, %248, %cst_89 {dimension_numbers = #tpu.dot_dimension_numbers<[1], [1], [0], [0], [0, 0, 1, 0], [], []>} : vector<17x8xf32>, vector<17x8xf32>, vector<17x17xf32> -> vector<17x17xf32>
    %cst_90 = arith.constant 0.353553385 : f32
    %251 = vector.broadcast %cst_90 : f32 to vector<17x17xf32>
    %252 = arith.mulf %250, %251 : vector<17x17xf32>
    %cst_91 = arith.constant dense<0xFF800000> : vector<17xf32>
    %253 = vector.multi_reduction <maximumf>, %252, %cst_91 [1] : vector<17x17xf32> to vector<17xf32>
    %254 = vector.shape_cast %253 : vector<17xf32> to vector<17x1xf32>
    %255 = vector.broadcast %254 : vector<17x1xf32> to vector<17x17xf32>
    %256 = arith.subf %252, %255 : vector<17x17xf32>
    %257 = math.exp %256 : vector<17x17xf32>
    %cst_92 = arith.constant dense<0.000000e+00> : vector<17xf32>
    %258 = vector.multi_reduction <add>, %257, %cst_92 [1] : vector<17x17xf32> to vector<17xf32>
    %259 = vector.shape_cast %258 : vector<17xf32> to vector<17x1xf32>
    %260 = vector.broadcast %259 : vector<17x1xf32> to vector<17x17xf32>
    %261 = arith.divf %257, %260 : vector<17x17xf32>
    %cst_93 = arith.constant dense<0.000000e+00> : vector<17x8xf32>
    %262 = tpu.matmul %261, %249, %cst_93 {dimension_numbers = #tpu.dot_dimension_numbers<[1], [0], [0], [1], [0, 0, 1, 1], [], []>} : vector<17x17xf32>, vector<17x8xf32>, vector<17x8xf32> -> vector<17x8xf32>
    %263 = vector.extract_strided_slice %246 {offsets = [0, 8], sizes = [17, 8], strides = [1, 1]} : vector<17x96xf32> to vector<17x8xf32>
    %264 = vector.extract_strided_slice %246 {offsets = [0, 40], sizes = [17, 8], strides = [1, 1]} : vector<17x96xf32> to vector<17x8xf32>
    %265 = vector.extract_strided_slice %246 {offsets = [0, 72], sizes = [17, 8], strides = [1, 1]} : vector<17x96xf32> to vector<17x8xf32>
    %cst_94 = arith.constant dense<0.000000e+00> : vector<17x17xf32>
    %266 = tpu.matmul %263, %264, %cst_94 {dimension_numbers = #tpu.dot_dimension_numbers<[1], [1], [0], [0], [0, 0, 1, 0], [], []>} : vector<17x8xf32>, vector<17x8xf32>, vector<17x17xf32> -> vector<17x17xf32>
    %cst_95 = arith.constant 0.353553385 : f32
    %267 = vector.broadcast %cst_95 : f32 to vector<17x17xf32>
    %268 = arith.mulf %266, %267 : vector<17x17xf32>
    %cst_96 = arith.constant dense<0xFF800000> : vector<17xf32>
    %269 = vector.multi_reduction <maximumf>, %268, %cst_96 [1] : vector<17x17xf32> to vector<17xf32>
    %270 = vector.shape_cast %269 : vector<17xf32> to vector<17x1xf32>
    %271 = vector.broadcast %270 : vector<17x1xf32> to vector<17x17xf32>
    %272 = arith.subf %268, %271 : vector<17x17xf32>
    %273 = math.exp %272 : vector<17x17xf32>
    %cst_97 = arith.constant dense<0.000000e+00> : vector<17xf32>
    %274 = vector.multi_reduction <add>, %273, %cst_97 [1] : vector<17x17xf32> to vector<17xf32>
    %275 = vector.shape_cast %274 : vector<17xf32> to vector<17x1xf32>
    %276 = vector.broadcast %275 : vector<17x1xf32> to vector<17x17xf32>
    %277 = arith.divf %273, %276 : vector<17x17xf32>
    %cst_98 = arith.constant dense<0.000000e+00> : vector<17x8xf32>
    %278 = tpu.matmul %277, %265, %cst_98 {dimension_numbers = #tpu.dot_dimension_numbers<[1], [0], [0], [1], [0, 0, 1, 1], [], []>} : vector<17x17xf32>, vector<17x8xf32>, vector<17x8xf32> -> vector<17x8xf32>
    %279 = vector.extract_strided_slice %246 {offsets = [0, 16], sizes = [17, 8], strides = [1, 1]} : vector<17x96xf32> to vector<17x8xf32>
    %280 = vector.extract_strided_slice %246 {offsets = [0, 48], sizes = [17, 8], strides = [1, 1]} : vector<17x96xf32> to vector<17x8xf32>
    %281 = vector.extract_strided_slice %246 {offsets = [0, 80], sizes = [17, 8], strides = [1, 1]} : vector<17x96xf32> to vector<17x8xf32>
    %cst_99 = arith.constant dense<0.000000e+00> : vector<17x17xf32>
    %282 = tpu.matmul %279, %280, %cst_99 {dimension_numbers = #tpu.dot_dimension_numbers<[1], [1], [0], [0], [0, 0, 1, 0], [], []>} : vector<17x8xf32>, vector<17x8xf32>, vector<17x17xf32> -> vector<17x17xf32>
    %cst_100 = arith.constant 0.353553385 : f32
    %283 = vector.broadcast %cst_100 : f32 to vector<17x17xf32>
    %284 = arith.mulf %282, %283 : vector<17x17xf32>
    %cst_101 = arith.constant dense<0xFF800000> : vector<17xf32>
    %285 = vector.multi_reduction <maximumf>, %284, %cst_101 [1] : vector<17x17xf32> to vector<17xf32>
    %286 = vector.shape_cast %285 : vector<17xf32> to vector<17x1xf32>
    %287 = vector.broadcast %286 : vector<17x1xf32> to vector<17x17xf32>
    %288 = arith.subf %284, %287 : vector<17x17xf32>
    %289 = math.exp %288 : vector<17x17xf32>
    %cst_102 = arith.constant dense<0.000000e+00> : vector<17xf32>
    %290 = vector.multi_reduction <add>, %289, %cst_102 [1] : vector<17x17xf32> to vector<17xf32>
    %291 = vector.shape_cast %290 : vector<17xf32> to vector<17x1xf32>
    %292 = vector.broadcast %291 : vector<17x1xf32> to vector<17x17xf32>
    %293 = arith.divf %289, %292 : vector<17x17xf32>
    %cst_103 = arith.constant dense<0.000000e+00> : vector<17x8xf32>
    %294 = tpu.matmul %293, %281, %cst_103 {dimension_numbers = #tpu.dot_dimension_numbers<[1], [0], [0], [1], [0, 0, 1, 1], [], []>} : vector<17x17xf32>, vector<17x8xf32>, vector<17x8xf32> -> vector<17x8xf32>
    %295 = vector.extract_strided_slice %246 {offsets = [0, 24], sizes = [17, 8], strides = [1, 1]} : vector<17x96xf32> to vector<17x8xf32>
    %296 = vector.extract_strided_slice %246 {offsets = [0, 56], sizes = [17, 8], strides = [1, 1]} : vector<17x96xf32> to vector<17x8xf32>
    %297 = vector.extract_strided_slice %246 {offsets = [0, 88], sizes = [17, 8], strides = [1, 1]} : vector<17x96xf32> to vector<17x8xf32>
    %cst_104 = arith.constant dense<0.000000e+00> : vector<17x17xf32>
    %298 = tpu.matmul %295, %296, %cst_104 {dimension_numbers = #tpu.dot_dimension_numbers<[1], [1], [0], [0], [0, 0, 1, 0], [], []>} : vector<17x8xf32>, vector<17x8xf32>, vector<17x17xf32> -> vector<17x17xf32>
    %cst_105 = arith.constant 0.353553385 : f32
    %299 = vector.broadcast %cst_105 : f32 to vector<17x17xf32>
    %300 = arith.mulf %298, %299 : vector<17x17xf32>
    %cst_106 = arith.constant dense<0xFF800000> : vector<17xf32>
    %301 = vector.multi_reduction <maximumf>, %300, %cst_106 [1] : vector<17x17xf32> to vector<17xf32>
    %302 = vector.shape_cast %301 : vector<17xf32> to vector<17x1xf32>
    %303 = vector.broadcast %302 : vector<17x1xf32> to vector<17x17xf32>
    %304 = arith.subf %300, %303 : vector<17x17xf32>
    %305 = math.exp %304 : vector<17x17xf32>
    %cst_107 = arith.constant dense<0.000000e+00> : vector<17xf32>
    %306 = vector.multi_reduction <add>, %305, %cst_107 [1] : vector<17x17xf32> to vector<17xf32>
    %307 = vector.shape_cast %306 : vector<17xf32> to vector<17x1xf32>
    %308 = vector.broadcast %307 : vector<17x1xf32> to vector<17x17xf32>
    %309 = arith.divf %305, %308 : vector<17x17xf32>
    %cst_108 = arith.constant dense<0.000000e+00> : vector<17x8xf32>
    %310 = tpu.matmul %309, %297, %cst_108 {dimension_numbers = #tpu.dot_dimension_numbers<[1], [0], [0], [1], [0, 0, 1, 1], [], []>} : vector<17x17xf32>, vector<17x8xf32>, vector<17x8xf32> -> vector<17x8xf32>
    %311 = tpu.concatenate %262, %278, %294, %310 in 1 : vector<17x8xf32>, vector<17x8xf32>, vector<17x8xf32>, vector<17x8xf32> -> vector<17x32xf32>
    %c1_109 = arith.constant 1 : index
    %c0_110 = arith.constant 0 : index
    %c0_111 = arith.constant 0 : index
    %312 = vector.load %arg9[%c1_109, %c0_110, %c0_111] : memref<2x32x32xf32, #tpu.memory_space<vmem>>, vector<1x32x32xf32>
    %313 = vector.shape_cast %312 : vector<1x32x32xf32> to vector<32x32xf32>
    %cst_112 = arith.constant dense<0.000000e+00> : vector<17x32xf32>
    %314 = tpu.matmul %311, %313, %cst_112 {dimension_numbers = #tpu.dot_dimension_numbers<[1], [0], [0], [1], [0, 0, 1, 1], [], []>} : vector<17x32xf32>, vector<32x32xf32>, vector<17x32xf32> -> vector<17x32xf32>
    %315 = vector.extract_strided_slice %240 {offsets = [1, 0], sizes = [1, 32], strides = [1, 1]} : vector<2x96xf32> to vector<1x32xf32>
    %316 = vector.broadcast %315 : vector<1x32xf32> to vector<17x32xf32>
    %317 = arith.addf %314, %316 : vector<17x32xf32>
    %318 = arith.addf %214, %317 : vector<17x32xf32>
    %319 = vector.extract_strided_slice %216 {offsets = [2, 0], sizes = [1, 32], strides = [1, 1]} : vector<4x32xf32> to vector<1x32xf32>
    %320 = vector.extract_strided_slice %216 {offsets = [3, 0], sizes = [1, 32], strides = [1, 1]} : vector<4x32xf32> to vector<1x32xf32>
    %cst_113 = arith.constant dense<0.000000e+00> : vector<17xf32>
    %321 = vector.multi_reduction <add>, %318, %cst_113 [1] : vector<17x32xf32> to vector<17xf32>
    %322 = vector.shape_cast %321 : vector<17xf32> to vector<17x1xf32>
    %cst_114 = arith.constant 3.200000e+01 : f32
    %323 = vector.broadcast %cst_114 : f32 to vector<17x1xf32>
    %324 = arith.divf %322, %323 : vector<17x1xf32>
    %325 = vector.broadcast %324 : vector<17x1xf32> to vector<17x32xf32>
    %326 = arith.subf %318, %325 : vector<17x32xf32>
    %327 = arith.mulf %326, %326 : vector<17x32xf32>
    %cst_115 = arith.constant dense<0.000000e+00> : vector<17xf32>
    %328 = vector.multi_reduction <add>, %327, %cst_115 [1] : vector<17x32xf32> to vector<17xf32>
    %329 = vector.shape_cast %328 : vector<17xf32> to vector<17x1xf32>
    %cst_116 = arith.constant 3.200000e+01 : f32
    %330 = vector.broadcast %cst_116 : f32 to vector<17x1xf32>
    %331 = arith.divf %329, %330 : vector<17x1xf32>
    %cst_117 = arith.constant 9.99999974E-6 : f32
    %332 = vector.broadcast %cst_117 : f32 to vector<17x1xf32>
    %333 = arith.addf %331, %332 : vector<17x1xf32>
    %334 = math.rsqrt %333 : vector<17x1xf32>
    %335 = vector.broadcast %334 : vector<17x1xf32> to vector<17x32xf32>
    %336 = arith.mulf %326, %335 : vector<17x32xf32>
    %337 = vector.broadcast %319 : vector<1x32xf32> to vector<17x32xf32>
    %338 = arith.mulf %336, %337 : vector<17x32xf32>
    %339 = vector.broadcast %320 : vector<1x32xf32> to vector<17x32xf32>
    %340 = arith.addf %338, %339 : vector<17x32xf32>
    %c1_118 = arith.constant 1 : index
    %c0_119 = arith.constant 0 : index
    %c0_120 = arith.constant 0 : index
    %341 = vector.load %arg11[%c1_118, %c0_119, %c0_120] : memref<2x2x64xf32, #tpu.memory_space<vmem>>, vector<1x2x64xf32>
    %342 = vector.shape_cast %341 : vector<1x2x64xf32> to vector<2x64xf32>
    %c1_121 = arith.constant 1 : index
    %c0_122 = arith.constant 0 : index
    %c0_123 = arith.constant 0 : index
    %343 = vector.load %arg10[%c1_121, %c0_122, %c0_123] : memref<2x32x64xf32, #tpu.memory_space<vmem>>, vector<1x32x64xf32>
    %344 = vector.shape_cast %343 : vector<1x32x64xf32> to vector<32x64xf32>
    %cst_124 = arith.constant dense<0.000000e+00> : vector<17x64xf32>
    %345 = tpu.matmul %340, %344, %cst_124 {dimension_numbers = #tpu.dot_dimension_numbers<[1], [0], [0], [1], [0, 0, 1, 1], [], []>} : vector<17x32xf32>, vector<32x64xf32>, vector<17x64xf32> -> vector<17x64xf32>
    %346 = vector.extract_strided_slice %342 {offsets = [0, 0], sizes = [1, 64], strides = [1, 1]} : vector<2x64xf32> to vector<1x64xf32>
    %347 = vector.broadcast %346 : vector<1x64xf32> to vector<17x64xf32>
    %348 = arith.addf %345, %347 : vector<17x64xf32>
    %cst_125 = arith.constant 0.000000e+00 : f32
    %349 = vector.broadcast %cst_125 : f32 to vector<17x64xf32>
    %350 = arith.maximumf %348, %349 : vector<17x64xf32>
    %c1_126 = arith.constant 1 : index
    %c0_127 = arith.constant 0 : index
    %c0_128 = arith.constant 0 : index
    %351 = vector.load %arg12[%c1_126, %c0_127, %c0_128] : memref<2x64x32xf32, #tpu.memory_space<vmem>>, vector<1x64x32xf32>
    %352 = vector.shape_cast %351 : vector<1x64x32xf32> to vector<64x32xf32>
    %cst_129 = arith.constant dense<0.000000e+00> : vector<17x32xf32>
    %353 = tpu.matmul %350, %352, %cst_129 {dimension_numbers = #tpu.dot_dimension_numbers<[1], [0], [0], [1], [0, 0, 1, 1], [], []>} : vector<17x64xf32>, vector<64x32xf32>, vector<17x32xf32> -> vector<17x32xf32>
    %354 = vector.extract_strided_slice %342 {offsets = [1, 0], sizes = [1, 32], strides = [1, 1]} : vector<2x64xf32> to vector<1x32xf32>
    %355 = vector.broadcast %354 : vector<1x32xf32> to vector<17x32xf32>
    %356 = arith.addf %353, %355 : vector<17x32xf32>
    %357 = arith.addf %318, %356 : vector<17x32xf32>
    %358 = vector.extract_strided_slice %357 {offsets = [0, 0], sizes = [1, 32], strides = [1, 1]} : vector<17x32xf32> to vector<1x32xf32>
    %359 = vector.extract_strided_slice %357 {offsets = [1, 0], sizes = [1, 32], strides = [1, 1]} : vector<17x32xf32> to vector<1x32xf32>
    %360 = vector.extract_strided_slice %357 {offsets = [2, 0], sizes = [1, 32], strides = [1, 1]} : vector<17x32xf32> to vector<1x32xf32>
    %361 = vector.extract_strided_slice %357 {offsets = [3, 0], sizes = [1, 32], strides = [1, 1]} : vector<17x32xf32> to vector<1x32xf32>
    %362 = vector.extract_strided_slice %357 {offsets = [4, 0], sizes = [1, 32], strides = [1, 1]} : vector<17x32xf32> to vector<1x32xf32>
    %363 = vector.extract_strided_slice %357 {offsets = [5, 0], sizes = [1, 32], strides = [1, 1]} : vector<17x32xf32> to vector<1x32xf32>
    %364 = vector.extract_strided_slice %357 {offsets = [6, 0], sizes = [1, 32], strides = [1, 1]} : vector<17x32xf32> to vector<1x32xf32>
    %365 = vector.extract_strided_slice %357 {offsets = [7, 0], sizes = [1, 32], strides = [1, 1]} : vector<17x32xf32> to vector<1x32xf32>
    %366 = vector.extract_strided_slice %357 {offsets = [8, 0], sizes = [1, 32], strides = [1, 1]} : vector<17x32xf32> to vector<1x32xf32>
    %367 = vector.extract_strided_slice %357 {offsets = [9, 0], sizes = [1, 32], strides = [1, 1]} : vector<17x32xf32> to vector<1x32xf32>
    %368 = vector.extract_strided_slice %357 {offsets = [10, 0], sizes = [1, 32], strides = [1, 1]} : vector<17x32xf32> to vector<1x32xf32>
    %369 = vector.extract_strided_slice %357 {offsets = [11, 0], sizes = [1, 32], strides = [1, 1]} : vector<17x32xf32> to vector<1x32xf32>
    %370 = vector.extract_strided_slice %357 {offsets = [12, 0], sizes = [1, 32], strides = [1, 1]} : vector<17x32xf32> to vector<1x32xf32>
    %371 = vector.extract_strided_slice %357 {offsets = [13, 0], sizes = [1, 32], strides = [1, 1]} : vector<17x32xf32> to vector<1x32xf32>
    %372 = vector.extract_strided_slice %357 {offsets = [14, 0], sizes = [1, 32], strides = [1, 1]} : vector<17x32xf32> to vector<1x32xf32>
    %373 = vector.extract_strided_slice %357 {offsets = [15, 0], sizes = [1, 32], strides = [1, 1]} : vector<17x32xf32> to vector<1x32xf32>
    %374 = vector.extract_strided_slice %357 {offsets = [16, 0], sizes = [1, 32], strides = [1, 1]} : vector<17x32xf32> to vector<1x32xf32>
    %375 = tpu.concatenate %358, %359, %360, %361, %362, %363, %364, %365, %366, %367, %368, %369, %370, %371, %372, %373 in 1 : vector<1x32xf32>, vector<1x32xf32>, vector<1x32xf32>, vector<1x32xf32>, vector<1x32xf32>, vector<1x32xf32>, vector<1x32xf32>, vector<1x32xf32>, vector<1x32xf32>, vector<1x32xf32>, vector<1x32xf32>, vector<1x32xf32>, vector<1x32xf32>, vector<1x32xf32>, vector<1x32xf32>, vector<1x32xf32> -> vector<1x512xf32>
    %376 = tpu.concatenate %375, %374 in 1 : vector<1x512xf32>, vector<1x32xf32> -> vector<1x544xf32>
    %c1_130 = arith.constant 1 : index
    %377 = memref.load %arg0[%c1_130] : memref<2xf32, #tpu.memory_space<smem>>
    %cst_131 = arith.constant -1.000000e+04 : f32
    %378 = arith.cmpf oeq, %377, %cst_131 : f32
    %cst_132 = arith.constant 0.000000e+00 : f32
    %379 = arith.select %378, %cst_132, %377 : f32
    %cst_133 = arith.constant 0.00999999977 : f32
    %380 = arith.mulf %379, %cst_133 : f32
    %c1_134 = arith.constant 1 : index
    %c0_135 = arith.constant 0 : index
    %381 = vector.load %arg4[%c1_134, %c0_135] : memref<3x32xf32, #tpu.memory_space<vmem>>, vector<1x32xf32>
    %382 = vector.broadcast %380 : f32 to vector<1x32xf32>
    %383 = arith.mulf %382, %381 : vector<1x32xf32>
    %c2_136 = arith.constant 2 : index
    %c0_137 = arith.constant 0 : index
    %384 = vector.load %arg4[%c2_136, %c0_137] : memref<3x32xf32, #tpu.memory_space<vmem>>, vector<1x32xf32>
    %385 = arith.addf %383, %384 : vector<1x32xf32>
    %386 = vector.extract_strided_slice %58 {offsets = [16, 0], sizes = [16, 32], strides = [1, 1]} : vector<32x32xf32> to vector<16x32xf32>
    %387 = tpu.concatenate %385, %386 in 0 : vector<1x32xf32>, vector<16x32xf32> -> vector<17x32xf32>
    %c0_138 = arith.constant 0 : index
    %c0_139 = arith.constant 0 : index
    %388 = vector.load %arg5[%c0_138, %c0_139] : memref<17x32xf32, #tpu.memory_space<vmem>>, vector<17x32xf32>
    %389 = arith.addf %387, %388 : vector<17x32xf32>
    %c0_140 = arith.constant 0 : index
    %c0_141 = arith.constant 0 : index
    %c0_142 = arith.constant 0 : index
    %390 = vector.load %arg6[%c0_140, %c0_141, %c0_142] : memref<2x4x32xf32, #tpu.memory_space<vmem>>, vector<1x4x32xf32>
    %391 = vector.shape_cast %390 : vector<1x4x32xf32> to vector<4x32xf32>
    %392 = vector.extract_strided_slice %391 {offsets = [0, 0], sizes = [1, 32], strides = [1, 1]} : vector<4x32xf32> to vector<1x32xf32>
    %393 = vector.extract_strided_slice %391 {offsets = [1, 0], sizes = [1, 32], strides = [1, 1]} : vector<4x32xf32> to vector<1x32xf32>
    %cst_143 = arith.constant dense<0.000000e+00> : vector<17xf32>
    %394 = vector.multi_reduction <add>, %389, %cst_143 [1] : vector<17x32xf32> to vector<17xf32>
    %395 = vector.shape_cast %394 : vector<17xf32> to vector<17x1xf32>
    %cst_144 = arith.constant 3.200000e+01 : f32
    %396 = vector.broadcast %cst_144 : f32 to vector<17x1xf32>
    %397 = arith.divf %395, %396 : vector<17x1xf32>
    %398 = vector.broadcast %397 : vector<17x1xf32> to vector<17x32xf32>
    %399 = arith.subf %389, %398 : vector<17x32xf32>
    %400 = arith.mulf %399, %399 : vector<17x32xf32>
    %cst_145 = arith.constant dense<0.000000e+00> : vector<17xf32>
    %401 = vector.multi_reduction <add>, %400, %cst_145 [1] : vector<17x32xf32> to vector<17xf32>
    %402 = vector.shape_cast %401 : vector<17xf32> to vector<17x1xf32>
    %cst_146 = arith.constant 3.200000e+01 : f32
    %403 = vector.broadcast %cst_146 : f32 to vector<17x1xf32>
    %404 = arith.divf %402, %403 : vector<17x1xf32>
    %cst_147 = arith.constant 9.99999974E-6 : f32
    %405 = vector.broadcast %cst_147 : f32 to vector<17x1xf32>
    %406 = arith.addf %404, %405 : vector<17x1xf32>
    %407 = math.rsqrt %406 : vector<17x1xf32>
    %408 = vector.broadcast %407 : vector<17x1xf32> to vector<17x32xf32>
    %409 = arith.mulf %399, %408 : vector<17x32xf32>
    %410 = vector.broadcast %392 : vector<1x32xf32> to vector<17x32xf32>
    %411 = arith.mulf %409, %410 : vector<17x32xf32>
    %412 = vector.broadcast %393 : vector<1x32xf32> to vector<17x32xf32>
    %413 = arith.addf %411, %412 : vector<17x32xf32>
    %c0_148 = arith.constant 0 : index
    %c0_149 = arith.constant 0 : index
    %c0_150 = arith.constant 0 : index
    %414 = vector.load %arg8[%c0_148, %c0_149, %c0_150] : memref<2x2x96xf32, #tpu.memory_space<vmem>>, vector<1x2x96xf32>
    %415 = vector.shape_cast %414 : vector<1x2x96xf32> to vector<2x96xf32>
    %c0_151 = arith.constant 0 : index
    %c0_152 = arith.constant 0 : index
    %c0_153 = arith.constant 0 : index
    %416 = vector.load %arg7[%c0_151, %c0_152, %c0_153] : memref<2x32x96xf32, #tpu.memory_space<vmem>>, vector<1x32x96xf32>
    %417 = vector.shape_cast %416 : vector<1x32x96xf32> to vector<32x96xf32>
    %cst_154 = arith.constant dense<0.000000e+00> : vector<17x96xf32>
    %418 = tpu.matmul %413, %417, %cst_154 {dimension_numbers = #tpu.dot_dimension_numbers<[1], [0], [0], [1], [0, 0, 1, 1], [], []>} : vector<17x32xf32>, vector<32x96xf32>, vector<17x96xf32> -> vector<17x96xf32>
    %419 = vector.extract_strided_slice %415 {offsets = [0, 0], sizes = [1, 96], strides = [1, 1]} : vector<2x96xf32> to vector<1x96xf32>
    %420 = vector.broadcast %419 : vector<1x96xf32> to vector<17x96xf32>
    %421 = arith.addf %418, %420 : vector<17x96xf32>
    %422 = vector.extract_strided_slice %421 {offsets = [0, 0], sizes = [17, 8], strides = [1, 1]} : vector<17x96xf32> to vector<17x8xf32>
    %423 = vector.extract_strided_slice %421 {offsets = [0, 32], sizes = [17, 8], strides = [1, 1]} : vector<17x96xf32> to vector<17x8xf32>
    %424 = vector.extract_strided_slice %421 {offsets = [0, 64], sizes = [17, 8], strides = [1, 1]} : vector<17x96xf32> to vector<17x8xf32>
    %cst_155 = arith.constant dense<0.000000e+00> : vector<17x17xf32>
    %425 = tpu.matmul %422, %423, %cst_155 {dimension_numbers = #tpu.dot_dimension_numbers<[1], [1], [0], [0], [0, 0, 1, 0], [], []>} : vector<17x8xf32>, vector<17x8xf32>, vector<17x17xf32> -> vector<17x17xf32>
    %cst_156 = arith.constant 0.353553385 : f32
    %426 = vector.broadcast %cst_156 : f32 to vector<17x17xf32>
    %427 = arith.mulf %425, %426 : vector<17x17xf32>
    %cst_157 = arith.constant dense<0xFF800000> : vector<17xf32>
    %428 = vector.multi_reduction <maximumf>, %427, %cst_157 [1] : vector<17x17xf32> to vector<17xf32>
    %429 = vector.shape_cast %428 : vector<17xf32> to vector<17x1xf32>
    %430 = vector.broadcast %429 : vector<17x1xf32> to vector<17x17xf32>
    %431 = arith.subf %427, %430 : vector<17x17xf32>
    %432 = math.exp %431 : vector<17x17xf32>
    %cst_158 = arith.constant dense<0.000000e+00> : vector<17xf32>
    %433 = vector.multi_reduction <add>, %432, %cst_158 [1] : vector<17x17xf32> to vector<17xf32>
    %434 = vector.shape_cast %433 : vector<17xf32> to vector<17x1xf32>
    %435 = vector.broadcast %434 : vector<17x1xf32> to vector<17x17xf32>
    %436 = arith.divf %432, %435 : vector<17x17xf32>
    %cst_159 = arith.constant dense<0.000000e+00> : vector<17x8xf32>
    %437 = tpu.matmul %436, %424, %cst_159 {dimension_numbers = #tpu.dot_dimension_numbers<[1], [0], [0], [1], [0, 0, 1, 1], [], []>} : vector<17x17xf32>, vector<17x8xf32>, vector<17x8xf32> -> vector<17x8xf32>
    %438 = vector.extract_strided_slice %421 {offsets = [0, 8], sizes = [17, 8], strides = [1, 1]} : vector<17x96xf32> to vector<17x8xf32>
    %439 = vector.extract_strided_slice %421 {offsets = [0, 40], sizes = [17, 8], strides = [1, 1]} : vector<17x96xf32> to vector<17x8xf32>
    %440 = vector.extract_strided_slice %421 {offsets = [0, 72], sizes = [17, 8], strides = [1, 1]} : vector<17x96xf32> to vector<17x8xf32>
    %cst_160 = arith.constant dense<0.000000e+00> : vector<17x17xf32>
    %441 = tpu.matmul %438, %439, %cst_160 {dimension_numbers = #tpu.dot_dimension_numbers<[1], [1], [0], [0], [0, 0, 1, 0], [], []>} : vector<17x8xf32>, vector<17x8xf32>, vector<17x17xf32> -> vector<17x17xf32>
    %cst_161 = arith.constant 0.353553385 : f32
    %442 = vector.broadcast %cst_161 : f32 to vector<17x17xf32>
    %443 = arith.mulf %441, %442 : vector<17x17xf32>
    %cst_162 = arith.constant dense<0xFF800000> : vector<17xf32>
    %444 = vector.multi_reduction <maximumf>, %443, %cst_162 [1] : vector<17x17xf32> to vector<17xf32>
    %445 = vector.shape_cast %444 : vector<17xf32> to vector<17x1xf32>
    %446 = vector.broadcast %445 : vector<17x1xf32> to vector<17x17xf32>
    %447 = arith.subf %443, %446 : vector<17x17xf32>
    %448 = math.exp %447 : vector<17x17xf32>
    %cst_163 = arith.constant dense<0.000000e+00> : vector<17xf32>
    %449 = vector.multi_reduction <add>, %448, %cst_163 [1] : vector<17x17xf32> to vector<17xf32>
    %450 = vector.shape_cast %449 : vector<17xf32> to vector<17x1xf32>
    %451 = vector.broadcast %450 : vector<17x1xf32> to vector<17x17xf32>
    %452 = arith.divf %448, %451 : vector<17x17xf32>
    %cst_164 = arith.constant dense<0.000000e+00> : vector<17x8xf32>
    %453 = tpu.matmul %452, %440, %cst_164 {dimension_numbers = #tpu.dot_dimension_numbers<[1], [0], [0], [1], [0, 0, 1, 1], [], []>} : vector<17x17xf32>, vector<17x8xf32>, vector<17x8xf32> -> vector<17x8xf32>
    %454 = vector.extract_strided_slice %421 {offsets = [0, 16], sizes = [17, 8], strides = [1, 1]} : vector<17x96xf32> to vector<17x8xf32>
    %455 = vector.extract_strided_slice %421 {offsets = [0, 48], sizes = [17, 8], strides = [1, 1]} : vector<17x96xf32> to vector<17x8xf32>
    %456 = vector.extract_strided_slice %421 {offsets = [0, 80], sizes = [17, 8], strides = [1, 1]} : vector<17x96xf32> to vector<17x8xf32>
    %cst_165 = arith.constant dense<0.000000e+00> : vector<17x17xf32>
    %457 = tpu.matmul %454, %455, %cst_165 {dimension_numbers = #tpu.dot_dimension_numbers<[1], [1], [0], [0], [0, 0, 1, 0], [], []>} : vector<17x8xf32>, vector<17x8xf32>, vector<17x17xf32> -> vector<17x17xf32>
    %cst_166 = arith.constant 0.353553385 : f32
    %458 = vector.broadcast %cst_166 : f32 to vector<17x17xf32>
    %459 = arith.mulf %457, %458 : vector<17x17xf32>
    %cst_167 = arith.constant dense<0xFF800000> : vector<17xf32>
    %460 = vector.multi_reduction <maximumf>, %459, %cst_167 [1] : vector<17x17xf32> to vector<17xf32>
    %461 = vector.shape_cast %460 : vector<17xf32> to vector<17x1xf32>
    %462 = vector.broadcast %461 : vector<17x1xf32> to vector<17x17xf32>
    %463 = arith.subf %459, %462 : vector<17x17xf32>
    %464 = math.exp %463 : vector<17x17xf32>
    %cst_168 = arith.constant dense<0.000000e+00> : vector<17xf32>
    %465 = vector.multi_reduction <add>, %464, %cst_168 [1] : vector<17x17xf32> to vector<17xf32>
    %466 = vector.shape_cast %465 : vector<17xf32> to vector<17x1xf32>
    %467 = vector.broadcast %466 : vector<17x1xf32> to vector<17x17xf32>
    %468 = arith.divf %464, %467 : vector<17x17xf32>
    %cst_169 = arith.constant dense<0.000000e+00> : vector<17x8xf32>
    %469 = tpu.matmul %468, %456, %cst_169 {dimension_numbers = #tpu.dot_dimension_numbers<[1], [0], [0], [1], [0, 0, 1, 1], [], []>} : vector<17x17xf32>, vector<17x8xf32>, vector<17x8xf32> -> vector<17x8xf32>
    %470 = vector.extract_strided_slice %421 {offsets = [0, 24], sizes = [17, 8], strides = [1, 1]} : vector<17x96xf32> to vector<17x8xf32>
    %471 = vector.extract_strided_slice %421 {offsets = [0, 56], sizes = [17, 8], strides = [1, 1]} : vector<17x96xf32> to vector<17x8xf32>
    %472 = vector.extract_strided_slice %421 {offsets = [0, 88], sizes = [17, 8], strides = [1, 1]} : vector<17x96xf32> to vector<17x8xf32>
    %cst_170 = arith.constant dense<0.000000e+00> : vector<17x17xf32>
    %473 = tpu.matmul %470, %471, %cst_170 {dimension_numbers = #tpu.dot_dimension_numbers<[1], [1], [0], [0], [0, 0, 1, 0], [], []>} : vector<17x8xf32>, vector<17x8xf32>, vector<17x17xf32> -> vector<17x17xf32>
    %cst_171 = arith.constant 0.353553385 : f32
    %474 = vector.broadcast %cst_171 : f32 to vector<17x17xf32>
    %475 = arith.mulf %473, %474 : vector<17x17xf32>
    %cst_172 = arith.constant dense<0xFF800000> : vector<17xf32>
    %476 = vector.multi_reduction <maximumf>, %475, %cst_172 [1] : vector<17x17xf32> to vector<17xf32>
    %477 = vector.shape_cast %476 : vector<17xf32> to vector<17x1xf32>
    %478 = vector.broadcast %477 : vector<17x1xf32> to vector<17x17xf32>
    %479 = arith.subf %475, %478 : vector<17x17xf32>
    %480 = math.exp %479 : vector<17x17xf32>
    %cst_173 = arith.constant dense<0.000000e+00> : vector<17xf32>
    %481 = vector.multi_reduction <add>, %480, %cst_173 [1] : vector<17x17xf32> to vector<17xf32>
    %482 = vector.shape_cast %481 : vector<17xf32> to vector<17x1xf32>
    %483 = vector.broadcast %482 : vector<17x1xf32> to vector<17x17xf32>
    %484 = arith.divf %480, %483 : vector<17x17xf32>
    %cst_174 = arith.constant dense<0.000000e+00> : vector<17x8xf32>
    %485 = tpu.matmul %484, %472, %cst_174 {dimension_numbers = #tpu.dot_dimension_numbers<[1], [0], [0], [1], [0, 0, 1, 1], [], []>} : vector<17x17xf32>, vector<17x8xf32>, vector<17x8xf32> -> vector<17x8xf32>
    %486 = tpu.concatenate %437, %453, %469, %485 in 1 : vector<17x8xf32>, vector<17x8xf32>, vector<17x8xf32>, vector<17x8xf32> -> vector<17x32xf32>
    %c0_175 = arith.constant 0 : index
    %c0_176 = arith.constant 0 : index
    %c0_177 = arith.constant 0 : index
    %487 = vector.load %arg9[%c0_175, %c0_176, %c0_177] : memref<2x32x32xf32, #tpu.memory_space<vmem>>, vector<1x32x32xf32>
    %488 = vector.shape_cast %487 : vector<1x32x32xf32> to vector<32x32xf32>
    %cst_178 = arith.constant dense<0.000000e+00> : vector<17x32xf32>
    %489 = tpu.matmul %486, %488, %cst_178 {dimension_numbers = #tpu.dot_dimension_numbers<[1], [0], [0], [1], [0, 0, 1, 1], [], []>} : vector<17x32xf32>, vector<32x32xf32>, vector<17x32xf32> -> vector<17x32xf32>
    %490 = vector.extract_strided_slice %415 {offsets = [1, 0], sizes = [1, 32], strides = [1, 1]} : vector<2x96xf32> to vector<1x32xf32>
    %491 = vector.broadcast %490 : vector<1x32xf32> to vector<17x32xf32>
    %492 = arith.addf %489, %491 : vector<17x32xf32>
    %493 = arith.addf %389, %492 : vector<17x32xf32>
    %494 = vector.extract_strided_slice %391 {offsets = [2, 0], sizes = [1, 32], strides = [1, 1]} : vector<4x32xf32> to vector<1x32xf32>
    %495 = vector.extract_strided_slice %391 {offsets = [3, 0], sizes = [1, 32], strides = [1, 1]} : vector<4x32xf32> to vector<1x32xf32>
    %cst_179 = arith.constant dense<0.000000e+00> : vector<17xf32>
    %496 = vector.multi_reduction <add>, %493, %cst_179 [1] : vector<17x32xf32> to vector<17xf32>
    %497 = vector.shape_cast %496 : vector<17xf32> to vector<17x1xf32>
    %cst_180 = arith.constant 3.200000e+01 : f32
    %498 = vector.broadcast %cst_180 : f32 to vector<17x1xf32>
    %499 = arith.divf %497, %498 : vector<17x1xf32>
    %500 = vector.broadcast %499 : vector<17x1xf32> to vector<17x32xf32>
    %501 = arith.subf %493, %500 : vector<17x32xf32>
    %502 = arith.mulf %501, %501 : vector<17x32xf32>
    %cst_181 = arith.constant dense<0.000000e+00> : vector<17xf32>
    %503 = vector.multi_reduction <add>, %502, %cst_181 [1] : vector<17x32xf32> to vector<17xf32>
    %504 = vector.shape_cast %503 : vector<17xf32> to vector<17x1xf32>
    %cst_182 = arith.constant 3.200000e+01 : f32
    %505 = vector.broadcast %cst_182 : f32 to vector<17x1xf32>
    %506 = arith.divf %504, %505 : vector<17x1xf32>
    %cst_183 = arith.constant 9.99999974E-6 : f32
    %507 = vector.broadcast %cst_183 : f32 to vector<17x1xf32>
    %508 = arith.addf %506, %507 : vector<17x1xf32>
    %509 = math.rsqrt %508 : vector<17x1xf32>
    %510 = vector.broadcast %509 : vector<17x1xf32> to vector<17x32xf32>
    %511 = arith.mulf %501, %510 : vector<17x32xf32>
    %512 = vector.broadcast %494 : vector<1x32xf32> to vector<17x32xf32>
    %513 = arith.mulf %511, %512 : vector<17x32xf32>
    %514 = vector.broadcast %495 : vector<1x32xf32> to vector<17x32xf32>
    %515 = arith.addf %513, %514 : vector<17x32xf32>
    %c0_184 = arith.constant 0 : index
    %c0_185 = arith.constant 0 : index
    %c0_186 = arith.constant 0 : index
    %516 = vector.load %arg11[%c0_184, %c0_185, %c0_186] : memref<2x2x64xf32, #tpu.memory_space<vmem>>, vector<1x2x64xf32>
    %517 = vector.shape_cast %516 : vector<1x2x64xf32> to vector<2x64xf32>
    %c0_187 = arith.constant 0 : index
    %c0_188 = arith.constant 0 : index
    %c0_189 = arith.constant 0 : index
    %518 = vector.load %arg10[%c0_187, %c0_188, %c0_189] : memref<2x32x64xf32, #tpu.memory_space<vmem>>, vector<1x32x64xf32>
    %519 = vector.shape_cast %518 : vector<1x32x64xf32> to vector<32x64xf32>
    %cst_190 = arith.constant dense<0.000000e+00> : vector<17x64xf32>
    %520 = tpu.matmul %515, %519, %cst_190 {dimension_numbers = #tpu.dot_dimension_numbers<[1], [0], [0], [1], [0, 0, 1, 1], [], []>} : vector<17x32xf32>, vector<32x64xf32>, vector<17x64xf32> -> vector<17x64xf32>
    %521 = vector.extract_strided_slice %517 {offsets = [0, 0], sizes = [1, 64], strides = [1, 1]} : vector<2x64xf32> to vector<1x64xf32>
    %522 = vector.broadcast %521 : vector<1x64xf32> to vector<17x64xf32>
    %523 = arith.addf %520, %522 : vector<17x64xf32>
    %cst_191 = arith.constant 0.000000e+00 : f32
    %524 = vector.broadcast %cst_191 : f32 to vector<17x64xf32>
    %525 = arith.maximumf %523, %524 : vector<17x64xf32>
    %c0_192 = arith.constant 0 : index
    %c0_193 = arith.constant 0 : index
    %c0_194 = arith.constant 0 : index
    %526 = vector.load %arg12[%c0_192, %c0_193, %c0_194] : memref<2x64x32xf32, #tpu.memory_space<vmem>>, vector<1x64x32xf32>
    %527 = vector.shape_cast %526 : vector<1x64x32xf32> to vector<64x32xf32>
    %cst_195 = arith.constant dense<0.000000e+00> : vector<17x32xf32>
    %528 = tpu.matmul %525, %527, %cst_195 {dimension_numbers = #tpu.dot_dimension_numbers<[1], [0], [0], [1], [0, 0, 1, 1], [], []>} : vector<17x64xf32>, vector<64x32xf32>, vector<17x32xf32> -> vector<17x32xf32>
    %529 = vector.extract_strided_slice %517 {offsets = [1, 0], sizes = [1, 32], strides = [1, 1]} : vector<2x64xf32> to vector<1x32xf32>
    %530 = vector.broadcast %529 : vector<1x32xf32> to vector<17x32xf32>
    %531 = arith.addf %528, %530 : vector<17x32xf32>
    %532 = arith.addf %493, %531 : vector<17x32xf32>
    %c1_196 = arith.constant 1 : index
    %c0_197 = arith.constant 0 : index
    %c0_198 = arith.constant 0 : index
    %533 = vector.load %arg6[%c1_196, %c0_197, %c0_198] : memref<2x4x32xf32, #tpu.memory_space<vmem>>, vector<1x4x32xf32>
    %534 = vector.shape_cast %533 : vector<1x4x32xf32> to vector<4x32xf32>
    %535 = vector.extract_strided_slice %534 {offsets = [0, 0], sizes = [1, 32], strides = [1, 1]} : vector<4x32xf32> to vector<1x32xf32>
    %536 = vector.extract_strided_slice %534 {offsets = [1, 0], sizes = [1, 32], strides = [1, 1]} : vector<4x32xf32> to vector<1x32xf32>
    %cst_199 = arith.constant dense<0.000000e+00> : vector<17xf32>
    %537 = vector.multi_reduction <add>, %532, %cst_199 [1] : vector<17x32xf32> to vector<17xf32>
    %538 = vector.shape_cast %537 : vector<17xf32> to vector<17x1xf32>
    %cst_200 = arith.constant 3.200000e+01 : f32
    %539 = vector.broadcast %cst_200 : f32 to vector<17x1xf32>
    %540 = arith.divf %538, %539 : vector<17x1xf32>
    %541 = vector.broadcast %540 : vector<17x1xf32> to vector<17x32xf32>
    %542 = arith.subf %532, %541 : vector<17x32xf32>
    %543 = arith.mulf %542, %542 : vector<17x32xf32>
    %cst_201 = arith.constant dense<0.000000e+00> : vector<17xf32>
    %544 = vector.multi_reduction <add>, %543, %cst_201 [1] : vector<17x32xf32> to vector<17xf32>
    %545 = vector.shape_cast %544 : vector<17xf32> to vector<17x1xf32>
    %cst_202 = arith.constant 3.200000e+01 : f32
    %546 = vector.broadcast %cst_202 : f32 to vector<17x1xf32>
    %547 = arith.divf %545, %546 : vector<17x1xf32>
    %cst_203 = arith.constant 9.99999974E-6 : f32
    %548 = vector.broadcast %cst_203 : f32 to vector<17x1xf32>
    %549 = arith.addf %547, %548 : vector<17x1xf32>
    %550 = math.rsqrt %549 : vector<17x1xf32>
    %551 = vector.broadcast %550 : vector<17x1xf32> to vector<17x32xf32>
    %552 = arith.mulf %542, %551 : vector<17x32xf32>
    %553 = vector.broadcast %535 : vector<1x32xf32> to vector<17x32xf32>
    %554 = arith.mulf %552, %553 : vector<17x32xf32>
    %555 = vector.broadcast %536 : vector<1x32xf32> to vector<17x32xf32>
    %556 = arith.addf %554, %555 : vector<17x32xf32>
    %c1_204 = arith.constant 1 : index
    %c0_205 = arith.constant 0 : index
    %c0_206 = arith.constant 0 : index
    %557 = vector.load %arg8[%c1_204, %c0_205, %c0_206] : memref<2x2x96xf32, #tpu.memory_space<vmem>>, vector<1x2x96xf32>
    %558 = vector.shape_cast %557 : vector<1x2x96xf32> to vector<2x96xf32>
    %c1_207 = arith.constant 1 : index
    %c0_208 = arith.constant 0 : index
    %c0_209 = arith.constant 0 : index
    %559 = vector.load %arg7[%c1_207, %c0_208, %c0_209] : memref<2x32x96xf32, #tpu.memory_space<vmem>>, vector<1x32x96xf32>
    %560 = vector.shape_cast %559 : vector<1x32x96xf32> to vector<32x96xf32>
    %cst_210 = arith.constant dense<0.000000e+00> : vector<17x96xf32>
    %561 = tpu.matmul %556, %560, %cst_210 {dimension_numbers = #tpu.dot_dimension_numbers<[1], [0], [0], [1], [0, 0, 1, 1], [], []>} : vector<17x32xf32>, vector<32x96xf32>, vector<17x96xf32> -> vector<17x96xf32>
    %562 = vector.extract_strided_slice %558 {offsets = [0, 0], sizes = [1, 96], strides = [1, 1]} : vector<2x96xf32> to vector<1x96xf32>
    %563 = vector.broadcast %562 : vector<1x96xf32> to vector<17x96xf32>
    %564 = arith.addf %561, %563 : vector<17x96xf32>
    %565 = vector.extract_strided_slice %564 {offsets = [0, 0], sizes = [17, 8], strides = [1, 1]} : vector<17x96xf32> to vector<17x8xf32>
    %566 = vector.extract_strided_slice %564 {offsets = [0, 32], sizes = [17, 8], strides = [1, 1]} : vector<17x96xf32> to vector<17x8xf32>
    %567 = vector.extract_strided_slice %564 {offsets = [0, 64], sizes = [17, 8], strides = [1, 1]} : vector<17x96xf32> to vector<17x8xf32>
    %cst_211 = arith.constant dense<0.000000e+00> : vector<17x17xf32>
    %568 = tpu.matmul %565, %566, %cst_211 {dimension_numbers = #tpu.dot_dimension_numbers<[1], [1], [0], [0], [0, 0, 1, 0], [], []>} : vector<17x8xf32>, vector<17x8xf32>, vector<17x17xf32> -> vector<17x17xf32>
    %cst_212 = arith.constant 0.353553385 : f32
    %569 = vector.broadcast %cst_212 : f32 to vector<17x17xf32>
    %570 = arith.mulf %568, %569 : vector<17x17xf32>
    %cst_213 = arith.constant dense<0xFF800000> : vector<17xf32>
    %571 = vector.multi_reduction <maximumf>, %570, %cst_213 [1] : vector<17x17xf32> to vector<17xf32>
    %572 = vector.shape_cast %571 : vector<17xf32> to vector<17x1xf32>
    %573 = vector.broadcast %572 : vector<17x1xf32> to vector<17x17xf32>
    %574 = arith.subf %570, %573 : vector<17x17xf32>
    %575 = math.exp %574 : vector<17x17xf32>
    %cst_214 = arith.constant dense<0.000000e+00> : vector<17xf32>
    %576 = vector.multi_reduction <add>, %575, %cst_214 [1] : vector<17x17xf32> to vector<17xf32>
    %577 = vector.shape_cast %576 : vector<17xf32> to vector<17x1xf32>
    %578 = vector.broadcast %577 : vector<17x1xf32> to vector<17x17xf32>
    %579 = arith.divf %575, %578 : vector<17x17xf32>
    %cst_215 = arith.constant dense<0.000000e+00> : vector<17x8xf32>
    %580 = tpu.matmul %579, %567, %cst_215 {dimension_numbers = #tpu.dot_dimension_numbers<[1], [0], [0], [1], [0, 0, 1, 1], [], []>} : vector<17x17xf32>, vector<17x8xf32>, vector<17x8xf32> -> vector<17x8xf32>
    %581 = vector.extract_strided_slice %564 {offsets = [0, 8], sizes = [17, 8], strides = [1, 1]} : vector<17x96xf32> to vector<17x8xf32>
    %582 = vector.extract_strided_slice %564 {offsets = [0, 40], sizes = [17, 8], strides = [1, 1]} : vector<17x96xf32> to vector<17x8xf32>
    %583 = vector.extract_strided_slice %564 {offsets = [0, 72], sizes = [17, 8], strides = [1, 1]} : vector<17x96xf32> to vector<17x8xf32>
    %cst_216 = arith.constant dense<0.000000e+00> : vector<17x17xf32>
    %584 = tpu.matmul %581, %582, %cst_216 {dimension_numbers = #tpu.dot_dimension_numbers<[1], [1], [0], [0], [0, 0, 1, 0], [], []>} : vector<17x8xf32>, vector<17x8xf32>, vector<17x17xf32> -> vector<17x17xf32>
    %cst_217 = arith.constant 0.353553385 : f32
    %585 = vector.broadcast %cst_217 : f32 to vector<17x17xf32>
    %586 = arith.mulf %584, %585 : vector<17x17xf32>
    %cst_218 = arith.constant dense<0xFF800000> : vector<17xf32>
    %587 = vector.multi_reduction <maximumf>, %586, %cst_218 [1] : vector<17x17xf32> to vector<17xf32>
    %588 = vector.shape_cast %587 : vector<17xf32> to vector<17x1xf32>
    %589 = vector.broadcast %588 : vector<17x1xf32> to vector<17x17xf32>
    %590 = arith.subf %586, %589 : vector<17x17xf32>
    %591 = math.exp %590 : vector<17x17xf32>
    %cst_219 = arith.constant dense<0.000000e+00> : vector<17xf32>
    %592 = vector.multi_reduction <add>, %591, %cst_219 [1] : vector<17x17xf32> to vector<17xf32>
    %593 = vector.shape_cast %592 : vector<17xf32> to vector<17x1xf32>
    %594 = vector.broadcast %593 : vector<17x1xf32> to vector<17x17xf32>
    %595 = arith.divf %591, %594 : vector<17x17xf32>
    %cst_220 = arith.constant dense<0.000000e+00> : vector<17x8xf32>
    %596 = tpu.matmul %595, %583, %cst_220 {dimension_numbers = #tpu.dot_dimension_numbers<[1], [0], [0], [1], [0, 0, 1, 1], [], []>} : vector<17x17xf32>, vector<17x8xf32>, vector<17x8xf32> -> vector<17x8xf32>
    %597 = vector.extract_strided_slice %564 {offsets = [0, 16], sizes = [17, 8], strides = [1, 1]} : vector<17x96xf32> to vector<17x8xf32>
    %598 = vector.extract_strided_slice %564 {offsets = [0, 48], sizes = [17, 8], strides = [1, 1]} : vector<17x96xf32> to vector<17x8xf32>
    %599 = vector.extract_strided_slice %564 {offsets = [0, 80], sizes = [17, 8], strides = [1, 1]} : vector<17x96xf32> to vector<17x8xf32>
    %cst_221 = arith.constant dense<0.000000e+00> : vector<17x17xf32>
    %600 = tpu.matmul %597, %598, %cst_221 {dimension_numbers = #tpu.dot_dimension_numbers<[1], [1], [0], [0], [0, 0, 1, 0], [], []>} : vector<17x8xf32>, vector<17x8xf32>, vector<17x17xf32> -> vector<17x17xf32>
    %cst_222 = arith.constant 0.353553385 : f32
    %601 = vector.broadcast %cst_222 : f32 to vector<17x17xf32>
    %602 = arith.mulf %600, %601 : vector<17x17xf32>
    %cst_223 = arith.constant dense<0xFF800000> : vector<17xf32>
    %603 = vector.multi_reduction <maximumf>, %602, %cst_223 [1] : vector<17x17xf32> to vector<17xf32>
    %604 = vector.shape_cast %603 : vector<17xf32> to vector<17x1xf32>
    %605 = vector.broadcast %604 : vector<17x1xf32> to vector<17x17xf32>
    %606 = arith.subf %602, %605 : vector<17x17xf32>
    %607 = math.exp %606 : vector<17x17xf32>
    %cst_224 = arith.constant dense<0.000000e+00> : vector<17xf32>
    %608 = vector.multi_reduction <add>, %607, %cst_224 [1] : vector<17x17xf32> to vector<17xf32>
    %609 = vector.shape_cast %608 : vector<17xf32> to vector<17x1xf32>
    %610 = vector.broadcast %609 : vector<17x1xf32> to vector<17x17xf32>
    %611 = arith.divf %607, %610 : vector<17x17xf32>
    %cst_225 = arith.constant dense<0.000000e+00> : vector<17x8xf32>
    %612 = tpu.matmul %611, %599, %cst_225 {dimension_numbers = #tpu.dot_dimension_numbers<[1], [0], [0], [1], [0, 0, 1, 1], [], []>} : vector<17x17xf32>, vector<17x8xf32>, vector<17x8xf32> -> vector<17x8xf32>
    %613 = vector.extract_strided_slice %564 {offsets = [0, 24], sizes = [17, 8], strides = [1, 1]} : vector<17x96xf32> to vector<17x8xf32>
    %614 = vector.extract_strided_slice %564 {offsets = [0, 56], sizes = [17, 8], strides = [1, 1]} : vector<17x96xf32> to vector<17x8xf32>
    %615 = vector.extract_strided_slice %564 {offsets = [0, 88], sizes = [17, 8], strides = [1, 1]} : vector<17x96xf32> to vector<17x8xf32>
    %cst_226 = arith.constant dense<0.000000e+00> : vector<17x17xf32>
    %616 = tpu.matmul %613, %614, %cst_226 {dimension_numbers = #tpu.dot_dimension_numbers<[1], [1], [0], [0], [0, 0, 1, 0], [], []>} : vector<17x8xf32>, vector<17x8xf32>, vector<17x17xf32> -> vector<17x17xf32>
    %cst_227 = arith.constant 0.353553385 : f32
    %617 = vector.broadcast %cst_227 : f32 to vector<17x17xf32>
    %618 = arith.mulf %616, %617 : vector<17x17xf32>
    %cst_228 = arith.constant dense<0xFF800000> : vector<17xf32>
    %619 = vector.multi_reduction <maximumf>, %618, %cst_228 [1] : vector<17x17xf32> to vector<17xf32>
    %620 = vector.shape_cast %619 : vector<17xf32> to vector<17x1xf32>
    %621 = vector.broadcast %620 : vector<17x1xf32> to vector<17x17xf32>
    %622 = arith.subf %618, %621 : vector<17x17xf32>
    %623 = math.exp %622 : vector<17x17xf32>
    %cst_229 = arith.constant dense<0.000000e+00> : vector<17xf32>
    %624 = vector.multi_reduction <add>, %623, %cst_229 [1] : vector<17x17xf32> to vector<17xf32>
    %625 = vector.shape_cast %624 : vector<17xf32> to vector<17x1xf32>
    %626 = vector.broadcast %625 : vector<17x1xf32> to vector<17x17xf32>
    %627 = arith.divf %623, %626 : vector<17x17xf32>
    %cst_230 = arith.constant dense<0.000000e+00> : vector<17x8xf32>
    %628 = tpu.matmul %627, %615, %cst_230 {dimension_numbers = #tpu.dot_dimension_numbers<[1], [0], [0], [1], [0, 0, 1, 1], [], []>} : vector<17x17xf32>, vector<17x8xf32>, vector<17x8xf32> -> vector<17x8xf32>
    %629 = tpu.concatenate %580, %596, %612, %628 in 1 : vector<17x8xf32>, vector<17x8xf32>, vector<17x8xf32>, vector<17x8xf32> -> vector<17x32xf32>
    %c1_231 = arith.constant 1 : index
    %c0_232 = arith.constant 0 : index
    %c0_233 = arith.constant 0 : index
    %630 = vector.load %arg9[%c1_231, %c0_232, %c0_233] : memref<2x32x32xf32, #tpu.memory_space<vmem>>, vector<1x32x32xf32>
    %631 = vector.shape_cast %630 : vector<1x32x32xf32> to vector<32x32xf32>
    %cst_234 = arith.constant dense<0.000000e+00> : vector<17x32xf32>
    %632 = tpu.matmul %629, %631, %cst_234 {dimension_numbers = #tpu.dot_dimension_numbers<[1], [0], [0], [1], [0, 0, 1, 1], [], []>} : vector<17x32xf32>, vector<32x32xf32>, vector<17x32xf32> -> vector<17x32xf32>
    %633 = vector.extract_strided_slice %558 {offsets = [1, 0], sizes = [1, 32], strides = [1, 1]} : vector<2x96xf32> to vector<1x32xf32>
    %634 = vector.broadcast %633 : vector<1x32xf32> to vector<17x32xf32>
    %635 = arith.addf %632, %634 : vector<17x32xf32>
    %636 = arith.addf %532, %635 : vector<17x32xf32>
    %637 = vector.extract_strided_slice %534 {offsets = [2, 0], sizes = [1, 32], strides = [1, 1]} : vector<4x32xf32> to vector<1x32xf32>
    %638 = vector.extract_strided_slice %534 {offsets = [3, 0], sizes = [1, 32], strides = [1, 1]} : vector<4x32xf32> to vector<1x32xf32>
    %cst_235 = arith.constant dense<0.000000e+00> : vector<17xf32>
    %639 = vector.multi_reduction <add>, %636, %cst_235 [1] : vector<17x32xf32> to vector<17xf32>
    %640 = vector.shape_cast %639 : vector<17xf32> to vector<17x1xf32>
    %cst_236 = arith.constant 3.200000e+01 : f32
    %641 = vector.broadcast %cst_236 : f32 to vector<17x1xf32>
    %642 = arith.divf %640, %641 : vector<17x1xf32>
    %643 = vector.broadcast %642 : vector<17x1xf32> to vector<17x32xf32>
    %644 = arith.subf %636, %643 : vector<17x32xf32>
    %645 = arith.mulf %644, %644 : vector<17x32xf32>
    %cst_237 = arith.constant dense<0.000000e+00> : vector<17xf32>
    %646 = vector.multi_reduction <add>, %645, %cst_237 [1] : vector<17x32xf32> to vector<17xf32>
    %647 = vector.shape_cast %646 : vector<17xf32> to vector<17x1xf32>
    %cst_238 = arith.constant 3.200000e+01 : f32
    %648 = vector.broadcast %cst_238 : f32 to vector<17x1xf32>
    %649 = arith.divf %647, %648 : vector<17x1xf32>
    %cst_239 = arith.constant 9.99999974E-6 : f32
    %650 = vector.broadcast %cst_239 : f32 to vector<17x1xf32>
    %651 = arith.addf %649, %650 : vector<17x1xf32>
    %652 = math.rsqrt %651 : vector<17x1xf32>
    %653 = vector.broadcast %652 : vector<17x1xf32> to vector<17x32xf32>
    %654 = arith.mulf %644, %653 : vector<17x32xf32>
    %655 = vector.broadcast %637 : vector<1x32xf32> to vector<17x32xf32>
    %656 = arith.mulf %654, %655 : vector<17x32xf32>
    %657 = vector.broadcast %638 : vector<1x32xf32> to vector<17x32xf32>
    %658 = arith.addf %656, %657 : vector<17x32xf32>
    %c1_240 = arith.constant 1 : index
    %c0_241 = arith.constant 0 : index
    %c0_242 = arith.constant 0 : index
    %659 = vector.load %arg11[%c1_240, %c0_241, %c0_242] : memref<2x2x64xf32, #tpu.memory_space<vmem>>, vector<1x2x64xf32>
    %660 = vector.shape_cast %659 : vector<1x2x64xf32> to vector<2x64xf32>
    %c1_243 = arith.constant 1 : index
    %c0_244 = arith.constant 0 : index
    %c0_245 = arith.constant 0 : index
    %661 = vector.load %arg10[%c1_243, %c0_244, %c0_245] : memref<2x32x64xf32, #tpu.memory_space<vmem>>, vector<1x32x64xf32>
    %662 = vector.shape_cast %661 : vector<1x32x64xf32> to vector<32x64xf32>
    %cst_246 = arith.constant dense<0.000000e+00> : vector<17x64xf32>
    %663 = tpu.matmul %658, %662, %cst_246 {dimension_numbers = #tpu.dot_dimension_numbers<[1], [0], [0], [1], [0, 0, 1, 1], [], []>} : vector<17x32xf32>, vector<32x64xf32>, vector<17x64xf32> -> vector<17x64xf32>
    %664 = vector.extract_strided_slice %660 {offsets = [0, 0], sizes = [1, 64], strides = [1, 1]} : vector<2x64xf32> to vector<1x64xf32>
    %665 = vector.broadcast %664 : vector<1x64xf32> to vector<17x64xf32>
    %666 = arith.addf %663, %665 : vector<17x64xf32>
    %cst_247 = arith.constant 0.000000e+00 : f32
    %667 = vector.broadcast %cst_247 : f32 to vector<17x64xf32>
    %668 = arith.maximumf %666, %667 : vector<17x64xf32>
    %c1_248 = arith.constant 1 : index
    %c0_249 = arith.constant 0 : index
    %c0_250 = arith.constant 0 : index
    %669 = vector.load %arg12[%c1_248, %c0_249, %c0_250] : memref<2x64x32xf32, #tpu.memory_space<vmem>>, vector<1x64x32xf32>
    %670 = vector.shape_cast %669 : vector<1x64x32xf32> to vector<64x32xf32>
    %cst_251 = arith.constant dense<0.000000e+00> : vector<17x32xf32>
    %671 = tpu.matmul %668, %670, %cst_251 {dimension_numbers = #tpu.dot_dimension_numbers<[1], [0], [0], [1], [0, 0, 1, 1], [], []>} : vector<17x64xf32>, vector<64x32xf32>, vector<17x32xf32> -> vector<17x32xf32>
    %672 = vector.extract_strided_slice %660 {offsets = [1, 0], sizes = [1, 32], strides = [1, 1]} : vector<2x64xf32> to vector<1x32xf32>
    %673 = vector.broadcast %672 : vector<1x32xf32> to vector<17x32xf32>
    %674 = arith.addf %671, %673 : vector<17x32xf32>
    %675 = arith.addf %636, %674 : vector<17x32xf32>
    %676 = vector.extract_strided_slice %675 {offsets = [0, 0], sizes = [1, 32], strides = [1, 1]} : vector<17x32xf32> to vector<1x32xf32>
    %677 = vector.extract_strided_slice %675 {offsets = [1, 0], sizes = [1, 32], strides = [1, 1]} : vector<17x32xf32> to vector<1x32xf32>
    %678 = vector.extract_strided_slice %675 {offsets = [2, 0], sizes = [1, 32], strides = [1, 1]} : vector<17x32xf32> to vector<1x32xf32>
    %679 = vector.extract_strided_slice %675 {offsets = [3, 0], sizes = [1, 32], strides = [1, 1]} : vector<17x32xf32> to vector<1x32xf32>
    %680 = vector.extract_strided_slice %675 {offsets = [4, 0], sizes = [1, 32], strides = [1, 1]} : vector<17x32xf32> to vector<1x32xf32>
    %681 = vector.extract_strided_slice %675 {offsets = [5, 0], sizes = [1, 32], strides = [1, 1]} : vector<17x32xf32> to vector<1x32xf32>
    %682 = vector.extract_strided_slice %675 {offsets = [6, 0], sizes = [1, 32], strides = [1, 1]} : vector<17x32xf32> to vector<1x32xf32>
    %683 = vector.extract_strided_slice %675 {offsets = [7, 0], sizes = [1, 32], strides = [1, 1]} : vector<17x32xf32> to vector<1x32xf32>
    %684 = vector.extract_strided_slice %675 {offsets = [8, 0], sizes = [1, 32], strides = [1, 1]} : vector<17x32xf32> to vector<1x32xf32>
    %685 = vector.extract_strided_slice %675 {offsets = [9, 0], sizes = [1, 32], strides = [1, 1]} : vector<17x32xf32> to vector<1x32xf32>
    %686 = vector.extract_strided_slice %675 {offsets = [10, 0], sizes = [1, 32], strides = [1, 1]} : vector<17x32xf32> to vector<1x32xf32>
    %687 = vector.extract_strided_slice %675 {offsets = [11, 0], sizes = [1, 32], strides = [1, 1]} : vector<17x32xf32> to vector<1x32xf32>
    %688 = vector.extract_strided_slice %675 {offsets = [12, 0], sizes = [1, 32], strides = [1, 1]} : vector<17x32xf32> to vector<1x32xf32>
    %689 = vector.extract_strided_slice %675 {offsets = [13, 0], sizes = [1, 32], strides = [1, 1]} : vector<17x32xf32> to vector<1x32xf32>
    %690 = vector.extract_strided_slice %675 {offsets = [14, 0], sizes = [1, 32], strides = [1, 1]} : vector<17x32xf32> to vector<1x32xf32>
    %691 = vector.extract_strided_slice %675 {offsets = [15, 0], sizes = [1, 32], strides = [1, 1]} : vector<17x32xf32> to vector<1x32xf32>
    %692 = vector.extract_strided_slice %675 {offsets = [16, 0], sizes = [1, 32], strides = [1, 1]} : vector<17x32xf32> to vector<1x32xf32>
    %693 = tpu.concatenate %676, %677, %678, %679, %680, %681, %682, %683, %684, %685, %686, %687, %688, %689, %690, %691 in 1 : vector<1x32xf32>, vector<1x32xf32>, vector<1x32xf32>, vector<1x32xf32>, vector<1x32xf32>, vector<1x32xf32>, vector<1x32xf32>, vector<1x32xf32>, vector<1x32xf32>, vector<1x32xf32>, vector<1x32xf32>, vector<1x32xf32>, vector<1x32xf32>, vector<1x32xf32>, vector<1x32xf32>, vector<1x32xf32> -> vector<1x512xf32>
    %694 = tpu.concatenate %693, %692 in 1 : vector<1x512xf32>, vector<1x32xf32> -> vector<1x544xf32>
    %695 = tpu.concatenate %376, %694 in 0 : vector<1x544xf32>, vector<1x544xf32> -> vector<2x544xf32>
    %c0_i32_252 = arith.constant 0 : i32
    %696 = tpu.memref_slice %arg22[%c0_i32_252] : memref<2x!tpu.dma_semaphore, #tpu.memory_space<semaphore_mem>> -> memref<1x!tpu.dma_semaphore, #tpu.memory_space<semaphore_mem>>
    %697 = tpu.memref_squeeze %696 : memref<1x!tpu.dma_semaphore, #tpu.memory_space<semaphore_mem>> -> memref<!tpu.dma_semaphore, #tpu.memory_space<semaphore_mem>>
    tpu.wait_dma2 semaphore(%697 : memref<!tpu.dma_semaphore, #tpu.memory_space<semaphore_mem>>) src(%arg17 : memref<544x512xf32, #tpu.memory_space<any>>) dst(%arg20 : memref<544x512xf32, #tpu.memory_space<vmem>>)
    %c0_253 = arith.constant 0 : index
    %c0_254 = arith.constant 0 : index
    %698 = vector.load %arg20[%c0_253, %c0_254] : memref<544x512xf32, #tpu.memory_space<vmem>>, vector<544x512xf32>
    %cst_255 = arith.constant dense<0.000000e+00> : vector<2x512xf32>
    %699 = tpu.matmul %695, %698, %cst_255 {dimension_numbers = #tpu.dot_dimension_numbers<[1], [0], [0], [1], [0, 0, 1, 1], [], []>} : vector<2x544xf32>, vector<544x512xf32>, vector<2x512xf32> -> vector<2x512xf32>
    %c0_256 = arith.constant 0 : index
    %c0_257 = arith.constant 0 : index
    %700 = vector.load %arg13[%c0_256, %c0_257] : memref<1x512xf32, #tpu.memory_space<vmem>>, vector<1x512xf32>
    %701 = vector.broadcast %700 : vector<1x512xf32> to vector<2x512xf32>
    %702 = arith.addf %699, %701 : vector<2x512xf32>
    %cst_258 = arith.constant 0.000000e+00 : f32
    %703 = vector.broadcast %cst_258 : f32 to vector<2x512xf32>
    %704 = arith.maximumf %702, %703 : vector<2x512xf32>
    %c1_i32_259 = arith.constant 1 : i32
    %705 = tpu.memref_slice %arg22[%c1_i32_259] : memref<2x!tpu.dma_semaphore, #tpu.memory_space<semaphore_mem>> -> memref<1x!tpu.dma_semaphore, #tpu.memory_space<semaphore_mem>>
    %706 = tpu.memref_squeeze %705 : memref<1x!tpu.dma_semaphore, #tpu.memory_space<semaphore_mem>> -> memref<!tpu.dma_semaphore, #tpu.memory_space<semaphore_mem>>
    tpu.wait_dma2 semaphore(%706 : memref<!tpu.dma_semaphore, #tpu.memory_space<semaphore_mem>>) src(%arg18 : memref<512x128xf32, #tpu.memory_space<any>>) dst(%arg21 : memref<512x128xf32, #tpu.memory_space<vmem>>)
    %c0_260 = arith.constant 0 : index
    %c0_261 = arith.constant 0 : index
    %707 = vector.load %arg21[%c0_260, %c0_261] : memref<512x128xf32, #tpu.memory_space<vmem>>, vector<512x128xf32>
    %cst_262 = arith.constant dense<0.000000e+00> : vector<2x128xf32>
    %708 = tpu.matmul %704, %707, %cst_262 {dimension_numbers = #tpu.dot_dimension_numbers<[1], [0], [0], [1], [0, 0, 1, 1], [], []>} : vector<2x512xf32>, vector<512x128xf32>, vector<2x128xf32> -> vector<2x128xf32>
    %c0_263 = arith.constant 0 : index
    %c0_264 = arith.constant 0 : index
    %709 = vector.load %arg14[%c0_263, %c0_264] : memref<1x128xf32, #tpu.memory_space<vmem>>, vector<1x128xf32>
    %710 = vector.broadcast %709 : vector<1x128xf32> to vector<2x128xf32>
    %711 = arith.addf %708, %710 : vector<2x128xf32>
    %cst_265 = arith.constant 0.000000e+00 : f32
    %712 = vector.broadcast %cst_265 : f32 to vector<2x128xf32>
    %713 = arith.maximumf %711, %712 : vector<2x128xf32>
    %c0_266 = arith.constant 0 : index
    %c0_267 = arith.constant 0 : index
    %714 = vector.load %arg15[%c0_266, %c0_267] : memref<128x1xf32, #tpu.memory_space<vmem>>, vector<128x1xf32>
    %cst_268 = arith.constant dense<0.000000e+00> : vector<2x1xf32>
    %715 = tpu.matmul %713, %714, %cst_268 {dimension_numbers = #tpu.dot_dimension_numbers<[1], [0], [0], [1], [0, 0, 1, 1], [], []>} : vector<2x128xf32>, vector<128x1xf32>, vector<2x1xf32> -> vector<2x1xf32>
    %c0_269 = arith.constant 0 : index
    %c0_270 = arith.constant 0 : index
    %716 = vector.load %arg16[%c0_269, %c0_270] : memref<1x1xf32, #tpu.memory_space<vmem>>, vector<1x1xf32>
    %717 = vector.broadcast %716 : vector<1x1xf32> to vector<2x1xf32>
    %718 = arith.addf %715, %717 : vector<2x1xf32>
    %c0_271 = arith.constant 0 : index
    %c0_272 = arith.constant 0 : index
    %719 = vector.load %arg19[%c0_271, %c0_272] : memref<2x1xf32, #tpu.memory_space<vmem>>, vector<2x1xf32>
    tpu.vector_store %arg19[%c0_271, %c0_272], %718 {strides = array<i32>} : memref<2x1xf32, #tpu.memory_space<vmem>>, vector<2x1xf32>,
    return
  }
}

</mosaic_0001>

<bundles_post_ra>
// kernel: _lambda_.1
= control target key start
LH: loop header
LB: loop body
LE: loop exit
PB: predicated region body
PF: predicated region fallthrough
CT: control target
= control target key end

     0   :  { %s12687_s0 = inlined_call_operand.vmem [shape: f32[2], index: 0, kind: input, shape index: {}]   ;;  %s12688_s1 = inlined_call_operand.vmem [shape: f32[128,32], index: 1, kind: input, shape index: {}]   ;;  %s12689_s2 = inlined_call_operand.hbm [shape: f32[128,128], index: 2, kind: input, shape index: {}]   ;;  %s12690_s3 = inlined_call_operand.hbm [shape: f32[64,32], index: 3, kind: input, shape index: {}]   ;;  %s12691_s4 = inlined_call_operand.hbm [shape: f32[3,32], index: 4, kind: input, shape index: {}]   ;;  %s12692_s5 = inlined_call_operand.hbm [shape: f32[17,32], index: 5, kind: input, shape index: {}]   ;;  %s12693_s6 = inlined_call_operand.hbm [shape: f32[2,4,32], index: 6, kind: input, shape index: {}]   ;;  %s12694_s7 = inlined_call_operand.hbm [shape: f32[2,32,96], index: 7, kind: input, shape index: {}]   ;;  %s12695_s8 = inlined_call_operand.hbm [shape: f32[2,2,96], index: 8, kind: input, shape index: {}]   ;;  %s12696_s9 = inlined_call_operand.hbm [shape: f32[2,32,32], index: 9, kind: input, shape index: {}]   ;;  %s12697_s10 = inlined_call_operand.hbm [shape: f32[2,32,64], index: 10, kind: input, shape index: {}]   ;;  %s12698_s11 = inlined_call_operand.hbm [shape: f32[2,2,64], index: 11, kind: input, shape index: {}]   ;;  %s12699_s12 = inlined_call_operand.hbm [shape: f32[2,64,32], index: 12, kind: input, shape index: {}]   ;;  %s12700_s13 = inlined_call_operand.hbm [shape: f32[1,512], index: 13, kind: input, shape index: {}]   ;;  %s12701_s14 = inlined_call_operand.hbm [shape: f32[1,128], index: 14, kind: input, shape index: {}]   ;;  %s12702_s15 = inlined_call_operand.hbm [shape: f32[128,1], index: 15, kind: input, shape index: {}]   ;;  %s12703_s16 = inlined_call_operand.<no memory space> [shape: f32[1,1], index: 16, kind: input, shape index: {}]   ;;  %s12704_s17 = inlined_call_operand.hbm [shape: f32[544,512], index: 17, kind: input, shape index: {}]   ;;  %s12705_s18 = inlined_call_operand.hbm [shape: f32[512,128], index: 18, kind: input, shape index: {}]   ;;  %s12706_s19 = inlined_call_operand.vmem [shape: f32[2,1], index: 19, kind: output, shape index: {}]  }
   0x1   :  { %12708 = sst [smem:[#allocation47_spill]] %s12687_s0  ;;  %v24_v0 = vstv %s12703_s16 }
   0x2   :  { %12709 = sst [smem:[#allocation48_spill]] %s12688_s1  ;;  %25 = vst [vmem:[#allocation5] sm:$0x1] %v24_v0 }
   0x3   :  { %12710 = sst [smem:[#allocation49_spill]] %s12689_s2 }
   0x4   :  { %12711 = sst [smem:[#allocation50_spill]] %s12690_s3 }
   0x5   :  { %26 = vsyncpa [#allocation8], 0 }
   0x6   :  { %27 = vsyncpa [#allocation7], 0 }
   0x7   :  { %28 = vsyncpa [#allocation11], 0 }
   0x8   :  { %29 = vsyncpa [#allocation14], 0 }
   0x9   :  { %30 = vsyncpa [#allocation17], 0 }
   0xa   :  { %31 = vsyncpa [#allocation20], 0 }
   0xb   :  { %32 = vsyncpa [#allocation23], 0 }
   0xc   :  { %33 = vsyncpa [#allocation26], 0 }
   0xd   :  { %34 = vsyncpa [#allocation29], 0  ;;  %s10272_s20 = smov [#allocation10]   ;;  %s10273_s1 = smov [#allocation13]  }
   0xe   :  { %s64_s21 = sshll.u32 %s10272_s20, 4  ;;  %s86_s22 = sshll.u32 %s10273_s1, 4  ;;  %s65_s21 = int_to_ptr.vmem [resolvable:$true] %s64_s21  ;;  %s87_s22 = int_to_ptr.vmem [resolvable:$true] %s86_s22 }
   0xf   :  { %s9926_s2 = scalar_lea.vmem %s65_s21, 1024  ;;  %p9931_p1 = scmp.lt.s32.totalorder %s65_s21, %s65_s21 }
  0x10   :  { %p9927_p0 = scmp.ne.s32.totalorder %s65_s21, %s9926_s2  ;;  %p9932_p2 = scmp.lt.s32.totalorder %s9926_s2, %s9926_s2 }
  0x12   :  { %p9933_p3 = por %p9932_p2, %p9931_p1 }
  0x14   :  { %p9934_p4 = pnand %p9933_p3, %p9927_p0 }
  0x16   :  { %9937 = shalt.err (!%p9934_p4)
}
  0x17   :  { %s10274_s16 = smov 128   ;;  %s10275_s23 = smov 8  }
  0x18   :  { %s12712_s3 = sld [smem:[#allocation50_spill]]  ;;  %s9946_s26 = scalar_lea.vmem %s87_s22, 384 }
  0x19   :  { %p9947_p5 = scmp.ne.s32.totalorder %s87_s22, %s9946_s26  ;;  %p9951_p6 = scmp.lt.s32.totalorder %s87_s22, %s87_s22 }
  0x1a   :  { %p9952_p7 = scmp.lt.s32.totalorder %s9946_s26, %s9946_s26 }
  0x1c   :  { %p9953_p8 = por %p9952_p7, %p9951_p6 }
  0x1e   :  { %70 = dma.hbm_to_vmem [thread:$0]  %s12712_s3, 1024, %s65_s21, [#allocation11], %s10274_s16, %s10274_s16, %s10275_s23  }
  0x1f   :  { %p9954_p9 = pnand %p9953_p8, %p9947_p5 }
  0x21   :  { %9957 = shalt.err (!%p9954_p9)
}
  0x22   :  { %92 = dma.hbm_to_vmem [thread:$0]  %s12692_s5, 384, %s87_s22, [#allocation14], %s10274_s16, %s10274_s16, %s10275_s23  }
  0x23   :  { %s10276_s29 = smov [#allocation16]   ;;  %s10277_s30 = smov [#allocation19]  }
  0x24   :  { %s110_s0 = sshll.u32 %s10276_s29, 4  ;;  %s134_s20 = sshll.u32 %s10277_s30, 4  ;;  %s111_s0 = int_to_ptr.vmem [resolvable:$true] %s110_s0  ;;  %s135_s20 = int_to_ptr.vmem [resolvable:$true] %s134_s20 }
  0x25   :  { %s9966_s21 = scalar_lea.vmem %s111_s0, 1024  ;;  %p9971_p11 = scmp.lt.s32.totalorder %s111_s0, %s111_s0 }
  0x26   :  { %p9967_p10 = scmp.ne.s32.totalorder %s111_s0, %s9966_s21  ;;  %p9972_p12 = scmp.lt.s32.totalorder %s9966_s21, %s9966_s21 }
  0x28   :  { %p9973_p13 = por %p9972_p12, %p9971_p11 }
  0x2a   :  { %p9974_p0 = pnand %p9973_p13, %p9967_p10 }
  0x2c   :  { %9977 = shalt.err (!%p9974_p0)
}
  0x2d   :  { %116 = dma.hbm_to_vmem [thread:$0]  %s12694_s7, 1024, %s111_s0, [#allocation17], %s10274_s16, %s10274_s16, %s10275_s23  }
  0x2e   :  { %s9986_s5 = scalar_lea.vmem %s135_s20, 1024  ;;  %p9991_p2 = scmp.lt.s32.totalorder %s135_s20, %s135_s20 }
  0x2f   :  { %p9987_p1 = scmp.ne.s32.totalorder %s135_s20, %s9986_s5  ;;  %p9992_p3 = scmp.lt.s32.totalorder %s9986_s5, %s9986_s5 }
  0x31   :  { %p9993_p4 = por %p9992_p3, %p9991_p2 }
  0x33   :  { %p9994_p5 = pnand %p9993_p4, %p9987_p1 }
  0x35   :  { %9997 = shalt.err (!%p9994_p5)
}
  0x36   :  { %140 = dma.hbm_to_vmem [thread:$0]  %s12696_s9, 1024, %s135_s20, [#allocation20], %s10274_s16, %s10274_s16, %s10275_s23  }
  0x37   :  { %s10278_s25 = smov [#allocation22]   ;;  %s10279_s26 = smov [#allocation25]  }
  0x38   :  { %s158_s3 = sshll.u32 %s10278_s25, 4  ;;  %s183_s27 = sshll.u32 %s10279_s26, 4  ;;  %s159_s3 = int_to_ptr.vmem [resolvable:$true] %s158_s3  ;;  %s184_s27 = int_to_ptr.vmem [resolvable:$true] %s183_s27 }
  0x39   :  { %s10006_s7 = scalar_lea.vmem %s159_s3, 64  ;;  %p10011_p7 = scmp.lt.s32.totalorder %s159_s3, %s159_s3 }
  0x3a   :  { %p10007_p6 = scmp.ne.s32.totalorder %s159_s3, %s10006_s7  ;;  %p10012_p8 = scmp.lt.s32.totalorder %s10006_s7, %s10006_s7 }
  0x3c   :  { %p10013_p9 = por %p10012_p8, %p10011_p7 }
  0x3e   :  { %p10014_p10 = pnand %p10013_p9, %p10007_p6 }
  0x40   :  { %10017 = shalt.err (!%p10014_p10)
}
  0x41   :  { %s10280_s28 = smov 32   ;;  %s10281_s29 = smov 2  }
  0x42   :  { %164 = dma.hbm_to_vmem [thread:$0]  %s12698_s11, 64, %s159_s3, [#allocation23], %s10280_s28, %s10280_s28, %s10281_s29  }
  0x43   :  { %s10026_s30 = scalar_lea.vmem %s184_s27, 64  ;;  %p10031_p12 = scmp.lt.s32.totalorder %s184_s27, %s184_s27 }
  0x44   :  { %p10027_p11 = scmp.ne.s32.totalorder %s184_s27, %s10026_s30  ;;  %p10032_p13 = scmp.lt.s32.totalorder %s10026_s30, %s10026_s30 }
  0x46   :  { %p10033_p0 = por %p10032_p13, %p10031_p12 }
  0x48   :  { %p10034_p1 = pnand %p10033_p0, %p10027_p11 }
  0x4a   :  { %10037 = shalt.err (!%p10034_p1)
}
  0x4b   :  { %186 = dma.hbm_to_vmem [thread:$0]  %s12700_s13, 64, %s184_s27, [#allocation26]  }
  0x4c   :  { %s12713_s5 = sld [smem:[#allocation47_spill]] }
  0x52   :  { %s41_s22 = sshll.u32 %s12713_s5, 4  ;;  %s42_s22 = int_to_ptr.vmem [resolvable:$true] %s41_s22 }
  0x53   :  { %s10038_s24 = scalar_lea.vmem %s42_s22, 16  ;;  %p10043_p3 = scmp.lt.s32.totalorder %s42_s22, %s42_s22 }
  0x54   :  { %p10039_p2 = scmp.ne.s32.totalorder %s42_s22, %s10038_s24  ;;  %p10044_p4 = scmp.lt.s32.totalorder %s10038_s24, %s10038_s24 }
  0x56   :  { %p10045_p5 = por %p10044_p4, %p10043_p3 }
  0x58   :  { %p10046_p6 = pnand %p10045_p5, %p10039_p2 }
  0x5a   :  { %10049 = shalt.err (!%p10046_p6)
}
  0x5b   :  { %s10282_s11 = smov [#allocation6]   ;;  %s10283_s25 = smov [#allocation9]  }
  0x5c   :  { %44 = dma.vmem_to_smem %s42_s22, 16, %s10282_s11, [#allocation8]  }
  0x5d   :  { %s52_s3 = sshll.u32 %s10283_s25, 4  ;;  %s10284_s26 = smov [#allocation12]   ;;  %s53_s3 = int_to_ptr.vmem [resolvable:$true] %s52_s3 }
  0x5e   :  { %s77_s7 = sshll.u32 %s10284_s26, 4  ;;  %s10058_s13 = scalar_lea.vmem %s53_s3, 2048  ;;  %s78_s7 = int_to_ptr.vmem [resolvable:$true] %s77_s7 }
  0x5f   :  { %p10059_p7 = scmp.ne.s32.totalorder %s53_s3, %s10058_s13  ;;  %p10063_p8 = scmp.lt.s32.totalorder %s53_s3, %s53_s3 }
  0x60   :  { %p10064_p9 = scmp.lt.s32.totalorder %s10058_s13, %s10058_s13 }
  0x62   :  { %p10065_p10 = por %p10064_p9, %p10063_p8 }
  0x64   :  { %p10066_p11 = pnand %p10065_p10, %p10059_p7 }
  0x66   :  { %10069 = shalt.err (!%p10066_p11)
}
  0x67   :  { %s12714_s9 = sld [smem:[#allocation49_spill]]  ;;  %s10078_s30 = scalar_lea.vmem %s78_s7, 64 }
  0x68   :  { %p10079_p12 = scmp.ne.s32.totalorder %s78_s7, %s10078_s30  ;;  %p10083_p13 = scmp.lt.s32.totalorder %s78_s7, %s78_s7 }
  0x69   :  { %p10084_p0 = scmp.lt.s32.totalorder %s10078_s30, %s10078_s30 }
  0x6b   :  { %p10085_p1 = por %p10084_p0, %p10083_p13 }
  0x6d   :  { %58 = dma.hbm_to_vmem [thread:$0]  %s12714_s9, 2048, %s53_s3, [#allocation7], %s10274_s16, %s10274_s16, %s10275_s23  }
  0x6e   :  { %p10086_p2 = pnand %p10085_p1, %p10079_p12 }
  0x70   :  { %10089 = shalt.err (!%p10086_p2)
}
  0x71   :  { %80 = dma.hbm_to_vmem [thread:$0]  %s12691_s4, 64, %s78_s7, [#allocation11]  }
  0x72   :  { %s10285_s1 = smov [#allocation15]  }
  0x73   :  { %s98_s2 = sshll.u32 %s10285_s1, 4  ;;  %s99_s2 = int_to_ptr.vmem [resolvable:$true] %s98_s2 }
  0x74   :  { %s10098_s5 = scalar_lea.vmem %s99_s2, 128  ;;  %p10103_p4 = scmp.lt.s32.totalorder %s99_s2, %s99_s2 }
  0x75   :  { %p10099_p3 = scmp.ne.s32.totalorder %s99_s2, %s10098_s5  ;;  %p10104_p5 = scmp.lt.s32.totalorder %s10098_s5, %s10098_s5 }
  0x77   :  { %p10105_p6 = por %p10104_p5, %p10103_p4 }
  0x79   :  { %p10106_p7 = pnand %p10105_p6, %p10099_p3 }
  0x7b   :  { %10109 = shalt.err (!%p10106_p7)
}
  0x7c   :  { %s10286_s22 = smov 64   ;;  %s10287_s24 = smov 4  }
  0x7d   :  { %104 = dma.hbm_to_vmem [thread:$0]  %s12693_s6, 128, %s99_s2, [#allocation14], %s10286_s22, %s10286_s22, %s10287_s24  }
  0x7e   :  { %s10288_s3 = smov [#allocation18]   ;;  %s10289_s26 = smov [#allocation21]  }
  0x7f   :  { %s122_s4 = sshll.u32 %s10288_s3, 4  ;;  %s146_s7 = sshll.u32 %s10289_s26, 4  ;;  %s123_s4 = int_to_ptr.vmem [resolvable:$true] %s122_s4  ;;  %s147_s7 = int_to_ptr.vmem [resolvable:$true] %s146_s7 }
  0x80   :  { %s10118_s13 = scalar_lea.vmem %s123_s4, 64  ;;  %p10123_p9 = scmp.lt.s32.totalorder %s123_s4, %s123_s4 }
  0x81   :  { %p10119_p8 = scmp.ne.s32.totalorder %s123_s4, %s10118_s13  ;;  %p10124_p10 = scmp.lt.s32.totalorder %s10118_s13, %s10118_s13 }
  0x83   :  { %p10125_p11 = por %p10124_p10, %p10123_p9 }
  0x85   :  { %p10126_p12 = pnand %p10125_p11, %p10119_p8 }
  0x87   :  { %10129 = shalt.err (!%p10126_p12)
}
  0x88   :  { %128 = dma.hbm_to_vmem [thread:$0]  %s12695_s8, 64, %s123_s4, [#allocation17], %s10280_s28, %s10280_s28, %s10281_s29  }
  0x89   :  { %s10138_s6 = scalar_lea.vmem %s147_s7, 1024  ;;  %p10143_p0 = scmp.lt.s32.totalorder %s147_s7, %s147_s7 }
  0x8a   :  { %p10139_p13 = scmp.ne.s32.totalorder %s147_s7, %s10138_s6  ;;  %p10144_p1 = scmp.lt.s32.totalorder %s10138_s6, %s10138_s6 }
  0x8c   :  { %p10145_p2 = por %p10144_p1, %p10143_p0 }
  0x8e   :  { %p10146_p3 = pnand %p10145_p2, %p10139_p13 }
  0x90   :  { %10149 = shalt.err (!%p10146_p3)
}
  0x91   :  { %152 = dma.hbm_to_vmem [thread:$0]  %s12697_s10, 1024, %s147_s7, [#allocation20], %s10274_s16, %s10274_s16, %s10275_s23  }
  0x92   :  { %s10290_s20 = smov [#allocation24]   ;;  %s10291_s1 = smov [#allocation27]  }
  0x93   :  { %s170_s21 = sshll.u32 %s10290_s20, 4  ;;  %s193_s2 = sshll.u32 %s10291_s1, 4  ;;  %s171_s21 = int_to_ptr.vmem [resolvable:$true] %s170_s21  ;;  %s194_s2 = int_to_ptr.vmem [resolvable:$true] %s193_s2 }
  0x94   :  { %s10158_s8 = scalar_lea.vmem %s171_s21, 2048  ;;  %p10163_p5 = scmp.lt.s32.totalorder %s171_s21, %s171_s21 }
  0x95   :  { %p10159_p4 = scmp.ne.s32.totalorder %s171_s21, %s10158_s8  ;;  %p10164_p6 = scmp.lt.s32.totalorder %s10158_s8, %s10158_s8 }
  0x97   :  { %p10165_p7 = por %p10164_p6, %p10163_p5 }
  0x99   :  { %p10166_p8 = pnand %p10165_p7, %p10159_p4 }
  0x9b   :  { %10169 = shalt.err (!%p10166_p8)
}
  0x9c   :  { %176 = dma.hbm_to_vmem [thread:$0]  %s12699_s12, 2048, %s171_s21, [#allocation23], %s10274_s16, %s10274_s16, %s10275_s23  }
  0x9d   :  { %s10178_s10 = scalar_lea.vmem %s194_s2, 16  ;;  %s10182_s24 = scalar_lea.vmem %s194_s2, 32 }
  0x9e   :  { %p10179_p9 = scmp.ne.s32.totalorder %s194_s2, %s10178_s10  ;;  %p10183_p10 = scmp.lt.s32.totalorder %s194_s2, %s194_s2 }
  0x9f   :  { %p10184_p11 = scmp.lt.s32.totalorder %s10182_s24, %s10178_s10 }
  0xa1   :  { %p10185_p12 = por %p10184_p11, %p10183_p10 }
  0xa3   :  { %p10186_p13 = pnand %p10185_p12, %p10179_p9 }
  0xa5   :  { %10189 = shalt.err (!%p10186_p13)
}
  0xa6   :  { %196 = dma.hbm_to_vmem [thread:$0]  %s12701_s14, 16, %s194_s2, [#allocation26]  }
  0xa7   :  { %s10292_s3 = smov [#allocation28]  }
  0xa8   :  { %s202_s4 = sshll.u32 %s10292_s3, 4  ;;  %s203_s4 = int_to_ptr.vmem [resolvable:$true] %s202_s4 }
  0xa9   :  { %s10198_s26 = scalar_lea.vmem %s203_s4, 2048  ;;  %p10203_p1 = scmp.lt.s32.totalorder %s203_s4, %s203_s4 }
  0xaa   :  { %p10199_p0 = scmp.ne.s32.totalorder %s203_s4, %s10198_s26  ;;  %p10204_p2 = scmp.lt.s32.totalorder %s10198_s26, %s10198_s26 }
  0xac   :  { %p10205_p3 = por %p10204_p2, %p10203_p1 }
  0xae   :  { %p10206_p4 = pnand %p10205_p3, %p10199_p0 }
  0xb0   :  { %10209 = shalt.err (!%p10206_p4)
}
  0xb1   :  { %208 = dma.hbm_to_vmem [thread:$0]  %s12702_s15, 2048, %s203_s4, [#allocation29], %s10274_s16, %s10274_s16, %s10275_s23  }
  0xb2   :  { %10250 = dma.done.wait [#allocation8], 16  }
  0xb3   :  { %10251 = vsyncadd [#allocation8], 4294967280 }
  0xb4   :  { %10252 = dma.done.wait [#allocation7], 2048  }
  0xb5   :  { %10253 = vsyncadd [#allocation7], 4294965248 }
  0xb6   :  { %10254 = dma.done.wait [#allocation11], 1088  }
  0xb7   :  { %10255 = vsyncadd [#allocation11], 4294966208 }
  0xb8   :  { %10256 = dma.done.wait [#allocation14], 512  }
  0xb9   :  { %10257 = vsyncadd [#allocation14], 4294966784 }
  0xba   :  { %10258 = dma.done.wait [#allocation17], 1088  }
  0xbb   :  { %10259 = vsyncadd [#allocation17], 4294966208 }
  0xbc   :  { %10260 = dma.done.wait [#allocation20], 2048  }
  0xbd   :  { %10261 = vsyncadd [#allocation20], 4294965248 }
  0xbe   :  { %10262 = dma.done.wait [#allocation23], 2112  }
  0xbf   :  { %10263 = vsyncadd [#allocation23], 4294965184 }
  0xc0   :  { %10264 = dma.done.wait [#allocation26], 80  }
  0xc1   :  { %10265 = vsyncadd [#allocation26], 4294967216 }
  0xc2   :  { %10266 = dma.done.wait [#allocation29], 2048  }
  0xc3   :  { %10267 = vsyncadd [#allocation29], 4294965248 }
  0xc4   :  { %256 = sfence }
  0xc5   :  { %s12715_s16 = sld [smem:[#allocation48_spill]]  ;;  %v280_v5 = vld [vmem:[#allocation9] sm:$0xff]  ;;  %v281_v18 = vld [vmem:[#allocation9 + $0x8] sm:$0xff]  ;;  %v282_v19 = vld [vmem:[#allocation9 + $0x10] sm:$0xff]  ;;  %s10294_s20 = smov 16   ;;  %vm541_vm0 = vcmask 64512  }
  0xc6   :  { %8651 = vmatprep.mubr.f32.mxu0 %v280_v5  ;;  %v283_v20 = vld [vmem:[#allocation9 + $0x18] sm:$0xff]  ;;  %v284_v21 = vld [vmem:[#allocation9 + $0x20] sm:$0xff]  ;;  %v285_v22 = vld [vmem:[#allocation9 + $0x28] sm:$0xff]  ;;  %s10295_s21 = smov 24   ;;  %s10296_s1 = smov 40   ;;  %vm543_vm1 = vcmask 130048  }
  0xc7   :  { %v286_v23 = vld [vmem:[#allocation9 + $0x30] sm:$0xff]  ;;  %v287_v24 = vld [vmem:[#allocation9 + $0x38] sm:$0xff]  ;;  %v288_v25 = vld [vmem:[#allocation9 + $0x40] sm:$0xff]  ;;  %s10297_s2 = smov 56   ;;  %s10298_s8 = smov 48   ;;  %vm545_vm2 = vcmask 195584  }
  0xc8   :  { %v289_v26 = vld [vmem:[#allocation9 + $0x48] sm:$0xff]  ;;  %v290_v27 = vld [vmem:[#allocation9 + $0x50] sm:$0xff]  ;;  %v291_v28 = vld [vmem:[#allocation9 + $0x58] sm:$0xff]  ;;  %s10299_s29 = smov 112   ;;  %s10300_s5 = smov 104   ;;  %vm547_vm3 = vcmask 261120  }
  0xc9   :  { %v292_v29 = vld [vmem:[#allocation9 + $0x60] sm:$0xff]  ;;  %v293_v30 = vld [vmem:[#allocation9 + $0x68] sm:$0xff]  ;;  %v294_v31 = vld [vmem:[#allocation9 + $0x70] sm:$0xff]  ;;  %vm549_vm4 = vcmask 326656   ;;  %vm551_vm5 = vcmask 392192   ;;  %vm553_vm6 = vcmask 457728  }
  0xca   :  { %v295_v32 = vld [vmem:[#allocation9 + $0x78] sm:$0xff]  ;;  %vm653_vm7 = vcmask 523264   ;;  %s751_s10 = sld [smem:[#allocation6]]  ;;  %vm762_vm8 = vcmask 1040384   ;;  %vm783_vm9 = vcmask 253952   ;;  %vm10302_vm10 = vmmov 0  }
  0xcb   :  { %v311_v1 = vld [vmem:[%s12715_s16 + $0x78] sm:$0xff]  ;;  %v310_v2 = vld [vmem:[%s12715_s16 + $0x70] sm:$0xff]  ;;  %v309_v3 = vld [vmem:[%s12715_s16 + $0x68] sm:$0xff]  ;;  %s10303_s11 = smov 96   ;;  %vm1034_vm11 = vcmask 138240   ;;  %vm1041_vm12 = vcmask 131072  }
  0xcc   :  { %8619 = vmatprep.subr.mxu0 %v311_v1  ;;  %v308_v4 = vld [vmem:[%s12715_s16 + $0x60] sm:$0xff]  ;;  %v307_v6 = vld [vmem:[%s12715_s16 + $0x58] sm:$0xff]  ;;  %v306_v7 = vld [vmem:[%s12715_s16 + $0x50] sm:$0xff]  ;;  %s10304_s25 = smov 88   ;;  %s10305_s3 = smov 80  }
  0xcd   :  { %8620 = vmatpush3.msra.mxu0 %v311_v1  ;;  %v305_v8 = vld [vmem:[%s12715_s16 + $0x48] sm:$0xff]  ;;  %v304_v9 = vld [vmem:[%s12715_s16 + $0x40] sm:$0xff]  ;;  %v303_v10 = vld [vmem:[%s12715_s16 + $0x38] sm:$0xff]  ;;  %s10306_s4 = smov 72   ;;  %s8057_s26 = sld [smem:[#allocation6 + $0x1]] }
  0xce   :  { %8621 = vmatprep.subr.mxu0 %v310_v2  ;;  %v302_v11 = vld [vmem:[%s12715_s16 + $0x30] sm:$0xff]  ;;  %v301_v12 = vld [vmem:[%s12715_s16 + $0x28] sm:$0xff]  ;;  %v300_v13 = vld [vmem:[%s12715_s16 + $0x20] sm:$0xff]  ;;  %s10308_s14 = smov [#allocation3]  }
  0xcf   :  { %8622 = vmatpush3.msra.mxu0 %v310_v2  ;;  %v299_v14 = vld [vmem:[%s12715_s16 + $0x18] sm:$0xff]  ;;  %v298_v15 = vld [vmem:[%s12715_s16 + $0x10] sm:$0xff]  ;;  %v297_v16 = vld [vmem:[%s12715_s16 + $0x8] sm:$0xff]  ;;  %s276_s15 = sshll.u32 %s10308_s14, 4  ;;  %s277_s15 = int_to_ptr.vmem [resolvable:$true] %s276_s15 }
  0xd0   :  { %8623 = vmatprep.subr.mxu0 %v309_v3  ;;  %v296_v17 = vld [vmem:[%s12715_s16] sm:$0xff]  ;;  %s10293_s16 = smov 120   ;;  %p752_p5 = scmp.eq.f32.partialorder %s751_s10, -10000.0 }
  0xd1   :  { %8624 = vmatpush3.msra.mxu0 %v309_v3 }
  0xd2   :  { %8625 = vmatprep.subr.mxu0 %v308_v4  ;;  %s12717_s10 = smov (%p752_p5, %s751_s10), 0.0 }
  0xd3   :  { %8626 = vmatpush3.msra.mxu0 %v308_v4  ;;  %s754_s24 = smul.f32 0.01, %s12717_s10  ;;  %p3871_p6 = scmp.eq.f32.partialorder %s8057_s26, -10000.0 }
  0xd4   :  { %8627 = vmatprep.subr.mxu0 %v307_v6 }
  0xd5   :  { %8628 = vmatpush3.msra.mxu0 %v307_v6  ;;  %s12719_s26 = smov (%p3871_p6, %s8057_s26), 0.0 }
  0xd6   :  { %8629 = vmatprep.subr.mxu0 %v306_v7  ;;  %s3873_s12 = smul.f32 0.01, %s12719_s26 }
  0xd7   :  { %8630 = vmatpush3.msra.mxu0 %v306_v7 }
  0xd8   :  { %8631 = vmatprep.subr.mxu0 %v305_v8 }
  0xd9   :  { %8632 = vmatpush3.msra.mxu0 %v305_v8 }
  0xda   :  { %8633 = vmatprep.subr.mxu0 %v304_v9 }
  0xdb   :  { %8634 = vmatpush3.msra.mxu0 %v304_v9 }
  0xdc   :  { %8635 = vmatprep.subr.mxu0 %v303_v10 }
  0xdd   :  { %8636 = vmatpush3.msra.mxu0 %v303_v10 }
  0xde   :  { %8637 = vmatprep.subr.mxu0 %v302_v11 }
  0xdf   :  { %8638 = vmatpush3.msra.mxu0 %v302_v11 }
  0xe0   :  { %8639 = vmatprep.subr.mxu0 %v301_v12 }
  0xe1   :  { %8640 = vmatpush3.msra.mxu0 %v301_v12 }
  0xe2   :  { %8641 = vmatprep.subr.mxu0 %v300_v13 }
  0xe3   :  { %8642 = vmatpush3.msra.mxu0 %v300_v13 }
  0xe4   :  { %8643 = vmatprep.subr.mxu0 %v299_v14 }
  0xe5   :  { %8644 = vmatpush3.msra.mxu0 %v299_v14 }
  0xe6   :  { %8645 = vmatprep.subr.mxu0 %v298_v15 }
  0xe7   :  { %8646 = vmatpush3.msra.mxu0 %v298_v15 }
  0xe8   :  { %8647 = vmatprep.subr.mxu0 %v297_v16 }
  0xe9   :  { %8648 = vmatpush3.msra.mxu0 %v297_v16 }
  0xea   :  { %8649 = vmatprep.subr.mxu0 %v296_v17 }
  0xeb   :  { %8650 = vmatpush3.msra.mxu0 %v296_v17 }
  0xec   :  { %8652 = vmatmul.mubr.f32.vlgmr.msra.gmra.mxu0 %v281_v18 }
  0xed   :  { %8654 = vmatprep.mubr.f32.mxu0 %v282_v19  ;;  %v647_v19 = vld [vmem:[#allocation10 + $0x38] sm:$0xff] }
  0xee   :  { %8675 = vmatprep.subr.mxu1 %v647_v19 }
  0xef   :  { %8676 = vmatpush3.msra.mxu1 %v647_v19 }
  0xf0   :  { %8655 = vmatmul.mubr.f32.gmra.mxu0 %v283_v20 }
  0xf1   :  { %8657 = vmatprep.mubr.f32.mxu0 %v284_v21 }
  0xf4   :  { %8658 = vmatmul.mubr.f32.gmra.mxu0 %v285_v22 }
  0xf5   :  { %8660 = vmatprep.mubr.f32.mxu0 %v286_v23 }
  0xf8   :  { %8661 = vmatmul.mubr.f32.gmra.mxu0 %v287_v24  ;;  %v646_v24 = vld [vmem:[#allocation10 + $0x30] sm:$0xff] }
  0xf9   :  { %8663 = vmatprep.mubr.f32.mxu0 %v288_v25  ;;  %8677 = vmatprep.subr.mxu1 %v646_v24 }
  0xfa   :  { %8678 = vmatpush3.msra.mxu1 %v646_v24 }
  0xfc   :  { %8664 = vmatmul.mubr.f32.gmra.mxu0 %v289_v26 }
  0xfd   :  { %8666 = vmatprep.mubr.f32.mxu0 %v290_v27 }
 0x100   :  { %8667 = vmatmul.mubr.f32.gmra.mxu0 %v291_v28  ;;  %v645_v28 = vld [vmem:[#allocation10 + $0x28] sm:$0xff] }
 0x101   :  { %8669 = vmatprep.mubr.f32.mxu0 %v292_v29  ;;  %8679 = vmatprep.subr.mxu1 %v645_v28 }
 0x102   :  { %8680 = vmatpush3.msra.mxu1 %v645_v28  ;;  %v772_v28 = vld [vmem:[#allocation13 + $0x10] sm:$0x1] }
 0x104   :  { %8670 = vmatmul.mubr.f32.gmra.mxu0 %v293_v30 }
 0x105   :  { %8672 = vmatprep.mubr.f32.mxu0 %v294_v31  ;;  %v644_v31 = vld [vmem:[#allocation10 + $0x20] sm:$0xff] }
 0x106   :  { %8681 = vmatprep.subr.mxu1 %v644_v31 }
 0x107   :  { %8682 = vmatpush3.msra.mxu1 %v644_v31 }
 0x108   :  { %8673 = vmatmul.mubr.f32.gmra.mxu0 %v295_v32 }
 0x1ac   :  { %v8653_v33 = vpop.f32.mrf.mxu0 }
 0x1ad   :  { %v458_v42 = vmul.f32 %v8653_v33, %v8653_v33 }
 0x1ae   :  { %v378_v34 = vpop.f32.mrf.mxu0 }
 0x1af   :  { %v457_v45 = vmul.f32 %v378_v34, %v378_v34  ;;  %v643_v34 = vld [vmem:[#allocation10 + $0x18] sm:$0xff] }
 0x1b0   :  { %v8656_v35 = vpop.f32.mrf.mxu0  ;;  %8683 = vmatprep.subr.mxu1 %v643_v34 }
 0x1b1   :  { %v460_v49 = vmul.f32 %v8656_v35, %v8656_v35  ;;  %8684 = vmatpush3.msra.mxu1 %v643_v34 }
 0x1b2   :  { %v388_v36 = vpop.f32.mrf.mxu0 }
 0x1b3   :  { %v459_v53 = vmul.f32 %v388_v36, %v388_v36 }
 0x1b4   :  { %v8659_v37 = vpop.f32.mrf.mxu0 }
 0x1b5   :  { %v462_v58 = vmul.f32 %v8659_v37, %v8659_v37  ;;  %v642_v37 = vld [vmem:[#allocation10 + $0x10] sm:$0xff] }
 0x1b6   :  { %v398_v38 = vpop.f32.mrf.mxu0  ;;  %8685 = vmatprep.subr.mxu1 %v642_v37 }
 0x1b7   :  { %v461_v63 = vmul.f32 %v398_v38, %v398_v38  ;;  %8686 = vmatpush3.msra.mxu1 %v642_v37 }
 0x1b8   :  { %v8662_v39 = vpop.f32.mrf.mxu0 }
 0x1b9   :  { %v464_v4 = vmul.f32 %v8662_v39, %v8662_v39 }
 0x1ba   :  { %v408_v40 = vpop.f32.mrf.mxu0 }
 0x1bb   :  { %v463_v9 = vmul.f32 %v408_v40, %v408_v40 }
 0x1bc   :  { %v8665_v41 = vpop.f32.mrf.mxu0 }
 0x1bd   :  { %v466_v43 = vmul.f32 %v8665_v41, %v8665_v41  ;;  %v641_v41 = vld [vmem:[#allocation10 + $0x8] sm:$0xff] }
 0x1be   :  { %v418_v44 = vpop.f32.mrf.mxu0  ;;  %8687 = vmatprep.subr.mxu1 %v641_v41 }
 0x1bf   :  { %v474_v46 = vadd.f32 %v466_v43, %v458_v42  ;;  %v465_v47 = vmul.f32 %v418_v44, %v418_v44  ;;  %8688 = vmatpush3.msra.mxu1 %v641_v41  ;;  %v640_v42 = vld [vmem:[#allocation10] sm:$0xff] }
 0x1c0   :  { %v8668_v48 = vpop.f32.mrf.mxu0  ;;  %8689 = vmatprep.subr.mxu1 %v640_v42 }
 0x1c1   :  { %v482_v50 = vmax.f32 %v474_v46, 1e-30  ;;  %v473_v51 = vadd.f32 %v465_v47, %v457_v45  ;;  %v468_v52 = vmul.f32 %v8668_v48, %v8668_v48  ;;  %8690 = vmatpush3.msra.mxu1 %v640_v42 }
 0x1c2   :  { %v428_v54 = vpop.f32.mrf.mxu0 }
 0x1c3   :  { %9613 = vlog2.f32 %v482_v50  ;;  %v481_v55 = vmax.f32 %v473_v51, 1e-30  ;;  %v476_v56 = vadd.f32 %v468_v52, %v460_v49  ;;  %v467_v57 = vmul.f32 %v428_v54, %v428_v54 }
 0x1c4   :  { %v8671_v59 = vpop.f32.mrf.mxu0 }
 0x1c5   :  { %9615 = vlog2.f32 %v481_v55  ;;  %v484_v60 = vmax.f32 %v476_v56, 1e-30  ;;  %v475_v61 = vadd.f32 %v467_v57, %v459_v53  ;;  %v470_v62 = vmul.f32 %v8671_v59, %v8671_v59 }
 0x1c6   :  { %v438_v0 = vpop.f32.mrf.mxu0 }
 0x1c7   :  { %9617 = vlog2.f32 %v484_v60  ;;  %v483_v1 = vmax.f32 %v475_v61, 1e-30  ;;  %v478_v2 = vadd.f32 %v470_v62, %v462_v58  ;;  %v469_v3 = vmul.f32 %v438_v0, %v438_v0 }
 0x1c8   :  { %v8674_v5 = vpop.f32.mrf.mxu0 }
 0x1c9   :  { %9619 = vlog2.f32 %v483_v1  ;;  %v486_v6 = vmax.f32 %v478_v2, 1e-30  ;;  %v477_v7 = vadd.f32 %v469_v3, %v461_v63  ;;  %v472_v8 = vmul.f32 %v8674_v5, %v8674_v5 }
 0x1ca   :  { %v448_v10 = vpop.f32.mrf.mxu0 }
 0x1cb   :  { %9621 = vlog2.f32 %v486_v6  ;;  %v485_v11 = vmax.f32 %v477_v7, 1e-30  ;;  %v480_v12 = vadd.f32 %v472_v8, %v464_v4  ;;  %v471_v13 = vmul.f32 %v448_v10, %v448_v10 }
 0x1cd   :  { %9623 = vlog2.f32 %v485_v11  ;;  %v488_v14 = vmax.f32 %v480_v12, 1e-30  ;;  %v479_v15 = vadd.f32 %v471_v13, %v463_v9  ;;  %v755_v13 = vld [vmem:[#allocation12 + $0x1] sm:$0x1] }
 0x1cf   :  { %9625 = vlog2.f32 %v488_v14  ;;  %v487_v18 = vmax.f32 %v479_v15, 1e-30  ;;  %v756_v14 = vstv %s754_s24  ;;  %v7948_v15 = vld [vmem:[#allocation12] ss:$0 sm:$0xff] }
 0x1d0   :  { %v9614_v16 = vpop.eup %9613 }
 0x1d1   :  { %v492_v17 = vmul.f32 0.6931472, %v9614_v16  ;;  %9627 = vlog2.f32 %v487_v18  ;;  %v757_v16 = vmul.f32 %v756_v14, %v755_v13  ;;  %v758_v18 = vld [vmem:[#allocation12 + $0x2] sm:$0x1] }
 0x1d2   :  { %v9616_v20 = vpop.eup %9615 }
 0x1d3   :  { %v10537_v21 = vmul.f32 0.868589, %v492_v17  ;;  %v490_v22 = vmul.f32 0.6931472, %v9616_v20 }
 0x1d4   :  { %v9618_v23 = vpop.eup %9617 }
 0x1d5   :  { %v496_v25 = vmul.f32 0.6931472, %v9618_v23  ;;  %514 = vrot.lane.b32.xlu0 %v10537_v21, %s10275_s23  ;;  %v10541_v26 = vmul.f32 0.868589, %v490_v22  ;;  %v759_v23 = vadd.f32 %v758_v18, %v757_v16 }
 0x1d6   :  { %v9620_v27 = vpop.eup %9619 }
 0x1d7   :  { %556 = vrot.lane.b32.xlu1 %v10541_v26, %s10293_s16  ;;  %v10545_v29 = vmul.f32 0.868589, %v496_v25  ;;  %v494_v30 = vmul.f32 0.6931472, %v9620_v27  ;;  %v771_v27 = vld [vmem:[#allocation13 + $0x8] sm:$0xff] }
 0x1d8   :  { %v9622_v32 = vpop.eup %9621 }
 0x1d9   :  { %v500_v33 = vmul.f32 0.6931472, %v9622_v32  ;;  %562 = vrot.lane.b32.xlu0 %v10545_v29, %s10294_s20  ;;  %v10551_v36 = vmul.f32 0.868589, %v494_v30 }
 0x1da   :  { %v9624_v35 = vpop.eup %9623 }
 0x1db   :  { %522 = vrot.lane.b32.xlu1 %v10545_v29, %s10295_s21  ;;  %v10555_v38 = vmul.f32 0.868589, %v500_v33  ;;  %v498_v39 = vmul.f32 0.6931472, %v9624_v35 }
 0x1dc   :  { %v9626_v40 = vpop.eup %9625 }
 0x1dd   :  { %518 = vrot.lane.b32.xlu0 %v10551_v36, %s10294_s20  ;;  %v504_v43 = vmul.f32 0.6931472, %v9626_v40  ;;  %v10561_v44 = vmul.f32 0.868589, %v498_v39 }
 0x1de   :  { %v9628_v45 = vpop.eup %9627 }
 0x1df   :  { %530 = vrot.lane.b32.xlu1 %v10555_v38, %s10296_s1  ;;  %v10567_v46 = vmul.f32 0.868589, %v504_v43  ;;  %v502_v47 = vmul.f32 0.6931472, %v9628_v45 }
 0x1e1   :  { %559 = vrot.lane.b32.xlu0 %v10551_v36, %s10275_s23  ;;  %v10573_v48 = vmul.f32 0.868589, %v502_v47 }
 0x1e3   :  { %526 = vrot.lane.b32.xlu1 %v10561_v44, %s10280_s28 }
 0x1e5   :  { %568 = vrot.lane.b32.xlu0 %v10555_v38, %s10280_s28 }
 0x1e7   :  { %538 = vrot.lane.b32.xlu1 %v10567_v46, %s10297_s2 }
 0x1e9   :  { %565 = vrot.lane.b32.xlu0 %v10561_v44, %s10295_s21 }
 0x1eb   :  { %534 = vrot.lane.b32.xlu1 %v10573_v48, %s10298_s8 }
 0x1ed   :  { %571 = vrot.lane.b32.xlu0 %v10573_v48, %s10296_s1 }
 0x1ef   :  { %574 = vrot.lane.b32.xlu1 %v10567_v46, %s10298_s8 }
 0x1f3   :  { %584 = vrot.lane.b32.xlu1 %v10541_v26, %s10299_s29 }
 0x1f7   :  { %612 = vrot.lane.b32.xlu1 %v10541_v26, %s10300_s5 }
 0x247   :  { %v515_v49 = vpop.permute.xlu0 %514 }
 0x248   :  { %v542_v56 = vsel %vm541_vm0, %v10541_v26, %v515_v49  ;;  %v770_v26 = vld [vmem:[#allocation13] sm:$0xff] }
 0x249   :  { %v557_v50 = vpop.permute.xlu1 %556 }
 0x24a   :  { %v577_v59 = vsel %vm541_vm0, %v557_v50, %v10537_v21 }
 0x24b   :  { %v563_v51 = vpop.permute.xlu0 %562 }
 0x24d   :  { %v523_v52 = vpop.permute.xlu1 %522 }
 0x24f   :  { %v519_v53 = vpop.permute.xlu0 %518 }
 0x250   :  { %v544_v58 = vsel %vm543_vm1, %v542_v56, %v519_v53 }
 0x251   :  { %v531_v54 = vpop.permute.xlu1 %530  ;;  %v546_v62 = vsel %vm545_vm2, %v544_v58, %v523_v52 }
 0x253   :  { %v560_v55 = vpop.permute.xlu0 %559 }
 0x254   :  { %v578_v61 = vsel %vm543_vm1, %v577_v59, %v560_v55 }
 0x255   :  { %v527_v57 = vpop.permute.xlu1 %526  ;;  %v579_v1 = vsel %vm545_vm2, %v578_v61, %v563_v51 }
 0x256   :  { %v548_v0 = vsel %vm547_vm3, %v546_v62, %v527_v57 }
 0x257   :  { %v569_v60 = vpop.permute.xlu0 %568  ;;  %v550_v4 = vsel %vm549_vm4, %v548_v0, %v531_v54 }
 0x259   :  { %v539_v63 = vpop.permute.xlu1 %538 }
 0x25b   :  { %v566_v2 = vpop.permute.xlu0 %565 }
 0x25c   :  { %v580_v3 = vsel %vm547_vm3, %v579_v1, %v566_v2 }
 0x25d   :  { %v535_v5 = vpop.permute.xlu1 %534  ;;  %v581_v7 = vsel %vm549_vm4, %v580_v3, %v569_v60 }
 0x25e   :  { %v552_v6 = vsel %vm551_vm5, %v550_v4, %v535_v5 }
 0x25f   :  { %v572_v8 = vpop.permute.xlu0 %571  ;;  %v554_v9 = vsel %vm553_vm6, %v552_v6, %v539_v63 }
 0x260   :  { %v582_v10 = vsel %vm551_vm5, %v581_v7, %v572_v8  ;;  %8691 = vmatprep.mubr.msk.f32.mxu1 %vm653_vm7, %v554_v9  ;;  %v836_v8 = vld [vmem:[#allocation16 + $0x18] sm:$0xff]  ;;  %v835_v9 = vld [vmem:[#allocation16 + $0x10] sm:$0xff] }
 0x261   :  { %v575_v11 = vpop.permute.xlu1 %574 }
 0x262   :  { %v583_v12 = vsel %vm553_vm6, %v582_v10, %v575_v11  ;;  %v834_v10 = vld [vmem:[#allocation16 + $0x8] sm:$0xff]  ;;  %v833_v11 = vld [vmem:[#allocation16] sm:$0xff] }
 0x263   :  { %8692 = vmatmul.mubr.msk.f32.vlgmr.msra.gmra.mxu1 %vm653_vm7, %v583_v12 }
 0x265   :  { %v585_v40 = vpop.permute.xlu1 %584 }
 0x323   :  { %v8693_v17 = vpop.f32.mrf.mxu1 }
 0x324   :  { %v738_v19 = vadd.f32 %v8693_v17, %v7948_v15 }
 0x325   :  { %v732_v20 = vpop.f32.mrf.mxu1 }
 0x326   :  { %v733_v22 = vadd.f32 %v7948_v15, %v732_v20  ;;  %v764_v24 = vrot.slane %v738_v19, 7 }
 0x328   :  { %v763_v25 = vrot.slane %v733_v22, 7  ;;  %v10609_v34 = vadd.f32 %v772_v28, %v764_v24 }
 0x32a   :  { %v769_v30 = vsel %vm762_vm8, %v759_v23, %v763_v25  ;;  %v765_v31 = vsel %vm762_vm8, %v763_v25, %v764_v24  ;;  %v784_v39 = vsel %vm783_vm9, %v10609_v34, 0.0 }
 0x32b   :  { %v10605_v32 = vadd.f32 %v770_v26, %v769_v30  ;;  %v10607_v33 = vadd.f32 %v771_v27, %v765_v31 }
 0x32d   :  { %v777_v35 = vsel %vm547_vm3, %v10605_v32, 0.0  ;;  %v780_v37 = vsel %vm547_vm3, %v10607_v33, 0.0 }
 0x32e   :  { %778 = vadd.xlane.f32.xlu0 %v777_v35  ;;  %781 = vadd.xlane.f32.xlu1 %v780_v37  ;;  %v818_v35 = vlaneseq }
 0x332   :  { %785 = vadd.xlane.f32.xlu0 %v784_v39 }
 0x33f   :  { %615 = vrot.lane.b32.xlu1 %v10537_v21, %s10299_s29 }
 0x343   :  { %618 = vrot.lane.b32.xlu1 %v10551_v36, %s10293_s16 }
 0x347   :  { %596 = vrot.lane.b32.xlu1 %v10555_v38, %s10295_s21 }
 0x348   :  { %587 = vrot.lane.b32.xlu0 %v10537_v21, %s10293_s16  ;;  %v613_v21 = vpop.permute.xlu1 %612 }
 0x34b   :  { %599 = vrot.lane.b32.xlu1 %v10573_v48, %s10280_s28 }
 0x34c   :  { %590 = vrot.lane.b32.xlu0 %v10545_v29, %s10275_s23 }
 0x34f   :  { %602 = vrot.lane.b32.xlu1 %v10567_v46, %s10296_s1 }
 0x350   :  { %593 = vrot.lane.b32.xlu0 %v10561_v44, %s10294_s20 }
 0x354   :  { %621 = vrot.lane.b32.xlu0 %v10561_v44, %s10275_s23 }
 0x358   :  { %624 = vrot.lane.b32.xlu0 %v10555_v38, %s10294_s20 }
 0x3b7   :  { %v779_v41 = vpop.xlane.xlu0 %778  ;;  %v782_v42 = vpop.xlane.xlu1 %781 }
 0x3b8   :  { %v789_v43 = vmul.f32 0.03125, %v782_v42  ;;  %v788_v45 = vmul.f32 0.03125, %v779_v41 }
 0x3ba   :  { %v10638_v47 = vsub.f32 %v10607_v33, %v789_v43  ;;  %v10643_v44 = vsub.f32 %v10605_v32, %v788_v45 }
 0x3bb   :  { %v786_v49 = vpop.xlane.xlu0 %785  ;;  %v616_v50 = vpop.permute.xlu1 %615 }
 0x3bc   :  { %v790_v51 = vmul.f32 0.03125, %v786_v49  ;;  %v795_v52 = vmul.f32 %v10638_v47, %v10638_v47  ;;  %v794_v58 = vmul.f32 %v10643_v44, %v10643_v44  ;;  %v633_v15 = vsel %vm541_vm0, %v613_v21, %v616_v50 }
 0x3be   :  { %v10646_v38 = vsub.f32 %v10609_v34, %v790_v51  ;;  %v800_v53 = vsel %vm547_vm3, %v795_v52, 0.0  ;;  %v797_v63 = vsel %vm547_vm3, %v794_v58, 0.0 }
 0x3bf   :  { %v588_v54 = vpop.permute.xlu0 %587  ;;  %801 = vadd.xlane.f32.xlu1 %v800_v53  ;;  %v619_v55 = vpop.permute.xlu1 %618 }
 0x3c0   :  { %v796_v56 = vmul.f32 %v10646_v38, %v10646_v38  ;;  %v605_v59 = vsel %vm541_vm0, %v585_v40, %v588_v54  ;;  %v634_v16 = vsel %vm543_vm1, %v633_v15, %v619_v55  ;;  %v776_v40 = vld [vmem:[#allocation15] sm:$0xf] }
 0x3c1   :  { %v606_v62 = vsel %vm543_vm1, %v605_v59, %v10551_v36  ;;  %v10301_v36 = vmov 0.0   ;;  %v635_v22 = vsel %vm545_vm2, %v634_v16, %v10545_v29  ;;  %v10687_v29 = vshrl.u32 %v818_v35, 7 }
 0x3c2   :  { %v803_v57 = vsel %vm783_vm9, %v796_v56, 0.0  ;;  %8697 = vmatprep.subr.mxu1 %v10301_v36  ;;  %8759 = vmatprep.subr.mxu0 %v10301_v36 }
 0x3c3   :  { %804 = vadd.xlane.f32.xlu0 %v803_v57  ;;  %v591_v60 = vpop.permute.xlu0 %590  ;;  %v597_v61 = vpop.permute.xlu1 %596  ;;  %8698 = vmatpush3.msra.mxu1 %v836_v8  ;;  %v10690_v37 = vsub.s32 0, %v10687_v29  ;;  %v10693_v21 = vsub.s32 1, %v10687_v29  ;;  %v10723_v57 = vld [vmem:[#allocation18] sm:$0x3] }
 0x3c4   :  { %v607_v0 = vsel %vm545_vm2, %v606_v62, %v591_v60  ;;  %8699 = vmatprep.subr.mxu1 %v10301_v36  ;;  %8765 = vmatprep.mubr.msk.f32.mxu0 %vm10302_vm10, %v10301_v36 }
 0x3c5   :  { %8700 = vmatpush3.msra.mxu1 %v835_v9  ;;  %v10696_v42 = vrot.slane %v776_v40, %v10690_v37  ;;  %v10702_v51 = vrot.slane %v776_v40, %v10693_v21  ;;  %v10727_v60 = vrot.slane %v10723_v57, %v10690_v37 }
 0x3c6   :  { %8701 = vmatprep.subr.mxu1 %v10301_v36 }
 0x3c7   :  { %798 = vadd.xlane.f32.xlu0 %v797_v63  ;;  %v594_v1 = vpop.permute.xlu0 %593  ;;  %v600_v2 = vpop.permute.xlu1 %599  ;;  %8702 = vmatpush3.msra.mxu1 %v834_v10 }
 0x3c8   :  { %v608_v3 = vsel %vm547_vm3, %v607_v0, %v594_v1  ;;  %8703 = vmatprep.subr.mxu1 %v10301_v36 }
 0x3c9   :  { %v609_v4 = vsel %vm549_vm4, %v608_v3, %v597_v61  ;;  %8704 = vmatpush3.msra.mxu1 %v833_v11 }
 0x3ca   :  { %v610_v5 = vsel %vm551_vm5, %v609_v4, %v600_v2  ;;  %8714 = vmatprep.subr.mxu1 %v10301_v36 }
 0x3cb   :  { %v603_v6 = vpop.permute.xlu1 %602 }
 0x3cc   :  { %v611_v7 = vsel %vm553_vm6, %v610_v5, %v603_v6 }
 0x3cd   :  { %8694 = vmatprep.mubr.msk.f32.mxu1 %vm653_vm7, %v611_v7 }
 0x3d0   :  { %630 = vrot.lane.b32.xlu1 %v10567_v46, %s10280_s28  ;;  %v622_v46 = vpop.permute.xlu0 %621 }
 0x3d1   :  { %v636_v23 = vsel %vm547_vm3, %v635_v22, %v622_v46 }
 0x3dd   :  { %627 = vrot.lane.b32.xlu0 %v10573_v48, %s10295_s21  ;;  %v625_v48 = vpop.permute.xlu0 %624 }
 0x3de   :  { %v637_v26 = vsel %vm549_vm4, %v636_v23, %v625_v48 }
 0x448   :  { %v802_v12 = vpop.xlane.xlu1 %801 }
 0x449   :  { %v807_v13 = vmul.f32 0.03125, %v802_v12 }
 0x44b   :  { %v810_v17 = vadd.f32 1e-05, %v807_v13 }
 0x44c   :  { %v805_v14 = vpop.xlane.xlu0 %804  ;;  %v631_v28 = vpop.permute.xlu1 %630 }
 0x44d   :  { %v808_v18 = vmul.f32 0.03125, %v805_v14  ;;  %9629 = vrsqrt.f32 %v810_v17 }
 0x44f   :  { %v811_v24 = vadd.f32 1e-05, %v808_v18 }
 0x450   :  { %v799_v19 = vpop.xlane.xlu0 %798 }
 0x451   :  { %v806_v20 = vmul.f32 0.03125, %v799_v19 }
 0x453   :  { %v809_v25 = vadd.f32 1e-05, %v806_v20 }
 0x454   :  { %v628_v27 = vpop.permute.xlu0 %627 }
 0x455   :  { %9631 = vrsqrt.f32 %v809_v25  ;;  %v638_v30 = vsel %vm551_vm5, %v637_v26, %v628_v27 }
 0x456   :  { %v639_v31 = vsel %vm553_vm6, %v638_v30, %v631_v28  ;;  %9633 = vrsqrt.f32 %v811_v24 }
 0x457   :  { %8695 = vmatmul.mubr.msk.f32.gmra.mxu1 %vm653_vm7, %v639_v31 }
 0x458   :  { %8705 = vmatprep.mubr.msk.f32.mxu1 %vm10302_vm10, %v10301_v36 }
 0x45a   :  { %v9630_v39 = vpop.eup %9629 }
 0x45b   :  { %v816_v45 = vmul.f32 %v9630_v39, %v10638_v47 }
 0x45d   :  { %v823_v53 = vmul.f32 %v10696_v42, %v816_v45 }
 0x462   :  { %v9632_v41 = vpop.eup %9631 }
 0x463   :  { %v815_v43 = vmul.f32 %v9632_v41, %v10643_v44  ;;  %v9634_v49 = vpop.eup %9633  ;;  %v830_v44 = vadd.f32 %v10702_v51, %v823_v53 }
 0x464   :  { %v817_v54 = vmul.f32 %v9634_v49, %v10646_v38 }
 0x465   :  { %v822_v50 = vmul.f32 %v10696_v42, %v815_v43 }
 0x466   :  { %v824_v47 = vmul.f32 %v10696_v42, %v817_v54 }
 0x467   :  { %v829_v52 = vadd.f32 %v10702_v51, %v822_v50 }
 0x468   :  { %v831_v55 = vadd.f32 %v10702_v51, %v824_v47 }
 0x469   :  { %8706 = vmatmul.mubr.msk.f32.vlgmr.msra.gmra.mxu1 %vm547_vm3, %v829_v52 }
 0x46a   :  { %8708 = vmatprep.mubr.msk.f32.mxu1 %vm10302_vm10, %v10301_v36 }
 0x46d   :  { %8709 = vmatmul.mubr.msk.f32.gmra.mxu1 %vm547_vm3, %v830_v44 }
 0x46e   :  { %8711 = vmatprep.mubr.msk.f32.mxu1 %vm10302_vm10, %v10301_v36 }
 0x471   :  { %8712 = vmatmul.mubr.msk.f32.gmra.mxu1 %vm547_vm3, %v831_v55 }
 0x472   :  { %8720 = vmatprep.mubr.msk.f32.mxu1 %vm10302_vm10, %v10301_v36 }
 0x517   :  { %v10719_v38 = vpop.f32.mrf.mxu1 }
 0x519   :  { %v10721_v56 = vpop.f32.mrf.mxu1 }
 0x529   :  { %v916_v58 = vpop.f32.mrf.mxu1 }
 0x52a   :  { %v10740_v3 = vadd.f32 %v916_v58, %v10727_v60 }
 0x52b   :  { %v8707_v59 = vpop.f32.mrf.mxu1 }
 0x52d   :  { %v921_v61 = vpop.f32.mrf.mxu1 }
 0x52e   :  { %v10730_v62 = vadd.f32 %v921_v61, %v10727_v60 }
 0x52f   :  { %v8710_v63 = vpop.f32.mrf.mxu1 }
 0x530   :  { %935 = vrot.lane.b32.xlu1 %v10730_v62, %s10303_s11 }
 0x531   :  { %v926_v0 = vpop.f32.mrf.mxu1 }
 0x532   :  { %v10735_v1 = vadd.f32 %v926_v0, %v10727_v60 }
 0x533   :  { %v8713_v2 = vpop.f32.mrf.mxu1 }
 0x534   :  { %937 = vrot.lane.b32.xlu0 %v10735_v1, %s10303_s11 }
 0x538   :  { %933 = vrot.lane.b32.xlu0 %v10740_v3, %s10303_s11 }
 0x5a2   :  { %v936_v5 = vpop.permute.xlu1 %935 }
 0x5a6   :  { %v938_v4 = vpop.permute.xlu0 %937 }
 0x5a7   :  { %8715 = vmatpush3.xpose.msk.msra.mxu1 %vm541_vm0, %v938_v4 }
 0x5a8   :  { %8716 = vmatprep.subr.mxu1 %v10301_v36 }
 0x5aa   :  { %v934_v6 = vpop.permute.xlu0 %933 }
 0x5ab   :  { %8717 = vmatpush3.xpose.msk.msra.mxu1 %vm541_vm0, %v936_v5 }
 0x5ac   :  { %8718 = vmatprep.subr.mxu1 %v10301_v36 }
 0x5af   :  { %8719 = vmatpush3.xpose.msk.msra.mxu1 %vm541_vm0, %v934_v6 }
 0x5b0   :  { %8729 = vmatprep.subr.mxu1 %v10301_v36 }
 0x5b2   :  { %8721 = vmatmul.mubr.msk.f32.vlgmr.msra.gmra.mxu1 %vm541_vm0, %v10740_v3 }
 0x5b3   :  { %8723 = vmatprep.mubr.msk.f32.mxu1 %vm10302_vm10, %v10301_v36 }
 0x5b6   :  { %8724 = vmatmul.mubr.msk.f32.gmra.mxu1 %vm541_vm0, %v10730_v62 }
 0x5b7   :  { %8726 = vmatprep.mubr.msk.f32.mxu1 %vm10302_vm10, %v10301_v36 }
 0x5ba   :  { %8727 = vmatmul.mubr.msk.f32.gmra.mxu1 %vm541_vm0, %v10735_v1 }
 0x5bb   :  { %8735 = vmatprep.mubr.msk.f32.mxu1 %vm10302_vm10, %v10301_v36 }
 0x672   :  { %v1017_v7 = vpop.f32.mrf.mxu1 }
 0x673   :  { %v1031_v8 = vmul.f32 0.35355338, %v1017_v7 }
 0x674   :  { %v8722_v9 = vpop.f32.mrf.mxu1 }
 0x675   :  { %v1035_v10 = vsel %vm1034_vm11, %v1031_v8, -inf }
 0x676   :  { %1036 = vmax.xlane.f32.xlu1 %v1035_v10  ;;  %v1022_v11 = vpop.f32.mrf.mxu1 }
 0x677   :  { %v1032_v46 = vmul.f32 0.35355338, %v1022_v11 }
 0x678   :  { %v8725_v48 = vpop.f32.mrf.mxu1 }
 0x679   :  { %v1038_v12 = vsel %vm1034_vm11, %v1032_v46, -inf }
 0x67a   :  { %1039 = vmax.xlane.f32.xlu0 %v1038_v12  ;;  %v1027_v13 = vpop.f32.mrf.mxu1 }
 0x67b   :  { %v1033_v14 = vmul.f32 0.35355338, %v1027_v13 }
 0x67c   :  { %v8728_v15 = vpop.f32.mrf.mxu1 }
 0x67d   :  { %v1042_v16 = vsel %vm1041_vm12, %v1033_v14, -inf }
 0x67e   :  { %1043 = vmax.xlane.f32.xlu0 %v1042_v16 }
 0x687   :  { %1071 = vrot.lane.b32.xlu1 %v10730_v62, %s10286_s22 }
 0x68b   :  { %1069 = vrot.lane.b32.xlu1 %v10740_v3, %s10286_s22 }
 0x694   :  { %1073 = vrot.lane.b32.xlu0 %v10735_v1, %s10286_s22 }
 0x6ff   :  { %v1037_v17 = vpop.xlane.xlu1 %1036 }
 0x700   :  { %v1045_v18 = vsub.f32 %v1031_v8, %v1037_v17 }
 0x702   :  { %v1048_v19 = vmul.f32 1.442695, %v1045_v18 }
 0x703   :  { %v1040_v20 = vpop.xlane.xlu0 %1039  ;;  %v1072_v25 = vpop.permute.xlu1 %1071 }
 0x704   :  { %9635 = vpow2.f32 %v1048_v19  ;;  %v1046_v22 = vsub.f32 %v1032_v46, %v1040_v20 }
 0x706   :  { %v1050_v23 = vmul.f32 1.442695, %v1046_v22 }
 0x707   :  { %v1044_v24 = vpop.xlane.xlu0 %1043  ;;  %v1070_v27 = vpop.permute.xlu1 %1069 }
 0x708   :  { %9637 = vpow2.f32 %v1050_v23  ;;  %v1047_v39 = vsub.f32 %v1033_v14, %v1044_v24 }
 0x70a   :  { %v1052_v40 = vmul.f32 1.442695, %v1047_v39 }
 0x70b   :  { %v1074_v26 = vpop.permute.xlu0 %1073 }
 0x70c   :  { %8730 = vmatpush3.msk.msra.mxu1 %vm762_vm8, %v1074_v26  ;;  %9639 = vpow2.f32 %v1052_v40 }
 0x70d   :  { %8731 = vmatprep.subr.mxu1 %v10301_v36 }
 0x70e   :  { %8732 = vmatpush3.msra.mxu1 %v1072_v25 }
 0x70f   :  { %8733 = vmatprep.subr.mxu1 %v10301_v36 }
 0x710   :  { %8734 = vmatpush3.msra.mxu1 %v1070_v27 }
 0x711   :  { %v9636_v28 = vpop.eup %9635  ;;  %8744 = vmatprep.subr.mxu1 %v10301_v36 }
 0x712   :  { %v1054_v30 = vsel %vm1034_vm11, %v9636_v28, 0.0 }
 0x713   :  { %1055 = vadd.xlane.f32.xlu1 %v1054_v30 }
 0x715   :  { %v9638_v31 = vpop.eup %9637 }
 0x716   :  { %v1057_v35 = vsel %vm1034_vm11, %v9638_v31, 0.0 }
 0x717   :  { %1058 = vadd.xlane.f32.xlu0 %v1057_v35 }
 0x719   :  { %v9640_v41 = vpop.eup %9639 }
 0x71a   :  { %v1060_v43 = vsel %vm1041_vm12, %v9640_v41, 0.0 }
 0x724   :  { %1176 = vrot.lane.b32.xlu1 %v10730_v62, %s10304_s25 }
 0x728   :  { %1168 = vrot.lane.b32.xlu1 %v10740_v3, %s10293_s16 }
 0x72d   :  { %1178 = vrot.lane.b32.xlu0 %v10735_v1, %s10304_s25 }
 0x731   :  { %1174 = vrot.lane.b32.xlu0 %v10740_v3, %s10304_s25 }
 0x735   :  { %1417 = vrot.lane.b32.xlu0 %v10735_v1, %s10305_s3 }
 0x739   :  { %1415 = vrot.lane.b32.xlu0 %v10730_v62, %s10305_s3 }
 0x73d   :  { %1413 = vrot.lane.b32.xlu0 %v10740_v3, %s10305_s3 }
 0x741   :  { %1656 = vrot.lane.b32.xlu0 %v10735_v1, %s10306_s4 }
 0x745   :  { %1654 = vrot.lane.b32.xlu0 %v10730_v62, %s10306_s4 }
 0x749   :  { %1652 = vrot.lane.b32.xlu0 %v10740_v3, %s10306_s4 }
 0x74c   :  { %1061 = vadd.xlane.f32.xlu1 %v1060_v43 }
 0x74d   :  { %1648 = vrot.lane.b32.xlu0 %v10730_v62, %s10300_s5 }
 0x751   :  { %1312 = vrot.lane.b32.xlu0 %v10735_v1, %s10297_s2 }
 0x75d   :  { %1170 = vrot.lane.b32.xlu1 %v10730_v62, %s10293_s16 }
 0x761   :  { %1172 = vrot.lane.b32.xlu1 %v10735_v1, %s10293_s16 }
 0x765   :  { %1407 = vrot.lane.b32.xlu1 %v10740_v3, %s10299_s29 }
 0x769   :  { %1409 = vrot.lane.b32.xlu1 %v10730_v62, %s10299_s29 }
 0x76d   :  { %1411 = vrot.lane.b32.xlu1 %v10735_v1, %s10299_s29 }
 0x771   :  { %1646 = vrot.lane.b32.xlu1 %v10740_v3, %s10300_s5 }
 0x775   :  { %1650 = vrot.lane.b32.xlu1 %v10735_v1, %s10300_s5 }
 0x79c   :  { %v1056_v45 = vpop.xlane.xlu1 %1055 }
 0x79d   :  { %9641 = vrcp.f32 %v1056_v45 }
 0x7a0   :  { %v1059_v49 = vpop.xlane.xlu0 %1058  ;;  %v1177_v59 = vpop.permute.xlu1 %1176 }
 0x7a1   :  { %9643 = vrcp.f32 %v1059_v49 }
 0x7a4   :  { %v1179_v50 = vpop.permute.xlu0 %1178  ;;  %v1169_v6 = vpop.permute.xlu1 %1168 }
 0x7a8   :  { %v1175_v52 = vpop.permute.xlu0 %1174 }
 0x7aa   :  { %v9642_v53 = vpop.eup %9641 }
 0x7ab   :  { %v1064_v54 = vmul.f32 %v9642_v53, %v9636_v28 }
 0x7ac   :  { %v1418_v44 = vpop.permute.xlu0 %1417 }
 0x7ad   :  { %8736 = vmatmul.mubr.msk.f32.vlgmr.msra.gmra.mxu1 %vm1034_vm11, %v1064_v54 }
 0x7ae   :  { %v9644_v47 = vpop.eup %9643  ;;  %8745 = vmatpush3.xpose.msk.msra.mxu1 %vm541_vm0, %v1179_v50  ;;  %8738 = vmatprep.mubr.msk.f32.mxu1 %vm10302_vm10, %v10301_v36 }
 0x7af   :  { %8746 = vmatprep.subr.mxu1 %v10301_v36  ;;  %v1066_v55 = vmul.f32 %v9644_v47, %v9638_v31 }
 0x7b0   :  { %v1416_v58 = vpop.permute.xlu0 %1415 }
 0x7b1   :  { %8739 = vmatmul.mubr.msk.f32.gmra.mxu1 %vm1034_vm11, %v1066_v55 }
 0x7b2   :  { %8747 = vmatpush3.xpose.msk.msra.mxu1 %vm541_vm0, %v1177_v59  ;;  %8741 = vmatprep.mubr.msk.f32.mxu1 %vm10302_vm10, %v10301_v36 }
 0x7b3   :  { %8748 = vmatprep.subr.mxu1 %v10301_v36 }
 0x7b4   :  { %v1414_v61 = vpop.permute.xlu0 %1413 }
 0x7b6   :  { %8749 = vmatpush3.xpose.msk.msra.mxu1 %vm541_vm0, %v1175_v52 }
 0x7b7   :  { %8774 = vmatprep.subr.mxu1 %v10301_v36 }
 0x7b8   :  { %v1657_v63 = vpop.permute.xlu0 %1656 }
 0x7bc   :  { %v1655_v0 = vpop.permute.xlu0 %1654 }
 0x7c0   :  { %v1653_v2 = vpop.permute.xlu0 %1652 }
 0x7c4   :  { %v1649_v4 = vpop.permute.xlu0 %1648 }
 0x7c8   :  { %v1313_v5 = vpop.permute.xlu0 %1312 }
 0x7c9   :  { %8760 = vmatpush3.msk.msra.mxu0 %vm762_vm8, %v1313_v5 }
 0x7ca   :  { %8761 = vmatprep.subr.mxu0 %v10301_v36 }
 0x7d5   :  { %v1062_v7 = vpop.xlane.xlu1 %1061 }
 0x7d6   :  { %9645 = vrcp.f32 %v1062_v7 }
 0x7d9   :  { %v1171_v9 = vpop.permute.xlu1 %1170 }
 0x7dd   :  { %v1173_v11 = vpop.permute.xlu1 %1172 }
 0x7e1   :  { %v1408_v46 = vpop.permute.xlu1 %1407 }
 0x7e3   :  { %v9646_v8 = vpop.eup %9645 }
 0x7e4   :  { %v1068_v10 = vmul.f32 %v9646_v8, %v9640_v41 }
 0x7e5   :  { %v1410_v48 = vpop.permute.xlu1 %1409 }
 0x7e6   :  { %8742 = vmatmul.mubr.msk.f32.gmra.mxu1 %vm1034_vm11, %v1068_v10 }
 0x7e7   :  { %8750 = vmatprep.mubr.msk.f32.mxu1 %vm10302_vm10, %v10301_v36 }
 0x7e9   :  { %v1412_v12 = vpop.permute.xlu1 %1411 }
 0x7ea   :  { %8751 = vmatmul.mubr.msk.f32.vlgmr.msra.gmra.mxu1 %vm541_vm0, %v1169_v6 }
 0x7eb   :  { %8775 = vmatpush3.xpose.msk.msra.mxu1 %vm541_vm0, %v1418_v44  ;;  %8753 = vmatprep.mubr.msk.f32.mxu1 %vm10302_vm10, %v10301_v36 }
 0x7ec   :  { %8776 = vmatprep.subr.mxu1 %v10301_v36 }
 0x7ed   :  { %v1647_v13 = vpop.permute.xlu1 %1646 }
 0x7ee   :  { %8754 = vmatmul.mubr.msk.f32.gmra.mxu1 %vm541_vm0, %v1171_v9 }
 0x7ef   :  { %8777 = vmatpush3.xpose.msk.msra.mxu1 %vm541_vm0, %v1416_v58  ;;  %8756 = vmatprep.mubr.msk.f32.mxu1 %vm10302_vm10, %v10301_v36 }
 0x7f0   :  { %8778 = vmatprep.subr.mxu1 %v10301_v36 }
 0x7f1   :  { %v1651_v14 = vpop.permute.xlu1 %1650 }
 0x7f2   :  { %8757 = vmatmul.mubr.msk.f32.gmra.mxu1 %vm541_vm0, %v1173_v11 }
 0x7f3   :  { %8779 = vmatpush3.xpose.msk.msra.mxu1 %vm541_vm0, %v1414_v61  ;;  %8780 = vmatprep.mubr.msk.f32.mxu1 %vm10302_vm10, %v10301_v36 }
 0x7f4   :  { %8804 = vmatprep.subr.mxu1 %v10301_v36 }
 0x7f6   :  { %8781 = vmatmul.mubr.msk.f32.vlgmr.msra.gmra.mxu1 %vm541_vm0, %v1408_v46 }
 0x7f7   :  { %8805 = vmatpush3.xpose.msk.msra.mxu1 %vm541_vm0, %v1657_v63  ;;  %8783 = vmatprep.mubr.msk.f32.mxu1 %vm10302_vm10, %v10301_v36 }
 0x7f8   :  { %8806 = vmatprep.subr.mxu1 %v10301_v36 }
 0x7fa   :  { %8784 = vmatmul.mubr.msk.f32.gmra.mxu1 %vm541_vm0, %v1410_v48 }
 0x7fb   :  { %8807 = vmatpush3.xpose.msk.msra.mxu1 %vm541_vm0, %v1655_v0  ;;  %8786 = vmatprep.mubr.msk.f32.mxu1 %vm10302_vm10, %v10301_v36 }
 0x7fc   :  { %8808 = vmatprep.subr.mxu1 %v10301_v36 }
 0x7fe   :  { %8787 = vmatmul.mubr.msk.f32.gmra.mxu1 %vm541_vm0, %v1412_v12 }
 0x7ff   :  { %8809 = vmatpush3.xpose.msk.msra.mxu1 %vm541_vm0, %v1653_v2  ;;  %8810 = vmatprep.mubr.msk.f32.mxu1 %vm10302_vm10, %v10301_v36 }
 0x800   :  { %8834 = vmatprep.subr.mxu1 %v10301_v36 }
 0x802   :  { %8811 = vmatmul.mubr.msk.f32.vlgmr.msra.gmra.mxu1 %vm541_vm0, %v1647_v13 }
 0x803   :  { %8813 = vmatprep.mubr.msk.f32.mxu1 %vm10302_vm10, %v10301_v36 }
 0x806   :  { %8814 = vmatmul.mubr.msk.f32.gmra.mxu1 %vm541_vm0, %v1649_v4 }
 0x807   :  { %8816 = vmatprep.mubr.msk.f32.mxu1 %vm10302_vm10, %v10301_v36 }
 0x80a   :  { %8817 = vmatmul.mubr.msk.f32.gmra.mxu1 %vm541_vm0, %v1651_v14 }
 0x80b   :  { %8842 = vmatprep.mubr.msk.f32.mxu1 %vm10302_vm10, %v10301_v36 }
 0x86d   :  { %v10872_v15 = vpop.f32.mrf.mxu1 }
 0x86f   :  { %v8737_v16 = vpop.f32.mrf.mxu1 }
 0x871   :  { %v10874_v17 = vpop.f32.mrf.mxu1 }
 0x873   :  { %v8740_v18 = vpop.f32.mrf.mxu1 }
 0x8a6   :  { %v10876_v19 = vpop.f32.mrf.mxu1 }
 0x8a8   :  { %v8743_v20 = vpop.f32.mrf.mxu1 }
 0x8aa   :  { %v1258_v22 = vpop.f32.mrf.mxu1 }
 0x8ab   :  { %v1272_v23 = vmul.f32 0.35355338, %v1258_v22 }
 0x8ac   :  { %v8752_v24 = vpop.f32.mrf.mxu1 }
 0x8ad   :  { %v1275_v25 = vsel %vm1034_vm11, %v1272_v23, -inf }
 0x8ae   :  { %1276 = vmax.xlane.f32.xlu0 %v1275_v25  ;;  %v1263_v26 = vpop.f32.mrf.mxu1 }
 0x8af   :  { %v1273_v27 = vmul.f32 0.35355338, %v1263_v26 }
 0x8b0   :  { %v8755_v28 = vpop.f32.mrf.mxu1 }
 0x8b1   :  { %v1278_v30 = vsel %vm1034_vm11, %v1273_v27, -inf }
 0x8b2   :  { %1279 = vmax.xlane.f32.xlu1 %v1278_v30  ;;  %v1268_v31 = vpop.f32.mrf.mxu1 }
 0x8b3   :  { %v1274_v35 = vmul.f32 0.35355338, %v1268_v31 }
 0x8b4   :  { %v8758_v39 = vpop.f32.mrf.mxu1 }
 0x8b5   :  { %v1281_v40 = vsel %vm1041_vm12, %v1274_v35, -inf }
 0x8b6   :  { %1282 = vmax.xlane.f32.xlu0 %v1281_v40  ;;  %v1497_v41 = vpop.f32.mrf.mxu1 }
 0x8b7   :  { %v1511_v43 = vmul.f32 0.35355338, %v1497_v41 }
 0x8b8   :  { %v8782_v45 = vpop.f32.mrf.mxu1 }
 0x8b9   :  { %v1514_v49 = vsel %vm1034_vm11, %v1511_v43, -inf }
 0x8ba   :  { %1515 = vmax.xlane.f32.xlu0 %v1514_v49  ;;  %v1502_v50 = vpop.f32.mrf.mxu1 }
 0x8bb   :  { %v10882_v52 = vmul.f32 0.35355338, %v1502_v50 }
 0x8bc   :  { %v8785_v53 = vpop.f32.mrf.mxu1 }
 0x8bd   :  { %v1517_v54 = vsel %vm1034_vm11, %v10882_v52, -inf }
 0x8be   :  { %1518 = vmax.xlane.f32.xlu1 %v1517_v54  ;;  %v1507_v44 = vpop.f32.mrf.mxu1 }
 0x8bf   :  { %v1513_v47 = vmul.f32 0.35355338, %v1507_v44 }
 0x8c0   :  { %v8788_v55 = vpop.f32.mrf.mxu1 }
 0x8c1   :  { %v1520_v58 = vsel %vm1041_vm12, %v1513_v47, -inf }
 0x8c2   :  { %1521 = vmax.xlane.f32.xlu0 %v1520_v58  ;;  %v1736_v59 = vpop.f32.mrf.mxu1 }
 0x8c3   :  { %v1750_v61 = vmul.f32 0.35355338, %v1736_v59 }
 0x8c4   :  { %v8812_v63 = vpop.f32.mrf.mxu1 }
 0x8c5   :  { %v1753_v0 = vsel %vm1034_vm11, %v1750_v61, -inf }
 0x8c6   :  { %1754 = vmax.xlane.f32.xlu1 %v1753_v0  ;;  %v1741_v2 = vpop.f32.mrf.mxu1 }
 0x8c7   :  { %v10892_v7 = vmul.f32 0.35355338, %v1741_v2 }
 0x8c8   :  { %v8815_v4 = vpop.f32.mrf.mxu1 }
 0x8c9   :  { %v1756_v9 = vsel %vm1034_vm11, %v10892_v7, -inf }
 0x8ca   :  { %v1746_v5 = vpop.f32.mrf.mxu1 }
 0x8cb   :  { %v10894_v8 = vmul.f32 0.35355338, %v1746_v5 }
 0x8cc   :  { %v8818_v6 = vpop.f32.mrf.mxu1 }
 0x8cd   :  { %v1759_v10 = vsel %vm1041_vm12, %v10894_v8, -inf }
 0x8d7   :  { %1310 = vrot.lane.b32.xlu1 %v10730_v62, %s10297_s2 }
 0x8d8   :  { %1308 = vrot.lane.b32.xlu0 %v10740_v3, %s10297_s2 }
 0x8f7   :  { %1757 = vmax.xlane.f32.xlu0 %v1756_v9 }
 0x8fb   :  { %1760 = vmax.xlane.f32.xlu1 %v1759_v10 }
 0x90c   :  { %1549 = vrot.lane.b32.xlu1 %v10730_v62, %s10298_s8 }
 0x90d   :  { %1551 = vrot.lane.b32.xlu0 %v10735_v1, %s10298_s8 }
 0x910   :  { %1547 = vrot.lane.b32.xlu1 %v10740_v3, %s10298_s8 }
 0x937   :  { %v1277_v11 = vpop.xlane.xlu0 %1276 }
 0x938   :  { %v1284_v46 = vsub.f32 %v1272_v23, %v1277_v11 }
 0x93a   :  { %v1287_v48 = vmul.f32 1.442695, %v1284_v46 }
 0x93b   :  { %v1280_v12 = vpop.xlane.xlu1 %1279 }
 0x93c   :  { %9647 = vpow2.f32 %v1287_v48  ;;  %v1285_v13 = vsub.f32 %v1273_v27, %v1280_v12 }
 0x93e   :  { %v1289_v14 = vmul.f32 1.442695, %v1285_v13 }
 0x93f   :  { %v1283_v16 = vpop.xlane.xlu0 %1282 }
 0x940   :  { %9649 = vpow2.f32 %v1289_v14  ;;  %v1286_v18 = vsub.f32 %v1274_v35, %v1283_v16 }
 0x942   :  { %v1291_v20 = vmul.f32 1.442695, %v1286_v18 }
 0x943   :  { %v1516_v22 = vpop.xlane.xlu0 %1515 }
 0x944   :  { %9651 = vpow2.f32 %v1291_v20  ;;  %v1523_v24 = vsub.f32 %v1511_v43, %v1516_v22 }
 0x946   :  { %v1526_v25 = vmul.f32 1.442695, %v1523_v24 }
 0x947   :  { %v1519_v23 = vpop.xlane.xlu1 %1518 }
 0x948   :  { %9653 = vpow2.f32 %v1526_v25 }
 0x949   :  { %v10906_v26 = vpop.eup %9647 }
 0x94a   :  { %v1293_v28 = vsel %vm1034_vm11, %v10906_v26, 0.0 }
 0x94b   :  { %v1522_v30 = vpop.xlane.xlu0 %1521  ;;  %1294 = vadd.xlane.f32.xlu0 %v1293_v28 }
 0x94c   :  { %v1525_v31 = vsub.f32 %v1513_v47, %v1522_v30 }
 0x94d   :  { %v10910_v27 = vpop.eup %9649 }
 0x94e   :  { %v1530_v39 = vmul.f32 1.442695, %v1525_v31  ;;  %v1296_v35 = vsel %vm1034_vm11, %v10910_v27, 0.0 }
 0x94f   :  { %v1755_v40 = vpop.xlane.xlu1 %1754  ;;  %1297 = vadd.xlane.f32.xlu1 %v1296_v35  ;;  %v1309_v54 = vpop.permute.xlu0 %1308 }
 0x950   :  { %9655 = vpow2.f32 %v1530_v39  ;;  %v1762_v41 = vsub.f32 %v1750_v61, %v1755_v40  ;;  %v1524_v61 = vsub.f32 %v10882_v52, %v1519_v23 }
 0x951   :  { %v10914_v43 = vpop.eup %9651 }
 0x952   :  { %v1765_v45 = vmul.f32 1.442695, %v1762_v41  ;;  %v1299_v49 = vsel %vm1041_vm12, %v10914_v43, 0.0  ;;  %v1528_v63 = vmul.f32 1.442695, %v1524_v61  ;;  %v1933_v61 = vld [vmem:[#allocation19 + $0x18] sm:$0xff] }
 0x953   :  { %v1311_v50 = vpop.permute.xlu1 %1310  ;;  %1300 = vadd.xlane.f32.xlu0 %v1299_v49  ;;  %8835 = vmatpush3.msra.mxu1 %v1933_v61 }
 0x954   :  { %9657 = vpow2.f32 %v1765_v45  ;;  %8762 = vmatpush3.msra.mxu0 %v1311_v50  ;;  %8836 = vmatprep.subr.mxu1 %v10301_v36 }
 0x955   :  { %v10918_v53 = vpop.eup %9653  ;;  %8763 = vmatprep.subr.mxu0 %v10301_v36  ;;  %9659 = vpow2.f32 %v1528_v63 }
 0x956   :  { %8764 = vmatpush3.msra.mxu0 %v1309_v54  ;;  %v1532_v44 = vsel %vm1034_vm11, %v10918_v53, 0.0 }
 0x957   :  { %1533 = vadd.xlane.f32.xlu1 %v1532_v44  ;;  %8789 = vmatprep.subr.mxu0 %v10301_v36 }
 0x95d   :  { %v10924_v47 = vpop.eup %9655 }
 0x95e   :  { %v1538_v55 = vsel %vm1041_vm12, %v10924_v47, 0.0 }
 0x95f   :  { %1539 = vadd.xlane.f32.xlu1 %v1538_v55 }
 0x961   :  { %v10928_v58 = vpop.eup %9657 }
 0x962   :  { %v1771_v59 = vsel %vm1034_vm11, %v10928_v58, 0.0  ;;  %v9660_v5 = vpop.eup %9659 }
 0x963   :  { %1772 = vadd.xlane.f32.xlu1 %v1771_v59  ;;  %v1535_v11 = vsel %vm1034_vm11, %v9660_v5, 0.0 }
 0x969   :  { %1790 = vrot.lane.b32.xlu0 %v10735_v1, %s10296_s1 }
 0x980   :  { %v1758_v0 = vpop.xlane.xlu0 %1757 }
 0x981   :  { %v1763_v2 = vsub.f32 %v10892_v7, %v1758_v0 }
 0x983   :  { %v1767_v4 = vmul.f32 1.442695, %v1763_v2 }
 0x984   :  { %v1761_v6 = vpop.xlane.xlu1 %1760  ;;  %v1552_v48 = vpop.permute.xlu0 %1551 }
 0x985   :  { %9661 = vpow2.f32 %v1767_v4  ;;  %v1764_v9 = vsub.f32 %v10894_v8, %v1761_v6 }
 0x987   :  { %v1769_v10 = vmul.f32 1.442695, %v1764_v9 }
 0x988   :  { %1536 = vadd.xlane.f32.xlu0 %v1535_v11  ;;  %v1550_v8 = vpop.permute.xlu1 %1549  ;;  %v1931_v11 = vld [vmem:[#allocation19 + $0x8] sm:$0xff] }
 0x989   :  { %9663 = vpow2.f32 %v1769_v10  ;;  %v1932_v10 = vld [vmem:[#allocation19 + $0x10] sm:$0xff] }
 0x98a   :  { %8837 = vmatpush3.msra.mxu1 %v1932_v10 }
 0x98b   :  { %8838 = vmatprep.subr.mxu1 %v10301_v36 }
 0x98c   :  { %v1548_v12 = vpop.permute.xlu1 %1547  ;;  %8839 = vmatpush3.msra.mxu1 %v1931_v11 }
 0x98d   :  { %8840 = vmatprep.subr.mxu1 %v10301_v36 }
 0x992   :  { %v10938_v46 = vpop.eup %9661 }
 0x993   :  { %v1774_v1 = vsel %vm1034_vm11, %v10938_v46, 0.0 }
 0x994   :  { %1775 = vadd.xlane.f32.xlu1 %v1774_v1 }
 0x996   :  { %v10942_v52 = vpop.eup %9663 }
 0x997   :  { %v1777_v7 = vsel %vm1041_vm12, %v10942_v52, 0.0 }
 0x998   :  { %1778 = vadd.xlane.f32.xlu0 %v1777_v7 }
 0x9a5   :  { %1788 = vrot.lane.b32.xlu1 %v10730_v62, %s10296_s1 }
 0x9ae   :  { %1786 = vrot.lane.b32.xlu0 %v10740_v3, %s10296_s1 }
 0x9d4   :  { %v1295_v13 = vpop.xlane.xlu0 %1294 }
 0x9d5   :  { %9665 = vrcp.f32 %v1295_v13 }
 0x9d8   :  { %v1298_v14 = vpop.xlane.xlu1 %1297 }
 0x9d9   :  { %9667 = vrcp.f32 %v1298_v14 }
 0x9dc   :  { %v1301_v16 = vpop.xlane.xlu0 %1300 }
 0x9dd   :  { %9669 = vrcp.f32 %v1301_v16 }
 0x9e0   :  { %v1534_v18 = vpop.xlane.xlu1 %1533  ;;  %v1791_v23 = vpop.permute.xlu0 %1790 }
 0x9e1   :  { %9671 = vrcp.f32 %v1534_v18 }
 0x9e2   :  { %v9666_v20 = vpop.eup %9665 }
 0x9e3   :  { %v1303_v22 = vmul.f32 %v9666_v20, %v10906_v26 }
 0x9e5   :  { %8766 = vmatmul.mubr.msk.f32.vlgmr.msra.gmra.mxu0 %vm1034_vm11, %v1303_v22 }
 0x9e6   :  { %v9668_v62 = vpop.eup %9667  ;;  %8790 = vmatpush3.msk.msra.mxu0 %vm762_vm8, %v1552_v48  ;;  %8768 = vmatprep.mubr.msk.f32.mxu0 %vm10302_vm10, %v10301_v36 }
 0x9e7   :  { %8791 = vmatprep.subr.mxu0 %v10301_v36  ;;  %v1305_v3 = vmul.f32 %v9668_v62, %v10910_v27 }
 0x9e8   :  { %8792 = vmatpush3.msra.mxu0 %v1550_v8  ;;  %v1540_v30 = vpop.xlane.xlu1 %1539 }
 0x9e9   :  { %8793 = vmatprep.subr.mxu0 %v10301_v36  ;;  %8769 = vmatmul.mubr.msk.f32.gmra.mxu0 %vm1034_vm11, %v1305_v3 }
 0x9ea   :  { %v9670_v24 = vpop.eup %9669  ;;  %8794 = vmatpush3.msra.mxu0 %v1548_v12  ;;  %8771 = vmatprep.mubr.msk.f32.mxu0 %vm10302_vm10, %v10301_v36 }
 0x9eb   :  { %v1307_v25 = vmul.f32 %v9670_v24, %v10914_v43  ;;  %8819 = vmatprep.subr.mxu0 %v10301_v36 }
 0x9ec   :  { %v1773_v27 = vpop.xlane.xlu1 %1772 }
 0x9ed   :  { %8772 = vmatmul.mubr.msk.f32.gmra.mxu0 %vm1034_vm11, %v1307_v25 }
 0x9ee   :  { %v9672_v26 = vpop.eup %9671  ;;  %8795 = vmatprep.mubr.msk.f32.mxu0 %vm10302_vm10, %v10301_v36 }
 0x9ef   :  { %v1542_v28 = vmul.f32 %v9672_v26, %v10918_v53 }
 0x9f1   :  { %8796 = vmatmul.mubr.msk.f32.vlgmr.msra.gmra.mxu0 %vm1034_vm11, %v1542_v28 }
 0x9f2   :  { %8820 = vmatpush3.msk.msra.mxu0 %vm762_vm8, %v1791_v23  ;;  %8798 = vmatprep.mubr.msk.f32.mxu0 %vm10302_vm10, %v10301_v36 }
 0x9f3   :  { %8821 = vmatprep.subr.mxu0 %v10301_v36 }
 0xa11   :  { %v1537_v31 = vpop.xlane.xlu0 %1536 }
 0xa12   :  { %9673 = vrcp.f32 %v1537_v31 }
 0xa13   :  { %9675 = vrcp.f32 %v1540_v30 }
 0xa14   :  { %9677 = vrcp.f32 %v1773_v27 }
 0xa1d   :  { %v1776_v39 = vpop.xlane.xlu1 %1775 }
 0xa1e   :  { %9679 = vrcp.f32 %v1776_v39 }
 0xa1f   :  { %v9674_v35 = vpop.eup %9673 }
 0xa20   :  { %v1544_v40 = vmul.f32 %v9674_v35, %v9660_v5  ;;  %v9676_v41 = vpop.eup %9675 }
 0xa21   :  { %v1779_v43 = vpop.xlane.xlu0 %1778  ;;  %v1789_v45 = vpop.permute.xlu1 %1788  ;;  %v1546_v49 = vmul.f32 %v9676_v41, %v10924_v47 }
 0xa22   :  { %9681 = vrcp.f32 %v1779_v43  ;;  %8799 = vmatmul.mubr.msk.f32.gmra.mxu0 %vm1034_vm11, %v1544_v40  ;;  %v9678_v50 = vpop.eup %9677  ;;  %v11029_v43 = vrot.slane %v10723_v57, %v10693_v21 }
 0xa23   :  { %8822 = vmatpush3.msra.mxu0 %v1789_v45  ;;  %8801 = vmatprep.mubr.msk.f32.mxu0 %vm10302_vm10, %v10301_v36  ;;  %v1781_v54 = vmul.f32 %v9678_v50, %v10928_v58 }
 0xa24   :  { %8823 = vmatprep.subr.mxu0 %v10301_v36 }
 0xa25   :  { %v1787_v53 = vpop.permute.xlu0 %1786 }
 0xa26   :  { %8802 = vmatmul.mubr.msk.f32.gmra.mxu0 %vm1034_vm11, %v1546_v49 }
 0xa27   :  { %8824 = vmatpush3.msra.mxu0 %v1787_v53  ;;  %8825 = vmatprep.mubr.msk.f32.mxu0 %vm10302_vm10, %v10301_v36 }
 0xa28   :  { %8851 = vmatprep.subr.mxu0 %v10301_v36 }
 0xa2a   :  { %8826 = vmatmul.mubr.msk.f32.vlgmr.msra.gmra.mxu0 %vm1034_vm11, %v1781_v54 }
 0xa2b   :  { %v9680_v44 = vpop.eup %9679  ;;  %8828 = vmatprep.mubr.msk.f32.mxu0 %vm10302_vm10, %v10301_v36 }
 0xa2c   :  { %v1783_v47 = vmul.f32 %v9680_v44, %v10938_v46  ;;  %v1930_v46 = vld [vmem:[#allocation19] sm:$0xff] }
 0xa2d   :  { %8841 = vmatpush3.msra.mxu1 %v1930_v46 }
 0xa2e   :  { %8829 = vmatmul.mubr.msk.f32.gmra.mxu0 %vm1034_vm11, %v1783_v47  ;;  %8868 = vmatprep.subr.mxu1 %v10301_v36 }
 0xa2f   :  { %v9682_v55 = vpop.eup %9681  ;;  %8831 = vmatprep.mubr.msk.f32.mxu0 %vm10302_vm10, %v10301_v36 }
 0xa30   :  { %v1785_v59 = vmul.f32 %v9682_v55, %v10942_v52 }
 0xa32   :  { %8832 = vmatmul.mubr.msk.f32.gmra.mxu0 %vm1034_vm11, %v1785_v59 }
 0xa33   :  { %8859 = vmatprep.mubr.msk.f32.mxu0 %vm10302_vm10, %v10301_v36 }
 0xaa5   :  { %v1393_v58 = vpop.f32.mrf.mxu0 }
 0xaa6   :  { %1888 = vrot.lane.b32.xlu1 %v1393_v58, %s10275_s23 }
 0xaa7   :  { %v8767_v63 = vpop.f32.mrf.mxu0 }
 0xaa9   :  { %v1398_v0 = vpop.f32.mrf.mxu0 }
 0xaaa   :  { %1890 = vrot.lane.b32.xlu0 %v1398_v0, %s10275_s23 }
 0xaab   :  { %v8770_v2 = vpop.f32.mrf.mxu0 }
 0xaad   :  { %v1403_v4 = vpop.f32.mrf.mxu0 }
 0xaaf   :  { %v8773_v5 = vpop.f32.mrf.mxu0 }
 0xab1   :  { %v1632_v6 = vpop.f32.mrf.mxu0 }
 0xab2   :  { %1900 = vrot.lane.b32.xlu0 %v1632_v6, %s10294_s20 }
 0xab3   :  { %v8797_v9 = vpop.f32.mrf.mxu0 }
 0xae2   :  { %v1637_v1 = vpop.f32.mrf.mxu0 }
 0xae3   :  { %1902 = vrot.lane.b32.xlu1 %v1637_v1, %s10294_s20 }
 0xae4   :  { %v8800_v52 = vpop.f32.mrf.mxu0 }
 0xae6   :  { %v1642_v7 = vpop.f32.mrf.mxu0 }
 0xae8   :  { %v8803_v8 = vpop.f32.mrf.mxu0 }
 0xaea   :  { %v1871_v48 = vpop.f32.mrf.mxu0 }
 0xaeb   :  { %1912 = vrot.lane.b32.xlu1 %v1871_v48, %s10295_s21  ;;  %v2087_v48 = vld [vmem:[#allocation21 + $0x18] sm:$0xff] }
 0xaec   :  { %v8827_v12 = vpop.f32.mrf.mxu0  ;;  %8852 = vmatpush3.msra.mxu0 %v2087_v48 }
 0xaed   :  { %8853 = vmatprep.subr.mxu0 %v10301_v36  ;;  %v2086_v12 = vld [vmem:[#allocation21 + $0x10] sm:$0xff] }
 0xaee   :  { %v1876_v13 = vpop.f32.mrf.mxu0  ;;  %8854 = vmatpush3.msra.mxu0 %v2086_v12 }
 0xaef   :  { %1892 = vrot.lane.b32.xlu1 %v1403_v4, %s10275_s23  ;;  %1914 = vrot.lane.b32.xlu0 %v1876_v13, %s10295_s21  ;;  %v2085_v13 = vld [vmem:[#allocation21 + $0x8] sm:$0xff] }
 0xaf0   :  { %v8830_v14 = vpop.f32.mrf.mxu0  ;;  %8855 = vmatprep.subr.mxu0 %v10301_v36 }
 0xaf1   :  { %v2084_v14 = vld [vmem:[#allocation21] sm:$0xff]  ;;  %8856 = vmatpush3.msra.mxu0 %v2085_v13 }
 0xaf2   :  { %v1881_v16 = vpop.f32.mrf.mxu0  ;;  %8857 = vmatprep.subr.mxu0 %v10301_v36 }
 0xaf3   :  { %1904 = vrot.lane.b32.xlu0 %v1642_v7, %s10294_s20  ;;  %1916 = vrot.lane.b32.xlu1 %v1881_v16, %s10295_s21  ;;  %v2191_v16 = vld [vmem:[#allocation24 + $0x38] sm:$0xff] }
 0xaf4   :  { %v8833_v18 = vpop.f32.mrf.mxu0  ;;  %8858 = vmatpush3.msra.mxu0 %v2084_v14 }
 0xaf5   :  { %8893 = vmatprep.subr.mxu0 %v10301_v36  ;;  %v2190_v18 = vld [vmem:[#allocation24 + $0x30] sm:$0xff] }
 0xb18   :  { %v1889_v20 = vpop.permute.xlu1 %1888 }
 0xb19   :  { %v1921_v24 = vsel %vm541_vm0, %v10872_v15, %v1889_v20  ;;  %v2189_v20 = vld [vmem:[#allocation24 + $0x28] sm:$0xff] }
 0xb1c   :  { %v1891_v22 = vpop.permute.xlu0 %1890 }
 0xb1d   :  { %v1922_v23 = vsel %vm541_vm0, %v10874_v17, %v1891_v22  ;;  %v2188_v22 = vld [vmem:[#allocation24 + $0x20] sm:$0xff] }
 0xb24   :  { %v1901_v3 = vpop.permute.xlu0 %1900 }
 0xb25   :  { %v1924_v25 = vsel %vm543_vm1, %v1921_v24, %v1901_v3 }
 0xb55   :  { %v1903_v62 = vpop.permute.xlu1 %1902 }
 0xb56   :  { %v1925_v30 = vsel %vm543_vm1, %v1922_v23, %v1903_v62  ;;  %v2187_v62 = vld [vmem:[#allocation24 + $0x18] sm:$0xff] }
 0xb5d   :  { %v1913_v26 = vpop.permute.xlu1 %1912 }
 0xb5e   :  { %v1927_v28 = vsel %vm545_vm2, %v1924_v25, %v1913_v26 }
 0xb5f   :  { %8843 = vmatmul.mubr.msk.f32.vlgmr.msra.gmra.mxu1 %vm547_vm3, %v1927_v28 }
 0xb60   :  { %8845 = vmatprep.mubr.msk.f32.mxu1 %vm10302_vm10, %v10301_v36  ;;  %8869 = vmatpush3.msra.mxu1 %v2191_v16 }
 0xb61   :  { %v1915_v31 = vpop.permute.xlu0 %1914  ;;  %v1893_v27 = vpop.permute.xlu1 %1892  ;;  %8870 = vmatprep.subr.mxu1 %v10301_v36 }
 0xb62   :  { %v1928_v39 = vsel %vm545_vm2, %v1925_v30, %v1915_v31  ;;  %v1923_v15 = vsel %vm541_vm0, %v10876_v19, %v1893_v27  ;;  %8871 = vmatpush3.msra.mxu1 %v2190_v18 }
 0xb63   :  { %8846 = vmatmul.mubr.msk.f32.gmra.mxu1 %vm547_vm3, %v1928_v39  ;;  %8872 = vmatprep.subr.mxu1 %v10301_v36  ;;  %v11065_v39 = vsub.s32 2, %v10687_v29 }
 0xb64   :  { %8848 = vmatprep.mubr.msk.f32.mxu1 %vm10302_vm10, %v10301_v36  ;;  %8873 = vmatpush3.msra.mxu1 %v2189_v20 }
 0xb65   :  { %v1905_v35 = vpop.permute.xlu0 %1904  ;;  %v1917_v40 = vpop.permute.xlu1 %1916  ;;  %8874 = vmatprep.subr.mxu1 %v10301_v36 }
 0xb66   :  { %v1926_v17 = vsel %vm543_vm1, %v1923_v15, %v1905_v35  ;;  %8875 = vmatpush3.msra.mxu1 %v2188_v22  ;;  %v11068_v15 = vsub.s32 3, %v10687_v29  ;;  %v9869_v35 = vld [vmem:[#allocation15] sm:$0xf] }
 0xb67   :  { %v1929_v41 = vsel %vm545_vm2, %v1926_v17, %v1917_v40  ;;  %8876 = vmatprep.subr.mxu1 %v10301_v36  ;;  %v11071_v40 = vrot.slane %v9869_v35, %v11065_v39 }
 0xb68   :  { %8849 = vmatmul.mubr.msk.f32.gmra.mxu1 %vm547_vm3, %v1929_v41 }
 0xb69   :  { %8884 = vmatprep.mubr.msk.f32.mxu1 %vm10302_vm10, %v10301_v36  ;;  %8877 = vmatpush3.msra.mxu1 %v2187_v62 }
 0xb6a   :  { %8878 = vmatprep.subr.mxu1 %v10301_v36 }
 0xc1f   :  { %v2013_v45 = vpop.f32.mrf.mxu1 }
 0xc20   :  { %v2014_v49 = vadd.f32 %v2013_v45, %v11029_v43  ;;  %v11074_v45 = vrot.slane %v9869_v35, %v11068_v15 }
 0xc21   :  { %v8844_v50 = vpop.f32.mrf.mxu1 }
 0xc22   :  { %v11033_v19 = vadd.f32 %v2014_v49, %v10605_v32 }
 0xc23   :  { %v2018_v53 = vpop.f32.mrf.mxu1 }
 0xc24   :  { %v2019_v54 = vadd.f32 %v2018_v53, %v11029_v43  ;;  %v2030_v44 = vsel %vm547_vm3, %v11033_v19, 0.0 }
 0xc25   :  { %2031 = vadd.xlane.f32.xlu0 %v2030_v44  ;;  %v8847_v47 = vpop.f32.mrf.mxu1 }
 0xc26   :  { %v11039_v55 = vadd.f32 %v2019_v54, %v10607_v33 }
 0xc28   :  { %v2023_v57 = vpop.f32.mrf.mxu1  ;;  %v2033_v59 = vsel %vm547_vm3, %v11039_v55, 0.0 }
 0xc29   :  { %v2024_v58 = vadd.f32 %v2023_v57, %v11029_v43  ;;  %2034 = vadd.xlane.f32.xlu1 %v2033_v59 }
 0xc2a   :  { %v8850_v32 = vpop.f32.mrf.mxu1 }
 0xc2b   :  { %v11045_v61 = vadd.f32 %v2024_v58, %v10609_v34  ;;  %v2186_v32 = vld [vmem:[#allocation24 + $0x10] sm:$0xff] }
 0xc2c   :  { %8879 = vmatpush3.msra.mxu1 %v2186_v32  ;;  %v2346_v32 = vld [vmem:[#allocation16 + $0x20] sm:$0xff] }
 0xc2d   :  { %v2036_v63 = vsel %vm783_vm9, %v11045_v61, 0.0  ;;  %8880 = vmatprep.subr.mxu1 %v10301_v36 }
 0xc2e   :  { %2037 = vadd.xlane.f32.xlu0 %v2036_v63  ;;  %v2185_v63 = vld [vmem:[#allocation24 + $0x8] sm:$0xff] }
 0xc2f   :  { %8881 = vmatpush3.msra.mxu1 %v2185_v63 }
 0xc30   :  { %8882 = vmatprep.subr.mxu1 %v10301_v36 }
 0xcae   :  { %v2032_v0 = vpop.xlane.xlu0 %2031 }
 0xcaf   :  { %v2039_v2 = vmul.f32 0.03125, %v2032_v0  ;;  %v2184_v0 = vld [vmem:[#allocation24] sm:$0xff] }
 0xcb0   :  { %8883 = vmatpush3.msra.mxu1 %v2184_v0 }
 0xcb1   :  { %v2042_v33 = vsub.f32 %v11033_v19, %v2039_v2  ;;  %8925 = vmatprep.subr.mxu1 %v10301_v36  ;;  %v2083_v2 = vld [vmem:[#allocation22] sm:$0x3] }
 0xcb2   :  { %v2035_v4 = vpop.xlane.xlu1 %2034  ;;  %v11110_v48 = vrot.slane %v2083_v2, %v10693_v21 }
 0xcb3   :  { %v2040_v5 = vmul.f32 0.03125, %v2035_v4  ;;  %v2045_v6 = vmul.f32 %v2042_v33, %v2042_v33 }
 0xcb5   :  { %v2043_v9 = vsub.f32 %v11039_v55, %v2040_v5  ;;  %v2048_v10 = vsel %vm547_vm3, %v2045_v6, 0.0 }
 0xcb6   :  { %2049 = vadd.xlane.f32.xlu0 %v2048_v10 }
 0xcb7   :  { %v2038_v11 = vpop.xlane.xlu0 %2037  ;;  %v2046_v46 = vmul.f32 %v2043_v9, %v2043_v9 }
 0xcb8   :  { %v2041_v34 = vmul.f32 0.03125, %v2038_v11 }
 0xcb9   :  { %v2051_v1 = vsel %vm547_vm3, %v2046_v46, 0.0 }
 0xcba   :  { %v2044_v52 = vsub.f32 %v11045_v61, %v2041_v34  ;;  %2052 = vadd.xlane.f32.xlu1 %v2051_v1 }
 0xcbc   :  { %v2047_v7 = vmul.f32 %v2044_v52, %v2044_v52 }
 0xcbe   :  { %v2054_v8 = vsel %vm783_vm9, %v2047_v7, 0.0 }
 0xcbf   :  { %2055 = vadd.xlane.f32.xlu0 %v2054_v8 }
 0xd3f   :  { %v2050_v3 = vpop.xlane.xlu0 %2049 }
 0xd40   :  { %v2057_v24 = vmul.f32 0.03125, %v2050_v3 }
 0xd42   :  { %v2060_v25 = vadd.f32 1e-05, %v2057_v24 }
 0xd43   :  { %v2053_v26 = vpop.xlane.xlu1 %2052 }
 0xd44   :  { %9683 = vrsqrt.f32 %v2060_v25  ;;  %v2058_v28 = vmul.f32 0.03125, %v2053_v26 }
 0xd46   :  { %v2061_v23 = vadd.f32 1e-05, %v2058_v28 }
 0xd48   :  { %9685 = vrsqrt.f32 %v2061_v23  ;;  %v2056_v30 = vpop.xlane.xlu0 %2055 }
 0xd49   :  { %v2059_v31 = vmul.f32 0.03125, %v2056_v30 }
 0xd4b   :  { %v2062_v27 = vadd.f32 1e-05, %v2059_v31 }
 0xd4d   :  { %9687 = vrsqrt.f32 %v2062_v27 }
 0xd51   :  { %v9684_v17 = vpop.eup %9683 }
 0xd52   :  { %v2066_v41 = vmul.f32 %v9684_v17, %v2042_v33  ;;  %v11095_v33 = vrot.slane %v2083_v2, %v10690_v37 }
 0xd54   :  { %v2073_v49 = vmul.f32 %v11071_v40, %v2066_v41 }
 0xd55   :  { %v9686_v50 = vpop.eup %9685 }
 0xd56   :  { %v2080_v53 = vadd.f32 %v11074_v45, %v2073_v49  ;;  %v2067_v54 = vmul.f32 %v9686_v50, %v2043_v9 }
 0xd58   :  { %8860 = vmatmul.mubr.msk.f32.vlgmr.msra.gmra.mxu0 %vm547_vm3, %v2080_v53  ;;  %v2074_v29 = vmul.f32 %v11071_v40, %v2067_v54 }
 0xd59   :  { %8862 = vmatprep.mubr.msk.f32.mxu0 %vm10302_vm10, %v10301_v36 }
 0xd5a   :  { %v9688_v44 = vpop.eup %9687  ;;  %v2081_v47 = vadd.f32 %v11074_v45, %v2074_v29 }
 0xd5b   :  { %v2068_v57 = vmul.f32 %v9688_v44, %v2044_v52 }
 0xd5c   :  { %8863 = vmatmul.mubr.msk.f32.gmra.mxu0 %vm547_vm3, %v2081_v47 }
 0xd5d   :  { %8865 = vmatprep.mubr.msk.f32.mxu0 %vm10302_vm10, %v10301_v36  ;;  %v2075_v59 = vmul.f32 %v11071_v40, %v2068_v57  ;;  %v2349_v57 = vld [vmem:[#allocation16 + $0x38] sm:$0xff] }
 0xd5e   :  { %8894 = vmatpush3.msra.mxu0 %v2349_v57 }
 0xd5f   :  { %v2082_v58 = vadd.f32 %v11074_v45, %v2075_v59  ;;  %8895 = vmatprep.subr.mxu0 %v10301_v36  ;;  %v2348_v59 = vld [vmem:[#allocation16 + $0x30] sm:$0xff] }
 0xd60   :  { %8896 = vmatpush3.msra.mxu0 %v2348_v59 }
 0xd61   :  { %8866 = vmatmul.mubr.msk.f32.gmra.mxu0 %vm547_vm3, %v2082_v58  ;;  %v2347_v58 = vld [vmem:[#allocation16 + $0x28] sm:$0xff]  ;;  %8897 = vmatprep.subr.mxu0 %v10301_v36 }
 0xd62   :  { %8901 = vmatprep.mubr.msk.f32.mxu0 %vm10302_vm10, %v10301_v36  ;;  %8898 = vmatpush3.msra.mxu0 %v2347_v58 }
 0xd63   :  { %8899 = vmatprep.subr.mxu0 %v10301_v36 }
 0xd64   :  { %8900 = vmatpush3.msra.mxu0 %v2346_v32 }
 0xd65   :  { %8910 = vmatprep.subr.mxu0 %v10301_v36 }
 0xe18   :  { %v2167_v4 = vpop.f32.mrf.mxu0 }
 0xe19   :  { %v2168_v5 = vadd.f32 %v2167_v4, %v11095_v33 }
 0xe1a   :  { %v8861_v6 = vpop.f32.mrf.mxu0 }
 0xe1b   :  { %v2181_v9 = vmax.f32 %v2168_v5, 0.0 }
 0xe1c   :  { %v2172_v10 = vpop.f32.mrf.mxu0 }
 0xe1d   :  { %v2173_v11 = vadd.f32 %v2172_v10, %v11095_v33  ;;  %8885 = vmatmul.mubr.msk.f32.vlgmr.msra.gmra.mxu1 %vm653_vm7, %v2181_v9 }
 0xe1e   :  { %v8864_v46 = vpop.f32.mrf.mxu0  ;;  %8887 = vmatprep.mubr.msk.f32.mxu1 %vm10302_vm10, %v10301_v36 }
 0xe1f   :  { %v2182_v34 = vmax.f32 %v2173_v11, 0.0  ;;  %v2289_v46 = vld [vmem:[#allocation15 + $0x4] sm:$0xf] }
 0xe21   :  { %v2177_v1 = vpop.f32.mrf.mxu0  ;;  %8888 = vmatmul.mubr.msk.f32.gmra.mxu1 %vm653_vm7, %v2182_v34  ;;  %v11141_v34 = vrot.slane %v2289_v46, %v10690_v37 }
 0xe22   :  { %v2178_v52 = vadd.f32 %v2177_v1, %v11095_v33  ;;  %8890 = vmatprep.mubr.msk.f32.mxu1 %vm10302_vm10, %v10301_v36 }
 0xe23   :  { %v8867_v7 = vpop.f32.mrf.mxu0 }
 0xe24   :  { %v2183_v8 = vmax.f32 %v2178_v52, 0.0  ;;  %v11144_v7 = vrot.slane %v2289_v46, %v10693_v21 }
 0xe26   :  { %8891 = vmatmul.mubr.msk.f32.gmra.mxu1 %vm653_vm7, %v2183_v8 }
 0xe27   :  { %8931 = vmatprep.mubr.msk.f32.mxu1 %vm10302_vm10, %v10301_v36 }
 0xedd   :  { %v2271_v12 = vpop.f32.mrf.mxu1 }
 0xede   :  { %v2272_v13 = vadd.f32 %v2271_v12, %v11110_v48 }
 0xedf   :  { %v8886_v14 = vpop.f32.mrf.mxu1 }
 0xee0   :  { %v11114_v16 = vadd.f32 %v2272_v13, %v11033_v19 }
 0xee1   :  { %v2276_v18 = vpop.f32.mrf.mxu1 }
 0xee2   :  { %v2277_v20 = vadd.f32 %v2276_v18, %v11110_v48  ;;  %v2290_v22 = vsel %vm547_vm3, %v11114_v16, 0.0 }
 0xee3   :  { %2291 = vadd.xlane.f32.xlu1 %v2290_v22  ;;  %v8889_v62 = vpop.f32.mrf.mxu1 }
 0xee4   :  { %v11120_v3 = vadd.f32 %v2277_v20, %v11039_v55 }
 0xee6   :  { %v2281_v24 = vpop.f32.mrf.mxu1  ;;  %v2293_v25 = vsel %vm547_vm3, %v11120_v3, 0.0 }
 0xee7   :  { %v2282_v26 = vadd.f32 %v2281_v24, %v11110_v48  ;;  %2294 = vadd.xlane.f32.xlu0 %v2293_v25 }
 0xee8   :  { %v8892_v19 = vpop.f32.mrf.mxu1 }
 0xee9   :  { %v11126_v28 = vadd.f32 %v2282_v26, %v11045_v61  ;;  %v11161_v26 = vld [vmem:[#allocation18 + $0x2] sm:$0x3] }
 0xeeb   :  { %v2296_v23 = vsel %vm783_vm9, %v11126_v28, 0.0 }
 0xeec   :  { %2297 = vadd.xlane.f32.xlu1 %v2296_v23 }
 0xf6c   :  { %v2292_v30 = vpop.xlane.xlu1 %2291 }
 0xf6d   :  { %v2299_v31 = vmul.f32 0.03125, %v2292_v30  ;;  %v11165_v30 = vrot.slane %v11161_v26, %v10690_v37 }
 0xf6f   :  { %v2302_v55 = vsub.f32 %v11114_v16, %v2299_v31 }
 0xf70   :  { %v2295_v27 = vpop.xlane.xlu0 %2294 }
 0xf71   :  { %v2300_v35 = vmul.f32 0.03125, %v2295_v27  ;;  %v2305_v17 = vmul.f32 %v2302_v55, %v2302_v55 }
 0xf73   :  { %v2303_v41 = vsub.f32 %v11120_v3, %v2300_v35  ;;  %v2308_v49 = vsel %vm547_vm3, %v2305_v17, 0.0 }
 0xf74   :  { %2309 = vadd.xlane.f32.xlu0 %v2308_v49 }
 0xf75   :  { %v2298_v50 = vpop.xlane.xlu1 %2297  ;;  %v2306_v53 = vmul.f32 %v2303_v41, %v2303_v41 }
 0xf76   :  { %v2301_v61 = vmul.f32 0.03125, %v2298_v50 }
 0xf77   :  { %v2311_v54 = vsel %vm547_vm3, %v2306_v53, 0.0 }
 0xf78   :  { %v2304_v29 = vsub.f32 %v11126_v28, %v2301_v61  ;;  %2312 = vadd.xlane.f32.xlu1 %v2311_v54 }
 0xf7a   :  { %v2307_v44 = vmul.f32 %v2304_v29, %v2304_v29 }
 0xf7c   :  { %v2314_v47 = vsel %vm783_vm9, %v2307_v44, 0.0 }
 0xf7d   :  { %2315 = vadd.xlane.f32.xlu0 %v2314_v47 }
 0xffd   :  { %v2310_v63 = vpop.xlane.xlu0 %2309 }
 0xffe   :  { %v2317_v0 = vmul.f32 0.03125, %v2310_v63 }
0x1000   :  { %v2320_v2 = vadd.f32 1e-05, %v2317_v0 }
0x1001   :  { %v2313_v4 = vpop.xlane.xlu1 %2312 }
0x1002   :  { %9689 = vrsqrt.f32 %v2320_v2  ;;  %v2318_v5 = vmul.f32 0.03125, %v2313_v4 }
0x1004   :  { %v2321_v6 = vadd.f32 1e-05, %v2318_v5 }
0x1006   :  { %9691 = vrsqrt.f32 %v2321_v6  ;;  %v2316_v9 = vpop.xlane.xlu0 %2315 }
0x1007   :  { %v2319_v10 = vmul.f32 0.03125, %v2316_v9 }
0x1009   :  { %v2322_v11 = vadd.f32 1e-05, %v2319_v10 }
0x100b   :  { %9693 = vrsqrt.f32 %v2322_v11 }
0x100f   :  { %v9690_v1 = vpop.eup %9689 }
0x1010   :  { %v2326_v52 = vmul.f32 %v9690_v1, %v2302_v55 }
0x1012   :  { %v2333_v8 = vmul.f32 %v11141_v34, %v2326_v52 }
0x1013   :  { %v9692_v12 = vpop.eup %9691 }
0x1014   :  { %v2340_v13 = vadd.f32 %v11144_v7, %v2333_v8  ;;  %v2327_v14 = vmul.f32 %v9692_v12, %v2303_v41 }
0x1016   :  { %8902 = vmatmul.mubr.msk.f32.vlgmr.msra.gmra.mxu0 %vm547_vm3, %v2340_v13  ;;  %v2334_v18 = vmul.f32 %v11141_v34, %v2327_v14 }
0x1017   :  { %8904 = vmatprep.mubr.msk.f32.mxu0 %vm10302_vm10, %v10301_v36 }
0x1018   :  { %v9694_v20 = vpop.eup %9693  ;;  %v2341_v22 = vadd.f32 %v11144_v7, %v2334_v18 }
0x1019   :  { %v2328_v62 = vmul.f32 %v9694_v20, %v2304_v29 }
0x101a   :  { %8905 = vmatmul.mubr.msk.f32.gmra.mxu0 %vm547_vm3, %v2341_v22 }
0x101b   :  { %8907 = vmatprep.mubr.msk.f32.mxu0 %vm10302_vm10, %v10301_v36  ;;  %v2335_v24 = vmul.f32 %v11141_v34, %v2328_v62 }
0x101d   :  { %v2342_v25 = vadd.f32 %v11144_v7, %v2335_v24 }
0x101f   :  { %8908 = vmatmul.mubr.msk.f32.gmra.mxu0 %vm547_vm3, %v2342_v25 }
0x1020   :  { %8916 = vmatprep.mubr.msk.f32.mxu0 %vm10302_vm10, %v10301_v36 }
0x10d6   :  { %v2429_v19 = vpop.f32.mrf.mxu0 }
0x10d7   :  { %v11180_v49 = vadd.f32 %v2429_v19, %v11165_v30 }
0x10d8   :  { %v8903_v23 = vpop.f32.mrf.mxu0 }
0x10da   :  { %v2434_v31 = vpop.f32.mrf.mxu0 }
0x10db   :  { %v11168_v55 = vadd.f32 %v2434_v31, %v11165_v30 }
0x10dc   :  { %v8906_v27 = vpop.f32.mrf.mxu0 }
0x10dd   :  { %2448 = vrot.lane.b32.xlu0 %v11168_v55, %s10303_s11 }
0x10df   :  { %v2439_v35 = vpop.f32.mrf.mxu0 }
0x10e0   :  { %v11173_v17 = vadd.f32 %v2439_v35, %v11165_v30 }
0x10e1   :  { %2687 = vrot.lane.b32.xlu0 %v11168_v55, %s10304_s25  ;;  %v8909_v41 = vpop.f32.mrf.mxu0 }
0x10e2   :  { %2450 = vrot.lane.b32.xlu1 %v11173_v17, %s10303_s11 }
0x10e5   :  { %2679 = vrot.lane.b32.xlu0 %v11180_v49, %s10293_s16 }
0x10e6   :  { %2446 = vrot.lane.b32.xlu1 %v11180_v49, %s10303_s11 }
0x10e9   :  { %2681 = vrot.lane.b32.xlu0 %v11168_v55, %s10293_s16 }
0x10ea   :  { %2689 = vrot.lane.b32.xlu1 %v11173_v17, %s10304_s25 }
0x10ed   :  { %2683 = vrot.lane.b32.xlu0 %v11173_v17, %s10293_s16 }
0x10ee   :  { %2685 = vrot.lane.b32.xlu1 %v11180_v49, %s10304_s25 }
0x10f1   :  { %2918 = vrot.lane.b32.xlu0 %v11180_v49, %s10299_s29 }
0x10f2   :  { %2928 = vrot.lane.b32.xlu1 %v11173_v17, %s10305_s3 }
0x10f5   :  { %2920 = vrot.lane.b32.xlu0 %v11168_v55, %s10299_s29 }
0x10f6   :  { %2926 = vrot.lane.b32.xlu1 %v11168_v55, %s10305_s3 }
0x10f9   :  { %2922 = vrot.lane.b32.xlu0 %v11173_v17, %s10299_s29 }
0x10fa   :  { %2924 = vrot.lane.b32.xlu1 %v11180_v49, %s10305_s3 }
0x10fd   :  { %3157 = vrot.lane.b32.xlu0 %v11180_v49, %s10300_s5 }
0x10fe   :  { %3167 = vrot.lane.b32.xlu1 %v11173_v17, %s10306_s4 }
0x1101   :  { %3161 = vrot.lane.b32.xlu0 %v11173_v17, %s10300_s5 }
0x1102   :  { %3165 = vrot.lane.b32.xlu1 %v11168_v55, %s10306_s4 }
0x1105   :  { %2580 = vrot.lane.b32.xlu0 %v11180_v49, %s10286_s22 }
0x1106   :  { %3163 = vrot.lane.b32.xlu1 %v11180_v49, %s10306_s4 }
0x1109   :  { %2819 = vrot.lane.b32.xlu0 %v11180_v49, %s10297_s2 }
0x110a   :  { %3159 = vrot.lane.b32.xlu1 %v11168_v55, %s10300_s5 }
0x110d   :  { %2584 = vrot.lane.b32.xlu0 %v11173_v17, %s10286_s22 }
0x110e   :  { %2582 = vrot.lane.b32.xlu1 %v11168_v55, %s10286_s22 }
0x1111   :  { %2823 = vrot.lane.b32.xlu0 %v11173_v17, %s10297_s2 }
0x1112   :  { %2821 = vrot.lane.b32.xlu1 %v11168_v55, %s10297_s2 }
0x114f   :  { %v2449_v50 = vpop.permute.xlu0 %2448 }
0x1153   :  { %v2688_v53 = vpop.permute.xlu0 %2687 }
0x1154   :  { %v2451_v61 = vpop.permute.xlu1 %2450 }
0x1155   :  { %8911 = vmatpush3.xpose.msk.msra.mxu0 %vm541_vm0, %v2451_v61 }
0x1156   :  { %8912 = vmatprep.subr.mxu0 %v10301_v36 }
0x1157   :  { %v2680_v54 = vpop.permute.xlu0 %2679 }
0x1158   :  { %v2447_v29 = vpop.permute.xlu1 %2446 }
0x1159   :  { %8913 = vmatpush3.xpose.msk.msra.mxu0 %vm541_vm0, %v2449_v50 }
0x115a   :  { %8914 = vmatprep.subr.mxu0 %v10301_v36 }
0x115b   :  { %v2682_v44 = vpop.permute.xlu0 %2681 }
0x115c   :  { %v2690_v47 = vpop.permute.xlu1 %2689 }
0x115d   :  { %8915 = vmatpush3.xpose.msk.msra.mxu0 %vm541_vm0, %v2447_v29 }
0x115e   :  { %8940 = vmatprep.subr.mxu0 %v10301_v36 }
0x115f   :  { %v2684_v57 = vpop.permute.xlu0 %2683 }
0x1160   :  { %8917 = vmatmul.mubr.msk.f32.vlgmr.msra.gmra.mxu0 %vm541_vm0, %v11180_v49  ;;  %v2686_v59 = vpop.permute.xlu1 %2685 }
0x1161   :  { %8941 = vmatpush3.xpose.msk.msra.mxu0 %vm541_vm0, %v2690_v47  ;;  %8919 = vmatprep.mubr.msk.f32.mxu0 %vm10302_vm10, %v10301_v36 }
0x1162   :  { %8942 = vmatprep.subr.mxu0 %v10301_v36 }
0x1163   :  { %v2919_v58 = vpop.permute.xlu0 %2918 }
0x1164   :  { %8920 = vmatmul.mubr.msk.f32.gmra.mxu0 %vm541_vm0, %v11168_v55  ;;  %v2929_v32 = vpop.permute.xlu1 %2928 }
0x1165   :  { %8943 = vmatpush3.xpose.msk.msra.mxu0 %vm541_vm0, %v2688_v53  ;;  %8922 = vmatprep.mubr.msk.f32.mxu0 %vm10302_vm10, %v10301_v36 }
0x1166   :  { %8944 = vmatprep.subr.mxu0 %v10301_v36 }
0x1167   :  { %v2921_v63 = vpop.permute.xlu0 %2920 }
0x1168   :  { %8923 = vmatmul.mubr.msk.f32.gmra.mxu0 %vm541_vm0, %v11173_v17  ;;  %v2927_v0 = vpop.permute.xlu1 %2926 }
0x1169   :  { %8945 = vmatpush3.xpose.msk.msra.mxu0 %vm541_vm0, %v2686_v59  ;;  %8946 = vmatprep.mubr.msk.f32.mxu0 %vm10302_vm10, %v10301_v36 }
0x116a   :  { %8970 = vmatprep.subr.mxu0 %v10301_v36 }
0x116b   :  { %v2923_v2 = vpop.permute.xlu0 %2922 }
0x116c   :  { %8947 = vmatmul.mubr.msk.f32.vlgmr.msra.gmra.mxu0 %vm541_vm0, %v2680_v54  ;;  %v2925_v4 = vpop.permute.xlu1 %2924 }
0x116d   :  { %8971 = vmatpush3.xpose.msk.msra.mxu0 %vm541_vm0, %v2929_v32  ;;  %8949 = vmatprep.mubr.msk.f32.mxu0 %vm10302_vm10, %v10301_v36 }
0x116e   :  { %8972 = vmatprep.subr.mxu0 %v10301_v36 }
0x116f   :  { %v3158_v5 = vpop.permute.xlu0 %3157 }
0x1170   :  { %8950 = vmatmul.mubr.msk.f32.gmra.mxu0 %vm541_vm0, %v2682_v44  ;;  %v3168_v6 = vpop.permute.xlu1 %3167 }
0x1171   :  { %8973 = vmatpush3.xpose.msk.msra.mxu0 %vm541_vm0, %v2927_v0  ;;  %8952 = vmatprep.mubr.msk.f32.mxu0 %vm10302_vm10, %v10301_v36 }
0x1172   :  { %8974 = vmatprep.subr.mxu0 %v10301_v36 }
0x1173   :  { %v3162_v9 = vpop.permute.xlu0 %3161 }
0x1174   :  { %8953 = vmatmul.mubr.msk.f32.gmra.mxu0 %vm541_vm0, %v2684_v57  ;;  %v3166_v10 = vpop.permute.xlu1 %3165 }
0x1175   :  { %8975 = vmatpush3.xpose.msk.msra.mxu0 %vm541_vm0, %v2925_v4  ;;  %8976 = vmatprep.mubr.msk.f32.mxu0 %vm10302_vm10, %v10301_v36 }
0x1176   :  { %9000 = vmatprep.subr.mxu0 %v10301_v36 }
0x1177   :  { %v2581_v11 = vpop.permute.xlu0 %2580 }
0x1178   :  { %8977 = vmatmul.mubr.msk.f32.vlgmr.msra.gmra.mxu0 %vm541_vm0, %v2919_v58  ;;  %v3164_v46 = vpop.permute.xlu1 %3163 }
0x1179   :  { %9001 = vmatpush3.xpose.msk.msra.mxu0 %vm541_vm0, %v3168_v6  ;;  %8979 = vmatprep.mubr.msk.f32.mxu0 %vm10302_vm10, %v10301_v36 }
0x117a   :  { %9002 = vmatprep.subr.mxu0 %v10301_v36 }
0x117b   :  { %v11274_v1 = vpop.permute.xlu0 %2819 }
0x117c   :  { %8980 = vmatmul.mubr.msk.f32.gmra.mxu0 %vm541_vm0, %v2921_v63  ;;  %v3160_v52 = vpop.permute.xlu1 %3159 }
0x117d   :  { %9003 = vmatpush3.xpose.msk.msra.mxu0 %vm541_vm0, %v3166_v10  ;;  %8982 = vmatprep.mubr.msk.f32.mxu0 %vm10302_vm10, %v10301_v36 }
0x117e   :  { %9004 = vmatprep.subr.mxu0 %v10301_v36 }
0x117f   :  { %v2585_v8 = vpop.permute.xlu0 %2584 }
0x1180   :  { %8926 = vmatpush3.msk.msra.mxu1 %vm762_vm8, %v2585_v8  ;;  %8983 = vmatmul.mubr.msk.f32.gmra.mxu0 %vm541_vm0, %v2923_v2  ;;  %v2583_v12 = vpop.permute.xlu1 %2582 }
0x1181   :  { %8927 = vmatprep.subr.mxu1 %v10301_v36  ;;  %9005 = vmatpush3.xpose.msk.msra.mxu0 %vm541_vm0, %v3164_v46 }
0x1182   :  { %8928 = vmatpush3.msra.mxu1 %v2583_v12  ;;  %9006 = vmatprep.mubr.msk.f32.mxu0 %vm10302_vm10, %v10301_v36 }
0x1183   :  { %8929 = vmatprep.subr.mxu1 %v10301_v36  ;;  %9030 = vmatprep.subr.mxu0 %v10301_v36 }
0x1184   :  { %8930 = vmatpush3.msra.mxu1 %v2581_v11  ;;  %9007 = vmatmul.mubr.msk.f32.vlgmr.msra.gmra.mxu0 %vm541_vm0, %v3158_v5 }
0x1185   :  { %9009 = vmatprep.mubr.msk.f32.mxu0 %vm10302_vm10, %v10301_v36  ;;  %8955 = vmatprep.subr.mxu1 %v10301_v36 }
0x1188   :  { %9010 = vmatmul.mubr.msk.f32.gmra.mxu0 %vm541_vm0, %v3160_v52 }
0x1189   :  { %9012 = vmatprep.mubr.msk.f32.mxu0 %vm10302_vm10, %v10301_v36 }
0x118c   :  { %9013 = vmatmul.mubr.msk.f32.gmra.mxu0 %vm541_vm0, %v3162_v9 }
0x118d   :  { %9038 = vmatprep.mubr.msk.f32.mxu0 %vm10302_vm10, %v10301_v36 }
0x1220   :  { %v2530_v13 = vpop.f32.mrf.mxu0 }
0x1221   :  { %v11299_v14 = vmul.f32 0.35355338, %v2530_v13 }
0x1222   :  { %v8918_v18 = vpop.f32.mrf.mxu0 }
0x1223   :  { %v2547_v20 = vsel %vm1034_vm11, %v11299_v14, -inf }
0x1224   :  { %2548 = vmax.xlane.f32.xlu1 %v2547_v20  ;;  %v2535_v22 = vpop.f32.mrf.mxu0 }
0x1225   :  { %v11303_v62 = vmul.f32 0.35355338, %v2535_v22 }
0x1226   :  { %v8921_v24 = vpop.f32.mrf.mxu0 }
0x1227   :  { %v2550_v25 = vsel %vm1034_vm11, %v11303_v62, -inf }
0x1228   :  { %2551 = vmax.xlane.f32.xlu0 %v2550_v25  ;;  %v2540_v19 = vpop.f32.mrf.mxu0 }
0x1229   :  { %v11307_v23 = vmul.f32 0.35355338, %v2540_v19 }
0x122a   :  { %v8924_v31 = vpop.f32.mrf.mxu0 }
0x122b   :  { %v2553_v27 = vsel %vm1041_vm12, %v11307_v23, -inf }
0x122c   :  { %2554 = vmax.xlane.f32.xlu0 %v2553_v27  ;;  %v2769_v35 = vpop.f32.mrf.mxu0 }
0x122d   :  { %v11311_v41 = vmul.f32 0.35355338, %v2769_v35 }
0x122e   :  { %v8948_v50 = vpop.f32.mrf.mxu0 }
0x122f   :  { %v2786_v53 = vsel %vm1034_vm11, %v11311_v41, -inf  ;;  %v11353_v50 = vpop.permute.xlu1 %2821 }
0x1230   :  { %2787 = vmax.xlane.f32.xlu1 %v2786_v53  ;;  %v2774_v61 = vpop.f32.mrf.mxu0  ;;  %v11355_v53 = vpop.permute.xlu0 %2823 }
0x1231   :  { %v11315_v54 = vmul.f32 0.35355338, %v2774_v61 }
0x1232   :  { %v8951_v29 = vpop.f32.mrf.mxu0 }
0x1233   :  { %v2789_v44 = vsel %vm1034_vm11, %v11315_v54, -inf }
0x1234   :  { %2790 = vmax.xlane.f32.xlu0 %v2789_v44  ;;  %v2779_v47 = vpop.f32.mrf.mxu0 }
0x1235   :  { %v11319_v57 = vmul.f32 0.35355338, %v2779_v47 }
0x1236   :  { %v8954_v59 = vpop.f32.mrf.mxu0 }
0x1237   :  { %v2792_v58 = vsel %vm1041_vm12, %v11319_v57, -inf }
0x1238   :  { %2793 = vmax.xlane.f32.xlu1 %v2792_v58  ;;  %v3008_v32 = vpop.f32.mrf.mxu0 }
0x1239   :  { %v11323_v63 = vmul.f32 0.35355338, %v3008_v32 }
0x123a   :  { %v8978_v0 = vpop.f32.mrf.mxu0 }
0x123b   :  { %v3025_v2 = vsel %vm1034_vm11, %v11323_v63, -inf }
0x123c   :  { %3026 = vmax.xlane.f32.xlu0 %v3025_v2  ;;  %v3013_v4 = vpop.f32.mrf.mxu0 }
0x123d   :  { %v11327_v5 = vmul.f32 0.35355338, %v3013_v4 }
0x123e   :  { %v8981_v6 = vpop.f32.mrf.mxu0 }
0x123f   :  { %v3028_v9 = vsel %vm1034_vm11, %v11327_v5, -inf }
0x1240   :  { %3029 = vmax.xlane.f32.xlu1 %v3028_v9  ;;  %v3018_v10 = vpop.f32.mrf.mxu0 }
0x1241   :  { %v11331_v11 = vmul.f32 0.35355338, %v3018_v10 }
0x1242   :  { %v8984_v46 = vpop.f32.mrf.mxu0 }
0x1243   :  { %v3031_v52 = vsel %vm1041_vm12, %v11331_v11, -inf }
0x1244   :  { %3032 = vmax.xlane.f32.xlu0 %v3031_v52  ;;  %v3247_v8 = vpop.f32.mrf.mxu0 }
0x1245   :  { %v11335_v12 = vmul.f32 0.35355338, %v3247_v8 }
0x1246   :  { %v9008_v13 = vpop.f32.mrf.mxu0 }
0x1247   :  { %v3264_v18 = vsel %vm1034_vm11, %v11335_v12, -inf }
0x1248   :  { %3265 = vmax.xlane.f32.xlu1 %v3264_v18  ;;  %v3252_v20 = vpop.f32.mrf.mxu0 }
0x1249   :  { %v11339_v22 = vmul.f32 0.35355338, %v3252_v20 }
0x124a   :  { %v9011_v24 = vpop.f32.mrf.mxu0 }
0x124b   :  { %v3267_v25 = vsel %vm1034_vm11, %v11339_v22, -inf }
0x124c   :  { %3268 = vmax.xlane.f32.xlu0 %v3267_v25  ;;  %v3257_v19 = vpop.f32.mrf.mxu0 }
0x124d   :  { %v11347_v27 = vmul.f32 0.35355338, %v3257_v19 }
0x124e   :  { %v9014_v31 = vpop.f32.mrf.mxu0 }
0x124f   :  { %v3270_v35 = vsel %vm1041_vm12, %v11347_v27, -inf }
0x1259   :  { %3060 = vrot.lane.b32.xlu1 %v11168_v55, %s10298_s8 }
0x1262   :  { %3062 = vrot.lane.b32.xlu0 %v11173_v17, %s10298_s8 }
0x127d   :  { %3271 = vmax.xlane.f32.xlu1 %v3270_v35 }
0x128e   :  { %3058 = vrot.lane.b32.xlu1 %v11180_v49, %s10298_s8 }
0x12ad   :  { %v2549_v61 = vpop.xlane.xlu1 %2548 }
0x12ae   :  { %v2556_v29 = vsub.f32 %v11299_v14, %v2549_v61 }
0x12b0   :  { %v2559_v44 = vmul.f32 1.442695, %v2556_v29 }
0x12b1   :  { %v2552_v47 = vpop.xlane.xlu0 %2551 }
0x12b2   :  { %9695 = vpow2.f32 %v2559_v44  ;;  %v2557_v59 = vsub.f32 %v11303_v62, %v2552_v47 }
0x12b4   :  { %v2561_v58 = vmul.f32 1.442695, %v2557_v59 }
0x12b5   :  { %v2555_v32 = vpop.xlane.xlu0 %2554 }
0x12b6   :  { %9697 = vpow2.f32 %v2561_v58  ;;  %v2558_v0 = vsub.f32 %v11307_v23, %v2555_v32 }
0x12b8   :  { %v2563_v2 = vmul.f32 1.442695, %v2558_v0 }
0x12b9   :  { %v2788_v4 = vpop.xlane.xlu1 %2787 }
0x12ba   :  { %9699 = vpow2.f32 %v2563_v2  ;;  %v2795_v6 = vsub.f32 %v11311_v41, %v2788_v4 }
0x12bc   :  { %v2798_v9 = vmul.f32 1.442695, %v2795_v6 }
0x12bd   :  { %v2791_v10 = vpop.xlane.xlu0 %2790 }
0x12be   :  { %9701 = vpow2.f32 %v2798_v9  ;;  %v2796_v14 = vsub.f32 %v11315_v54, %v2791_v10 }
0x12bf   :  { %v11362_v46 = vpop.eup %9695 }
0x12c0   :  { %v2800_v52 = vmul.f32 1.442695, %v2796_v14  ;;  %v2565_v62 = vsel %vm1034_vm11, %v11362_v46, 0.0 }
0x12c1   :  { %v2794_v8 = vpop.xlane.xlu1 %2793  ;;  %2566 = vadd.xlane.f32.xlu0 %v2565_v62 }
0x12c2   :  { %9703 = vpow2.f32 %v2800_v52  ;;  %v2797_v23 = vsub.f32 %v11319_v57, %v2794_v8 }
0x12c3   :  { %v11367_v13 = vpop.eup %9697 }
0x12c4   :  { %v2802_v18 = vmul.f32 1.442695, %v2797_v23  ;;  %v2568_v41 = vsel %vm1034_vm11, %v11367_v13, 0.0 }
0x12c5   :  { %v3027_v20 = vpop.xlane.xlu0 %3026  ;;  %2569 = vadd.xlane.f32.xlu1 %v2568_v41 }
0x12c6   :  { %9705 = vpow2.f32 %v2802_v18  ;;  %v3034_v54 = vsub.f32 %v11323_v63, %v3027_v20 }
0x12c7   :  { %v11372_v24 = vpop.eup %9699 }
0x12c8   :  { %v3037_v25 = vmul.f32 1.442695, %v3034_v54  ;;  %v2571_v19 = vsel %vm1041_vm12, %v11372_v24, 0.0 }
0x12c9   :  { %v3030_v31 = vpop.xlane.xlu1 %3029  ;;  %2572 = vadd.xlane.f32.xlu0 %v2571_v19 }
0x12ca   :  { %9707 = vpow2.f32 %v3037_v25  ;;  %v3035_v57 = vsub.f32 %v11327_v5, %v3030_v31 }
0x12cb   :  { %v11377_v35 = vpop.eup %9701 }
0x12cc   :  { %v3039_v61 = vmul.f32 1.442695, %v3035_v57  ;;  %v2804_v29 = vsel %vm1034_vm11, %v11377_v35, 0.0 }
0x12cd   :  { %2805 = vadd.xlane.f32.xlu1 %v2804_v29  ;;  %v3033_v47 = vpop.xlane.xlu0 %3032 }
0x12ce   :  { %9709 = vpow2.f32 %v3039_v61  ;;  %v3036_v23 = vsub.f32 %v11331_v11, %v3033_v47 }
0x12cf   :  { %v11381_v63 = vpop.eup %9703 }
0x12d0   :  { %v2807_v44 = vsel %vm1034_vm11, %v11381_v63, 0.0  ;;  %v3041_v18 = vmul.f32 1.442695, %v3036_v23 }
0x12d1   :  { %v3266_v59 = vpop.xlane.xlu1 %3265  ;;  %2808 = vadd.xlane.f32.xlu0 %v2807_v44 }
0x12d2   :  { %v3273_v58 = vsub.f32 %v11335_v12, %v3266_v59 }
0x12d3   :  { %v11386_v32 = vpop.eup %9705 }
0x12d4   :  { %v3276_v5 = vmul.f32 1.442695, %v3273_v58  ;;  %v2810_v0 = vsel %vm1041_vm12, %v11386_v32, 0.0 }
0x12d5   :  { %v3269_v2 = vpop.xlane.xlu0 %3268  ;;  %2811 = vadd.xlane.f32.xlu1 %v2810_v0  ;;  %v3061_v20 = vpop.permute.xlu1 %3060 }
0x12d6   :  { %9711 = vpow2.f32 %v3276_v5  ;;  %v3274_v4 = vsub.f32 %v11339_v22, %v3269_v2 }
0x12d7   :  { %v11391_v6 = vpop.eup %9707 }
0x12d8   :  { %v3278_v9 = vmul.f32 1.442695, %v3274_v4  ;;  %v3043_v10 = vsel %vm1034_vm11, %v11391_v6, 0.0 }
0x12d9   :  { %3044 = vadd.xlane.f32.xlu1 %v3043_v10 }
0x12da   :  { %9713 = vpow2.f32 %v3278_v9 }
0x12db   :  { %v11395_v12 = vpop.eup %9709  ;;  %9715 = vpow2.f32 %v3041_v18 }
0x12dc   :  { %v3046_v14 = vsel %vm1034_vm11, %v11395_v12, 0.0 }
0x12dd   :  { %3047 = vadd.xlane.f32.xlu1 %v3046_v14 }
0x12e3   :  { %v11399_v52 = vpop.eup %9711 }
0x12e4   :  { %v3282_v62 = vsel %vm1034_vm11, %v11399_v52, 0.0 }
0x12e5   :  { %3283 = vadd.xlane.f32.xlu1 %v3282_v62 }
0x12e7   :  { %v11403_v22 = vpop.eup %9713  ;;  %3301 = vrot.lane.b32.xlu0 %v11173_v17, %s10296_s1 }
0x12e8   :  { %v3285_v8 = vsel %vm1034_vm11, %v11403_v22, 0.0  ;;  %v11412_v41 = vpop.eup %9715 }
0x12e9   :  { %3286 = vadd.xlane.f32.xlu1 %v3285_v8  ;;  %v3049_v54 = vsel %vm1041_vm12, %v11412_v41, 0.0 }
0x12fa   :  { %3299 = vrot.lane.b32.xlu1 %v11168_v55, %s10296_s1  ;;  %v3063_v55 = vpop.permute.xlu0 %3062 }
0x1306   :  { %3050 = vadd.xlane.f32.xlu0 %v3049_v54  ;;  %v3272_v25 = vpop.xlane.xlu1 %3271 }
0x1307   :  { %v3275_v17 = vsub.f32 %v11347_v27, %v3272_v25 }
0x1309   :  { %v3280_v19 = vmul.f32 1.442695, %v3275_v17 }
0x130a   :  { %v3059_v57 = vpop.permute.xlu1 %3058 }
0x130b   :  { %9717 = vpow2.f32 %v3280_v19 }
0x1318   :  { %v11417_v31 = vpop.eup %9717 }
0x1319   :  { %v3288_v11 = vsel %vm1041_vm12, %v11417_v31, 0.0 }
0x131a   :  { %3289 = vadd.xlane.f32.xlu0 %v3288_v11 }
0x1330   :  { %3297 = vrot.lane.b32.xlu0 %v11180_v49, %s10296_s1 }
0x134a   :  { %v2567_v61 = vpop.xlane.xlu0 %2566 }
0x134b   :  { %9719 = vrcp.f32 %v2567_v61 }
0x134e   :  { %v2570_v29 = vpop.xlane.xlu1 %2569 }
0x134f   :  { %9721 = vrcp.f32 %v2570_v29 }
0x1352   :  { %v2573_v44 = vpop.xlane.xlu0 %2572 }
0x1353   :  { %9723 = vrcp.f32 %v2573_v44 }
0x1356   :  { %v2806_v27 = vpop.xlane.xlu1 %2805 }
0x1357   :  { %9725 = vrcp.f32 %v2806_v27 }
0x1358   :  { %v9720_v47 = vpop.eup %9719 }
0x1359   :  { %v2575_v59 = vmul.f32 %v9720_v47, %v11362_v46 }
0x135a   :  { %v2809_v58 = vpop.xlane.xlu0 %2808 }
0x135b   :  { %9727 = vrcp.f32 %v2809_v58  ;;  %8932 = vmatmul.mubr.msk.f32.vlgmr.msra.gmra.mxu1 %vm1034_vm11, %v2575_v59 }
0x135c   :  { %v9722_v5 = vpop.eup %9721  ;;  %8956 = vmatpush3.msk.msra.mxu1 %vm762_vm8, %v11355_v53  ;;  %8934 = vmatprep.mubr.msk.f32.mxu1 %vm10302_vm10, %v10301_v36 }
0x135d   :  { %8957 = vmatprep.subr.mxu1 %v10301_v36  ;;  %v2577_v49 = vmul.f32 %v9722_v5, %v11367_v13  ;;  %v3445_v5 = vld [vmem:[#allocation19 + $0x38] sm:$0xff] }
0x135e   :  { %8958 = vmatpush3.msra.mxu1 %v11353_v50  ;;  %v2812_v0 = vpop.xlane.xlu1 %2811  ;;  %v3302_v8 = vpop.permute.xlu0 %3301  ;;  %9031 = vmatpush3.msra.mxu0 %v3445_v5 }
0x135f   :  { %8959 = vmatprep.subr.mxu1 %v10301_v36  ;;  %9729 = vrcp.f32 %v2812_v0  ;;  %8935 = vmatmul.mubr.msk.f32.gmra.mxu1 %vm1034_vm11, %v2577_v49  ;;  %v3444_v49 = vld [vmem:[#allocation19 + $0x30] sm:$0xff]  ;;  %v3443_v0 = vld [vmem:[#allocation19 + $0x28] sm:$0xff] }
0x1360   :  { %v9724_v46 = vpop.eup %9723  ;;  %8960 = vmatpush3.msra.mxu1 %v11274_v1  ;;  %8937 = vmatprep.mubr.msk.f32.mxu1 %vm10302_vm10, %v10301_v36 }
0x1361   :  { %v2579_v53 = vmul.f32 %v9724_v46, %v11372_v24  ;;  %8985 = vmatprep.subr.mxu1 %v10301_v36  ;;  %9032 = vmatprep.subr.mxu0 %v10301_v36 }
0x1362   :  { %v3045_v2 = vpop.xlane.xlu1 %3044  ;;  %9033 = vmatpush3.msra.mxu0 %v3444_v49 }
0x1363   :  { %9731 = vrcp.f32 %v3045_v2  ;;  %8938 = vmatmul.mubr.msk.f32.gmra.mxu1 %vm1034_vm11, %v2579_v53  ;;  %9034 = vmatprep.subr.mxu0 %v10301_v36 }
0x1364   :  { %v9726_v50 = vpop.eup %9725  ;;  %8961 = vmatprep.mubr.msk.f32.mxu1 %vm10302_vm10, %v10301_v36  ;;  %9035 = vmatpush3.msra.mxu0 %v3443_v0 }
0x1365   :  { %v2814_v13 = vmul.f32 %v9726_v50, %v11377_v35  ;;  %9036 = vmatprep.subr.mxu0 %v10301_v36 }
0x1366   :  { %v3048_v4 = vpop.xlane.xlu1 %3047 }
0x1367   :  { %9733 = vrcp.f32 %v3048_v4  ;;  %8962 = vmatmul.mubr.msk.f32.vlgmr.msra.gmra.mxu1 %vm1034_vm11, %v2814_v13 }
0x1368   :  { %v9728_v1 = vpop.eup %9727  ;;  %8986 = vmatpush3.msk.msra.mxu1 %vm762_vm8, %v3063_v55  ;;  %8964 = vmatprep.mubr.msk.f32.mxu1 %vm10302_vm10, %v10301_v36 }
0x1369   :  { %8987 = vmatprep.subr.mxu1 %v10301_v36  ;;  %v2816_v24 = vmul.f32 %v9728_v1, %v11381_v63  ;;  %v3442_v1 = vld [vmem:[#allocation19 + $0x20] sm:$0xff] }
0x136a   :  { %8988 = vmatpush3.msra.mxu1 %v3061_v20  ;;  %9037 = vmatpush3.msra.mxu0 %v3442_v1 }
0x136b   :  { %8989 = vmatprep.subr.mxu1 %v10301_v36  ;;  %8965 = vmatmul.mubr.msk.f32.gmra.mxu1 %vm1034_vm11, %v2816_v24 }
0x136c   :  { %v9730_v35 = vpop.eup %9729  ;;  %8990 = vmatpush3.msra.mxu1 %v3059_v57  ;;  %8967 = vmatprep.mubr.msk.f32.mxu1 %vm10302_vm10, %v10301_v36 }
0x136d   :  { %v2818_v9 = vmul.f32 %v9730_v35, %v11386_v32  ;;  %9015 = vmatprep.subr.mxu1 %v10301_v36  ;;  %9121 = vmatprep.subr.mxu0 %v10301_v36 }
0x136e   :  { %v3284_v10 = vpop.xlane.xlu1 %3283 }
0x136f   :  { %8968 = vmatmul.mubr.msk.f32.gmra.mxu1 %vm1034_vm11, %v2818_v9 }
0x1370   :  { %v9732_v14 = vpop.eup %9731  ;;  %8991 = vmatprep.mubr.msk.f32.mxu1 %vm10302_vm10, %v10301_v36 }
0x1371   :  { %v3053_v63 = vmul.f32 %v9732_v14, %v11391_v6 }
0x1372   :  { %v3287_v62 = vpop.xlane.xlu1 %3286 }
0x1373   :  { %8992 = vmatmul.mubr.msk.f32.vlgmr.msra.gmra.mxu1 %vm1034_vm11, %v3053_v63 }
0x1374   :  { %v9734_v23 = vpop.eup %9733  ;;  %9016 = vmatpush3.msk.msra.mxu1 %vm762_vm8, %v3302_v8  ;;  %8994 = vmatprep.mubr.msk.f32.mxu1 %vm10302_vm10, %v10301_v36 }
0x1375   :  { %9017 = vmatprep.subr.mxu1 %v10301_v36  ;;  %v3055_v32 = vmul.f32 %v9734_v23, %v11395_v12 }
0x1376   :  { %v3300_v18 = vpop.permute.xlu1 %3299 }
0x1377   :  { %8995 = vmatmul.mubr.msk.f32.gmra.mxu1 %vm1034_vm11, %v3055_v32 }
0x1378   :  { %9018 = vmatpush3.msra.mxu1 %v3300_v18  ;;  %8997 = vmatprep.mubr.msk.f32.mxu1 %vm10302_vm10, %v10301_v36 }
0x1379   :  { %9019 = vmatprep.subr.mxu1 %v10301_v36 }
0x138f   :  { %v3051_v6 = vpop.xlane.xlu0 %3050 }
0x1390   :  { %9735 = vrcp.f32 %v3051_v6 }
0x1391   :  { %9737 = vrcp.f32 %v3284_v10 }
0x1392   :  { %9739 = vrcp.f32 %v3287_v62 }
0x139d   :  { %v9736_v20 = vpop.eup %9735 }
0x139e   :  { %v3057_v54 = vmul.f32 %v9736_v20, %v11412_v41  ;;  %v9738_v25 = vpop.eup %9737 }
0x139f   :  { %v3292_v17 = vmul.f32 %v9738_v25, %v11399_v52  ;;  %v9740_v11 = vpop.eup %9739 }
0x13a0   :  { %8998 = vmatmul.mubr.msk.f32.gmra.mxu1 %vm1034_vm11, %v3057_v54  ;;  %v3294_v41 = vmul.f32 %v9740_v11, %v11403_v22 }
0x13a1   :  { %9021 = vmatprep.mubr.msk.f32.mxu1 %vm10302_vm10, %v10301_v36 }
0x13a3   :  { %v3290_v12 = vpop.xlane.xlu0 %3289 }
0x13a4   :  { %9741 = vrcp.f32 %v3290_v12 }
0x13a7   :  { %v3298_v19 = vpop.permute.xlu0 %3297 }
0x13a8   :  { %9020 = vmatpush3.msra.mxu1 %v3298_v19 }
0x13a9   :  { %9022 = vmatmul.mubr.msk.f32.vlgmr.msra.gmra.mxu1 %vm1034_vm11, %v3292_v17  ;;  %9047 = vmatprep.subr.mxu1 %v10301_v36 }
0x13aa   :  { %9024 = vmatprep.mubr.msk.f32.mxu1 %vm10302_vm10, %v10301_v36 }
0x13ad   :  { %9025 = vmatmul.mubr.msk.f32.gmra.mxu1 %vm1034_vm11, %v3294_v41 }
0x13ae   :  { %9027 = vmatprep.mubr.msk.f32.mxu1 %vm10302_vm10, %v10301_v36 }
0x13b1   :  { %v9742_v55 = vpop.eup %9741 }
0x13b2   :  { %v3296_v52 = vmul.f32 %v9742_v55, %v11417_v31 }
0x13b4   :  { %9028 = vmatmul.mubr.msk.f32.gmra.mxu1 %vm1034_vm11, %v3296_v52 }
0x13b5   :  { %9055 = vmatprep.mubr.msk.f32.mxu1 %vm10302_vm10, %v10301_v36 }
0x141b   :  { %v2665_v57 = vpop.f32.mrf.mxu1 }
0x141d   :  { %v8933_v61 = vpop.f32.mrf.mxu1 }
0x141f   :  { %v2670_v29 = vpop.f32.mrf.mxu1 }
0x1421   :  { %v8936_v44 = vpop.f32.mrf.mxu1 }
0x1423   :  { %v2675_v27 = vpop.f32.mrf.mxu1 }
0x1425   :  { %v8939_v47 = vpop.f32.mrf.mxu1 }
0x1426   :  { %v11519_v47 = vrot.slane %v11161_v26, %v10693_v21 }
0x1427   :  { %v2904_v22 = vpop.f32.mrf.mxu1 }
0x1428   :  { %3399 = vrot.lane.b32.xlu1 %v2904_v22, %s10275_s23 }
0x1429   :  { %v8963_v59 = vpop.f32.mrf.mxu1 }
0x142b   :  { %v2909_v58 = vpop.f32.mrf.mxu1 }
0x142c   :  { %3401 = vrot.lane.b32.xlu0 %v2909_v58, %s10275_s23 }
0x142d   :  { %v8966_v31 = vpop.f32.mrf.mxu1 }
0x142f   :  { %v2914_v46 = vpop.f32.mrf.mxu1 }
0x1431   :  { %v8969_v53 = vpop.f32.mrf.mxu1 }
0x1433   :  { %v3143_v2 = vpop.f32.mrf.mxu1 }
0x1434   :  { %3411 = vrot.lane.b32.xlu0 %v3143_v2, %s10294_s20 }
0x1435   :  { %v8993_v50 = vpop.f32.mrf.mxu1 }
0x1437   :  { %v3148_v13 = vpop.f32.mrf.mxu1 }
0x1438   :  { %3413 = vrot.lane.b32.xlu1 %v3148_v13, %s10294_s20 }
0x1439   :  { %v8996_v4 = vpop.f32.mrf.mxu1 }
0x143a   :  { %v9870_v4 = vld [vmem:[#allocation12] ss:$0 sm:$0xff] }
0x143b   :  { %v743_v1 = vadd.f32 %v9870_v4, %v10721_v56 }
0x1460   :  { %v3153_v24 = vpop.f32.mrf.mxu1 }
0x1462   :  { %v8999_v35 = vpop.f32.mrf.mxu1 }
0x1469   :  { %v3382_v9 = vpop.f32.mrf.mxu1 }
0x146a   :  { %3423 = vrot.lane.b32.xlu1 %v3382_v9, %s10295_s21 }
0x146b   :  { %v9023_v10 = vpop.f32.mrf.mxu1 }
0x146d   :  { %v3387_v14 = vpop.f32.mrf.mxu1 }
0x146e   :  { %3403 = vrot.lane.b32.xlu1 %v2914_v46, %s10275_s23  ;;  %3425 = vrot.lane.b32.xlu0 %v3387_v14, %s10295_s21 }
0x146f   :  { %v9026_v63 = vpop.f32.mrf.mxu1 }
0x1472   :  { %3415 = vrot.lane.b32.xlu0 %v3153_v24, %s10294_s20  ;;  %v9871_v24 = vld [vmem:[#allocation12 + $0x1] sm:$0x1] }
0x1474   :  { %v3392_v62 = vpop.f32.mrf.mxu1 }
0x1475   :  { %3427 = vrot.lane.b32.xlu1 %v3392_v62, %s10295_s21  ;;  %v3879_v62 = vrot.slane %v743_v1, 7 }
0x1476   :  { %v9029_v8 = vpop.f32.mrf.mxu1 }
0x149a   :  { %v3400_v23 = vpop.permute.xlu1 %3399 }
0x149b   :  { %v3432_v20 = vsel %vm541_vm0, %v2665_v57, %v3400_v23 }
0x149e   :  { %v3402_v32 = vpop.permute.xlu0 %3401 }
0x149f   :  { %v3433_v17 = vsel %vm541_vm0, %v2670_v29, %v3402_v32 }
0x14a6   :  { %v3412_v6 = vpop.permute.xlu0 %3411 }
0x14a7   :  { %v3435_v54 = vsel %vm543_vm1, %v3432_v20, %v3412_v6 }
0x14aa   :  { %v3414_v18 = vpop.permute.xlu1 %3413 }
0x14ab   :  { %v3436_v19 = vsel %vm543_vm1, %v3433_v17, %v3414_v18  ;;  %v748_v18 = vadd.f32 %v9870_v4, %v10719_v38 }
0x14dc   :  { %v3424_v12 = vpop.permute.xlu1 %3423 }
0x14dd   :  { %v3438_v25 = vsel %vm545_vm2, %v3435_v54, %v3424_v12  ;;  %v3880_v12 = vrot.slane %v748_v18, 7 }
0x14de   :  { %9039 = vmatmul.mubr.msk.f32.vlgmr.msra.gmra.mxu0 %vm547_vm3, %v3438_v25 }
0x14df   :  { %9041 = vmatprep.mubr.msk.f32.mxu0 %vm10302_vm10, %v10301_v36 }
0x14e0   :  { %v3426_v11 = vpop.permute.xlu0 %3425  ;;  %v3404_v55 = vpop.permute.xlu1 %3403 }
0x14e1   :  { %v3439_v41 = vsel %vm545_vm2, %v3436_v19, %v3426_v11  ;;  %v3434_v57 = vsel %vm541_vm0, %v2675_v27, %v3404_v55  ;;  %v9873_v19 = vld [vmem:[#allocation13] sm:$0xff]  ;;  %v9874_v55 = vld [vmem:[#allocation13 + $0x10] sm:$0x1] }
0x14e2   :  { %9042 = vmatmul.mubr.msk.f32.gmra.mxu0 %vm547_vm3, %v3439_v41 }
0x14e3   :  { %9044 = vmatprep.mubr.msk.f32.mxu0 %vm10302_vm10, %v10301_v36 }
0x14e4   :  { %v3416_v52 = vpop.permute.xlu0 %3415 }
0x14e5   :  { %v3437_v61 = vsel %vm543_vm1, %v3434_v57, %v3416_v52  ;;  %v11559_v52 = vadd.f32 %v9874_v55, %v3880_v12  ;;  %v3881_v57 = vsel %vm762_vm8, %v3879_v62, %v3880_v12 }
0x14e7   :  { %v3428_v29 = vpop.permute.xlu1 %3427 }
0x14e8   :  { %v3440_v44 = vsel %vm545_vm2, %v3437_v61, %v3428_v29 }
0x14e9   :  { %9045 = vmatmul.mubr.msk.f32.gmra.mxu0 %vm547_vm3, %v3440_v44 }
0x14ea   :  { %9127 = vmatprep.mubr.msk.f32.mxu0 %vm10302_vm10, %v10301_v36 }
0x159e   :  { %v3525_v22 = vpop.f32.mrf.mxu0 }
0x159f   :  { %v3526_v59 = vadd.f32 %v3525_v22, %v11519_v47  ;;  %v9875_v22 = vld [vmem:[#allocation13 + $0x8] sm:$0xff] }
0x15a0   :  { %v9040_v58 = vpop.f32.mrf.mxu0 }
0x15a1   :  { %v11523_v27 = vadd.f32 %v3526_v59, %v11114_v16  ;;  %v11567_v59 = vadd.f32 %v9875_v22, %v3881_v57  ;;  %v3895_v58 = vsel %vm783_vm9, %v11559_v52, 0.0 }
0x15a2   :  { %v3530_v5 = vpop.f32.mrf.mxu0 }
0x15a3   :  { %v3531_v49 = vadd.f32 %v3530_v5, %v11519_v47  ;;  %v3542_v31 = vsel %vm547_vm3, %v11523_v27, 0.0  ;;  %v3892_v5 = vsel %vm547_vm3, %v11567_v59, 0.0 }
0x15a4   :  { %3543 = vadd.xlane.f32.xlu0 %v3542_v31  ;;  %v9043_v0 = vpop.f32.mrf.mxu0  ;;  %v3600_v31 = vld [vmem:[#allocation21 + $0x30] sm:$0xff] }
0x15a5   :  { %v11529_v46 = vadd.f32 %v3531_v49, %v11120_v3  ;;  %v3874_v3 = vstv %s3873_s12  ;;  %v3601_v49 = vld [vmem:[#allocation21 + $0x38] sm:$0xff]  ;;  %v3599_v0 = vld [vmem:[#allocation21 + $0x28] sm:$0xff] }
0x15a6   :  { %v3875_v35 = vmul.f32 %v9871_v24, %v3874_v3  ;;  %9048 = vmatpush3.msra.mxu1 %v3601_v49 }
0x15a7   :  { %v3545_v26 = vsel %vm547_vm3, %v11529_v46, 0.0  ;;  %9049 = vmatprep.subr.mxu1 %v10301_v36 }
0x15a8   :  { %3546 = vadd.xlane.f32.xlu1 %v3545_v26  ;;  %9050 = vmatpush3.msra.mxu1 %v3600_v31  ;;  %v3598_v26 = vld [vmem:[#allocation21 + $0x20] sm:$0xff] }
0x15a9   :  { %v3535_v53 = vpop.f32.mrf.mxu0  ;;  %9051 = vmatprep.subr.mxu1 %v10301_v36 }
0x15aa   :  { %v3536_v2 = vadd.f32 %v3535_v53, %v11519_v47  ;;  %9052 = vmatpush3.msra.mxu1 %v3599_v0 }
0x15ab   :  { %v9046_v16 = vpop.f32.mrf.mxu0  ;;  %9053 = vmatprep.subr.mxu1 %v10301_v36 }
0x15ac   :  { %v11535_v50 = vadd.f32 %v3536_v2, %v11126_v28  ;;  %v9872_v28 = vld [vmem:[#allocation12 + $0x2] sm:$0x1]  ;;  %9054 = vmatpush3.msra.mxu1 %v3598_v26  ;;  %v3706_v26 = vld [vmem:[#allocation24 + $0x78] sm:$0xff] }
0x15ad   :  { %v3876_v63 = vadd.f32 %v9872_v28, %v3875_v35  ;;  %9064 = vmatprep.subr.mxu1 %v10301_v36 }
0x15ae   :  { %v3548_v13 = vsel %vm783_vm9, %v11535_v50, 0.0 }
0x15af   :  { %3549 = vadd.xlane.f32.xlu0 %v3548_v13  ;;  %v3885_v20 = vsel %vm762_vm8, %v3876_v63, %v3879_v62 }
0x15b0   :  { %v11554_v11 = vadd.f32 %v9873_v19, %v3885_v20  ;;  %v9876_v20 = vld [vmem:[#allocation15 + $0x4] sm:$0xf] }
0x15b1   :  { %v11597_v55 = vrot.slane %v9876_v20, %v11068_v15 }
0x15b2   :  { %v3889_v61 = vsel %vm547_vm3, %v11554_v11, 0.0 }
0x162d   :  { %v3544_v9 = vpop.xlane.xlu0 %3543 }
0x162e   :  { %v3551_v10 = vmul.f32 0.03125, %v3544_v9 }
0x1630   :  { %v11541_v14 = vsub.f32 %v11523_v27, %v3551_v10 }
0x1631   :  { %v3547_v8 = vpop.xlane.xlu1 %3546 }
0x1632   :  { %v3552_v23 = vmul.f32 0.03125, %v3547_v8  ;;  %v3557_v32 = vmul.f32 %v11541_v14, %v11541_v14 }
0x1634   :  { %v11547_v6 = vsub.f32 %v11529_v46, %v3552_v23  ;;  %v3560_v56 = vsel %vm547_vm3, %v3557_v32, 0.0 }
0x1635   :  { %3561 = vadd.xlane.f32.xlu0 %v3560_v56 }
0x1636   :  { %v3558_v54 = vmul.f32 %v11547_v6, %v11547_v6 }
0x1638   :  { %v3550_v25 = vpop.xlane.xlu0 %3549  ;;  %v3563_v17 = vsel %vm547_vm3, %v3558_v54, 0.0  ;;  %v11587_v54 = vrot.slane %v9876_v20, %v11065_v39 }
0x1639   :  { %v3553_v41 = vmul.f32 0.03125, %v3550_v25  ;;  %3564 = vadd.xlane.f32.xlu1 %v3563_v17 }
0x163b   :  { %v11557_v38 = vsub.f32 %v11535_v50, %v3553_v41 }
0x163d   :  { %3890 = vadd.xlane.f32.xlu1 %v3889_v61  ;;  %v3559_v29 = vmul.f32 %v11557_v38, %v11557_v38 }
0x163f   :  { %v3566_v44 = vsel %vm783_vm9, %v3559_v29, 0.0 }
0x1640   :  { %3567 = vadd.xlane.f32.xlu0 %v3566_v44 }
0x1641   :  { %3896 = vadd.xlane.f32.xlu1 %v3895_v58 }
0x1644   :  { %3893 = vadd.xlane.f32.xlu0 %v3892_v5 }
0x16be   :  { %v3562_v53 = vpop.xlane.xlu0 %3561 }
0x16bf   :  { %v3569_v2 = vmul.f32 0.03125, %v3562_v53  ;;  %v3705_v53 = vld [vmem:[#allocation24 + $0x70] sm:$0xff] }
0x16c1   :  { %v3572_v16 = vadd.f32 1e-05, %v3569_v2  ;;  %v3704_v2 = vld [vmem:[#allocation24 + $0x68] sm:$0xff] }
0x16c2   :  { %v3565_v13 = vpop.xlane.xlu1 %3564 }
0x16c3   :  { %9743 = vrsqrt.f32 %v3572_v16  ;;  %v3570_v3 = vmul.f32 0.03125, %v3565_v13  ;;  %v3703_v16 = vld [vmem:[#allocation24 + $0x60] sm:$0xff]  ;;  %v3701_v13 = vld [vmem:[#allocation24 + $0x50] sm:$0xff] }
0x16c5   :  { %v3573_v4 = vadd.f32 1e-05, %v3570_v3  ;;  %v3700_v3 = vld [vmem:[#allocation24 + $0x48] sm:$0xff] }
0x16c6   :  { %v3891_v1 = vpop.xlane.xlu1 %3890 }
0x16c7   :  { %9745 = vrsqrt.f32 %v3573_v4  ;;  %v3898_v24 = vmul.f32 0.03125, %v3891_v1  ;;  %v3699_v4 = vld [vmem:[#allocation24 + $0x40] sm:$0xff] }
0x16c9   :  { %v11578_v35 = vsub.f32 %v11554_v11, %v3898_v24  ;;  %v3568_v9 = vpop.xlane.xlu0 %3567 }
0x16ca   :  { %v3571_v10 = vmul.f32 0.03125, %v3568_v9  ;;  %v3897_v28 = vpop.xlane.xlu1 %3896 }
0x16cb   :  { %v3900_v63 = vmul.f32 0.03125, %v3897_v28  ;;  %v3904_v62 = vmul.f32 %v11578_v35, %v11578_v35 }
0x16cc   :  { %v3574_v8 = vadd.f32 1e-05, %v3571_v10 }
0x16cd   :  { %v11583_v23 = vsub.f32 %v11559_v52, %v3900_v63  ;;  %v3894_v32 = vpop.xlane.xlu0 %3893  ;;  %v3907_v18 = vsel %vm547_vm3, %v3904_v62, 0.0 }
0x16ce   :  { %9747 = vrsqrt.f32 %v3574_v8  ;;  %v3899_v56 = vmul.f32 0.03125, %v3894_v32  ;;  %3908 = vadd.xlane.f32.xlu0 %v3907_v18  ;;  %v3596_v32 = vld [vmem:[#allocation22 + $0x2] sm:$0x3] }
0x16cf   :  { %v3906_v12 = vmul.f32 %v11583_v23, %v11583_v23  ;;  %v11628_v18 = vrot.slane %v3596_v32, %v10690_v37 }
0x16d0   :  { %v9744_v25 = vpop.eup %9743  ;;  %v11592_v17 = vsub.f32 %v11567_v59, %v3899_v56 }
0x16d1   :  { %v3578_v19 = vmul.f32 %v9744_v25, %v11541_v14  ;;  %v3913_v41 = vsel %vm783_vm9, %v3906_v12, 0.0 }
0x16d2   :  { %3914 = vadd.xlane.f32.xlu0 %v3913_v41  ;;  %v3905_v57 = vmul.f32 %v11592_v17, %v11592_v17 }
0x16d3   :  { %v3585_v61 = vmul.f32 %v11587_v54, %v3578_v19 }
0x16d4   :  { %v9746_v29 = vpop.eup %9745  ;;  %v3910_v44 = vsel %vm547_vm3, %v3905_v57, 0.0 }
0x16d5   :  { %3911 = vadd.xlane.f32.xlu1 %v3910_v44  ;;  %v3592_v22 = vadd.f32 %v11597_v55, %v3585_v61  ;;  %v3579_v58 = vmul.f32 %v9746_v29, %v11547_v6  ;;  %v9877_v29 = vld [vmem:[#allocation16 + $0x18] sm:$0xff] }
0x16d7   :  { %9056 = vmatmul.mubr.msk.f32.vlgmr.msra.gmra.mxu1 %vm547_vm3, %v3592_v22  ;;  %v3586_v14 = vmul.f32 %v11587_v54, %v3579_v58  ;;  %v9878_v58 = vld [vmem:[#allocation16 + $0x10] sm:$0xff] }
0x16d8   :  { %9058 = vmatprep.mubr.msk.f32.mxu1 %vm10302_vm10, %v10301_v36  ;;  %9065 = vmatpush3.msra.mxu1 %v3706_v26 }
0x16d9   :  { %v3593_v5 = vadd.f32 %v11597_v55, %v3586_v14  ;;  %9066 = vmatprep.subr.mxu1 %v10301_v36 }
0x16da   :  { %9067 = vmatpush3.msra.mxu1 %v3705_v53 }
0x16db   :  { %v9748_v49 = vpop.eup %9747  ;;  %9059 = vmatmul.mubr.msk.f32.gmra.mxu1 %vm547_vm3, %v3593_v5  ;;  %9068 = vmatprep.subr.mxu1 %v10301_v36  ;;  %v9879_v5 = vld [vmem:[#allocation16 + $0x8] sm:$0xff] }
0x16dc   :  { %9061 = vmatprep.mubr.msk.f32.mxu1 %vm10302_vm10, %v10301_v36  ;;  %v3580_v31 = vmul.f32 %v9748_v49, %v11557_v38  ;;  %9069 = vmatpush3.msra.mxu1 %v3704_v2  ;;  %v3702_v38 = vld [vmem:[#allocation24 + $0x58] sm:$0xff] }
0x16dd   :  { %9070 = vmatprep.subr.mxu1 %v10301_v36 }
0x16de   :  { %v3587_v0 = vmul.f32 %v11587_v54, %v3580_v31  ;;  %9071 = vmatpush3.msra.mxu1 %v3703_v16 }
0x16df   :  { %9072 = vmatprep.subr.mxu1 %v10301_v36 }
0x16e0   :  { %v3594_v6 = vadd.f32 %v11597_v55, %v3587_v0  ;;  %9073 = vmatpush3.msra.mxu1 %v3702_v38 }
0x16e1   :  { %9074 = vmatprep.subr.mxu1 %v10301_v36 }
0x16e2   :  { %9062 = vmatmul.mubr.msk.f32.gmra.mxu1 %vm547_vm3, %v3594_v6  ;;  %v9880_v6 = vld [vmem:[#allocation16] sm:$0xff] }
0x16e3   :  { %9080 = vmatprep.mubr.msk.f32.mxu1 %vm10302_vm10, %v10301_v36  ;;  %9075 = vmatpush3.msra.mxu1 %v3701_v13 }
0x16e4   :  { %9076 = vmatprep.subr.mxu1 %v10301_v36 }
0x16e5   :  { %9077 = vmatpush3.msra.mxu1 %v3700_v3 }
0x16e6   :  { %9078 = vmatprep.subr.mxu1 %v10301_v36 }
0x16e7   :  { %9079 = vmatpush3.msra.mxu1 %v3699_v4 }
0x16e8   :  { %9089 = vmatprep.subr.mxu1 %v10301_v36 }
0x1757   :  { %v3909_v1 = vpop.xlane.xlu0 %3908 }
0x1758   :  { %v3916_v24 = vmul.f32 0.03125, %v3909_v1 }
0x175a   :  { %v3919_v10 = vadd.f32 1e-05, %v3916_v24 }
0x175b   :  { %v3915_v63 = vpop.xlane.xlu0 %3914 }
0x175c   :  { %9749 = vrsqrt.f32 %v3919_v10  ;;  %v3918_v62 = vmul.f32 0.03125, %v3915_v63 }
0x175e   :  { %v3912_v9 = vpop.xlane.xlu1 %3911  ;;  %v3921_v56 = vadd.f32 1e-05, %v3918_v62 }
0x175f   :  { %v3917_v28 = vmul.f32 0.03125, %v3912_v9 }
0x1761   :  { %v3920_v8 = vadd.f32 1e-05, %v3917_v28 }
0x1763   :  { %9751 = vrsqrt.f32 %v3920_v8 }
0x1764   :  { %9753 = vrsqrt.f32 %v3921_v56 }
0x1769   :  { %v9750_v44 = vpop.eup %9749 }
0x176a   :  { %v3925_v14 = vmul.f32 %v9750_v44, %v11578_v35 }
0x176c   :  { %v3928_v53 = vmul.f32 %v3925_v14, %v10696_v42 }
0x176e   :  { %v3931_v38 = vadd.f32 %v3928_v53, %v10702_v51 }
0x1770   :  { %v9752_v49 = vpop.eup %9751 }
0x1771   :  { %v3926_v35 = vmul.f32 %v9752_v49, %v11592_v17  ;;  %v9754_v16 = vpop.eup %9753 }
0x1772   :  { %v3927_v3 = vmul.f32 %v9754_v16, %v11583_v23 }
0x1773   :  { %v3929_v13 = vmul.f32 %v3926_v35, %v10696_v42 }
0x1774   :  { %v3930_v17 = vmul.f32 %v3927_v3, %v10696_v42 }
0x1775   :  { %v3932_v4 = vadd.f32 %v3929_v13, %v10702_v51 }
0x1776   :  { %v3933_v1 = vadd.f32 %v3930_v17, %v10702_v51 }
0x1797   :  { %v3681_v20 = vpop.f32.mrf.mxu1 }
0x1798   :  { %v3682_v12 = vadd.f32 %v3681_v20, %v11628_v18 }
0x1799   :  { %v9057_v25 = vpop.f32.mrf.mxu1 }
0x179a   :  { %v3695_v19 = vmax.f32 %v3682_v12, 0.0 }
0x179b   :  { %v3686_v41 = vpop.f32.mrf.mxu1 }
0x179c   :  { %v3687_v57 = vadd.f32 %v3686_v41, %v11628_v18  ;;  %9081 = vmatmul.mubr.msk.f32.vlgmr.msra.gmra.mxu1 %vm653_vm7, %v3695_v19 }
0x179d   :  { %v9060_v61 = vpop.f32.mrf.mxu1  ;;  %9083 = vmatprep.mubr.msk.f32.mxu1 %vm10302_vm10, %v10301_v36  ;;  %9090 = vmatpush3.msra.mxu1 %v9877_v29 }
0x179e   :  { %v3696_v22 = vmax.f32 %v3687_v57, 0.0  ;;  %9091 = vmatprep.subr.mxu1 %v10301_v36 }
0x179f   :  { %9092 = vmatpush3.msra.mxu1 %v9878_v58 }
0x17a0   :  { %9084 = vmatmul.mubr.msk.f32.gmra.mxu1 %vm653_vm7, %v3696_v22  ;;  %9093 = vmatprep.subr.mxu1 %v10301_v36 }
0x17a1   :  { %9086 = vmatprep.mubr.msk.f32.mxu1 %vm10302_vm10, %v10301_v36  ;;  %9094 = vmatpush3.msra.mxu1 %v9879_v5 }
0x17a2   :  { %v3691_v31 = vpop.f32.mrf.mxu1  ;;  %9095 = vmatprep.subr.mxu1 %v10301_v36 }
0x17a3   :  { %v3692_v0 = vadd.f32 %v3691_v31, %v11628_v18  ;;  %9096 = vmatpush3.msra.mxu1 %v9880_v6 }
0x17a4   :  { %v9063_v26 = vpop.f32.mrf.mxu1  ;;  %9106 = vmatprep.subr.mxu1 %v10301_v36 }
0x17a5   :  { %v3697_v2 = vmax.f32 %v3692_v0, 0.0 }
0x17a7   :  { %9087 = vmatmul.mubr.msk.f32.gmra.mxu1 %vm653_vm7, %v3697_v2 }
0x17a8   :  { %9097 = vmatprep.mubr.msk.f32.mxu1 %vm10302_vm10, %v10301_v36 }
0x17ab   :  { %9098 = vmatmul.mubr.msk.f32.vlgmr.msra.gmra.mxu1 %vm547_vm3, %v3931_v38 }
0x17ac   :  { %9100 = vmatprep.mubr.msk.f32.mxu1 %vm10302_vm10, %v10301_v36 }
0x17af   :  { %9101 = vmatmul.mubr.msk.f32.gmra.mxu1 %vm547_vm3, %v3932_v4 }
0x17b0   :  { %9103 = vmatprep.mubr.msk.f32.mxu1 %vm10302_vm10, %v10301_v36 }
0x17b3   :  { %9104 = vmatmul.mubr.msk.f32.gmra.mxu1 %vm547_vm3, %v3933_v1  ;;  %v9881_v1 = vld [vmem:[#allocation19 + $0x18] sm:$0xff] }
0x17b4   :  { %9112 = vmatprep.mubr.msk.f32.mxu1 %vm10302_vm10, %v10301_v36 }
0x185c   :  { %v11664_v23 = vpop.f32.mrf.mxu1 }
0x185e   :  { %v9082_v24 = vpop.f32.mrf.mxu1 }
0x185f   :  { %v9882_v24 = vld [vmem:[#allocation19 + $0x10] sm:$0xff] }
0x1860   :  { %v11666_v9 = vpop.f32.mrf.mxu1 }
0x1862   :  { %v9085_v10 = vpop.f32.mrf.mxu1 }
0x1863   :  { %v9883_v10 = vld [vmem:[#allocation19 + $0x8] sm:$0xff] }
0x1867   :  { %v11668_v28 = vpop.f32.mrf.mxu1 }
0x1869   :  { %v9088_v42 = vpop.f32.mrf.mxu1 }
0x186a   :  { %v9884_v42 = vld [vmem:[#allocation19] sm:$0xff] }
0x186b   :  { %v4009_v63 = vpop.f32.mrf.mxu1 }
0x186c   :  { %v11683_v25 = vadd.f32 %v4009_v63, %v10727_v60 }
0x186d   :  { %v9099_v62 = vpop.f32.mrf.mxu1 }
0x186f   :  { %v4014_v8 = vpop.f32.mrf.mxu1 }
0x1870   :  { %v11671_v32 = vadd.f32 %v4014_v8, %v10727_v60 }
0x1871   :  { %v9102_v51 = vpop.f32.mrf.mxu1 }
0x1872   :  { %4028 = vrot.lane.b32.xlu0 %v11671_v32, %s10303_s11 }
0x1873   :  { %v4019_v56 = vpop.f32.mrf.mxu1 }
0x1874   :  { %v11676_v20 = vadd.f32 %v4019_v56, %v10727_v60 }
0x1875   :  { %v9105_v12 = vpop.f32.mrf.mxu1 }
0x1876   :  { %4267 = vrot.lane.b32.xlu0 %v11671_v32, %s10304_s25  ;;  %4030 = vrot.lane.b32.xlu1 %v11676_v20, %s10303_s11 }
0x187a   :  { %4259 = vrot.lane.b32.xlu0 %v11683_v25, %s10293_s16  ;;  %4026 = vrot.lane.b32.xlu1 %v11683_v25, %s10303_s11 }
0x187e   :  { %4261 = vrot.lane.b32.xlu0 %v11671_v32, %s10293_s16  ;;  %4269 = vrot.lane.b32.xlu1 %v11676_v20, %s10304_s25 }
0x1882   :  { %4263 = vrot.lane.b32.xlu0 %v11676_v20, %s10293_s16  ;;  %4265 = vrot.lane.b32.xlu1 %v11683_v25, %s10304_s25 }
0x1886   :  { %4498 = vrot.lane.b32.xlu0 %v11683_v25, %s10299_s29  ;;  %4508 = vrot.lane.b32.xlu1 %v11676_v20, %s10305_s3 }
0x188a   :  { %4500 = vrot.lane.b32.xlu0 %v11671_v32, %s10299_s29  ;;  %4506 = vrot.lane.b32.xlu1 %v11671_v32, %s10305_s3 }
0x188e   :  { %4502 = vrot.lane.b32.xlu0 %v11676_v20, %s10299_s29  ;;  %4504 = vrot.lane.b32.xlu1 %v11683_v25, %s10305_s3 }
0x1892   :  { %4737 = vrot.lane.b32.xlu0 %v11683_v25, %s10300_s5  ;;  %4747 = vrot.lane.b32.xlu1 %v11676_v20, %s10306_s4 }
0x1896   :  { %4741 = vrot.lane.b32.xlu0 %v11676_v20, %s10300_s5  ;;  %4745 = vrot.lane.b32.xlu1 %v11671_v32, %s10306_s4 }
0x189a   :  { %4160 = vrot.lane.b32.xlu0 %v11683_v25, %s10286_s22  ;;  %4743 = vrot.lane.b32.xlu1 %v11683_v25, %s10306_s4 }
0x189e   :  { %4399 = vrot.lane.b32.xlu0 %v11683_v25, %s10297_s2  ;;  %4739 = vrot.lane.b32.xlu1 %v11671_v32, %s10300_s5 }
0x18a2   :  { %4164 = vrot.lane.b32.xlu0 %v11676_v20, %s10286_s22  ;;  %4162 = vrot.lane.b32.xlu1 %v11671_v32, %s10286_s22 }
0x18a6   :  { %4403 = vrot.lane.b32.xlu0 %v11676_v20, %s10297_s2  ;;  %4401 = vrot.lane.b32.xlu1 %v11671_v32, %s10297_s2 }
0x18e4   :  { %v4029_v60 = vpop.permute.xlu0 %4028 }
0x18e8   :  { %v4031_v19 = vpop.permute.xlu1 %4030  ;;  %v4268_v41 = vpop.permute.xlu0 %4267 }
0x18e9   :  { %9107 = vmatpush3.xpose.msk.msra.mxu1 %vm541_vm0, %v4031_v19 }
0x18ea   :  { %9108 = vmatprep.subr.mxu1 %v10301_v36 }
0x18ec   :  { %v4027_v57 = vpop.permute.xlu1 %4026  ;;  %v4260_v61 = vpop.permute.xlu0 %4259 }
0x18ed   :  { %9109 = vmatpush3.xpose.msk.msra.mxu1 %vm541_vm0, %v4029_v60 }
0x18ee   :  { %9110 = vmatprep.subr.mxu1 %v10301_v36 }
0x18f0   :  { %v4270_v29 = vpop.permute.xlu1 %4269  ;;  %v4262_v44 = vpop.permute.xlu0 %4261 }
0x18f1   :  { %9111 = vmatpush3.xpose.msk.msra.mxu1 %vm541_vm0, %v4027_v57 }
0x18f2   :  { %9136 = vmatprep.subr.mxu1 %v10301_v36 }
0x18f4   :  { %v4266_v22 = vpop.permute.xlu1 %4265  ;;  %9113 = vmatmul.mubr.msk.f32.vlgmr.msra.gmra.mxu1 %vm541_vm0, %v11683_v25  ;;  %v4264_v58 = vpop.permute.xlu0 %4263 }
0x18f5   :  { %9137 = vmatpush3.xpose.msk.msra.mxu1 %vm541_vm0, %v4270_v29  ;;  %9115 = vmatprep.mubr.msk.f32.mxu1 %vm10302_vm10, %v10301_v36 }
0x18f6   :  { %9138 = vmatprep.subr.mxu1 %v10301_v36 }
0x18f8   :  { %v4509_v14 = vpop.permute.xlu1 %4508  ;;  %9116 = vmatmul.mubr.msk.f32.gmra.mxu1 %vm541_vm0, %v11671_v32  ;;  %v4499_v5 = vpop.permute.xlu0 %4498 }
0x18f9   :  { %9139 = vmatpush3.xpose.msk.msra.mxu1 %vm541_vm0, %v4268_v41  ;;  %9118 = vmatprep.mubr.msk.f32.mxu1 %vm10302_vm10, %v10301_v36 }
0x18fa   :  { %9140 = vmatprep.subr.mxu1 %v10301_v36 }
0x18fc   :  { %v4507_v49 = vpop.permute.xlu1 %4506  ;;  %9119 = vmatmul.mubr.msk.f32.gmra.mxu1 %vm541_vm0, %v11676_v20  ;;  %v4501_v31 = vpop.permute.xlu0 %4500 }
0x18fd   :  { %9141 = vmatpush3.xpose.msk.msra.mxu1 %vm541_vm0, %v4266_v22  ;;  %9142 = vmatprep.mubr.msk.f32.mxu1 %vm10302_vm10, %v10301_v36 }
0x18fe   :  { %9166 = vmatprep.subr.mxu1 %v10301_v36 }
0x1900   :  { %v4505_v0 = vpop.permute.xlu1 %4504  ;;  %9143 = vmatmul.mubr.msk.f32.vlgmr.msra.gmra.mxu1 %vm541_vm0, %v4260_v61  ;;  %v4503_v6 = vpop.permute.xlu0 %4502 }
0x1901   :  { %9167 = vmatpush3.xpose.msk.msra.mxu1 %vm541_vm0, %v4509_v14  ;;  %9145 = vmatprep.mubr.msk.f32.mxu1 %vm10302_vm10, %v10301_v36 }
0x1902   :  { %9168 = vmatprep.subr.mxu1 %v10301_v36 }
0x1904   :  { %v4748_v26 = vpop.permute.xlu1 %4747  ;;  %9146 = vmatmul.mubr.msk.f32.gmra.mxu1 %vm541_vm0, %v4262_v44  ;;  %v4738_v53 = vpop.permute.xlu0 %4737 }
0x1905   :  { %9169 = vmatpush3.xpose.msk.msra.mxu1 %vm541_vm0, %v4507_v49  ;;  %9148 = vmatprep.mubr.msk.f32.mxu1 %vm10302_vm10, %v10301_v36 }
0x1906   :  { %9170 = vmatprep.subr.mxu1 %v10301_v36 }
0x1908   :  { %v4746_v2 = vpop.permute.xlu1 %4745  ;;  %9149 = vmatmul.mubr.msk.f32.gmra.mxu1 %vm541_vm0, %v4264_v58  ;;  %v4742_v35 = vpop.permute.xlu0 %4741 }
0x1909   :  { %9171 = vmatpush3.xpose.msk.msra.mxu1 %vm541_vm0, %v4505_v0  ;;  %9172 = vmatprep.mubr.msk.f32.mxu1 %vm10302_vm10, %v10301_v36 }
0x190a   :  { %9196 = vmatprep.subr.mxu1 %v10301_v36 }
0x190c   :  { %v4744_v16 = vpop.permute.xlu1 %4743  ;;  %9173 = vmatmul.mubr.msk.f32.vlgmr.msra.gmra.mxu1 %vm541_vm0, %v4499_v5  ;;  %v4161_v38 = vpop.permute.xlu0 %4160 }
0x190d   :  { %9197 = vmatpush3.xpose.msk.msra.mxu1 %vm541_vm0, %v4748_v26  ;;  %9175 = vmatprep.mubr.msk.f32.mxu1 %vm10302_vm10, %v10301_v36 }
0x190e   :  { %9198 = vmatprep.subr.mxu1 %v10301_v36 }
0x1910   :  { %v4740_v13 = vpop.permute.xlu1 %4739  ;;  %9176 = vmatmul.mubr.msk.f32.gmra.mxu1 %vm541_vm0, %v4501_v31  ;;  %v11778_v3 = vpop.permute.xlu0 %4399 }
0x1911   :  { %9199 = vmatpush3.xpose.msk.msra.mxu1 %vm541_vm0, %v4746_v2  ;;  %9178 = vmatprep.mubr.msk.f32.mxu1 %vm10302_vm10, %v10301_v36 }
0x1912   :  { %9200 = vmatprep.subr.mxu1 %v10301_v36 }
0x1914   :  { %9179 = vmatmul.mubr.msk.f32.gmra.mxu1 %vm541_vm0, %v4503_v6  ;;  %v4165_v4 = vpop.permute.xlu0 %4164  ;;  %v4163_v17 = vpop.permute.xlu1 %4162 }
0x1915   :  { %9122 = vmatpush3.msk.msra.mxu0 %vm762_vm8, %v4165_v4  ;;  %9201 = vmatpush3.xpose.msk.msra.mxu1 %vm541_vm0, %v4744_v16 }
0x1916   :  { %9123 = vmatprep.subr.mxu0 %v10301_v36  ;;  %9202 = vmatprep.mubr.msk.f32.mxu1 %vm10302_vm10, %v10301_v36 }
0x1917   :  { %9124 = vmatpush3.msra.mxu0 %v4163_v17  ;;  %9226 = vmatprep.subr.mxu1 %v10301_v36 }
0x1918   :  { %9125 = vmatprep.subr.mxu0 %v10301_v36  ;;  %9203 = vmatmul.mubr.msk.f32.vlgmr.msra.gmra.mxu1 %vm541_vm0, %v4738_v53 }
0x1919   :  { %9126 = vmatpush3.msra.mxu0 %v4161_v38  ;;  %9205 = vmatprep.mubr.msk.f32.mxu1 %vm10302_vm10, %v10301_v36 }
0x191a   :  { %9151 = vmatprep.subr.mxu0 %v10301_v36  ;;  %9227 = vmatpush3.msra.mxu1 %v9881_v1 }
0x191b   :  { %9228 = vmatprep.subr.mxu1 %v10301_v36 }
0x191c   :  { %9206 = vmatmul.mubr.msk.f32.gmra.mxu1 %vm541_vm0, %v4740_v13 }
0x191d   :  { %9208 = vmatprep.mubr.msk.f32.mxu1 %vm10302_vm10, %v10301_v36  ;;  %9229 = vmatpush3.msra.mxu1 %v9882_v24 }
0x191e   :  { %9230 = vmatprep.subr.mxu1 %v10301_v36 }
0x191f   :  { %9231 = vmatpush3.msra.mxu1 %v9883_v10 }
0x1920   :  { %9209 = vmatmul.mubr.msk.f32.gmra.mxu1 %vm541_vm0, %v4742_v35  ;;  %9232 = vmatprep.subr.mxu1 %v10301_v36 }
0x1921   :  { %9233 = vmatpush3.msra.mxu1 %v9884_v42  ;;  %9234 = vmatprep.mubr.msk.f32.mxu1 %vm10302_vm10, %v10301_v36 }
0x1922   :  { %9260 = vmatprep.subr.mxu1 %v10301_v36 }
0x19b4   :  { %v4110_v63 = vpop.f32.mrf.mxu1 }
0x19b5   :  { %v11806_v62 = vmul.f32 0.35355338, %v4110_v63 }
0x19b6   :  { %v9114_v8 = vpop.f32.mrf.mxu1 }
0x19b7   :  { %v4127_v51 = vsel %vm1034_vm11, %v11806_v62, -inf }
0x19b8   :  { %4128 = vmax.xlane.f32.xlu1 %v4127_v51  ;;  %v4115_v56 = vpop.f32.mrf.mxu1 }
0x19b9   :  { %v11810_v12 = vmul.f32 0.35355338, %v4115_v56 }
0x19ba   :  { %v9117_v60 = vpop.f32.mrf.mxu1 }
0x19bb   :  { %v4130_v19 = vsel %vm1034_vm11, %v11810_v12, -inf }
0x19bc   :  { %4131 = vmax.xlane.f32.xlu0 %v4130_v19  ;;  %v4120_v41 = vpop.f32.mrf.mxu1 }
0x19bd   :  { %v11814_v57 = vmul.f32 0.35355338, %v4120_v41 }
0x19be   :  { %v9120_v61 = vpop.f32.mrf.mxu1 }
0x19bf   :  { %v4133_v29 = vsel %vm1041_vm12, %v11814_v57, -inf }
0x19c0   :  { %4134 = vmax.xlane.f32.xlu0 %v4133_v29  ;;  %v4349_v44 = vpop.f32.mrf.mxu1 }
0x19c1   :  { %v11818_v22 = vmul.f32 0.35355338, %v4349_v44 }
0x19c2   :  { %v9144_v58 = vpop.f32.mrf.mxu1 }
0x19c3   :  { %v4366_v14 = vsel %vm1034_vm11, %v11818_v22, -inf }
0x19c4   :  { %4367 = vmax.xlane.f32.xlu1 %v4366_v14  ;;  %v4354_v5 = vpop.f32.mrf.mxu1 }
0x19c5   :  { %v11822_v49 = vmul.f32 0.35355338, %v4354_v5 }
0x19c6   :  { %v9147_v31 = vpop.f32.mrf.mxu1 }
0x19c7   :  { %v4369_v0 = vsel %vm1034_vm11, %v11822_v49, -inf }
0x19c8   :  { %4370 = vmax.xlane.f32.xlu0 %v4369_v0  ;;  %v4359_v6 = vpop.f32.mrf.mxu1  ;;  %v11860_v0 = vpop.permute.xlu1 %4401 }
0x19c9   :  { %v11826_v26 = vmul.f32 0.35355338, %v4359_v6  ;;  %v11862_v6 = vpop.permute.xlu0 %4403 }
0x19ca   :  { %v9150_v53 = vpop.f32.mrf.mxu1 }
0x19cb   :  { %v4372_v2 = vsel %vm1041_vm12, %v11826_v26, -inf }
0x19cc   :  { %4373 = vmax.xlane.f32.xlu1 %v4372_v2  ;;  %v4588_v35 = vpop.f32.mrf.mxu1 }
0x19cd   :  { %v11830_v16 = vmul.f32 0.35355338, %v4588_v35 }
0x19ce   :  { %v9174_v38 = vpop.f32.mrf.mxu1 }
0x19cf   :  { %v4605_v13 = vsel %vm1034_vm11, %v11830_v16, -inf }
0x19d0   :  { %4606 = vmax.xlane.f32.xlu0 %v4605_v13  ;;  %v4593_v4 = vpop.f32.mrf.mxu1 }
0x19d1   :  { %v11834_v17 = vmul.f32 0.35355338, %v4593_v4 }
0x19d2   :  { %v9177_v1 = vpop.f32.mrf.mxu1 }
0x19d3   :  { %v4608_v24 = vsel %vm1034_vm11, %v11834_v17, -inf }
0x19d4   :  { %4609 = vmax.xlane.f32.xlu1 %v4608_v24  ;;  %v4598_v10 = vpop.f32.mrf.mxu1 }
0x19d5   :  { %v11838_v42 = vmul.f32 0.35355338, %v4598_v10 }
0x19d6   :  { %v9180_v63 = vpop.f32.mrf.mxu1 }
0x19d7   :  { %v4611_v8 = vsel %vm1041_vm12, %v11838_v42, -inf }
0x19d8   :  { %4612 = vmax.xlane.f32.xlu0 %v4611_v8  ;;  %v4827_v51 = vpop.f32.mrf.mxu1 }
0x19d9   :  { %v11842_v56 = vmul.f32 0.35355338, %v4827_v51 }
0x19da   :  { %v9204_v60 = vpop.f32.mrf.mxu1 }
0x19db   :  { %v4844_v19 = vsel %vm1034_vm11, %v11842_v56, -inf }
0x19dc   :  { %4845 = vmax.xlane.f32.xlu1 %v4844_v19  ;;  %v4832_v41 = vpop.f32.mrf.mxu1 }
0x19dd   :  { %v11846_v61 = vmul.f32 0.35355338, %v4832_v41 }
0x19de   :  { %v9207_v29 = vpop.f32.mrf.mxu1 }
0x19df   :  { %v4847_v44 = vsel %vm1034_vm11, %v11846_v61, -inf }
0x19e0   :  { %4848 = vmax.xlane.f32.xlu0 %v4847_v44  ;;  %v4837_v58 = vpop.f32.mrf.mxu1 }
0x19e1   :  { %v11854_v5 = vmul.f32 0.35355338, %v4837_v58 }
0x19e2   :  { %v9210_v14 = vpop.f32.mrf.mxu1 }
0x19e3   :  { %v4850_v31 = vsel %vm1041_vm12, %v11854_v5, -inf }
0x19ed   :  { %4640 = vrot.lane.b32.xlu1 %v11671_v32, %s10298_s8 }
0x19f6   :  { %4642 = vrot.lane.b32.xlu0 %v11676_v20, %s10298_s8 }
0x1a11   :  { %4851 = vmax.xlane.f32.xlu1 %v4850_v31 }
0x1a22   :  { %4638 = vrot.lane.b32.xlu1 %v11683_v25, %s10298_s8 }
0x1a41   :  { %v4129_v53 = vpop.xlane.xlu1 %4128 }
0x1a42   :  { %v4136_v2 = vsub.f32 %v11806_v62, %v4129_v53 }
0x1a44   :  { %v4139_v35 = vmul.f32 1.442695, %v4136_v2 }
0x1a45   :  { %v4132_v38 = vpop.xlane.xlu0 %4131 }
0x1a46   :  { %9755 = vpow2.f32 %v4139_v35  ;;  %v4137_v13 = vsub.f32 %v11810_v12, %v4132_v38 }
0x1a48   :  { %v4141_v4 = vmul.f32 1.442695, %v4137_v13 }
0x1a49   :  { %v4135_v1 = vpop.xlane.xlu0 %4134 }
0x1a4a   :  { %9757 = vpow2.f32 %v4141_v4  ;;  %v4138_v24 = vsub.f32 %v11814_v57, %v4135_v1 }
0x1a4c   :  { %v4143_v10 = vmul.f32 1.442695, %v4138_v24 }
0x1a4d   :  { %v4368_v63 = vpop.xlane.xlu1 %4367 }
0x1a4e   :  { %9759 = vpow2.f32 %v4143_v10  ;;  %v4375_v8 = vsub.f32 %v11818_v22, %v4368_v63 }
0x1a50   :  { %v4378_v51 = vmul.f32 1.442695, %v4375_v8 }
0x1a51   :  { %v4371_v60 = vpop.xlane.xlu0 %4370 }
0x1a52   :  { %9761 = vpow2.f32 %v4378_v51  ;;  %v4376_v62 = vsub.f32 %v11822_v49, %v4371_v60 }
0x1a53   :  { %v11869_v19 = vpop.eup %9755 }
0x1a54   :  { %v4380_v41 = vmul.f32 1.442695, %v4376_v62  ;;  %v4145_v12 = vsel %vm1034_vm11, %v11869_v19, 0.0 }
0x1a55   :  { %v4374_v29 = vpop.xlane.xlu1 %4373  ;;  %4146 = vadd.xlane.f32.xlu0 %v4145_v12 }
0x1a56   :  { %9763 = vpow2.f32 %v4380_v41  ;;  %v4377_v57 = vsub.f32 %v11826_v26, %v4374_v29 }
0x1a57   :  { %v11874_v44 = vpop.eup %9757 }
0x1a58   :  { %v4382_v58 = vmul.f32 1.442695, %v4377_v57  ;;  %v4148_v22 = vsel %vm1034_vm11, %v11874_v44, 0.0 }
0x1a59   :  { %4149 = vadd.xlane.f32.xlu1 %v4148_v22  ;;  %v4607_v14 = vpop.xlane.xlu0 %4606 }
0x1a5a   :  { %9765 = vpow2.f32 %v4382_v58  ;;  %v4614_v49 = vsub.f32 %v11830_v16, %v4607_v14 }
0x1a5b   :  { %v11879_v31 = vpop.eup %9759 }
0x1a5c   :  { %v4617_v53 = vmul.f32 1.442695, %v4614_v49  ;;  %v4151_v2 = vsel %vm1041_vm12, %v11879_v31, 0.0 }
0x1a5d   :  { %v4610_v35 = vpop.xlane.xlu1 %4609  ;;  %4152 = vadd.xlane.f32.xlu0 %v4151_v2 }
0x1a5e   :  { %9767 = vpow2.f32 %v4617_v53  ;;  %v4615_v26 = vsub.f32 %v11834_v17, %v4610_v35 }
0x1a5f   :  { %v11884_v38 = vpop.eup %9761 }
0x1a60   :  { %v4619_v13 = vmul.f32 1.442695, %v4615_v26  ;;  %v4384_v4 = vsel %vm1034_vm11, %v11884_v38, 0.0 }
0x1a61   :  { %4385 = vadd.xlane.f32.xlu1 %v4384_v4  ;;  %v4613_v24 = vpop.xlane.xlu0 %4612 }
0x1a62   :  { %9769 = vpow2.f32 %v4619_v13  ;;  %v4616_v49 = vsub.f32 %v11838_v42, %v4613_v24 }
0x1a63   :  { %v11888_v16 = vpop.eup %9763 }
0x1a64   :  { %v4387_v1 = vsel %vm1034_vm11, %v11888_v16, 0.0  ;;  %v4621_v53 = vmul.f32 1.442695, %v4616_v49 }
0x1a65   :  { %v4846_v10 = vpop.xlane.xlu1 %4845  ;;  %4388 = vadd.xlane.f32.xlu0 %v4387_v1 }
0x1a66   :  { %v4853_v63 = vsub.f32 %v11842_v56, %v4846_v10 }
0x1a67   :  { %v11893_v8 = vpop.eup %9765 }
0x1a68   :  { %v4856_v17 = vmul.f32 1.442695, %v4853_v63  ;;  %v4390_v51 = vsel %vm1041_vm12, %v11893_v8, 0.0 }
0x1a69   :  { %4391 = vadd.xlane.f32.xlu1 %v4390_v51  ;;  %v4849_v60 = vpop.xlane.xlu0 %4848  ;;  %v4641_v35 = vpop.permute.xlu1 %4640 }
0x1a6a   :  { %9771 = vpow2.f32 %v4856_v17  ;;  %v4854_v62 = vsub.f32 %v11846_v61, %v4849_v60 }
0x1a6b   :  { %v11898_v41 = vpop.eup %9767 }
0x1a6c   :  { %v4858_v12 = vmul.f32 1.442695, %v4854_v62  ;;  %v4623_v29 = vsel %vm1034_vm11, %v11898_v41, 0.0 }
0x1a6d   :  { %4624 = vadd.xlane.f32.xlu1 %v4623_v29 }
0x1a6e   :  { %9773 = vpow2.f32 %v4858_v12 }
0x1a6f   :  { %v11902_v56 = vpop.eup %9769  ;;  %9775 = vpow2.f32 %v4621_v53 }
0x1a70   :  { %v4626_v57 = vsel %vm1034_vm11, %v11902_v56, 0.0 }
0x1a71   :  { %4627 = vadd.xlane.f32.xlu1 %v4626_v57 }
0x1a77   :  { %v11906_v58 = vpop.eup %9771 }
0x1a78   :  { %v4862_v22 = vsel %vm1034_vm11, %v11906_v58, 0.0 }
0x1a79   :  { %4863 = vadd.xlane.f32.xlu1 %v4862_v22 }
0x1a7b   :  { %v11910_v61 = vpop.eup %9773  ;;  %4881 = vrot.lane.b32.xlu0 %v11676_v20, %s10296_s1 }
0x1a7c   :  { %v4865_v14 = vsel %vm1034_vm11, %v11910_v61, 0.0  ;;  %v11919_v2 = vpop.eup %9775 }
0x1a7d   :  { %4866 = vadd.xlane.f32.xlu1 %v4865_v14  ;;  %v4629_v26 = vsel %vm1041_vm12, %v11919_v2, 0.0 }
0x1a8e   :  { %4879 = vrot.lane.b32.xlu1 %v11671_v32, %s10296_s1  ;;  %v4643_v32 = vpop.permute.xlu0 %4642 }
0x1a9a   :  { %v4852_v13 = vpop.xlane.xlu1 %4851  ;;  %4630 = vadd.xlane.f32.xlu0 %v4629_v26 }
0x1a9b   :  { %v4855_v20 = vsub.f32 %v11854_v5, %v4852_v13 }
0x1a9d   :  { %v4860_v4 = vmul.f32 1.442695, %v4855_v20 }
0x1a9e   :  { %v4639_v24 = vpop.permute.xlu1 %4638 }
0x1a9f   :  { %9777 = vpow2.f32 %v4860_v4 }
0x1aac   :  { %v11924_v1 = vpop.eup %9777 }
0x1aad   :  { %v4868_v42 = vsel %vm1041_vm12, %v11924_v1, 0.0 }
0x1aae   :  { %4869 = vadd.xlane.f32.xlu0 %v4868_v42 }
0x1ac4   :  { %4877 = vrot.lane.b32.xlu0 %v11683_v25, %s10296_s1 }
0x1ade   :  { %v4147_v10 = vpop.xlane.xlu0 %4146 }
0x1adf   :  { %9779 = vrcp.f32 %v4147_v10 }
0x1ae2   :  { %v4150_v63 = vpop.xlane.xlu1 %4149 }
0x1ae3   :  { %9781 = vrcp.f32 %v4150_v63 }
0x1ae6   :  { %v4153_v17 = vpop.xlane.xlu0 %4152 }
0x1ae7   :  { %9783 = vrcp.f32 %v4153_v17 }
0x1aea   :  { %v4386_v5 = vpop.xlane.xlu1 %4385 }
0x1aeb   :  { %9785 = vrcp.f32 %v4386_v5  ;;  %v9886_v5 = vld [vmem:[#allocation21 + $0x10] sm:$0xff] }
0x1aec   :  { %v9780_v51 = vpop.eup %9779 }
0x1aed   :  { %v4155_v60 = vmul.f32 %v9780_v51, %v11869_v19  ;;  %v9888_v51 = vld [vmem:[#allocation21] sm:$0xff] }
0x1aee   :  { %v4389_v62 = vpop.xlane.xlu0 %4388 }
0x1aef   :  { %9787 = vrcp.f32 %v4389_v62  ;;  %9128 = vmatmul.mubr.msk.f32.vlgmr.msra.gmra.mxu0 %vm1034_vm11, %v4155_v60 }
0x1af0   :  { %v9782_v12 = vpop.eup %9781  ;;  %9152 = vmatpush3.msk.msra.mxu0 %vm762_vm8, %v11862_v6  ;;  %9130 = vmatprep.mubr.msk.f32.mxu0 %vm10302_vm10, %v10301_v36 }
0x1af1   :  { %9153 = vmatprep.subr.mxu0 %v10301_v36  ;;  %v4157_v25 = vmul.f32 %v9782_v12, %v11874_v44 }
0x1af2   :  { %9154 = vmatpush3.msra.mxu0 %v11860_v0  ;;  %v4392_v29 = vpop.xlane.xlu1 %4391  ;;  %v4882_v26 = vpop.permute.xlu0 %4881 }
0x1af3   :  { %9789 = vrcp.f32 %v4392_v29  ;;  %9155 = vmatprep.subr.mxu0 %v10301_v36  ;;  %9131 = vmatmul.mubr.msk.f32.gmra.mxu0 %vm1034_vm11, %v4157_v25 }
0x1af4   :  { %v9784_v19 = vpop.eup %9783  ;;  %9156 = vmatpush3.msra.mxu0 %v11778_v3  ;;  %9133 = vmatprep.mubr.msk.f32.mxu0 %vm10302_vm10, %v10301_v36 }
0x1af5   :  { %v4159_v6 = vmul.f32 %v9784_v19, %v11879_v31  ;;  %9181 = vmatprep.subr.mxu0 %v10301_v36 }
0x1af6   :  { %v4625_v57 = vpop.xlane.xlu1 %4624 }
0x1af7   :  { %9791 = vrcp.f32 %v4625_v57  ;;  %9134 = vmatmul.mubr.msk.f32.gmra.mxu0 %vm1034_vm11, %v4159_v6 }
0x1af8   :  { %v9786_v0 = vpop.eup %9785  ;;  %9157 = vmatprep.mubr.msk.f32.mxu0 %vm10302_vm10, %v10301_v36 }
0x1af9   :  { %v4394_v44 = vmul.f32 %v9786_v0, %v11884_v38 }
0x1afa   :  { %v4628_v22 = vpop.xlane.xlu1 %4627 }
0x1afb   :  { %9793 = vrcp.f32 %v4628_v22  ;;  %9158 = vmatmul.mubr.msk.f32.vlgmr.msra.gmra.mxu0 %vm1034_vm11, %v4394_v44 }
0x1afc   :  { %v9788_v3 = vpop.eup %9787  ;;  %9182 = vmatpush3.msk.msra.mxu0 %vm762_vm8, %v4643_v32  ;;  %9160 = vmatprep.mubr.msk.f32.mxu0 %vm10302_vm10, %v10301_v36 }
0x1afd   :  { %9183 = vmatprep.subr.mxu0 %v10301_v36  ;;  %v4396_v31 = vmul.f32 %v9788_v3, %v11888_v16 }
0x1afe   :  { %9184 = vmatpush3.msra.mxu0 %v4641_v35 }
0x1aff   :  { %9185 = vmatprep.subr.mxu0 %v10301_v36  ;;  %9161 = vmatmul.mubr.msk.f32.gmra.mxu0 %vm1034_vm11, %v4396_v31 }
0x1b00   :  { %v9790_v38 = vpop.eup %9789  ;;  %9186 = vmatpush3.msra.mxu0 %v4639_v24  ;;  %9163 = vmatprep.mubr.msk.f32.mxu0 %vm10302_vm10, %v10301_v36 }
0x1b01   :  { %v4398_v14 = vmul.f32 %v9790_v38, %v11893_v8  ;;  %9211 = vmatprep.subr.mxu0 %v10301_v36 }
0x1b02   :  { %v4864_v49 = vpop.xlane.xlu1 %4863 }
0x1b03   :  { %9164 = vmatmul.mubr.msk.f32.gmra.mxu0 %vm1034_vm11, %v4398_v14 }
0x1b04   :  { %v9792_v53 = vpop.eup %9791  ;;  %9187 = vmatprep.mubr.msk.f32.mxu0 %vm10302_vm10, %v10301_v36 }
0x1b05   :  { %v4633_v16 = vmul.f32 %v9792_v53, %v11898_v41 }
0x1b06   :  { %v4867_v35 = vpop.xlane.xlu1 %4866 }
0x1b07   :  { %9188 = vmatmul.mubr.msk.f32.vlgmr.msra.gmra.mxu0 %vm1034_vm11, %v4633_v16 }
0x1b08   :  { %v9794_v13 = vpop.eup %9793  ;;  %9212 = vmatpush3.msk.msra.mxu0 %vm762_vm8, %v4882_v26  ;;  %9190 = vmatprep.mubr.msk.f32.mxu0 %vm10302_vm10, %v10301_v36 }
0x1b09   :  { %9213 = vmatprep.subr.mxu0 %v10301_v36  ;;  %v4635_v8 = vmul.f32 %v9794_v13, %v11902_v56 }
0x1b0a   :  { %v4880_v20 = vpop.permute.xlu1 %4879 }
0x1b0b   :  { %9191 = vmatmul.mubr.msk.f32.gmra.mxu0 %vm1034_vm11, %v4635_v8 }
0x1b0c   :  { %9214 = vmatpush3.msra.mxu0 %v4880_v20  ;;  %9193 = vmatprep.mubr.msk.f32.mxu0 %vm10302_vm10, %v10301_v36 }
0x1b0d   :  { %9215 = vmatprep.subr.mxu0 %v10301_v36 }
0x1b23   :  { %v4631_v41 = vpop.xlane.xlu0 %4630 }
0x1b24   :  { %9795 = vrcp.f32 %v4631_v41 }
0x1b25   :  { %9797 = vrcp.f32 %v4864_v49 }
0x1b26   :  { %9799 = vrcp.f32 %v4867_v35 }
0x1b31   :  { %v9796_v4 = vpop.eup %9795 }
0x1b32   :  { %v4637_v42 = vmul.f32 %v9796_v4, %v11919_v2  ;;  %v9798_v32 = vpop.eup %9797  ;;  %v9885_v2 = vld [vmem:[#allocation21 + $0x18] sm:$0xff] }
0x1b33   :  { %v4872_v24 = vmul.f32 %v9798_v32, %v11906_v58  ;;  %v9800_v63 = vpop.eup %9799  ;;  %v9887_v58 = vld [vmem:[#allocation21 + $0x8] sm:$0xff] }
0x1b34   :  { %9194 = vmatmul.mubr.msk.f32.gmra.mxu0 %vm1034_vm11, %v4637_v42  ;;  %v4874_v17 = vmul.f32 %v9800_v63, %v11910_v61 }
0x1b35   :  { %9217 = vmatprep.mubr.msk.f32.mxu0 %vm10302_vm10, %v10301_v36 }
0x1b37   :  { %v4870_v56 = vpop.xlane.xlu0 %4869 }
0x1b38   :  { %9801 = vrcp.f32 %v4870_v56 }
0x1b3b   :  { %v4878_v10 = vpop.permute.xlu0 %4877 }
0x1b3c   :  { %9216 = vmatpush3.msra.mxu0 %v4878_v10 }
0x1b3d   :  { %9218 = vmatmul.mubr.msk.f32.vlgmr.msra.gmra.mxu0 %vm1034_vm11, %v4872_v24  ;;  %9243 = vmatprep.subr.mxu0 %v10301_v36 }
0x1b3e   :  { %9220 = vmatprep.mubr.msk.f32.mxu0 %vm10302_vm10, %v10301_v36  ;;  %9244 = vmatpush3.msra.mxu0 %v9885_v2 }
0x1b3f   :  { %9245 = vmatprep.subr.mxu0 %v10301_v36 }
0x1b40   :  { %9246 = vmatpush3.msra.mxu0 %v9886_v5  ;;  %v9889_v5 = vld [vmem:[#allocation24 + $0x38] sm:$0xff] }
0x1b41   :  { %9221 = vmatmul.mubr.msk.f32.gmra.mxu0 %vm1034_vm11, %v4874_v17  ;;  %9247 = vmatprep.subr.mxu0 %v10301_v36 }
0x1b42   :  { %9223 = vmatprep.mubr.msk.f32.mxu0 %vm10302_vm10, %v10301_v36  ;;  %9248 = vmatpush3.msra.mxu0 %v9887_v58 }
0x1b43   :  { %9249 = vmatprep.subr.mxu0 %v10301_v36 }
0x1b44   :  { %9250 = vmatpush3.msra.mxu0 %v9888_v51 }
0x1b45   :  { %v9802_v60 = vpop.eup %9801  ;;  %9285 = vmatprep.subr.mxu0 %v10301_v36 }
0x1b46   :  { %v4876_v61 = vmul.f32 %v9802_v60, %v11924_v1 }
0x1b48   :  { %9224 = vmatmul.mubr.msk.f32.gmra.mxu0 %vm1034_vm11, %v4876_v61  ;;  %v9890_v61 = vld [vmem:[#allocation24 + $0x30] sm:$0xff] }
0x1b49   :  { %9251 = vmatprep.mubr.msk.f32.mxu0 %vm10302_vm10, %v10301_v36 }
0x1baf   :  { %v4245_v62 = vpop.f32.mrf.mxu0 }
0x1bb1   :  { %v9129_v12 = vpop.f32.mrf.mxu0 }
0x1bb2   :  { %v9891_v12 = vld [vmem:[#allocation24 + $0x28] sm:$0xff] }
0x1bb3   :  { %v4250_v25 = vpop.f32.mrf.mxu0 }
0x1bb5   :  { %v9132_v29 = vpop.f32.mrf.mxu0 }
0x1bb6   :  { %v9892_v29 = vld [vmem:[#allocation24 + $0x20] sm:$0xff] }
0x1bb7   :  { %v4255_v19 = vpop.f32.mrf.mxu0 }
0x1bb9   :  { %v9135_v6 = vpop.f32.mrf.mxu0 }
0x1bbb   :  { %v4484_v57 = vpop.f32.mrf.mxu0 }
0x1bbc   :  { %4979 = vrot.lane.b32.xlu1 %v4484_v57, %s10275_s23 }
0x1bbd   :  { %v9159_v0 = vpop.f32.mrf.mxu0 }
0x1bbf   :  { %v4489_v44 = vpop.f32.mrf.mxu0 }
0x1bc0   :  { %4981 = vrot.lane.b32.xlu0 %v4489_v44, %s10275_s23  ;;  %v9893_v44 = vld [vmem:[#allocation24 + $0x18] sm:$0xff] }
0x1bc1   :  { %v9162_v22 = vpop.f32.mrf.mxu0 }
0x1bc3   :  { %v4494_v1 = vpop.f32.mrf.mxu0 }
0x1bc5   :  { %v9165_v3 = vpop.f32.mrf.mxu0 }
0x1bc6   :  { %v9896_v3 = vld [vmem:[#allocation24] sm:$0xff] }
0x1bc7   :  { %v4723_v31 = vpop.f32.mrf.mxu0 }
0x1bc8   :  { %4991 = vrot.lane.b32.xlu0 %v4723_v31, %s10294_s20 }
0x1bc9   :  { %v9189_v38 = vpop.f32.mrf.mxu0 }
0x1bcb   :  { %v4728_v14 = vpop.f32.mrf.mxu0 }
0x1bcc   :  { %4993 = vrot.lane.b32.xlu1 %v4728_v14, %s10294_s20 }
0x1bcd   :  { %v9192_v49 = vpop.f32.mrf.mxu0 }
0x1bf4   :  { %v4733_v53 = vpop.f32.mrf.mxu0 }
0x1bf6   :  { %v9195_v16 = vpop.f32.mrf.mxu0 }
0x1bfd   :  { %v4962_v35 = vpop.f32.mrf.mxu0 }
0x1bfe   :  { %5003 = vrot.lane.b32.xlu1 %v4962_v35, %s10295_s21 }
0x1bff   :  { %v9219_v26 = vpop.f32.mrf.mxu0 }
0x1c01   :  { %v4967_v13 = vpop.f32.mrf.mxu0 }
0x1c02   :  { %4983 = vrot.lane.b32.xlu1 %v4494_v1, %s10275_s23  ;;  %5005 = vrot.lane.b32.xlu0 %v4967_v13, %s10295_s21  ;;  %v9894_v1 = vld [vmem:[#allocation24 + $0x10] sm:$0xff] }
0x1c03   :  { %v9222_v8 = vpop.f32.mrf.mxu0 }
0x1c06   :  { %4995 = vrot.lane.b32.xlu0 %v4733_v53, %s10294_s20 }
0x1c08   :  { %v4972_v20 = vpop.f32.mrf.mxu0 }
0x1c09   :  { %5007 = vrot.lane.b32.xlu1 %v4972_v20, %s10295_s21 }
0x1c0a   :  { %v9225_v41 = vpop.f32.mrf.mxu0 }
0x1c2e   :  { %v4980_v4 = vpop.permute.xlu1 %4979 }
0x1c2f   :  { %v5012_v24 = vsel %vm541_vm0, %v4245_v62, %v4980_v4 }
0x1c32   :  { %v4982_v42 = vpop.permute.xlu0 %4981 }
0x1c33   :  { %v5013_v17 = vsel %vm541_vm0, %v4250_v25, %v4982_v42 }
0x1c3a   :  { %v4992_v32 = vpop.permute.xlu0 %4991 }
0x1c3b   :  { %v5015_v10 = vsel %vm543_vm1, %v5012_v24, %v4992_v32 }
0x1c3e   :  { %v4994_v56 = vpop.permute.xlu1 %4993 }
0x1c3f   :  { %v5016_v58 = vsel %vm543_vm1, %v5013_v17, %v4994_v56 }
0x1c70   :  { %v5004_v63 = vpop.permute.xlu1 %5003 }
0x1c71   :  { %v5018_v2 = vsel %vm545_vm2, %v5015_v10, %v5004_v63 }
0x1c72   :  { %9235 = vmatmul.mubr.msk.f32.vlgmr.msra.gmra.mxu1 %vm547_vm3, %v5018_v2 }
0x1c73   :  { %9237 = vmatprep.mubr.msk.f32.mxu1 %vm10302_vm10, %v10301_v36  ;;  %9261 = vmatpush3.msra.mxu1 %v9889_v5 }
0x1c74   :  { %v5006_v51 = vpop.permute.xlu0 %5005  ;;  %9262 = vmatprep.subr.mxu1 %v10301_v36  ;;  %v4984_v62 = vpop.permute.xlu1 %4983 }
0x1c75   :  { %v5019_v60 = vsel %vm545_vm2, %v5016_v58, %v5006_v51  ;;  %9263 = vmatpush3.msra.mxu1 %v9890_v61  ;;  %v5014_v6 = vsel %vm541_vm0, %v4255_v19, %v4984_v62  ;;  %v9895_v19 = vld [vmem:[#allocation24 + $0x8] sm:$0xff] }
0x1c76   :  { %9238 = vmatmul.mubr.msk.f32.gmra.mxu1 %vm547_vm3, %v5019_v60  ;;  %9264 = vmatprep.subr.mxu1 %v10301_v36 }
0x1c77   :  { %9240 = vmatprep.mubr.msk.f32.mxu1 %vm10302_vm10, %v10301_v36  ;;  %9265 = vmatpush3.msra.mxu1 %v9891_v12 }
0x1c78   :  { %v4996_v25 = vpop.permute.xlu0 %4995  ;;  %9266 = vmatprep.subr.mxu1 %v10301_v36 }
0x1c79   :  { %9267 = vmatpush3.msra.mxu1 %v9892_v29  ;;  %v5017_v57 = vsel %vm543_vm1, %v5014_v6, %v4996_v25 }
0x1c7a   :  { %9268 = vmatprep.subr.mxu1 %v10301_v36 }
0x1c7b   :  { %v5008_v0 = vpop.permute.xlu1 %5007  ;;  %9269 = vmatpush3.msra.mxu1 %v9893_v44 }
0x1c7c   :  { %v5020_v22 = vsel %vm545_vm2, %v5017_v57, %v5008_v0  ;;  %9270 = vmatprep.subr.mxu1 %v10301_v36 }
0x1c7d   :  { %9241 = vmatmul.mubr.msk.f32.gmra.mxu1 %vm547_vm3, %v5020_v22 }
0x1c7e   :  { %9271 = vmatpush3.msra.mxu1 %v9894_v1  ;;  %9276 = vmatprep.mubr.msk.f32.mxu1 %vm10302_vm10, %v10301_v36 }
0x1c7f   :  { %9272 = vmatprep.subr.mxu1 %v10301_v36 }
0x1c80   :  { %9273 = vmatpush3.msra.mxu1 %v9895_v19 }
0x1c81   :  { %9274 = vmatprep.subr.mxu1 %v10301_v36 }
0x1c82   :  { %9275 = vmatpush3.msra.mxu1 %v9896_v3 }
0x1c83   :  { %9317 = vmatprep.subr.mxu1 %v10301_v36 }
0x1d32   :  { %v5096_v31 = vpop.f32.mrf.mxu1 }
0x1d33   :  { %v5097_v38 = vadd.f32 %v5096_v31, %v11029_v43 }
0x1d34   :  { %v9236_v14 = vpop.f32.mrf.mxu1 }
0x1d35   :  { %v12034_v49 = vadd.f32 %v5097_v38, %v11554_v11 }
0x1d36   :  { %v5101_v53 = vpop.f32.mrf.mxu1 }
0x1d37   :  { %v5102_v16 = vadd.f32 %v5101_v53, %v11029_v43  ;;  %v5113_v35 = vsel %vm547_vm3, %v12034_v49, 0.0 }
0x1d38   :  { %5114 = vadd.xlane.f32.xlu0 %v5113_v35  ;;  %v9239_v26 = vpop.f32.mrf.mxu1 }
0x1d39   :  { %v12040_v13 = vadd.f32 %v5102_v16, %v11567_v59  ;;  %v9897_v16 = vld [vmem:[#allocation16 + $0x38] sm:$0xff]  ;;  %v9898_v26 = vld [vmem:[#allocation16 + $0x30] sm:$0xff] }
0x1d3b   :  { %v5116_v8 = vsel %vm547_vm3, %v12040_v13, 0.0 }
0x1d3c   :  { %5117 = vadd.xlane.f32.xlu1 %v5116_v8 }
0x1d3d   :  { %v5106_v20 = vpop.f32.mrf.mxu1 }
0x1d3e   :  { %v5107_v41 = vadd.f32 %v5106_v20, %v11029_v43 }
0x1d3f   :  { %v9242_v11 = vpop.f32.mrf.mxu1 }
0x1d40   :  { %v12046_v4 = vadd.f32 %v5107_v41, %v11559_v52  ;;  %v9899_v41 = vld [vmem:[#allocation16 + $0x28] sm:$0xff] }
0x1d42   :  { %v5119_v42 = vsel %vm783_vm9, %v12046_v4, 0.0 }
0x1d43   :  { %5120 = vadd.xlane.f32.xlu0 %v5119_v42  ;;  %v9900_v42 = vld [vmem:[#allocation16 + $0x20] sm:$0xff] }
0x1dc1   :  { %v5115_v56 = vpop.xlane.xlu0 %5114 }
0x1dc2   :  { %v5122_v32 = vmul.f32 0.03125, %v5115_v56 }
0x1dc4   :  { %v5125_v59 = vsub.f32 %v12034_v49, %v5122_v32 }
0x1dc5   :  { %v5118_v24 = vpop.xlane.xlu1 %5117 }
0x1dc6   :  { %v5123_v10 = vmul.f32 0.03125, %v5118_v24  ;;  %v5128_v63 = vmul.f32 %v5125_v59, %v5125_v59 }
0x1dc8   :  { %v5126_v2 = vsub.f32 %v12040_v13, %v5123_v10  ;;  %v5131_v17 = vsel %vm547_vm3, %v5128_v63, 0.0 }
0x1dc9   :  { %5132 = vadd.xlane.f32.xlu0 %v5131_v17 }
0x1dca   :  { %v5129_v43 = vmul.f32 %v5126_v2, %v5126_v2 }
0x1dcc   :  { %v5121_v5 = vpop.xlane.xlu0 %5120  ;;  %v5134_v52 = vsel %vm547_vm3, %v5129_v43, 0.0 }
0x1dcd   :  { %v5124_v58 = vmul.f32 0.03125, %v5121_v5  ;;  %5135 = vadd.xlane.f32.xlu1 %v5134_v52 }
0x1dcf   :  { %v5127_v51 = vsub.f32 %v12046_v4, %v5124_v58 }
0x1dd1   :  { %v5130_v60 = vmul.f32 %v5127_v51, %v5127_v51 }
0x1dd3   :  { %v5137_v61 = vsel %vm783_vm9, %v5130_v60, 0.0 }
0x1dd4   :  { %5138 = vadd.xlane.f32.xlu0 %v5137_v61 }
0x1e52   :  { %v5133_v62 = vpop.xlane.xlu0 %5132 }
0x1e53   :  { %v5140_v12 = vmul.f32 0.03125, %v5133_v62 }
0x1e55   :  { %v5143_v25 = vadd.f32 1e-05, %v5140_v12 }
0x1e56   :  { %v5136_v29 = vpop.xlane.xlu1 %5135 }
0x1e57   :  { %9803 = vrsqrt.f32 %v5143_v25  ;;  %v5141_v6 = vmul.f32 0.03125, %v5136_v29 }
0x1e59   :  { %v5144_v57 = vadd.f32 1e-05, %v5141_v6 }
0x1e5b   :  { %9805 = vrsqrt.f32 %v5144_v57 }
0x1e5d   :  { %v5139_v0 = vpop.xlane.xlu0 %5138 }
0x1e5e   :  { %v5142_v44 = vmul.f32 0.03125, %v5139_v0 }
0x1e60   :  { %v5145_v22 = vadd.f32 1e-05, %v5142_v44 }
0x1e62   :  { %9807 = vrsqrt.f32 %v5145_v22 }
0x1e64   :  { %v9804_v1 = vpop.eup %9803 }
0x1e65   :  { %v5149_v19 = vmul.f32 %v9804_v1, %v5125_v59 }
0x1e67   :  { %v5152_v3 = vmul.f32 %v5149_v19, %v11071_v40 }
0x1e68   :  { %v9806_v31 = vpop.eup %9805 }
0x1e69   :  { %v5155_v38 = vadd.f32 %v5152_v3, %v11074_v45  ;;  %v5150_v14 = vmul.f32 %v9806_v31, %v5126_v2 }
0x1e6b   :  { %9252 = vmatmul.mubr.msk.f32.vlgmr.msra.gmra.mxu0 %vm547_vm3, %v5155_v38  ;;  %v5153_v53 = vmul.f32 %v5150_v14, %v11071_v40 }
0x1e6c   :  { %9254 = vmatprep.mubr.msk.f32.mxu0 %vm10302_vm10, %v10301_v36  ;;  %9286 = vmatpush3.msra.mxu0 %v9897_v16 }
0x1e6d   :  { %v5156_v35 = vadd.f32 %v5153_v53, %v11074_v45  ;;  %9287 = vmatprep.subr.mxu0 %v10301_v36 }
0x1e6e   :  { %9288 = vmatpush3.msra.mxu0 %v9898_v26 }
0x1e6f   :  { %v9808_v8 = vpop.eup %9807  ;;  %9255 = vmatmul.mubr.msk.f32.gmra.mxu0 %vm547_vm3, %v5156_v35  ;;  %9289 = vmatprep.subr.mxu0 %v10301_v36 }
0x1e70   :  { %9257 = vmatprep.mubr.msk.f32.mxu0 %vm10302_vm10, %v10301_v36  ;;  %v5151_v20 = vmul.f32 %v9808_v8, %v5127_v51  ;;  %9290 = vmatpush3.msra.mxu0 %v9899_v41 }
0x1e71   :  { %9291 = vmatprep.subr.mxu0 %v10301_v36 }
0x1e72   :  { %v5154_v11 = vmul.f32 %v5151_v20, %v11071_v40  ;;  %9292 = vmatpush3.msra.mxu0 %v9900_v42 }
0x1e73   :  { %9302 = vmatprep.subr.mxu0 %v10301_v36 }
0x1e74   :  { %v5157_v56 = vadd.f32 %v5154_v11, %v11074_v45 }
0x1e76   :  { %9258 = vmatmul.mubr.msk.f32.gmra.mxu0 %vm547_vm3, %v5157_v56 }
0x1e77   :  { %9293 = vmatprep.mubr.msk.f32.mxu0 %vm10302_vm10, %v10301_v36 }
0x1f2b   :  { %v5233_v32 = vpop.f32.mrf.mxu0 }
0x1f2c   :  { %v5234_v59 = vadd.f32 %v5233_v32, %v11095_v33 }
0x1f2d   :  { %v9253_v24 = vpop.f32.mrf.mxu0 }
0x1f2e   :  { %v5247_v10 = vmax.f32 %v5234_v59, 0.0 }
0x1f2f   :  { %v5238_v63 = vpop.f32.mrf.mxu0 }
0x1f30   :  { %v5239_v2 = vadd.f32 %v5238_v63, %v11095_v33  ;;  %9277 = vmatmul.mubr.msk.f32.vlgmr.msra.gmra.mxu1 %vm653_vm7, %v5247_v10 }
0x1f31   :  { %v9256_v40 = vpop.f32.mrf.mxu0  ;;  %9279 = vmatprep.mubr.msk.f32.mxu1 %vm10302_vm10, %v10301_v36 }
0x1f32   :  { %v5248_v45 = vmax.f32 %v5239_v2, 0.0 }
0x1f34   :  { %9280 = vmatmul.mubr.msk.f32.gmra.mxu1 %vm653_vm7, %v5248_v45 }
0x1f35   :  { %9282 = vmatprep.mubr.msk.f32.mxu1 %vm10302_vm10, %v10301_v36 }
0x1f36   :  { %v5243_v17 = vpop.f32.mrf.mxu0 }
0x1f37   :  { %v5244_v43 = vadd.f32 %v5243_v17, %v11095_v33 }
0x1f38   :  { %v9259_v5 = vpop.f32.mrf.mxu0 }
0x1f39   :  { %v5249_v52 = vmax.f32 %v5244_v43, 0.0 }
0x1f3b   :  { %9283 = vmatmul.mubr.msk.f32.gmra.mxu1 %vm653_vm7, %v5249_v52 }
0x1f3c   :  { %9323 = vmatprep.mubr.msk.f32.mxu1 %vm10302_vm10, %v10301_v36 }
0x1ff0   :  { %v5325_v58 = vpop.f32.mrf.mxu1 }
0x1ff1   :  { %v5326_v51 = vadd.f32 %v5325_v58, %v11110_v48 }
0x1ff2   :  { %v9278_v60 = vpop.f32.mrf.mxu1 }
0x1ff3   :  { %v12089_v61 = vadd.f32 %v5326_v51, %v12034_v49 }
0x1ff4   :  { %v5330_v62 = vpop.f32.mrf.mxu1 }
0x1ff5   :  { %v5331_v12 = vadd.f32 %v5330_v62, %v11110_v48  ;;  %v5342_v33 = vsel %vm547_vm3, %v12089_v61, 0.0 }
0x1ff6   :  { %5343 = vadd.xlane.f32.xlu1 %v5342_v33  ;;  %v9281_v25 = vpop.f32.mrf.mxu1 }
0x1ff7   :  { %v12095_v29 = vadd.f32 %v5331_v12, %v12040_v13 }
0x1ff9   :  { %v5345_v6 = vsel %vm547_vm3, %v12095_v29, 0.0 }
0x1ffa   :  { %5346 = vadd.xlane.f32.xlu0 %v5345_v6 }
0x1ffb   :  { %v5335_v57 = vpop.f32.mrf.mxu1 }
0x1ffc   :  { %v5336_v0 = vadd.f32 %v5335_v57, %v11110_v48 }
0x1ffd   :  { %v9284_v49 = vpop.f32.mrf.mxu1 }
0x1ffe   :  { %v12101_v44 = vadd.f32 %v5336_v0, %v12046_v4 }
0x2000   :  { %v5348_v22 = vsel %vm783_vm9, %v12101_v44, 0.0 }
0x2001   :  { %5349 = vadd.xlane.f32.xlu1 %v5348_v22 }
0x207f   :  { %v5344_v1 = vpop.xlane.xlu1 %5343 }
0x2080   :  { %v5351_v19 = vmul.f32 0.03125, %v5344_v1 }
0x2082   :  { %v5354_v13 = vsub.f32 %v12089_v61, %v5351_v19 }
0x2083   :  { %v5347_v3 = vpop.xlane.xlu0 %5346 }
0x2084   :  { %v5352_v31 = vmul.f32 0.03125, %v5347_v3  ;;  %v5357_v38 = vmul.f32 %v5354_v13, %v5354_v13 }
0x2086   :  { %v5355_v14 = vsub.f32 %v12095_v29, %v5352_v31  ;;  %v5360_v53 = vsel %vm547_vm3, %v5357_v38, 0.0 }
0x2087   :  { %5361 = vadd.xlane.f32.xlu0 %v5360_v53 }
0x2088   :  { %v5358_v48 = vmul.f32 %v5355_v14, %v5355_v14 }
0x208a   :  { %v5350_v16 = vpop.xlane.xlu1 %5349  ;;  %v5363_v4 = vsel %vm547_vm3, %v5358_v48, 0.0 }
0x208b   :  { %v5353_v35 = vmul.f32 0.03125, %v5350_v16  ;;  %5364 = vadd.xlane.f32.xlu1 %v5363_v4 }
0x208d   :  { %v5356_v26 = vsub.f32 %v12101_v44, %v5353_v35 }
0x208f   :  { %v5359_v8 = vmul.f32 %v5356_v26, %v5356_v26 }
0x2091   :  { %v5366_v20 = vsel %vm783_vm9, %v5359_v8, 0.0 }
0x2092   :  { %5367 = vadd.xlane.f32.xlu0 %v5366_v20 }
0x2110   :  { %v5362_v41 = vpop.xlane.xlu0 %5361 }
0x2111   :  { %v5369_v11 = vmul.f32 0.03125, %v5362_v41 }
0x2113   :  { %v5372_v42 = vadd.f32 1e-05, %v5369_v11 }
0x2114   :  { %v5365_v56 = vpop.xlane.xlu1 %5364 }
0x2115   :  { %9809 = vrsqrt.f32 %v5372_v42  ;;  %v5370_v32 = vmul.f32 0.03125, %v5365_v56 }
0x2117   :  { %v5373_v59 = vadd.f32 1e-05, %v5370_v32 }
0x2119   :  { %9811 = vrsqrt.f32 %v5373_v59  ;;  %v9901_v59 = vld [vmem:[#allocation19 + $0x38] sm:$0xff] }
0x211b   :  { %v5368_v24 = vpop.xlane.xlu0 %5367 }
0x211c   :  { %v5371_v10 = vmul.f32 0.03125, %v5368_v24 }
0x211e   :  { %v5374_v63 = vadd.f32 1e-05, %v5371_v10  ;;  %v9902_v10 = vld [vmem:[#allocation19 + $0x30] sm:$0xff] }
0x2120   :  { %9813 = vrsqrt.f32 %v5374_v63  ;;  %v9903_v63 = vld [vmem:[#allocation19 + $0x28] sm:$0xff] }
0x2122   :  { %v9810_v2 = vpop.eup %9809 }
0x2123   :  { %v5378_v40 = vmul.f32 %v9810_v2, %v5354_v13  ;;  %v9904_v2 = vld [vmem:[#allocation19 + $0x20] sm:$0xff] }
0x2125   :  { %v5381_v45 = vmul.f32 %v5378_v40, %v11141_v34 }
0x2126   :  { %v9812_v17 = vpop.eup %9811 }
0x2127   :  { %v5384_v43 = vadd.f32 %v5381_v45, %v11144_v7  ;;  %v5379_v5 = vmul.f32 %v9812_v17, %v5355_v14 }
0x2129   :  { %9294 = vmatmul.mubr.msk.f32.vlgmr.msra.gmra.mxu0 %vm547_vm3, %v5384_v43  ;;  %v5382_v52 = vmul.f32 %v5379_v5, %v11141_v34 }
0x212a   :  { %9296 = vmatprep.mubr.msk.f32.mxu0 %vm10302_vm10, %v10301_v36 }
0x212b   :  { %v5385_v58 = vadd.f32 %v5382_v52, %v11144_v7 }
0x212d   :  { %v9814_v51 = vpop.eup %9813  ;;  %9297 = vmatmul.mubr.msk.f32.gmra.mxu0 %vm547_vm3, %v5385_v58 }
0x212e   :  { %9299 = vmatprep.mubr.msk.f32.mxu0 %vm10302_vm10, %v10301_v36  ;;  %v5380_v60 = vmul.f32 %v9814_v51, %v5356_v26 }
0x2130   :  { %v5383_v62 = vmul.f32 %v5380_v60, %v11141_v34 }
0x2132   :  { %v5386_v12 = vadd.f32 %v5383_v62, %v11144_v7 }
0x2134   :  { %9300 = vmatmul.mubr.msk.f32.gmra.mxu0 %vm547_vm3, %v5386_v12 }
0x2135   :  { %9308 = vmatprep.mubr.msk.f32.mxu0 %vm10302_vm10, %v10301_v36 }
0x21e9   :  { %v5462_v33 = vpop.f32.mrf.mxu0 }
0x21ea   :  { %v12137_v49 = vadd.f32 %v5462_v33, %v11165_v30 }
0x21eb   :  { %v9295_v25 = vpop.f32.mrf.mxu0 }
0x21ed   :  { %v5467_v6 = vpop.f32.mrf.mxu0 }
0x21ee   :  { %v12127_v57 = vadd.f32 %v5467_v6, %v11165_v30 }
0x21ef   :  { %v9298_v0 = vpop.f32.mrf.mxu0 }
0x21f0   :  { %5481 = vrot.lane.b32.xlu0 %v12127_v57, %s10303_s11 }
0x21f4   :  { %5720 = vrot.lane.b32.xlu0 %v12127_v57, %s10304_s25  ;;  %v5472_v34 = vpop.f32.mrf.mxu0 }
0x21f5   :  { %v12134_v7 = vadd.f32 %v5472_v34, %v11165_v30 }
0x21f6   :  { %v9301_v22 = vpop.f32.mrf.mxu0 }
0x21f7   :  { %5483 = vrot.lane.b32.xlu1 %v12134_v7, %s10303_s11 }
0x21f8   :  { %5712 = vrot.lane.b32.xlu0 %v12137_v49, %s10293_s16 }
0x21fb   :  { %5479 = vrot.lane.b32.xlu1 %v12137_v49, %s10303_s11 }
0x21fc   :  { %5714 = vrot.lane.b32.xlu0 %v12127_v57, %s10293_s16 }
0x21ff   :  { %5722 = vrot.lane.b32.xlu1 %v12134_v7, %s10304_s25 }
0x2200   :  { %5716 = vrot.lane.b32.xlu0 %v12134_v7, %s10293_s16 }
0x2203   :  { %5718 = vrot.lane.b32.xlu1 %v12137_v49, %s10304_s25 }
0x2204   :  { %5951 = vrot.lane.b32.xlu0 %v12137_v49, %s10299_s29 }
0x2207   :  { %5961 = vrot.lane.b32.xlu1 %v12134_v7, %s10305_s3 }
0x2208   :  { %5953 = vrot.lane.b32.xlu0 %v12127_v57, %s10299_s29 }
0x220b   :  { %5959 = vrot.lane.b32.xlu1 %v12127_v57, %s10305_s3 }
0x220c   :  { %5955 = vrot.lane.b32.xlu0 %v12134_v7, %s10299_s29 }
0x220f   :  { %5957 = vrot.lane.b32.xlu1 %v12137_v49, %s10305_s3 }
0x2210   :  { %6190 = vrot.lane.b32.xlu0 %v12137_v49, %s10300_s5 }
0x2213   :  { %6200 = vrot.lane.b32.xlu1 %v12134_v7, %s10306_s4 }
0x2214   :  { %6194 = vrot.lane.b32.xlu0 %v12134_v7, %s10300_s5 }
0x2217   :  { %6198 = vrot.lane.b32.xlu1 %v12127_v57, %s10306_s4 }
0x2218   :  { %5617 = vrot.lane.b32.xlu0 %v12134_v7, %s10286_s22 }
0x221b   :  { %6196 = vrot.lane.b32.xlu1 %v12137_v49, %s10306_s4 }
0x221f   :  { %6192 = vrot.lane.b32.xlu1 %v12127_v57, %s10300_s5 }
0x2262   :  { %v5482_v30 = vpop.permute.xlu0 %5481 }
0x2266   :  { %v5721_v1 = vpop.permute.xlu0 %5720 }
0x2269   :  { %v5484_v19 = vpop.permute.xlu1 %5483 }
0x226a   :  { %9303 = vmatpush3.xpose.msk.msra.mxu0 %vm541_vm0, %v5484_v19  ;;  %v5713_v13 = vpop.permute.xlu0 %5712 }
0x226b   :  { %9304 = vmatprep.subr.mxu0 %v10301_v36 }
0x226d   :  { %v5480_v3 = vpop.permute.xlu1 %5479 }
0x226e   :  { %9305 = vmatpush3.xpose.msk.msra.mxu0 %vm541_vm0, %v5482_v30  ;;  %v5715_v31 = vpop.permute.xlu0 %5714 }
0x226f   :  { %9306 = vmatprep.subr.mxu0 %v10301_v36 }
0x2271   :  { %v5723_v38 = vpop.permute.xlu1 %5722 }
0x2272   :  { %9307 = vmatpush3.xpose.msk.msra.mxu0 %vm541_vm0, %v5480_v3  ;;  %v5717_v14 = vpop.permute.xlu0 %5716 }
0x2273   :  { %9332 = vmatprep.subr.mxu0 %v10301_v36 }
0x2275   :  { %v5719_v53 = vpop.permute.xlu1 %5718  ;;  %9309 = vmatmul.mubr.msk.f32.vlgmr.msra.gmra.mxu0 %vm541_vm0, %v12137_v49 }
0x2276   :  { %9333 = vmatpush3.xpose.msk.msra.mxu0 %vm541_vm0, %v5723_v38  ;;  %v5952_v48 = vpop.permute.xlu0 %5951  ;;  %9311 = vmatprep.mubr.msk.f32.mxu0 %vm10302_vm10, %v10301_v36 }
0x2277   :  { %9334 = vmatprep.subr.mxu0 %v10301_v36 }
0x2279   :  { %v5962_v16 = vpop.permute.xlu1 %5961  ;;  %9312 = vmatmul.mubr.msk.f32.gmra.mxu0 %vm541_vm0, %v12127_v57 }
0x227a   :  { %9335 = vmatpush3.xpose.msk.msra.mxu0 %vm541_vm0, %v5721_v1  ;;  %v5954_v4 = vpop.permute.xlu0 %5953  ;;  %9314 = vmatprep.mubr.msk.f32.mxu0 %vm10302_vm10, %v10301_v36 }
0x227b   :  { %9336 = vmatprep.subr.mxu0 %v10301_v36 }
0x227d   :  { %v5960_v35 = vpop.permute.xlu1 %5959  ;;  %9315 = vmatmul.mubr.msk.f32.gmra.mxu0 %vm541_vm0, %v12134_v7 }
0x227e   :  { %9337 = vmatpush3.xpose.msk.msra.mxu0 %vm541_vm0, %v5719_v53  ;;  %v5956_v26 = vpop.permute.xlu0 %5955  ;;  %9338 = vmatprep.mubr.msk.f32.mxu0 %vm10302_vm10, %v10301_v36 }
0x227f   :  { %9362 = vmatprep.subr.mxu0 %v10301_v36 }
0x2281   :  { %9339 = vmatmul.mubr.msk.f32.vlgmr.msra.gmra.mxu0 %vm541_vm0, %v5713_v13  ;;  %v5958_v20 = vpop.permute.xlu1 %5957 }
0x2282   :  { %9363 = vmatpush3.xpose.msk.msra.mxu0 %vm541_vm0, %v5962_v16  ;;  %v6191_v8 = vpop.permute.xlu0 %6190  ;;  %9341 = vmatprep.mubr.msk.f32.mxu0 %vm10302_vm10, %v10301_v36 }
0x2283   :  { %9364 = vmatprep.subr.mxu0 %v10301_v36 }
0x2285   :  { %9342 = vmatmul.mubr.msk.f32.gmra.mxu0 %vm541_vm0, %v5715_v31  ;;  %v6201_v11 = vpop.permute.xlu1 %6200 }
0x2286   :  { %9365 = vmatpush3.xpose.msk.msra.mxu0 %vm541_vm0, %v5960_v35  ;;  %v6195_v41 = vpop.permute.xlu0 %6194  ;;  %9344 = vmatprep.mubr.msk.f32.mxu0 %vm10302_vm10, %v10301_v36 }
0x2287   :  { %9366 = vmatprep.subr.mxu0 %v10301_v36 }
0x2289   :  { %9345 = vmatmul.mubr.msk.f32.gmra.mxu0 %vm541_vm0, %v5717_v14  ;;  %v6199_v56 = vpop.permute.xlu1 %6198 }
0x228a   :  { %9367 = vmatpush3.xpose.msk.msra.mxu0 %vm541_vm0, %v5958_v20  ;;  %v5618_v42 = vpop.permute.xlu0 %5617  ;;  %9368 = vmatprep.mubr.msk.f32.mxu0 %vm10302_vm10, %v10301_v36 }
0x228b   :  { %9318 = vmatpush3.msk.msra.mxu1 %vm762_vm8, %v5618_v42  ;;  %9392 = vmatprep.subr.mxu0 %v10301_v36 }
0x228c   :  { %9319 = vmatprep.subr.mxu1 %v10301_v36 }
0x228d   :  { %9369 = vmatmul.mubr.msk.f32.vlgmr.msra.gmra.mxu0 %vm541_vm0, %v5952_v48  ;;  %v6197_v32 = vpop.permute.xlu1 %6196 }
0x228e   :  { %9393 = vmatpush3.xpose.msk.msra.mxu0 %vm541_vm0, %v6201_v11  ;;  %9371 = vmatprep.mubr.msk.f32.mxu0 %vm10302_vm10, %v10301_v36 }
0x228f   :  { %9394 = vmatprep.subr.mxu0 %v10301_v36 }
0x2291   :  { %9372 = vmatmul.mubr.msk.f32.gmra.mxu0 %vm541_vm0, %v5954_v4  ;;  %v6193_v24 = vpop.permute.xlu1 %6192 }
0x2292   :  { %9395 = vmatpush3.xpose.msk.msra.mxu0 %vm541_vm0, %v6199_v56  ;;  %9374 = vmatprep.mubr.msk.f32.mxu0 %vm10302_vm10, %v10301_v36 }
0x2293   :  { %9396 = vmatprep.subr.mxu0 %v10301_v36 }
0x2295   :  { %9375 = vmatmul.mubr.msk.f32.gmra.mxu0 %vm541_vm0, %v5956_v26 }
0x2296   :  { %9397 = vmatpush3.xpose.msk.msra.mxu0 %vm541_vm0, %v6197_v32  ;;  %9398 = vmatprep.mubr.msk.f32.mxu0 %vm10302_vm10, %v10301_v36 }
0x2297   :  { %9422 = vmatprep.subr.mxu0 %v10301_v36 }
0x2299   :  { %9399 = vmatmul.mubr.msk.f32.vlgmr.msra.gmra.mxu0 %vm541_vm0, %v6191_v8 }
0x229a   :  { %9401 = vmatprep.mubr.msk.f32.mxu0 %vm10302_vm10, %v10301_v36  ;;  %9423 = vmatpush3.msra.mxu0 %v9901_v59 }
0x229b   :  { %9424 = vmatprep.subr.mxu0 %v10301_v36 }
0x229c   :  { %9425 = vmatpush3.msra.mxu0 %v9902_v10 }
0x229d   :  { %9402 = vmatmul.mubr.msk.f32.gmra.mxu0 %vm541_vm0, %v6193_v24  ;;  %9426 = vmatprep.subr.mxu0 %v10301_v36 }
0x229e   :  { %9404 = vmatprep.mubr.msk.f32.mxu0 %vm10302_vm10, %v10301_v36  ;;  %9427 = vmatpush3.msra.mxu0 %v9903_v63 }
0x229f   :  { %9428 = vmatprep.subr.mxu0 %v10301_v36 }
0x22a0   :  { %9429 = vmatpush3.msra.mxu0 %v9904_v2 }
0x22a1   :  { %9405 = vmatmul.mubr.msk.f32.gmra.mxu0 %vm541_vm0, %v6195_v41  ;;  %9456 = vmatprep.subr.mxu0 %v10301_v36 }
0x22a2   :  { %9430 = vmatprep.mubr.msk.f32.mxu0 %vm10302_vm10, %v10301_v36 }
0x2335   :  { %v5563_v40 = vpop.f32.mrf.mxu0 }
0x2336   :  { %v12248_v45 = vmul.f32 0.35355338, %v5563_v40 }
0x2337   :  { %v9310_v17 = vpop.f32.mrf.mxu0 }
0x2338   :  { %v5580_v43 = vsel %vm1034_vm11, %v12248_v45, -inf }
0x2339   :  { %5581 = vmax.xlane.f32.xlu1 %v5580_v43  ;;  %v5568_v5 = vpop.f32.mrf.mxu0 }
0x233a   :  { %v12252_v52 = vmul.f32 0.35355338, %v5568_v5 }
0x233b   :  { %v9313_v58 = vpop.f32.mrf.mxu0 }
0x233c   :  { %v5583_v51 = vsel %vm1034_vm11, %v12252_v52, -inf }
0x233d   :  { %5584 = vmax.xlane.f32.xlu0 %v5583_v51  ;;  %v5573_v60 = vpop.f32.mrf.mxu0 }
0x233e   :  { %v5579_v62 = vmul.f32 0.35355338, %v5573_v60 }
0x233f   :  { %v9316_v12 = vpop.f32.mrf.mxu0 }
0x2340   :  { %v5586_v33 = vsel %vm1041_vm12, %v5579_v62, -inf }
0x2341   :  { %5587 = vmax.xlane.f32.xlu0 %v5586_v33  ;;  %v5802_v25 = vpop.f32.mrf.mxu0 }
0x2342   :  { %v5816_v6 = vmul.f32 0.35355338, %v5802_v25 }
0x2343   :  { %v9340_v0 = vpop.f32.mrf.mxu0 }
0x2344   :  { %v5819_v34 = vsel %vm1034_vm11, %v5816_v6, -inf }
0x2345   :  { %5820 = vmax.xlane.f32.xlu1 %v5819_v34  ;;  %v5807_v22 = vpop.f32.mrf.mxu0 }
0x2346   :  { %v5817_v30 = vmul.f32 0.35355338, %v5807_v22 }
0x2347   :  { %v9343_v1 = vpop.f32.mrf.mxu0 }
0x2348   :  { %v5822_v19 = vsel %vm1034_vm11, %v5817_v30, -inf }
0x2349   :  { %5823 = vmax.xlane.f32.xlu0 %v5822_v19  ;;  %v5812_v13 = vpop.f32.mrf.mxu0 }
0x234a   :  { %v12259_v3 = vmul.f32 0.35355338, %v5812_v13 }
0x234b   :  { %v9346_v31 = vpop.f32.mrf.mxu0 }
0x234c   :  { %v5825_v38 = vsel %vm1041_vm12, %v12259_v3, -inf }
0x234d   :  { %5826 = vmax.xlane.f32.xlu1 %v5825_v38  ;;  %v6041_v14 = vpop.f32.mrf.mxu0 }
0x234e   :  { %v12263_v53 = vmul.f32 0.35355338, %v6041_v14 }
0x234f   :  { %v9370_v48 = vpop.f32.mrf.mxu0 }
0x2350   :  { %v6058_v16 = vsel %vm1034_vm11, %v12263_v53, -inf }
0x2351   :  { %6059 = vmax.xlane.f32.xlu0 %v6058_v16  ;;  %v6046_v4 = vpop.f32.mrf.mxu0 }
0x2352   :  { %v12267_v35 = vmul.f32 0.35355338, %v6046_v4 }
0x2353   :  { %v9373_v26 = vpop.f32.mrf.mxu0 }
0x2354   :  { %v6061_v8 = vsel %vm1034_vm11, %v12267_v35, -inf }
0x2355   :  { %6062 = vmax.xlane.f32.xlu1 %v6061_v8  ;;  %v6051_v20 = vpop.f32.mrf.mxu0 }
0x2356   :  { %v12271_v41 = vmul.f32 0.35355338, %v6051_v20 }
0x2357   :  { %v9376_v11 = vpop.f32.mrf.mxu0 }
0x2358   :  { %v6064_v42 = vsel %vm1041_vm12, %v12271_v41, -inf }
0x2359   :  { %6065 = vmax.xlane.f32.xlu0 %v6064_v42  ;;  %v6280_v56 = vpop.f32.mrf.mxu0 }
0x235a   :  { %v12275_v32 = vmul.f32 0.35355338, %v6280_v56 }
0x235b   :  { %v9400_v59 = vpop.f32.mrf.mxu0 }
0x235c   :  { %v6297_v24 = vsel %vm1034_vm11, %v12275_v32, -inf }
0x235d   :  { %6298 = vmax.xlane.f32.xlu1 %v6297_v24  ;;  %v6285_v10 = vpop.f32.mrf.mxu0 }
0x235e   :  { %v12285_v17 = vmul.f32 0.35355338, %v6285_v10 }
0x235f   :  { %v9403_v63 = vpop.f32.mrf.mxu0 }
0x2360   :  { %v6300_v5 = vsel %vm1034_vm11, %v12285_v17, -inf }
0x2361   :  { %v6290_v2 = vpop.f32.mrf.mxu0 }
0x2362   :  { %v12287_v43 = vmul.f32 0.35355338, %v6290_v2 }
0x2363   :  { %v9406_v40 = vpop.f32.mrf.mxu0 }
0x2364   :  { %v6303_v58 = vsel %vm1041_vm12, %v12287_v43, -inf }
0x236e   :  { %5615 = vrot.lane.b32.xlu1 %v12127_v57, %s10286_s22 }
0x236f   :  { %5613 = vrot.lane.b32.xlu0 %v12137_v49, %s10286_s22 }
0x2373   :  { %5856 = vrot.lane.b32.xlu0 %v12134_v7, %s10297_s2 }
0x2392   :  { %6301 = vmax.xlane.f32.xlu0 %v6300_v5  ;;  %6304 = vmax.xlane.f32.xlu1 %v6303_v58 }
0x23c2   :  { %v5582_v51 = vpop.xlane.xlu1 %5581 }
0x23c3   :  { %v5589_v60 = vsub.f32 %v12248_v45, %v5582_v51 }
0x23c5   :  { %v5592_v12 = vmul.f32 1.442695, %v5589_v60 }
0x23c6   :  { %v5585_v33 = vpop.xlane.xlu0 %5584 }
0x23c7   :  { %9815 = vpow2.f32 %v5592_v12  ;;  %v5590_v25 = vsub.f32 %v12252_v52, %v5585_v33 }
0x23c9   :  { %v5594_v0 = vmul.f32 1.442695, %v5590_v25 }
0x23ca   :  { %v5588_v34 = vpop.xlane.xlu0 %5587 }
0x23cb   :  { %9817 = vpow2.f32 %v5594_v0  ;;  %v5591_v22 = vsub.f32 %v5579_v62, %v5588_v34 }
0x23cd   :  { %v5596_v1 = vmul.f32 1.442695, %v5591_v22 }
0x23ce   :  { %v5821_v19 = vpop.xlane.xlu1 %5820 }
0x23cf   :  { %9819 = vpow2.f32 %v5596_v1  ;;  %v5828_v13 = vsub.f32 %v5816_v6, %v5821_v19 }
0x23d1   :  { %v5831_v31 = vmul.f32 1.442695, %v5828_v13 }
0x23d2   :  { %v5824_v38 = vpop.xlane.xlu0 %5823 }
0x23d3   :  { %9821 = vpow2.f32 %v5831_v31  ;;  %v5829_v14 = vsub.f32 %v5817_v30, %v5824_v38 }
0x23d4   :  { %v12295_v48 = vpop.eup %9815 }
0x23d5   :  { %v5833_v45 = vmul.f32 1.442695, %v5829_v14  ;;  %v5598_v16 = vsel %vm1034_vm11, %v12295_v48, 0.0 }
0x23d6   :  { %v5827_v4 = vpop.xlane.xlu1 %5826  ;;  %5599 = vadd.xlane.f32.xlu1 %v5598_v16 }
0x23d7   :  { %9823 = vpow2.f32 %v5833_v45  ;;  %v5830_v52 = vsub.f32 %v12259_v3, %v5827_v4 }
0x23d8   :  { %v12300_v62 = vpop.eup %9817 }
0x23d9   :  { %v5835_v26 = vmul.f32 1.442695, %v5830_v52  ;;  %v5601_v6 = vsel %vm1034_vm11, %v12300_v62, 0.0 }
0x23da   :  { %5602 = vadd.xlane.f32.xlu0 %v5601_v6  ;;  %v6060_v8 = vpop.xlane.xlu0 %6059 }
0x23db   :  { %9825 = vpow2.f32 %v5835_v26  ;;  %v6067_v30 = vsub.f32 %v12263_v53, %v6060_v8 }
0x23dc   :  { %v12305_v20 = vpop.eup %9819 }
0x23dd   :  { %v6070_v11 = vmul.f32 1.442695, %v6067_v30  ;;  %v5604_v42 = vsel %vm1041_vm12, %v12305_v20, 0.0 }
0x23de   :  { %v6063_v56 = vpop.xlane.xlu1 %6062  ;;  %5605 = vadd.xlane.f32.xlu1 %v5604_v42 }
0x23df   :  { %9827 = vpow2.f32 %v6070_v11  ;;  %v6068_v3 = vsub.f32 %v12267_v35, %v6063_v56 }
0x23e0   :  { %v12310_v59 = vpop.eup %9821 }
0x23e1   :  { %v6072_v24 = vmul.f32 1.442695, %v6068_v3  ;;  %v5837_v10 = vsel %vm1034_vm11, %v12310_v59, 0.0 }
0x23e2   :  { %5838 = vadd.xlane.f32.xlu0 %v5837_v10  ;;  %v6066_v2 = vpop.xlane.xlu0 %6065 }
0x23e3   :  { %9829 = vpow2.f32 %v6072_v24  ;;  %v6069_v0 = vsub.f32 %v12271_v41, %v6066_v2 }
0x23e4   :  { %v12314_v53 = vpop.eup %9823 }
0x23e5   :  { %v5840_v63 = vsel %vm1034_vm11, %v12314_v53, 0.0  ;;  %v6074_v34 = vmul.f32 1.442695, %v6069_v0 }
0x23e6   :  { %v6299_v40 = vpop.xlane.xlu1 %6298  ;;  %5841 = vadd.xlane.f32.xlu0 %v5840_v63  ;;  %v5614_v60 = vpop.permute.xlu0 %5613 }
0x23e7   :  { %9831 = vpow2.f32 %v6074_v34  ;;  %v6306_v22 = vsub.f32 %v12275_v32, %v6299_v40 }
0x23e8   :  { %v12318_v5 = vpop.eup %9825 }
0x23e9   :  { %v5843_v35 = vsel %vm1041_vm12, %v12318_v5, 0.0  ;;  %v6309_v1 = vmul.f32 1.442695, %v6306_v22 }
0x23ea   :  { %v5616_v58 = vpop.permute.xlu1 %5615  ;;  %5844 = vadd.xlane.f32.xlu1 %v5843_v35  ;;  %v5857_v13 = vpop.permute.xlu0 %5856 }
0x23eb   :  { %9320 = vmatpush3.msra.mxu1 %v5616_v58  ;;  %9833 = vpow2.f32 %v6309_v1 }
0x23ec   :  { %v12322_v51 = vpop.eup %9827  ;;  %9321 = vmatprep.subr.mxu1 %v10301_v36 }
0x23ed   :  { %9322 = vmatpush3.msra.mxu1 %v5614_v60  ;;  %v6076_v12 = vsel %vm1034_vm11, %v12322_v51, 0.0 }
0x23ee   :  { %6077 = vadd.xlane.f32.xlu1 %v6076_v12  ;;  %9347 = vmatprep.subr.mxu1 %v10301_v36 }
0x23f0   :  { %v12328_v33 = vpop.eup %9829 }
0x23f1   :  { %v6079_v25 = vsel %vm1034_vm11, %v12328_v33, 0.0 }
0x23f2   :  { %6080 = vadd.xlane.f32.xlu1 %v6079_v25 }
0x23f4   :  { %v12338_v19 = vpop.eup %9831 }
0x23f5   :  { %v6082_v31 = vsel %vm1041_vm12, %v12338_v19, 0.0 }
0x23f8   :  { %v12343_v45 = vpop.eup %9833 }
0x23f9   :  { %v6315_v16 = vsel %vm1034_vm11, %v12343_v45, 0.0 }
0x23fc   :  { %5852 = vrot.lane.b32.xlu0 %v12137_v49, %s10297_s2 }
0x2403   :  { %5854 = vrot.lane.b32.xlu1 %v12127_v57, %s10297_s2 }
0x241b   :  { %6083 = vadd.xlane.f32.xlu0 %v6082_v31  ;;  %v6302_v38 = vpop.xlane.xlu0 %6301 }
0x241c   :  { %v6307_v14 = vsub.f32 %v12285_v17, %v6302_v38  ;;  %v6305_v17 = vpop.xlane.xlu1 %6304 }
0x241d   :  { %v6308_v52 = vsub.f32 %v12287_v43, %v6305_v17 }
0x241e   :  { %v6311_v41 = vmul.f32 1.442695, %v6307_v14 }
0x241f   :  { %v6313_v26 = vmul.f32 1.442695, %v6308_v52  ;;  %v9906_v52 = vld [vmem:[#allocation21 + $0x30] sm:$0xff] }
0x2420   :  { %9835 = vpow2.f32 %v6311_v41 }
0x2421   :  { %9837 = vpow2.f32 %v6313_v26  ;;  %v9907_v26 = vld [vmem:[#allocation21 + $0x28] sm:$0xff] }
0x2427   :  { %6316 = vadd.xlane.f32.xlu1 %v6315_v16 }
0x242d   :  { %v12347_v32 = vpop.eup %9835 }
0x242e   :  { %v6318_v4 = vsel %vm1034_vm11, %v12347_v32, 0.0  ;;  %v12364_v8 = vpop.eup %9837 }
0x242f   :  { %6319 = vadd.xlane.f32.xlu1 %v6318_v4  ;;  %v6321_v11 = vsel %vm1041_vm12, %v12364_v8, 0.0 }
0x2431   :  { %6095 = vrot.lane.b32.xlu0 %v12134_v7, %s10298_s8 }
0x2435   :  { %6093 = vrot.lane.b32.xlu0 %v12127_v57, %s10298_s8 }
0x2439   :  { %6091 = vrot.lane.b32.xlu0 %v12137_v49, %s10298_s8 }
0x243d   :  { %6334 = vrot.lane.b32.xlu0 %v12134_v7, %s10296_s1 }
0x2441   :  { %6332 = vrot.lane.b32.xlu0 %v12127_v57, %s10296_s1 }
0x2445   :  { %6330 = vrot.lane.b32.xlu0 %v12137_v49, %s10296_s1 }
0x245f   :  { %v5600_v6 = vpop.xlane.xlu1 %5599 }
0x2460   :  { %9839 = vrcp.f32 %v5600_v6 }
0x2463   :  { %v5603_v30 = vpop.xlane.xlu0 %5602 }
0x2464   :  { %9841 = vrcp.f32 %v5603_v30  ;;  %6322 = vadd.xlane.f32.xlu0 %v6321_v11  ;;  %v9908_v30 = vld [vmem:[#allocation21 + $0x20] sm:$0xff] }
0x2467   :  { %v5606_v7 = vpop.xlane.xlu1 %5605 }
0x2468   :  { %9843 = vrcp.f32 %v5606_v7 }
0x246b   :  { %v5839_v57 = vpop.xlane.xlu0 %5838 }
0x246c   :  { %9845 = vrcp.f32 %v5839_v57 }
0x246d   :  { %v9840_v42 = vpop.eup %9839 }
0x246e   :  { %v5608_v49 = vmul.f32 %v9840_v42, %v12295_v48 }
0x246f   :  { %v5842_v56 = vpop.xlane.xlu0 %5841 }
0x2470   :  { %9324 = vmatmul.mubr.msk.f32.vlgmr.msra.gmra.mxu1 %vm1034_vm11, %v5608_v49  ;;  %9847 = vrcp.f32 %v5842_v56 }
0x2471   :  { %v9842_v43 = vpop.eup %9841  ;;  %9348 = vmatpush3.msk.msra.mxu1 %vm762_vm8, %v5857_v13  ;;  %9326 = vmatprep.mubr.msk.f32.mxu1 %vm10302_vm10, %v10301_v36 }
0x2472   :  { %v5610_v3 = vmul.f32 %v9842_v43, %v12300_v62  ;;  %9349 = vmatprep.subr.mxu1 %v10301_v36 }
0x2473   :  { %v5845_v24 = vpop.xlane.xlu1 %5844  ;;  %v5853_v58 = vpop.permute.xlu0 %5852 }
0x2474   :  { %9327 = vmatmul.mubr.msk.f32.gmra.mxu1 %vm1034_vm11, %v5610_v3  ;;  %9849 = vrcp.f32 %v5845_v24 }
0x2475   :  { %v9844_v10 = vpop.eup %9843  ;;  %9329 = vmatprep.mubr.msk.f32.mxu1 %vm10302_vm10, %v10301_v36 }
0x2476   :  { %v5612_v48 = vmul.f32 %v9844_v10, %v12305_v20 }
0x2477   :  { %v6078_v63 = vpop.xlane.xlu1 %6077 }
0x2478   :  { %9330 = vmatmul.mubr.msk.f32.gmra.mxu1 %vm1034_vm11, %v5612_v48  ;;  %9851 = vrcp.f32 %v6078_v63 }
0x2479   :  { %9353 = vmatprep.mubr.msk.f32.mxu1 %vm10302_vm10, %v10301_v36  ;;  %v9846_v2 = vpop.eup %9845 }
0x247a   :  { %v5847_v35 = vmul.f32 %v9846_v2, %v12310_v59 }
0x247b   :  { %v6081_v62 = vpop.xlane.xlu1 %6080 }
0x247c   :  { %9853 = vrcp.f32 %v6081_v62 }
0x247d   :  { %v9848_v60 = vpop.eup %9847 }
0x247e   :  { %v5849_v20 = vmul.f32 %v9848_v60, %v12314_v53 }
0x247f   :  { %v5855_v40 = vpop.permute.xlu1 %5854 }
0x2480   :  { %9350 = vmatpush3.msra.mxu1 %v5855_v40 }
0x2481   :  { %9351 = vmatprep.subr.mxu1 %v10301_v36  ;;  %v9850_v12 = vpop.eup %9849 }
0x2482   :  { %9352 = vmatpush3.msra.mxu1 %v5853_v58  ;;  %v5851_v59 = vmul.f32 %v9850_v12, %v12318_v5 }
0x2483   :  { %9354 = vmatmul.mubr.msk.f32.vlgmr.msra.gmra.mxu1 %vm1034_vm11, %v5847_v35  ;;  %9377 = vmatprep.subr.mxu1 %v10301_v36 }
0x2484   :  { %9356 = vmatprep.mubr.msk.f32.mxu1 %vm10302_vm10, %v10301_v36 }
0x2485   :  { %v9852_v34 = vpop.eup %9851 }
0x2486   :  { %v6086_v5 = vmul.f32 %v9852_v34, %v12322_v51 }
0x2487   :  { %9357 = vmatmul.mubr.msk.f32.gmra.mxu1 %vm1034_vm11, %v5849_v20 }
0x2488   :  { %9359 = vmatprep.mubr.msk.f32.mxu1 %vm10302_vm10, %v10301_v36 }
0x2489   :  { %v9854_v13 = vpop.eup %9853 }
0x248a   :  { %v6088_v38 = vmul.f32 %v9854_v13, %v12328_v33 }
0x248b   :  { %9360 = vmatmul.mubr.msk.f32.gmra.mxu1 %vm1034_vm11, %v5851_v59 }
0x248c   :  { %9383 = vmatprep.mubr.msk.f32.mxu1 %vm10302_vm10, %v10301_v36 }
0x24a4   :  { %v6084_v25 = vpop.xlane.xlu0 %6083 }
0x24a5   :  { %9855 = vrcp.f32 %v6084_v25 }
0x24a8   :  { %v6096_v0 = vpop.permute.xlu0 %6095 }
0x24a9   :  { %9378 = vmatpush3.msk.msra.mxu1 %vm762_vm8, %v6096_v0 }
0x24aa   :  { %9379 = vmatprep.subr.mxu1 %v10301_v36 }
0x24ac   :  { %v6094_v53 = vpop.permute.xlu0 %6093 }
0x24ad   :  { %9380 = vmatpush3.msra.mxu1 %v6094_v53 }
0x24ae   :  { %9381 = vmatprep.subr.mxu1 %v10301_v36 }
0x24b0   :  { %v6317_v22 = vpop.xlane.xlu1 %6316  ;;  %v6092_v1 = vpop.permute.xlu0 %6091 }
0x24b1   :  { %9857 = vrcp.f32 %v6317_v22  ;;  %9382 = vmatpush3.msra.mxu1 %v6092_v1 }
0x24b2   :  { %9384 = vmatmul.mubr.msk.f32.vlgmr.msra.gmra.mxu1 %vm1034_vm11, %v6086_v5  ;;  %9407 = vmatprep.subr.mxu1 %v10301_v36  ;;  %v9856_v14 = vpop.eup %9855 }
0x24b3   :  { %9386 = vmatprep.mubr.msk.f32.mxu1 %vm10302_vm10, %v10301_v36  ;;  %v6090_v41 = vmul.f32 %v9856_v14, %v12338_v19  ;;  %v9905_v19 = vld [vmem:[#allocation21 + $0x38] sm:$0xff] }
0x24b4   :  { %v6335_v31 = vpop.permute.xlu0 %6334 }
0x24b5   :  { %9408 = vmatpush3.msk.msra.mxu1 %vm762_vm8, %v6335_v31 }
0x24b6   :  { %9387 = vmatmul.mubr.msk.f32.gmra.mxu1 %vm1034_vm11, %v6088_v38  ;;  %9409 = vmatprep.subr.mxu1 %v10301_v36 }
0x24b7   :  { %9389 = vmatprep.mubr.msk.f32.mxu1 %vm10302_vm10, %v10301_v36 }
0x24b8   :  { %v6333_v51 = vpop.permute.xlu0 %6332  ;;  %v6320_v16 = vpop.xlane.xlu1 %6319 }
0x24b9   :  { %9410 = vmatpush3.msra.mxu1 %v6333_v51  ;;  %9859 = vrcp.f32 %v6320_v16  ;;  %v9909_v51 = vld [vmem:[#allocation24 + $0x78] sm:$0xff]  ;;  %v9910_v16 = vld [vmem:[#allocation24 + $0x70] sm:$0xff] }
0x24ba   :  { %9390 = vmatmul.mubr.msk.f32.gmra.mxu1 %vm1034_vm11, %v6090_v41  ;;  %9411 = vmatprep.subr.mxu1 %v10301_v36 }
0x24bb   :  { %9413 = vmatprep.mubr.msk.f32.mxu1 %vm10302_vm10, %v10301_v36 }
0x24bc   :  { %v6331_v33 = vpop.permute.xlu0 %6330 }
0x24bd   :  { %9412 = vmatpush3.msra.mxu1 %v6331_v33  ;;  %v9911_v33 = vld [vmem:[#allocation24 + $0x68] sm:$0xff] }
0x24be   :  { %v9858_v4 = vpop.eup %9857  ;;  %9439 = vmatprep.subr.mxu1 %v10301_v36 }
0x24bf   :  { %v6325_v17 = vmul.f32 %v9858_v4, %v12343_v45 }
0x24c1   :  { %9414 = vmatmul.mubr.msk.f32.vlgmr.msra.gmra.mxu1 %vm1034_vm11, %v6325_v17 }
0x24c2   :  { %9416 = vmatprep.mubr.msk.f32.mxu1 %vm10302_vm10, %v10301_v36  ;;  %9440 = vmatpush3.msra.mxu1 %v9905_v19 }
0x24c3   :  { %9441 = vmatprep.subr.mxu1 %v10301_v36 }
0x24c4   :  { %9442 = vmatpush3.msra.mxu1 %v9906_v52  ;;  %v9912_v52 = vld [vmem:[#allocation24 + $0x60] sm:$0xff] }
0x24c5   :  { %9443 = vmatprep.subr.mxu1 %v10301_v36 }
0x24c6   :  { %9444 = vmatpush3.msra.mxu1 %v9907_v26  ;;  %v9860_v6 = vpop.eup %9859 }
0x24c7   :  { %9445 = vmatprep.subr.mxu1 %v10301_v36  ;;  %v6327_v45 = vmul.f32 %v9860_v6, %v12347_v32  ;;  %v9913_v6 = vld [vmem:[#allocation24 + $0x58] sm:$0xff] }
0x24c8   :  { %9446 = vmatpush3.msra.mxu1 %v9908_v30  ;;  %v9915_v30 = vld [vmem:[#allocation24 + $0x48] sm:$0xff] }
0x24c9   :  { %9417 = vmatmul.mubr.msk.f32.gmra.mxu1 %vm1034_vm11, %v6327_v45  ;;  %v9914_v45 = vld [vmem:[#allocation24 + $0x50] sm:$0xff] }
0x24ca   :  { %9419 = vmatprep.mubr.msk.f32.mxu1 %vm10302_vm10, %v10301_v36 }
0x24ed   :  { %v6323_v11 = vpop.xlane.xlu0 %6322 }
0x24ee   :  { %9861 = vrcp.f32 %v6323_v11  ;;  %v9916_v11 = vld [vmem:[#allocation24 + $0x40] sm:$0xff] }
0x24fb   :  { %v9862_v7 = vpop.eup %9861 }
0x24fc   :  { %v6329_v57 = vmul.f32 %v9862_v7, %v12364_v8 }
0x24fe   :  { %9420 = vmatmul.mubr.msk.f32.gmra.mxu1 %vm1034_vm11, %v6329_v57 }
0x24ff   :  { %9447 = vmatprep.mubr.msk.f32.mxu1 %vm10302_vm10, %v10301_v36 }
0x2530   :  { %v5698_v42 = vpop.f32.mrf.mxu1 }
0x2532   :  { %v9325_v49 = vpop.f32.mrf.mxu1 }
0x2534   :  { %v5703_v32 = vpop.f32.mrf.mxu1 }
0x2536   :  { %v9328_v43 = vpop.f32.mrf.mxu1 }
0x2538   :  { %v12431_v56 = vpop.f32.mrf.mxu1 }
0x253a   :  { %v9331_v3 = vpop.f32.mrf.mxu1 }
0x2543   :  { %v5937_v24 = vpop.f32.mrf.mxu1 }
0x2544   :  { %6432 = vrot.lane.b32.xlu1 %v5937_v24, %s10275_s23 }
0x2545   :  { %v9355_v10 = vpop.f32.mrf.mxu1 }
0x2547   :  { %v5942_v48 = vpop.f32.mrf.mxu1 }
0x2548   :  { %6434 = vrot.lane.b32.xlu0 %v5942_v48, %s10275_s23 }
0x2549   :  { %v9358_v8 = vpop.f32.mrf.mxu1 }
0x254b   :  { %v5947_v63 = vpop.f32.mrf.mxu1 }
0x254d   :  { %v9361_v62 = vpop.f32.mrf.mxu1 }
0x2572   :  { %v6176_v2 = vpop.f32.mrf.mxu1 }
0x2573   :  { %6444 = vrot.lane.b32.xlu1 %v6176_v2, %s10294_s20 }
0x2574   :  { %v9385_v40 = vpop.f32.mrf.mxu1 }
0x2576   :  { %v6181_v35 = vpop.f32.mrf.mxu1 }
0x2577   :  { %6446 = vrot.lane.b32.xlu1 %v6181_v35, %s10294_s20 }
0x2578   :  { %v9388_v58 = vpop.f32.mrf.mxu1 }
0x257a   :  { %v6186_v60 = vpop.f32.mrf.mxu1 }
0x257c   :  { %v9391_v20 = vpop.f32.mrf.mxu1 }
0x2581   :  { %v6415_v12 = vpop.f32.mrf.mxu1 }
0x2582   :  { %6456 = vrot.lane.b32.xlu1 %v6415_v12, %s10295_s21 }
0x2583   :  { %v9415_v59 = vpop.f32.mrf.mxu1 }
0x2589   :  { %v6420_v25 = vpop.f32.mrf.mxu1 }
0x258a   :  { %6458 = vrot.lane.b32.xlu1 %v6420_v25, %s10295_s21 }
0x258b   :  { %v9418_v0 = vpop.f32.mrf.mxu1 }
0x258e   :  { %6436 = vrot.lane.b32.xlu1 %v5947_v63, %s10275_s23  ;;  %s10307_s23 = smov [#allocation2]  }
0x258f   :  { %s264_s7 = sshll.u32 %s10307_s23, 4  ;;  %s265_s7 = int_to_ptr.vmem [resolvable:$true] %s264_s7 }
0x2590   :  { %s10218_s13 = scalar_lea.vmem %s265_s7, 34816  ;;  %p10223_p8 = scmp.lt.s32.totalorder %s265_s7, %s265_s7 }
0x2591   :  { %p10219_p7 = scmp.ne.s32.totalorder %s265_s7, %s10218_s13  ;;  %p10224_p9 = scmp.lt.s32.totalorder %s10218_s13, %s10218_s13 }
0x2592   :  { %6448 = vrot.lane.b32.xlu1 %v6186_v60, %s10294_s20 }
0x2593   :  { %p10225_p10 = por %p10224_p9, %p10223_p8 }
0x2595   :  { %p10226_p11 = pnand %p10225_p10, %p10219_p7 }
0x25b6   :  { %v6433_v5 = vpop.permute.xlu1 %6432 }
0x25b7   :  { %v6465_v13 = vsel %vm541_vm0, %v5698_v42, %v6433_v5 }
0x25ba   :  { %v6435_v41 = vpop.permute.xlu0 %6434 }
0x25bb   :  { %v6466_v4 = vsel %vm541_vm0, %v5703_v32, %v6435_v41 }
0x25be   :  { %v6425_v53 = vpop.f32.mrf.mxu1 }
0x25bf   :  { %6460 = vrot.lane.b32.xlu1 %v6425_v53, %s10295_s21 }
0x25c0   :  { %v9421_v34 = vpop.f32.mrf.mxu1 }
0x25e5   :  { %v6445_v22 = vpop.permute.xlu1 %6444 }
0x25e6   :  { %v6468_v31 = vsel %vm543_vm1, %v6465_v13, %v6445_v22  ;;  %v9917_v22 = vld [vmem:[#allocation22 + $0x2] sm:$0x3] }
0x25e9   :  { %v6447_v1 = vpop.permute.xlu1 %6446 }
0x25ea   :  { %v6469_v17 = vsel %vm543_vm1, %v6466_v4, %v6447_v1  ;;  %v12491_v1 = vrot.slane %v9917_v22, %v10693_v21 }
0x25ec   :  { %v3792_v13 = vadd.f32 %v11666_v9, %v12491_v1 }
0x25f4   :  { %v6457_v38 = vpop.permute.xlu1 %6456 }
0x25f5   :  { %v6471_v14 = vsel %vm545_vm2, %v6468_v31, %v6457_v38  ;;  %v12496_v31 = vadd.f32 %v3792_v13, %v11529_v46 }
0x25f6   :  { %9431 = vmatmul.mubr.msk.f32.vlgmr.msra.gmra.mxu0 %vm547_vm3, %v6471_v14 }
0x25f7   :  { %9433 = vmatprep.mubr.msk.f32.mxu0 %vm10302_vm10, %v10301_v36  ;;  %9457 = vmatpush3.msra.mxu0 %v9909_v51  ;;  %v3831_v38 = vrot.slane %v12496_v31, 1  ;;  %v3845_v14 = vrot.slane %v12496_v31, 5  ;;  %v3835_v41 = vrot.slane %v12496_v31, 2 }
0x25f8   :  { %9458 = vmatprep.subr.mxu0 %v10301_v36 }
0x25f9   :  { %9459 = vmatpush3.msra.mxu0 %v9910_v16  ;;  %v9558_v51 = vpack.i.bf16 %v3845_v14, %v3831_v38  ;;  %v3849_v16 = vrot.slane %v12496_v31, 6 }
0x25fa   :  { %9460 = vmatprep.subr.mxu0 %v10301_v36 }
0x25fb   :  { %9461 = vmatpush3.msra.mxu0 %v9911_v33  ;;  %v9568_v33 = vpack.i.bf16 %v3849_v16, %v3835_v41 }
0x25fc   :  { %9462 = vmatprep.subr.mxu0 %v10301_v36  ;;  %v6459_v19 = vpop.permute.xlu1 %6458 }
0x25fd   :  { %9463 = vmatpush3.msra.mxu0 %v9912_v52  ;;  %v6472_v26 = vsel %vm545_vm2, %v6469_v17, %v6459_v19  ;;  %v3787_v52 = vadd.f32 %v11664_v23, %v12491_v1 }
0x25fe   :  { %9464 = vmatprep.subr.mxu0 %v10301_v36  ;;  %9434 = vmatmul.mubr.msk.f32.gmra.mxu0 %vm547_vm3, %v6472_v26 }
0x25ff   :  { %9436 = vmatprep.mubr.msk.f32.mxu0 %vm10302_vm10, %v10301_v36  ;;  %9465 = vmatpush3.msra.mxu0 %v9913_v6  ;;  %v12509_v26 = vadd.f32 %v3787_v52, %v11523_v27 }
0x2600   :  { %9466 = vmatprep.subr.mxu0 %v10301_v36  ;;  %v6437_v7 = vpop.permute.xlu1 %6436 }
0x2601   :  { %9467 = vmatpush3.msra.mxu0 %v9914_v45  ;;  %v6467_v42 = vsel %vm541_vm0, %v12431_v56, %v6437_v7  ;;  %v3804_v6 = vrot.slane %v12509_v26, 1  ;;  %v3818_v45 = vrot.slane %v12509_v26, 5  ;;  %v3822_v7 = vrot.slane %v12509_v26, 6 }
0x2602   :  { %9468 = vmatprep.subr.mxu0 %v10301_v36 }
0x2603   :  { %9469 = vmatpush3.msra.mxu0 %v9915_v30  ;;  %v9553_v30 = vpack.i.bf16 %v3818_v45, %v3804_v6 }
0x2604   :  { %9470 = vmatprep.subr.mxu0 %v10301_v36  ;;  %v6449_v57 = vpop.permute.xlu1 %6448 }
0x2605   :  { %9471 = vmatpush3.msra.mxu0 %v9916_v11  ;;  %v6470_v49 = vsel %vm543_vm1, %v6467_v42, %v6449_v57  ;;  %v3808_v11 = vrot.slane %v12509_v26, 2 }
0x2607   :  { %v9563_v57 = vpack.i.bf16 %v3822_v7, %v3808_v11 }
0x2631   :  { %v6461_v32 = vpop.permute.xlu1 %6460 }
0x2632   :  { %v6473_v43 = vsel %vm545_vm2, %v6470_v49, %v6461_v32 }
0x2633   :  { %9437 = vmatmul.mubr.msk.f32.gmra.mxu0 %vm547_vm3, %v6473_v43 }
0x2634   :  { %9472 = vmatprep.mubr.msk.f32.mxu0 %vm10302_vm10, %v10301_v36 }
0x26b6   :  { %v6549_v3 = vpop.f32.mrf.mxu0 }
0x26b7   :  { %v6550_v24 = vadd.f32 %v6549_v3, %v11519_v47 }
0x26b8   :  { %v9432_v10 = vpop.f32.mrf.mxu0 }
0x26b9   :  { %v12470_v48 = vadd.f32 %v6550_v24, %v12089_v61 }
0x26bb   :  { %v6566_v56 = vsel %vm547_vm3, %v12470_v48, 0.0 }
0x26bc   :  { %6567 = vadd.xlane.f32.xlu0 %v6566_v56 }
0x26be   :  { %v6554_v8 = vpop.f32.mrf.mxu0 }
0x26bf   :  { %v6555_v63 = vadd.f32 %v6554_v8, %v11519_v47 }
0x26c0   :  { %v9435_v62 = vpop.f32.mrf.mxu0 }
0x26c1   :  { %v12476_v2 = vadd.f32 %v6555_v63, %v12095_v29 }
0x26c3   :  { %v6569_v40 = vsel %vm547_vm3, %v12476_v2, 0.0 }
0x26c4   :  { %6570 = vadd.xlane.f32.xlu1 %v6569_v40 }
0x26f3   :  { %v6559_v35 = vpop.f32.mrf.mxu0 }
0x26f4   :  { %v6560_v58 = vadd.f32 %v6559_v35, %v11519_v47 }
0x26f5   :  { %v9438_v61 = vpop.f32.mrf.mxu0 }
0x26f6   :  { %v12482_v60 = vadd.f32 %v6560_v58, %v12101_v44 }
0x26f8   :  { %v6572_v20 = vsel %vm783_vm9, %v12482_v60, 0.0 }
0x26f9   :  { %6573 = vadd.xlane.f32.xlu0 %v6572_v20 }
0x2745   :  { %v6568_v12 = vpop.xlane.xlu0 %6567 }
0x2746   :  { %v6575_v59 = vmul.f32 0.03125, %v6568_v12 }
0x2748   :  { %v6578_v29 = vsub.f32 %v12470_v48, %v6575_v59 }
0x274a   :  { %v6581_v25 = vmul.f32 %v6578_v29, %v6578_v29 }
0x274c   :  { %v6584_v0 = vsel %vm547_vm3, %v6581_v25, 0.0 }
0x274d   :  { %6585 = vadd.xlane.f32.xlu0 %v6584_v0  ;;  %v6571_v53 = vpop.xlane.xlu1 %6570 }
0x274e   :  { %v6576_v34 = vmul.f32 0.03125, %v6571_v53 }
0x2750   :  { %v6579_v47 = vsub.f32 %v12476_v2, %v6576_v34 }
0x2752   :  { %v6582_v5 = vmul.f32 %v6579_v47, %v6579_v47 }
0x2754   :  { %v6587_v44 = vsel %vm547_vm3, %v6582_v5, 0.0 }
0x2755   :  { %6588 = vadd.xlane.f32.xlu1 %v6587_v44 }
0x2766   :  { %9559 = vrot.lane.b32.xlu1 %v9558_v51, %s10280_s28 }
0x276a   :  { %9569 = vrot.lane.b32.xlu1 %v9568_v33, %s10286_s22 }
0x2782   :  { %v6574_v4 = vpop.xlane.xlu0 %6573 }
0x2783   :  { %v6577_v17 = vmul.f32 0.03125, %v6574_v4 }
0x2785   :  { %v6580_v9 = vsub.f32 %v12482_v60, %v6577_v17 }
0x2787   :  { %v6583_v46 = vmul.f32 %v6580_v9, %v6580_v9 }
0x2789   :  { %v6590_v19 = vsel %vm783_vm9, %v6583_v46, 0.0 }
0x278a   :  { %6591 = vadd.xlane.f32.xlu0 %v6590_v19 }
0x27a0   :  { %9554 = vrot.lane.b32.xlu0 %v9553_v30, %s10280_s28 }
0x27a4   :  { %9564 = vrot.lane.b32.xlu0 %v9563_v57, %s10286_s22 }
0x27d6   :  { %v6586_v42 = vpop.xlane.xlu0 %6585 }
0x27d7   :  { %v6593_v49 = vmul.f32 0.03125, %v6586_v42 }
0x27d9   :  { %v6596_v23 = vadd.f32 1e-05, %v6593_v49 }
0x27db   :  { %9863 = vrsqrt.f32 %v6596_v23  ;;  %v3812_v23 = vrot.slane %v12509_v26, 3 }
0x27de   :  { %v6589_v27 = vpop.xlane.xlu1 %6588 }
0x27df   :  { %v6594_v32 = vmul.f32 0.03125, %v6589_v27  ;;  %v3826_v27 = vrot.slane %v12509_v26, 7 }
0x27e1   :  { %v6597_v43 = vadd.f32 1e-05, %v6594_v32 }
0x27e3   :  { %9865 = vrsqrt.f32 %v6597_v43 }
0x27e8   :  { %v9864_v3 = vpop.eup %9863 }
0x27e9   :  { %v6602_v24 = vmul.f32 %v9864_v3, %v6578_v29 }
0x27eb   :  { %v6605_v10 = vmul.f32 %v6602_v24, %v11587_v54 }
0x27ed   :  { %v6608_v56 = vadd.f32 %v6605_v10, %v11597_v55 }
0x27ef   :  { %9448 = vmatmul.mubr.msk.f32.vlgmr.msra.gmra.mxu1 %vm547_vm3, %v6608_v56 }
0x27f0   :  { %9450 = vmatprep.mubr.msk.f32.mxu1 %vm10302_vm10, %v10301_v36  ;;  %v9866_v8 = vpop.eup %9865 }
0x27f1   :  { %v6603_v63 = vmul.f32 %v9866_v8, %v6579_v47 }
0x27f3   :  { %v6606_v62 = vmul.f32 %v6603_v63, %v11587_v54 }
0x27f5   :  { %v6609_v40 = vadd.f32 %v6606_v62, %v11597_v55 }
0x27f7   :  { %9451 = vmatmul.mubr.msk.f32.gmra.mxu1 %vm547_vm3, %v6609_v40 }
0x27f8   :  { %9453 = vmatprep.mubr.msk.f32.mxu1 %vm10302_vm10, %v10301_v36 }
0x2813   :  { %v6592_v35 = vpop.xlane.xlu0 %6591 }
0x2814   :  { %v6595_v58 = vmul.f32 0.03125, %v6592_v35 }
0x2816   :  { %v6598_v61 = vadd.f32 1e-05, %v6595_v58 }
0x2818   :  { %9867 = vrsqrt.f32 %v6598_v61 }
0x2825   :  { %v9868_v20 = vpop.eup %9867 }
0x2826   :  { %v6604_v12 = vmul.f32 %v9868_v20, %v6580_v9 }
0x2828   :  { %v6607_v59 = vmul.f32 %v6604_v12, %v11587_v54 }
0x282a   :  { %v6610_v29 = vadd.f32 %v6607_v59, %v11597_v55 }
0x282c   :  { %9454 = vmatmul.mubr.msk.f32.gmra.mxu1 %vm547_vm3, %v6610_v29 }
0x28af   :  { %v6686_v25 = vpop.f32.mrf.mxu1 }
0x28b0   :  { %v6687_v0 = vadd.f32 %v6686_v25, %v11628_v18 }
0x28b1   :  { %v9449_v53 = vpop.f32.mrf.mxu1 }
0x28b2   :  { %v6700_v34 = vmax.f32 %v6687_v0, 0.0 }
0x28b4   :  { %9473 = vmatmul.mubr.msk.f32.vlgmr.msra.gmra.mxu0 %vm653_vm7, %v6700_v34 }
0x28b5   :  { %9475 = vmatprep.mubr.msk.f32.mxu0 %vm10302_vm10, %v10301_v36 }
0x28b7   :  { %v6691_v47 = vpop.f32.mrf.mxu1 }
0x28b8   :  { %v6692_v5 = vadd.f32 %v6691_v47, %v11628_v18 }
0x28b9   :  { %v9452_v44 = vpop.f32.mrf.mxu1 }
0x28ba   :  { %v6701_v22 = vmax.f32 %v6692_v5, 0.0 }
0x28bc   :  { %9476 = vmatmul.mubr.msk.f32.gmra.mxu0 %vm653_vm7, %v6701_v22 }
0x28bd   :  { %9478 = vmatprep.mubr.msk.f32.mxu0 %vm10302_vm10, %v10301_v36 }
0x28ec   :  { %v6696_v54 = vpop.f32.mrf.mxu1 }
0x28ed   :  { %v6697_v55 = vadd.f32 %v6696_v54, %v11628_v18 }
0x28ee   :  { %v9455_v13 = vpop.f32.mrf.mxu1 }
0x28ef   :  { %v6702_v38 = vmax.f32 %v6697_v55, 0.0 }
0x28f1   :  { %9479 = vmatmul.mubr.msk.f32.gmra.mxu0 %vm653_vm7, %v6702_v38 }
0x2974   :  { %v6778_v14 = vpop.f32.mrf.mxu0 }
0x2975   :  { %v6779_v51 = vadd.f32 %v6778_v14, %v12491_v1 }
0x2976   :  { %v9474_v41 = vpop.f32.mrf.mxu0 }
0x2977   :  { %v12542_v16 = vadd.f32 %v6779_v51, %v12470_v48 }
0x2979   :  { %v6804_v33 = vrot.slane %v12542_v16, 3  ;;  %v6818_v4 = vrot.slane %v12542_v16, 7  ;;  %v6796_v17 = vrot.slane %v12542_v16, 1  ;;  %v6810_v9 = vrot.slane %v12542_v16, 5 }
0x297a   :  { %v6800_v19 = vrot.slane %v12542_v16, 2  ;;  %v6814_v52 = vrot.slane %v12542_v16, 6 }
0x297b   :  { %v9583_v18 = vpack.i.bf16 %v6818_v4, %v6804_v33  ;;  %v9573_v46 = vpack.i.bf16 %v6810_v9, %v6796_v17 }
0x297c   :  { %v6783_v6 = vpop.f32.mrf.mxu0  ;;  %v9578_v30 = vpack.i.bf16 %v6814_v52, %v6800_v19 }
0x297d   :  { %9584 = vrot.lane.b32.xlu0 %v9583_v18, %s10303_s11  ;;  %9574 = vrot.lane.b32.xlu1 %v9573_v46, %s10280_s28  ;;  %v6784_v48 = vadd.f32 %v6783_v6, %v12491_v1 }
0x297e   :  { %v9477_v45 = vpop.f32.mrf.mxu0 }
0x297f   :  { %v12554_v11 = vadd.f32 %v6784_v48, %v12476_v2 }
0x2981   :  { %9579 = vrot.lane.b32.xlu1 %v9578_v30, %s10286_s22  ;;  %v6827_v7 = vrot.slane %v12554_v11, 2  ;;  %v6841_v57 = vrot.slane %v12554_v11, 6  ;;  %v6823_v42 = vrot.slane %v12554_v11, 1  ;;  %v6837_v49 = vrot.slane %v12554_v11, 5 }
0x2982   :  { %v6831_v43 = vrot.slane %v12554_v11, 3  ;;  %v6845_v3 = vrot.slane %v12554_v11, 7 }
0x2983   :  { %v9593_v2 = vpack.i.bf16 %v6841_v57, %v6827_v7  ;;  %v9588_v32 = vpack.i.bf16 %v6837_v49, %v6823_v42 }
0x2984   :  { %10229 = shalt.err (!%p10226_p11)  }
0x2985   :  { %267 = dma.hbm_to_vmem [thread:$0]  %s12704_s17, 34816, %s265_s7, [#allocation4]  ;;  %9594 = vrot.lane.b32.xlu1 %v9593_v2, %s10286_s22  ;;  %9589 = vrot.lane.b32.xlu0 %v9588_v32, %s10280_s28 }
0x2986   :  { %s10238_s6 = scalar_lea.vmem %s277_s15, 8192  ;;  %p10243_p13 = scmp.lt.s32.totalorder %s277_s15, %s277_s15 }
0x2987   :  { %p10239_p12 = scmp.ne.s32.totalorder %s277_s15, %s10238_s6  ;;  %p10244_p0 = scmp.lt.s32.totalorder %s10238_s6, %s10238_s6 }
0x2989   :  { %p10245_p1 = por %p10244_p0, %p10243_p13 }
0x298b   :  { %p10246_p2 = pnand %p10245_p1, %p10239_p12 }
0x298d   :  { %10249 = shalt.err (!%p10246_p2)  }
0x298e   :  { %279 = dma.hbm_to_vmem [thread:$0]  %s12705_s18, 8192, %s277_s15, [#allocation4 + $0x1]  ;;  %v9598_v24 = vpack.i.bf16 %v6845_v3, %v6831_v43  ;;  %v9603_v10 = vpack.i.bf16 %v3826_v27, %v3812_v23  ;;  %v3839_v56 = vrot.slane %v12496_v31, 3  ;;  %v3853_v8 = vrot.slane %v12496_v31, 7  ;;  %v12586_v29 = vpop.permute.xlu1 %9559  ;;  %v9555_v25 = vpop.permute.xlu0 %9554 }
0x298f   :  { %v3797_v40 = vadd.f32 %v11668_v28, %v12491_v1  ;;  %v6808_v54 = vrot.slane %v12542_v16, 4  ;;  %v9562_v55 = vunpack.i.h.bf16 %v12586_v29  ;;  %v9561_v13 = vunpack.i.l.bf16 %v12586_v29 }
0x2990   :  { %9599 = vrot.lane.b32.xlu1 %v9598_v24, %s10303_s11  ;;  %9604 = vrot.lane.b32.xlu0 %v9603_v10, %s10303_s11  ;;  %v9608_v63 = vpack.i.bf16 %v3853_v8, %v3839_v56  ;;  %v9557_v38 = vunpack.i.h.bf16 %v9555_v25  ;;  %v9556_v14 = vunpack.i.l.bf16 %v9555_v25  ;;  %vm3859_vm13 = vcmask 785408  }
0x2991   :  { %v3802_v20 = vadd.f32 %v3797_v40, %v11535_v50  ;;  %v3816_v50 = vrot.slane %v12509_v26, 4  ;;  %v6835_v46 = vrot.slane %v12554_v11, 4 }
0x2992   :  { %v12588_v0 = vpop.permute.xlu1 %9569  ;;  %v9565_v34 = vpop.permute.xlu0 %9564  ;;  %v3857_v7 = vsel %vm547_vm3, %v12509_v26, %v9556_v14 }
0x2993   :  { %v9567_v51 = vunpack.i.h.bf16 %v9565_v34  ;;  %v9566_v41 = vunpack.i.l.bf16 %v9565_v34  ;;  %v3861_v30 = vsel %vm547_vm3, %v3816_v50, %v9557_v38  ;;  %v9572_v2 = vunpack.i.h.bf16 %v12588_v0 }
0x2994   :  { %9609 = vrot.lane.b32.xlu1 %v9608_v63, %s10303_s11  ;;  %v9571_v32 = vunpack.i.l.bf16 %v12588_v0  ;;  %v3864_v34 = vsel %vm547_vm3, %v12496_v31, %v9561_v13 }
0x2995   :  { %v3858_v43 = vsel %vm653_vm7, %v3857_v7, %v9566_v41  ;;  %v3862_v3 = vsel %vm653_vm7, %v3861_v30, %v9567_v51 }
0x29b1   :  { %v6788_v62 = vpop.f32.mrf.mxu0 }
0x29b2   :  { %v6789_v35 = vadd.f32 %v6788_v62, %v12491_v1 }
0x29b3   :  { %v9480_v58 = vpop.f32.mrf.mxu0 }
0x29b4   :  { %v6794_v61 = vadd.f32 %v6789_v35, %v12482_v60  ;;  %v3843_v60 = vrot.slane %v12496_v31, 4 }
0x29b6   :  { %v6870_v12 = vrot.slane %v6794_v61, 7 }
0x29b8   :  { %v12584_v59 = vsel %vm762_vm8, %v3802_v20, %v6870_v12 }
0x29ef   :  { %v9575_v53 = vpop.permute.xlu1 %9574  ;;  %v9585_v1 = vpop.permute.xlu0 %9584 }
0x29f0   :  { %v9577_v47 = vunpack.i.h.bf16 %v9575_v53  ;;  %v9576_v28 = vunpack.i.l.bf16 %v9575_v53  ;;  %v9587_v52 = vunpack.i.h.bf16 %v9585_v1  ;;  %v9586_v6 = vunpack.i.l.bf16 %v9585_v1 }
0x29f1   :  { %v3867_v53 = vsel %vm547_vm3, %v3843_v60, %v9562_v55 }
0x29f2   :  { %v6852_v33 = vsel %vm547_vm3, %v6808_v54, %v9577_v47  ;;  %v6849_v4 = vsel %vm547_vm3, %v12542_v16, %v9576_v28  ;;  %v3868_v1 = vsel %vm653_vm7, %v3867_v53, %v9572_v2 }
0x29f3   :  { %v9580_v5 = vpop.permute.xlu1 %9579 }
0x29f4   :  { %v9582_v44 = vunpack.i.h.bf16 %v9580_v5  ;;  %v9581_v22 = vunpack.i.l.bf16 %v9580_v5  ;;  %v3865_v5 = vsel %vm653_vm7, %v3864_v34, %v9571_v32 }
0x29f6   :  { %v6850_v17 = vsel %vm653_vm7, %v6849_v4, %v9581_v22  ;;  %v6853_v9 = vsel %vm653_vm7, %v6852_v33, %v9582_v44 }
0x29f7   :  { %v9595_v18 = vpop.permute.xlu1 %9594  ;;  %v9590_v19 = vpop.permute.xlu0 %9589  ;;  %v6851_v42 = vsel %vm3859_vm13, %v6850_v17, %v9586_v6  ;;  %v6854_v49 = vsel %vm3859_vm13, %v6853_v9, %v9587_v52 }
0x29f8   :  { %v9592_v48 = vunpack.i.h.bf16 %v9590_v19  ;;  %v9591_v45 = vunpack.i.l.bf16 %v9590_v19  ;;  %v9597_v57 = vunpack.i.h.bf16 %v9595_v18  ;;  %v9596_v16 = vunpack.i.l.bf16 %v9595_v18 }
0x29f9   :  { %v6866_v62 = vrot.slane %v6851_v42, 7  ;;  %v6867_v40 = vrot.slane %v6854_v49, 7 }
0x29fa   :  { %v6858_v23 = vsel %vm547_vm3, %v6835_v46, %v9592_v48  ;;  %v6855_v27 = vsel %vm547_vm3, %v12554_v11, %v9591_v45 }
0x29fb   :  { %v6856_v35 = vsel %vm653_vm7, %v6855_v27, %v9596_v16  ;;  %v6859_v11 = vsel %vm653_vm7, %v6858_v23, %v9597_v57 }
0x2a02   :  { %v9600_v26 = vpop.permute.xlu1 %9599  ;;  %v9605_v24 = vpop.permute.xlu0 %9604 }
0x2a03   :  { %v9602_v10 = vunpack.i.h.bf16 %v9600_v26  ;;  %v9601_v56 = vunpack.i.l.bf16 %v9600_v26  ;;  %v9607_v8 = vunpack.i.h.bf16 %v9605_v24  ;;  %v9606_v63 = vunpack.i.l.bf16 %v9605_v24 }
0x2a05   :  { %v6857_v58 = vsel %vm3859_vm13, %v6856_v35, %v9601_v56  ;;  %v6860_v61 = vsel %vm3859_vm13, %v6859_v11, %v9602_v10  ;;  %v3860_v20 = vsel %vm3859_vm13, %v3858_v43, %v9606_v63  ;;  %v3863_v12 = vsel %vm3859_vm13, %v3862_v3, %v9607_v8 }
0x2a06   :  { %v12620_v29 = vsel %vm762_vm8, %v3860_v20, %v6866_v62  ;;  %v12623_v25 = vsel %vm762_vm8, %v3863_v12, %v6867_v40  ;;  %v9610_v0 = vpop.permute.xlu1 %9609  ;;  %v6868_v44 = vrot.slane %v6857_v58, 7  ;;  %v6869_v22 = vrot.slane %v6860_v61, 7 }
0x2a07   :  { %v9612_v47 = vunpack.i.h.bf16 %v9610_v0  ;;  %v9611_v28 = vunpack.i.l.bf16 %v9610_v0 }
0x2a09   :  { %v3869_v50 = vsel %vm3859_vm13, %v3868_v1, %v9612_v47  ;;  %v3866_v54 = vsel %vm3859_vm13, %v3865_v5, %v9611_v28 }
0x2a0a   :  { %v12633_v38 = vsel %vm762_vm8, %v3866_v54, %v6868_v44  ;;  %v12636_v60 = vsel %vm762_vm8, %v3869_v50, %v6869_v22 }
0x2a0b   :  { %10268 = dma.done.wait [#allocation4], 34816 }
0x2a0c   :  { %10269 = vsyncadd [#allocation4], 4294932480  ;;  %7246 = vmatprep.mubr.f32.mxu1 %v12623_v25  ;;  %7317 = vmatprep.mubr.f32.mxu0 %v12636_v60  ;;  %v6946_v31 = vld [vmem:[#allocation2 + $0x1e8] sm:$0xff]  ;;  %v6945_v55 = vld [vmem:[#allocation2 + $0x1e0] sm:$0xff] }
0x2a0d   :  { %v6942_v13 = vld [vmem:[#allocation2 + $0x1c8] sm:$0xff]  ;;  %7182 = vmatprep.subr.mxu1 %v6946_v31  ;;  %v6941_v51 = vld [vmem:[#allocation2 + $0x1c0] sm:$0xff] }
0x2a0e   :  { %v7074_v14 = vld [vmem:[#allocation2 + $0x5e8] sm:$0xff]  ;;  %v7073_v41 = vld [vmem:[#allocation2 + $0x5e0] sm:$0xff]  ;;  %7183 = vmatpush1.msra.mxu1 %v6945_v55 }
0x2a0f   :  { %7253 = vmatprep.subr.mxu0 %v7074_v14  ;;  %v6938_v33 = vld [vmem:[#allocation2 + $0x1a8] sm:$0xff]  ;;  %7184 = vmatprep.subr.mxu1 %v6942_v13  ;;  %v6937_v17 = vld [vmem:[#allocation2 + $0x1a0] sm:$0xff] }
0x2a10   :  { %v7070_v4 = vld [vmem:[#allocation2 + $0x5c8] sm:$0xff]  ;;  %7254 = vmatpush1.msra.mxu0 %v7073_v41  ;;  %v7069_v9 = vld [vmem:[#allocation2 + $0x5c0] sm:$0xff]  ;;  %7185 = vmatpush1.msra.mxu1 %v6941_v51 }
0x2a11   :  { %v7066_v18 = vld [vmem:[#allocation2 + $0x5a8] sm:$0xff]  ;;  %7255 = vmatprep.subr.mxu0 %v7070_v4  ;;  %v7065_v19 = vld [vmem:[#allocation2 + $0x5a0] sm:$0xff]  ;;  %7186 = vmatprep.subr.mxu1 %v6938_v33 }
0x2a12   :  { %v6934_v46 = vld [vmem:[#allocation2 + $0x188] sm:$0xff]  ;;  %7256 = vmatpush1.msra.mxu0 %v7069_v9  ;;  %v6933_v52 = vld [vmem:[#allocation2 + $0x180] sm:$0xff]  ;;  %7187 = vmatpush1.msra.mxu1 %v6937_v17 }
0x2a13   :  { %v7062_v6 = vld [vmem:[#allocation2 + $0x588] sm:$0xff]  ;;  %7257 = vmatprep.subr.mxu0 %v7066_v18  ;;  %v7061_v45 = vld [vmem:[#allocation2 + $0x580] sm:$0xff]  ;;  %7188 = vmatprep.subr.mxu1 %v6934_v46 }
0x2a14   :  { %v6930_v48 = vld [vmem:[#allocation2 + $0x168] sm:$0xff]  ;;  %7258 = vmatpush1.msra.mxu0 %v7065_v19  ;;  %v6929_v30 = vld [vmem:[#allocation2 + $0x160] sm:$0xff]  ;;  %7189 = vmatpush1.msra.mxu1 %v6933_v52 }
0x2a15   :  { %v7058_v7 = vld [vmem:[#allocation2 + $0x568] sm:$0xff]  ;;  %7259 = vmatprep.subr.mxu0 %v7062_v6  ;;  %v7057_v16 = vld [vmem:[#allocation2 + $0x560] sm:$0xff]  ;;  %7190 = vmatprep.subr.mxu1 %v6930_v48 }
0x2a16   :  { %v6926_v57 = vld [vmem:[#allocation2 + $0x148] sm:$0xff]  ;;  %7260 = vmatpush1.msra.mxu0 %v7061_v45  ;;  %v6925_v42 = vld [vmem:[#allocation2 + $0x140] sm:$0xff]  ;;  %7191 = vmatpush1.msra.mxu1 %v6929_v30 }
0x2a17   :  { %v7054_v49 = vld [vmem:[#allocation2 + $0x548] sm:$0xff]  ;;  %7261 = vmatprep.subr.mxu0 %v7058_v7  ;;  %v7053_v27 = vld [vmem:[#allocation2 + $0x540] sm:$0xff]  ;;  %7192 = vmatprep.subr.mxu1 %v6926_v57 }
0x2a18   :  { %v6922_v23 = vld [vmem:[#allocation2 + $0x128] sm:$0xff]  ;;  %7262 = vmatpush1.msra.mxu0 %v7057_v16  ;;  %v6921_v2 = vld [vmem:[#allocation2 + $0x120] sm:$0xff]  ;;  %7193 = vmatpush1.msra.mxu1 %v6925_v42 }
0x2a19   :  { %v7050_v32 = vld [vmem:[#allocation2 + $0x528] sm:$0xff]  ;;  %7263 = vmatprep.subr.mxu0 %v7054_v49  ;;  %v7049_v3 = vld [vmem:[#allocation2 + $0x520] sm:$0xff]  ;;  %7194 = vmatprep.subr.mxu1 %v6922_v23 }
0x2a1a   :  { %v6918_v43 = vld [vmem:[#allocation2 + $0x108] sm:$0xff]  ;;  %7264 = vmatpush1.msra.mxu0 %v7053_v27  ;;  %v6917_v26 = vld [vmem:[#allocation2 + $0x100] sm:$0xff]  ;;  %7195 = vmatpush1.msra.mxu1 %v6921_v2 }
0x2a1b   :  { %v7046_v24 = vld [vmem:[#allocation2 + $0x508] sm:$0xff]  ;;  %7265 = vmatprep.subr.mxu0 %v7050_v32  ;;  %v7045_v56 = vld [vmem:[#allocation2 + $0x500] sm:$0xff]  ;;  %7196 = vmatprep.subr.mxu1 %v6918_v43 }
0x2a1c   :  { %v6914_v10 = vld [vmem:[#allocation2 + $0xe8] sm:$0xff]  ;;  %7266 = vmatpush1.msra.mxu0 %v7049_v3  ;;  %v6913_v8 = vld [vmem:[#allocation2 + $0xe0] sm:$0xff]  ;;  %7197 = vmatpush1.msra.mxu1 %v6917_v26 }
0x2a1d   :  { %v7042_v63 = vld [vmem:[#allocation2 + $0x4e8] sm:$0xff]  ;;  %7267 = vmatprep.subr.mxu0 %v7046_v24  ;;  %v7041_v40 = vld [vmem:[#allocation2 + $0x4e0] sm:$0xff]  ;;  %7198 = vmatprep.subr.mxu1 %v6914_v10 }
0x2a1e   :  { %v6910_v62 = vld [vmem:[#allocation2 + $0xc8] sm:$0xff]  ;;  %7268 = vmatpush1.msra.mxu0 %v7045_v56  ;;  %v6909_v35 = vld [vmem:[#allocation2 + $0xc0] sm:$0xff]  ;;  %7199 = vmatpush1.msra.mxu1 %v6913_v8 }
0x2a1f   :  { %v7038_v11 = vld [vmem:[#allocation2 + $0x4c8] sm:$0xff]  ;;  %7269 = vmatprep.subr.mxu0 %v7042_v63  ;;  %v7037_v61 = vld [vmem:[#allocation2 + $0x4c0] sm:$0xff]  ;;  %7200 = vmatprep.subr.mxu1 %v6910_v62 }
0x2a20   :  { %v6906_v58 = vld [vmem:[#allocation2 + $0xa8] sm:$0xff]  ;;  %7270 = vmatpush1.msra.mxu0 %v7041_v40  ;;  %v6905_v20 = vld [vmem:[#allocation2 + $0xa0] sm:$0xff]  ;;  %7201 = vmatpush1.msra.mxu1 %v6909_v35 }
0x2a21   :  { %v7034_v12 = vld [vmem:[#allocation2 + $0x4a8] sm:$0xff]  ;;  %7271 = vmatprep.subr.mxu0 %v7038_v11  ;;  %v7033_v53 = vld [vmem:[#allocation2 + $0x4a0] sm:$0xff]  ;;  %7202 = vmatprep.subr.mxu1 %v6906_v58 }
0x2a22   :  { %v6902_v0 = vld [vmem:[#allocation2 + $0x88] sm:$0xff]  ;;  %7272 = vmatpush1.msra.mxu0 %v7037_v61  ;;  %v6901_v34 = vld [vmem:[#allocation2 + $0x80] sm:$0xff]  ;;  %7203 = vmatpush1.msra.mxu1 %v6905_v20 }
0x2a23   :  { %v7030_v47 = vld [vmem:[#allocation2 + $0x488] sm:$0xff]  ;;  %7273 = vmatprep.subr.mxu0 %v7034_v12  ;;  %v7029_v5 = vld [vmem:[#allocation2 + $0x480] sm:$0xff]  ;;  %7204 = vmatprep.subr.mxu1 %v6902_v0 }
0x2a24   :  { %v6898_v28 = vld [vmem:[#allocation2 + $0x68] sm:$0xff]  ;;  %7274 = vmatpush1.msra.mxu0 %v7033_v53  ;;  %v6897_v1 = vld [vmem:[#allocation2 + $0x60] sm:$0xff]  ;;  %7205 = vmatpush1.msra.mxu1 %v6901_v34 }
0x2a25   :  { %v7026_v44 = vld [vmem:[#allocation2 + $0x468] sm:$0xff]  ;;  %7275 = vmatprep.subr.mxu0 %v7030_v47  ;;  %v7025_v50 = vld [vmem:[#allocation2 + $0x460] sm:$0xff]  ;;  %7206 = vmatprep.subr.mxu1 %v6898_v28 }
0x2a26   :  { %v6894_v22 = vld [vmem:[#allocation2 + $0x48] sm:$0xff]  ;;  %7276 = vmatpush1.msra.mxu0 %v7029_v5  ;;  %v6893_v54 = vld [vmem:[#allocation2 + $0x40] sm:$0xff]  ;;  %7207 = vmatpush1.msra.mxu1 %v6897_v1 }
0x2a27   :  { %v7022_v31 = vld [vmem:[#allocation2 + $0x448] sm:$0xff]  ;;  %7277 = vmatprep.subr.mxu0 %v7026_v44  ;;  %v7021_v13 = vld [vmem:[#allocation2 + $0x440] sm:$0xff]  ;;  %7208 = vmatprep.subr.mxu1 %v6894_v22 }
0x2a28   :  { %v6890_v55 = vld [vmem:[#allocation2 + $0x28] sm:$0xff]  ;;  %7278 = vmatpush1.msra.mxu0 %v7025_v50  ;;  %v6889_v14 = vld [vmem:[#allocation2 + $0x20] sm:$0xff]  ;;  %7209 = vmatpush1.msra.mxu1 %v6893_v54 }
0x2a29   :  { %v7018_v51 = vld [vmem:[#allocation2 + $0x428] sm:$0xff]  ;;  %7279 = vmatprep.subr.mxu0 %v7022_v31  ;;  %v7017_v33 = vld [vmem:[#allocation2 + $0x420] sm:$0xff]  ;;  %7210 = vmatprep.subr.mxu1 %v6890_v55 }
0x2a2a   :  { %v6886_v41 = vld [vmem:[#allocation2 + $0x8] sm:$0xff]  ;;  %7280 = vmatpush1.msra.mxu0 %v7021_v13  ;;  %v6885_v4 = vld [vmem:[#allocation2] sm:$0xff]  ;;  %7211 = vmatpush1.msra.mxu1 %v6889_v14 }
0x2a2b   :  { %v7014_v17 = vld [vmem:[#allocation2 + $0x408] sm:$0xff]  ;;  %7281 = vmatprep.subr.mxu0 %v7018_v51  ;;  %v7013_v18 = vld [vmem:[#allocation2 + $0x400] sm:$0xff]  ;;  %7212 = vmatprep.subr.mxu1 %v6886_v41 }
0x2a2c   :  { %v7010_v9 = vld [vmem:[#allocation2 + $0x3e8] sm:$0xff]  ;;  %7282 = vmatpush1.msra.mxu0 %v7017_v33  ;;  %v7009_v46 = vld [vmem:[#allocation2 + $0x3e0] sm:$0xff]  ;;  %7213 = vmatpush1.msra.mxu1 %v6885_v4 }
0x2a2d   :  { %v7138_v19 = vld [vmem:[#allocation2 + $0x7e8] sm:$0xff]  ;;  %7283 = vmatprep.subr.mxu0 %v7014_v17  ;;  %v7137_v6 = vld [vmem:[#allocation2 + $0x7e0] sm:$0xff]  ;;  %7214 = vmatprep.subr.mxu1 %v7010_v9 }
0x2a2e   :  { %v7006_v52 = vld [vmem:[#allocation2 + $0x3c8] sm:$0xff]  ;;  %7284 = vmatpush1.msra.mxu0 %v7013_v18  ;;  %v7005_v48 = vld [vmem:[#allocation2 + $0x3c0] sm:$0xff]  ;;  %7215 = vmatpush2.msra.mxu1 %v7009_v46 }
0x2a2f   :  { %v7134_v45 = vld [vmem:[#allocation2 + $0x7c8] sm:$0xff]  ;;  %7285 = vmatprep.subr.mxu0 %v7138_v19  ;;  %v7133_v7 = vld [vmem:[#allocation2 + $0x7c0] sm:$0xff]  ;;  %7216 = vmatprep.subr.mxu1 %v7006_v52 }
0x2a30   :  { %v7002_v30 = vld [vmem:[#allocation2 + $0x3a8] sm:$0xff]  ;;  %7286 = vmatpush2.msra.mxu0 %v7137_v6  ;;  %v7001_v57 = vld [vmem:[#allocation2 + $0x3a0] sm:$0xff]  ;;  %7217 = vmatpush2.msra.mxu1 %v7005_v48 }
0x2a31   :  { %v7130_v16 = vld [vmem:[#allocation2 + $0x7a8] sm:$0xff]  ;;  %7287 = vmatprep.subr.mxu0 %v7134_v45  ;;  %v7129_v49 = vld [vmem:[#allocation2 + $0x7a0] sm:$0xff]  ;;  %7218 = vmatprep.subr.mxu1 %v7002_v30 }
0x2a32   :  { %v6998_v42 = vld [vmem:[#allocation2 + $0x388] sm:$0xff]  ;;  %7288 = vmatpush2.msra.mxu0 %v7133_v7  ;;  %v6997_v23 = vld [vmem:[#allocation2 + $0x380] sm:$0xff]  ;;  %7219 = vmatpush2.msra.mxu1 %v7001_v57 }
0x2a33   :  { %v7126_v27 = vld [vmem:[#allocation2 + $0x788] sm:$0xff]  ;;  %7289 = vmatprep.subr.mxu0 %v7130_v16  ;;  %v7125_v32 = vld [vmem:[#allocation2 + $0x780] sm:$0xff]  ;;  %7220 = vmatprep.subr.mxu1 %v6998_v42 }
0x2a34   :  { %v6994_v2 = vld [vmem:[#allocation2 + $0x368] sm:$0xff]  ;;  %7290 = vmatpush2.msra.mxu0 %v7129_v49  ;;  %v6993_v43 = vld [vmem:[#allocation2 + $0x360] sm:$0xff]  ;;  %7221 = vmatpush2.msra.mxu1 %v6997_v23 }
0x2a35   :  { %v7122_v3 = vld [vmem:[#allocation2 + $0x768] sm:$0xff]  ;;  %7291 = vmatprep.subr.mxu0 %v7126_v27  ;;  %v7121_v24 = vld [vmem:[#allocation2 + $0x760] sm:$0xff]  ;;  %7222 = vmatprep.subr.mxu1 %v6994_v2  ;;  %v7076_v2 = vld [vmem:[#allocation2 + $0x5f8] sm:$0xff] }
0x2a36   :  { %v6990_v26 = vld [vmem:[#allocation2 + $0x348] sm:$0xff]  ;;  %7292 = vmatpush2.msra.mxu0 %v7125_v32  ;;  %v6989_v10 = vld [vmem:[#allocation2 + $0x340] sm:$0xff]  ;;  %7223 = vmatpush2.msra.mxu1 %v6993_v43  ;;  %v7075_v43 = vld [vmem:[#allocation2 + $0x5f0] sm:$0xff] }
0x2a37   :  { %v7118_v56 = vld [vmem:[#allocation2 + $0x748] sm:$0xff]  ;;  %7293 = vmatprep.subr.mxu0 %v7122_v3  ;;  %v7117_v63 = vld [vmem:[#allocation2 + $0x740] sm:$0xff]  ;;  %7224 = vmatprep.subr.mxu1 %v6990_v26  ;;  %v7072_v26 = vld [vmem:[#allocation2 + $0x5d8] sm:$0xff] }
0x2a38   :  { %v6986_v8 = vld [vmem:[#allocation2 + $0x328] sm:$0xff]  ;;  %7294 = vmatpush2.msra.mxu0 %v7121_v24  ;;  %v6985_v62 = vld [vmem:[#allocation2 + $0x320] sm:$0xff]  ;;  %7225 = vmatpush2.msra.mxu1 %v6989_v10  ;;  %v7071_v10 = vld [vmem:[#allocation2 + $0x5d0] sm:$0xff] }
0x2a39   :  { %v7114_v40 = vld [vmem:[#allocation2 + $0x728] sm:$0xff]  ;;  %7295 = vmatprep.subr.mxu0 %v7118_v56  ;;  %v7113_v11 = vld [vmem:[#allocation2 + $0x720] sm:$0xff]  ;;  %7226 = vmatprep.subr.mxu1 %v6986_v8  ;;  %v6948_v56 = vld [vmem:[#allocation2 + $0x1f8] sm:$0xff] }
0x2a3a   :  { %v6982_v35 = vld [vmem:[#allocation2 + $0x308] sm:$0xff]  ;;  %7296 = vmatpush2.msra.mxu0 %v7117_v63  ;;  %v6981_v58 = vld [vmem:[#allocation2 + $0x300] sm:$0xff]  ;;  %7227 = vmatpush2.msra.mxu1 %v6985_v62  ;;  %v6947_v8 = vld [vmem:[#allocation2 + $0x1f0] sm:$0xff] }
0x2a3b   :  { %v7110_v61 = vld [vmem:[#allocation2 + $0x708] sm:$0xff]  ;;  %7297 = vmatprep.subr.mxu0 %v7114_v40  ;;  %v7109_v12 = vld [vmem:[#allocation2 + $0x700] sm:$0xff]  ;;  %7228 = vmatprep.subr.mxu1 %v6982_v35  ;;  %v7068_v63 = vld [vmem:[#allocation2 + $0x5b8] sm:$0xff] }
0x2a3c   :  { %v6978_v20 = vld [vmem:[#allocation2 + $0x2e8] sm:$0xff]  ;;  %7298 = vmatpush2.msra.mxu0 %v7113_v11  ;;  %v6977_v0 = vld [vmem:[#allocation2 + $0x2e0] sm:$0xff]  ;;  %7229 = vmatpush2.msra.mxu1 %v6981_v58  ;;  %v6944_v62 = vld [vmem:[#allocation2 + $0x1d8] sm:$0xff] }
0x2a3d   :  { %v7106_v53 = vld [vmem:[#allocation2 + $0x6e8] sm:$0xff]  ;;  %7299 = vmatprep.subr.mxu0 %v7110_v61  ;;  %v7105_v47 = vld [vmem:[#allocation2 + $0x6e0] sm:$0xff]  ;;  %7230 = vmatprep.subr.mxu1 %v6978_v20  ;;  %v7067_v40 = vld [vmem:[#allocation2 + $0x5b0] sm:$0xff] }
0x2a3e   :  { %v6974_v34 = vld [vmem:[#allocation2 + $0x2c8] sm:$0xff]  ;;  %7300 = vmatpush2.msra.mxu0 %v7109_v12  ;;  %v6973_v28 = vld [vmem:[#allocation2 + $0x2c0] sm:$0xff]  ;;  %7231 = vmatpush2.msra.mxu1 %v6977_v0  ;;  %v6943_v35 = vld [vmem:[#allocation2 + $0x1d0] sm:$0xff] }
0x2a3f   :  { %v7102_v5 = vld [vmem:[#allocation2 + $0x6c8] sm:$0xff]  ;;  %7301 = vmatprep.subr.mxu0 %v7106_v53  ;;  %v7101_v44 = vld [vmem:[#allocation2 + $0x6c0] sm:$0xff]  ;;  %7232 = vmatprep.subr.mxu1 %v6974_v34  ;;  %v7064_v11 = vld [vmem:[#allocation2 + $0x598] sm:$0xff] }
0x2a40   :  { %v6970_v1 = vld [vmem:[#allocation2 + $0x2a8] sm:$0xff]  ;;  %7302 = vmatpush2.msra.mxu0 %v7105_v47  ;;  %v6969_v22 = vld [vmem:[#allocation2 + $0x2a0] sm:$0xff]  ;;  %7233 = vmatpush2.msra.mxu1 %v6973_v28  ;;  %v6940_v58 = vld [vmem:[#allocation2 + $0x1b8] sm:$0xff] }
0x2a41   :  { %v7098_v50 = vld [vmem:[#allocation2 + $0x6a8] sm:$0xff]  ;;  %7303 = vmatprep.subr.mxu0 %v7102_v5  ;;  %v7097_v31 = vld [vmem:[#allocation2 + $0x6a0] sm:$0xff]  ;;  %7234 = vmatprep.subr.mxu1 %v6970_v1  ;;  %v7063_v61 = vld [vmem:[#allocation2 + $0x590] sm:$0xff] }
0x2a42   :  { %v6966_v54 = vld [vmem:[#allocation2 + $0x288] sm:$0xff]  ;;  %7304 = vmatpush2.msra.mxu0 %v7101_v44  ;;  %v6965_v55 = vld [vmem:[#allocation2 + $0x280] sm:$0xff]  ;;  %7235 = vmatpush2.msra.mxu1 %v6969_v22  ;;  %v6939_v20 = vld [vmem:[#allocation2 + $0x1b0] sm:$0xff] }
0x2a43   :  { %v7094_v13 = vld [vmem:[#allocation2 + $0x688] sm:$0xff]  ;;  %7305 = vmatprep.subr.mxu0 %v7098_v50  ;;  %v7093_v51 = vld [vmem:[#allocation2 + $0x680] sm:$0xff]  ;;  %7236 = vmatprep.subr.mxu1 %v6966_v54  ;;  %v7060_v12 = vld [vmem:[#allocation2 + $0x578] sm:$0xff] }
0x2a44   :  { %v6962_v14 = vld [vmem:[#allocation2 + $0x268] sm:$0xff]  ;;  %7306 = vmatpush2.msra.mxu0 %v7097_v31  ;;  %v6961_v41 = vld [vmem:[#allocation2 + $0x260] sm:$0xff]  ;;  %7237 = vmatpush2.msra.mxu1 %v6965_v55  ;;  %v6936_v0 = vld [vmem:[#allocation2 + $0x198] sm:$0xff] }
0x2a45   :  { %v7090_v33 = vld [vmem:[#allocation2 + $0x668] sm:$0xff]  ;;  %7307 = vmatprep.subr.mxu0 %v7094_v13  ;;  %v7089_v17 = vld [vmem:[#allocation2 + $0x660] sm:$0xff]  ;;  %7238 = vmatprep.subr.mxu1 %v6962_v14  ;;  %v7059_v53 = vld [vmem:[#allocation2 + $0x570] sm:$0xff] }
0x2a46   :  { %v6958_v4 = vld [vmem:[#allocation2 + $0x248] sm:$0xff]  ;;  %7308 = vmatpush2.msra.mxu0 %v7093_v51  ;;  %v6957_v9 = vld [vmem:[#allocation2 + $0x240] sm:$0xff]  ;;  %7239 = vmatpush2.msra.mxu1 %v6961_v41  ;;  %v6935_v34 = vld [vmem:[#allocation2 + $0x190] sm:$0xff] }
0x2a47   :  { %v7086_v18 = vld [vmem:[#allocation2 + $0x648] sm:$0xff]  ;;  %7309 = vmatprep.subr.mxu0 %v7090_v33  ;;  %v7085_v19 = vld [vmem:[#allocation2 + $0x640] sm:$0xff]  ;;  %7240 = vmatprep.subr.mxu1 %v6958_v4  ;;  %v7056_v47 = vld [vmem:[#allocation2 + $0x558] sm:$0xff] }
0x2a48   :  { %v6954_v46 = vld [vmem:[#allocation2 + $0x228] sm:$0xff]  ;;  %7310 = vmatpush2.msra.mxu0 %v7089_v17  ;;  %v6953_v52 = vld [vmem:[#allocation2 + $0x220] sm:$0xff]  ;;  %7241 = vmatpush2.msra.mxu1 %v6957_v9  ;;  %v6932_v28 = vld [vmem:[#allocation2 + $0x178] sm:$0xff] }
0x2a49   :  { %v7082_v6 = vld [vmem:[#allocation2 + $0x628] sm:$0xff]  ;;  %7311 = vmatprep.subr.mxu0 %v7086_v18  ;;  %v7081_v45 = vld [vmem:[#allocation2 + $0x620] sm:$0xff]  ;;  %7242 = vmatprep.subr.mxu1 %v6954_v46  ;;  %v7055_v5 = vld [vmem:[#allocation2 + $0x550] sm:$0xff] }
0x2a4a   :  { %v6950_v48 = vld [vmem:[#allocation2 + $0x208] sm:$0xff]  ;;  %7312 = vmatpush2.msra.mxu0 %v7085_v19  ;;  %v6949_v30 = vld [vmem:[#allocation2 + $0x200] sm:$0xff]  ;;  %7243 = vmatpush2.msra.mxu1 %v6953_v52  ;;  %v6931_v1 = vld [vmem:[#allocation2 + $0x170] sm:$0xff] }
0x2a4b   :  { %v7078_v7 = vld [vmem:[#allocation2 + $0x608] sm:$0xff]  ;;  %7313 = vmatprep.subr.mxu0 %v7082_v6  ;;  %7244 = vmatprep.subr.mxu1 %v6950_v48  ;;  %v7077_v16 = vld [vmem:[#allocation2 + $0x600] sm:$0xff]  ;;  %v7052_v44 = vld [vmem:[#allocation2 + $0x538] sm:$0xff] }
0x2a4c   :  { %v7154_v57 = vld [vmem:[#allocation2 + $0x868] sm:$0xff]  ;;  %7314 = vmatpush2.msra.mxu0 %v7081_v45  ;;  %v7153_v42 = vld [vmem:[#allocation2 + $0x860] sm:$0xff]  ;;  %7245 = vmatpush2.msra.mxu1 %v6949_v30  ;;  %v6928_v22 = vld [vmem:[#allocation2 + $0x158] sm:$0xff] }
0x2a4d   :  { %7315 = vmatprep.subr.mxu0 %v7078_v7  ;;  %v7150_v49 = vld [vmem:[#allocation2 + $0x848] sm:$0xff]  ;;  %7247 = vmatmul.mubr.f32.vlgmr.msra.gmra.mxu1 %v12620_v29  ;;  %v7149_v23 = vld [vmem:[#allocation2 + $0x840] sm:$0xff]  ;;  %v7051_v50 = vld [vmem:[#allocation2 + $0x530] sm:$0xff] }
0x2a4e   :  { %7348 = vmatprep.subr.mxu1 %v7154_v57  ;;  %7316 = vmatpush2.msra.mxu0 %v7077_v16  ;;  %v7146_v27 = vld [vmem:[#allocation2 + $0x828] sm:$0xff]  ;;  %v7145_v32 = vld [vmem:[#allocation2 + $0x820] sm:$0xff]  ;;  %v6927_v54 = vld [vmem:[#allocation2 + $0x150] sm:$0xff] }
0x2a4f   :  { %7349 = vmatpush1.msra.mxu1 %v7153_v42  ;;  %7318 = vmatmul.mubr.f32.vlgmr.msra.gmra.mxu0 %v12633_v38  ;;  %v7142_v3 = vld [vmem:[#allocation2 + $0x808] sm:$0xff]  ;;  %v7141_v24 = vld [vmem:[#allocation2 + $0x800] sm:$0xff]  ;;  %v7048_v31 = vld [vmem:[#allocation2 + $0x518] sm:$0xff] }
0x2a50   :  { %7350 = vmatprep.subr.mxu1 %v7150_v49  ;;  %7388 = vmatprep.mubr.f32.mxu1 %v10301_v36  ;;  %v6924_v55 = vld [vmem:[#allocation2 + $0x138] sm:$0xff]  ;;  %v7047_v13 = vld [vmem:[#allocation2 + $0x510] sm:$0xff] }
0x2a51   :  { %7351 = vmatpush1.msra.mxu1 %v7149_v23  ;;  %7466 = vmatprep.subr.mxu0 %v7076_v2  ;;  %v6923_v14 = vld [vmem:[#allocation2 + $0x130] sm:$0xff]  ;;  %v7044_v51 = vld [vmem:[#allocation2 + $0x4f8] sm:$0xff] }
0x2a52   :  { %7352 = vmatprep.subr.mxu1 %v7146_v27  ;;  %7467 = vmatpush1.msra.mxu0 %v7075_v43  ;;  %v6920_v41 = vld [vmem:[#allocation2 + $0x118] sm:$0xff]  ;;  %v7043_v33 = vld [vmem:[#allocation2 + $0x4f0] sm:$0xff] }
0x2a53   :  { %7353 = vmatpush1.msra.mxu1 %v7145_v32  ;;  %7468 = vmatprep.subr.mxu0 %v7072_v26  ;;  %v6919_v4 = vld [vmem:[#allocation2 + $0x110] sm:$0xff]  ;;  %v7040_v17 = vld [vmem:[#allocation2 + $0x4d8] sm:$0xff] }
0x2a54   :  { %7354 = vmatprep.subr.mxu1 %v7142_v3  ;;  %7469 = vmatpush1.msra.mxu0 %v7071_v10  ;;  %v6916_v9 = vld [vmem:[#allocation2 + $0xf8] sm:$0xff]  ;;  %v7039_v18 = vld [vmem:[#allocation2 + $0x4d0] sm:$0xff] }
0x2a55   :  { %7355 = vmatpush1.msra.mxu1 %v7141_v24  ;;  %7470 = vmatprep.subr.mxu0 %v7068_v63  ;;  %v6915_v46 = vld [vmem:[#allocation2 + $0xf0] sm:$0xff]  ;;  %v7036_v19 = vld [vmem:[#allocation2 + $0x4b8] sm:$0xff] }
0x2a56   :  { %8162 = vmatmul.mubr.msk.f32.vlgmr.msra.gmra.mxu1 %vm547_vm3, %v12584_v59  ;;  %7395 = vmatprep.subr.mxu1 %v6948_v56  ;;  %v6912_v52 = vld [vmem:[#allocation2 + $0xd8] sm:$0xff]  ;;  %v7035_v6 = vld [vmem:[#allocation2 + $0x4b0] sm:$0xff] }
0x2a57   :  { %7396 = vmatpush1.msra.mxu1 %v6947_v8  ;;  %7471 = vmatpush1.msra.mxu0 %v7067_v40  ;;  %v6911_v48 = vld [vmem:[#allocation2 + $0xd0] sm:$0xff]  ;;  %v7032_v45 = vld [vmem:[#allocation2 + $0x498] sm:$0xff] }
0x2a58   :  { %7397 = vmatprep.subr.mxu1 %v6944_v62  ;;  %7472 = vmatprep.subr.mxu0 %v7064_v11  ;;  %v6908_v30 = vld [vmem:[#allocation2 + $0xb8] sm:$0xff]  ;;  %v7031_v7 = vld [vmem:[#allocation2 + $0x490] sm:$0xff] }
0x2a59   :  { %7398 = vmatpush1.msra.mxu1 %v6943_v35  ;;  %7473 = vmatpush1.msra.mxu0 %v7063_v61  ;;  %v6907_v57 = vld [vmem:[#allocation2 + $0xb0] sm:$0xff]  ;;  %v7028_v16 = vld [vmem:[#allocation2 + $0x478] sm:$0xff] }
0x2a5a   :  { %7399 = vmatprep.subr.mxu1 %v6940_v58  ;;  %7474 = vmatprep.subr.mxu0 %v7060_v12  ;;  %v6904_v42 = vld [vmem:[#allocation2 + $0x98] sm:$0xff]  ;;  %v7027_v49 = vld [vmem:[#allocation2 + $0x470] sm:$0xff] }
0x2a5b   :  { %7400 = vmatpush1.msra.mxu1 %v6939_v20  ;;  %7475 = vmatpush1.msra.mxu0 %v7059_v53  ;;  %v6903_v23 = vld [vmem:[#allocation2 + $0x90] sm:$0xff]  ;;  %v7024_v27 = vld [vmem:[#allocation2 + $0x458] sm:$0xff] }
0x2a5c   :  { %7401 = vmatprep.subr.mxu1 %v6936_v0  ;;  %7476 = vmatprep.subr.mxu0 %v7056_v47  ;;  %v6900_v2 = vld [vmem:[#allocation2 + $0x78] sm:$0xff]  ;;  %v7023_v32 = vld [vmem:[#allocation2 + $0x450] sm:$0xff] }
0x2a5d   :  { %7402 = vmatpush1.msra.mxu1 %v6935_v34  ;;  %7477 = vmatpush1.msra.mxu0 %v7055_v5  ;;  %v6899_v43 = vld [vmem:[#allocation2 + $0x70] sm:$0xff]  ;;  %v7020_v3 = vld [vmem:[#allocation2 + $0x438] sm:$0xff] }
0x2a5e   :  { %7403 = vmatprep.subr.mxu1 %v6932_v28  ;;  %7478 = vmatprep.subr.mxu0 %v7052_v44  ;;  %v6896_v26 = vld [vmem:[#allocation2 + $0x58] sm:$0xff]  ;;  %v7019_v24 = vld [vmem:[#allocation2 + $0x430] sm:$0xff] }
0x2a5f   :  { %7404 = vmatpush1.msra.mxu1 %v6931_v1  ;;  %7479 = vmatpush1.msra.mxu0 %v7051_v50  ;;  %v6895_v10 = vld [vmem:[#allocation2 + $0x50] sm:$0xff]  ;;  %v7016_v56 = vld [vmem:[#allocation2 + $0x418] sm:$0xff] }
0x2a60   :  { %7405 = vmatprep.subr.mxu1 %v6928_v22  ;;  %7480 = vmatprep.subr.mxu0 %v7048_v31  ;;  %v6892_v8 = vld [vmem:[#allocation2 + $0x38] sm:$0xff]  ;;  %v7015_v63 = vld [vmem:[#allocation2 + $0x410] sm:$0xff] }
0x2a61   :  { %7406 = vmatpush1.msra.mxu1 %v6927_v54  ;;  %7481 = vmatpush1.msra.mxu0 %v7047_v13  ;;  %v6891_v62 = vld [vmem:[#allocation2 + $0x30] sm:$0xff]  ;;  %v7140_v40 = vld [vmem:[#allocation2 + $0x7f8] sm:$0xff] }
0x2a62   :  { %7407 = vmatprep.subr.mxu1 %v6924_v55  ;;  %7482 = vmatprep.subr.mxu0 %v7044_v51  ;;  %v6888_v35 = vld [vmem:[#allocation2 + $0x18] sm:$0xff]  ;;  %v7139_v11 = vld [vmem:[#allocation2 + $0x7f0] sm:$0xff] }
0x2a63   :  { %7408 = vmatpush1.msra.mxu1 %v6923_v14  ;;  %7483 = vmatpush1.msra.mxu0 %v7043_v33  ;;  %v6887_v58 = vld [vmem:[#allocation2 + $0x10] sm:$0xff]  ;;  %v7136_v61 = vld [vmem:[#allocation2 + $0x7d8] sm:$0xff] }
0x2a64   :  { %7409 = vmatprep.subr.mxu1 %v6920_v41  ;;  %7484 = vmatprep.subr.mxu0 %v7040_v17  ;;  %v7012_v20 = vld [vmem:[#allocation2 + $0x3f8] sm:$0xff]  ;;  %v7135_v12 = vld [vmem:[#allocation2 + $0x7d0] sm:$0xff] }
0x2a65   :  { %7410 = vmatpush1.msra.mxu1 %v6919_v4  ;;  %7485 = vmatpush1.msra.mxu0 %v7039_v18  ;;  %v7011_v0 = vld [vmem:[#allocation2 + $0x3f0] sm:$0xff]  ;;  %v7132_v53 = vld [vmem:[#allocation2 + $0x7b8] sm:$0xff] }
0x2a66   :  { %7411 = vmatprep.subr.mxu1 %v6916_v9  ;;  %7486 = vmatprep.subr.mxu0 %v7036_v19  ;;  %v7008_v34 = vld [vmem:[#allocation2 + $0x3d8] sm:$0xff]  ;;  %v7131_v47 = vld [vmem:[#allocation2 + $0x7b0] sm:$0xff] }
0x2a67   :  { %7412 = vmatpush1.msra.mxu1 %v6915_v46  ;;  %7487 = vmatpush1.msra.mxu0 %v7035_v6  ;;  %v7007_v28 = vld [vmem:[#allocation2 + $0x3d0] sm:$0xff]  ;;  %v7128_v5 = vld [vmem:[#allocation2 + $0x798] sm:$0xff] }
0x2a68   :  { %7413 = vmatprep.subr.mxu1 %v6912_v52  ;;  %7488 = vmatprep.subr.mxu0 %v7032_v45  ;;  %v7004_v1 = vld [vmem:[#allocation2 + $0x3b8] sm:$0xff]  ;;  %v7127_v44 = vld [vmem:[#allocation2 + $0x790] sm:$0xff] }
0x2a69   :  { %7414 = vmatpush1.msra.mxu1 %v6911_v48  ;;  %7489 = vmatpush1.msra.mxu0 %v7031_v7  ;;  %v7003_v22 = vld [vmem:[#allocation2 + $0x3b0] sm:$0xff]  ;;  %v7124_v50 = vld [vmem:[#allocation2 + $0x778] sm:$0xff] }
0x2a6a   :  { %7415 = vmatprep.subr.mxu1 %v6908_v30  ;;  %7490 = vmatprep.subr.mxu0 %v7028_v16  ;;  %v7000_v54 = vld [vmem:[#allocation2 + $0x398] sm:$0xff]  ;;  %v7123_v31 = vld [vmem:[#allocation2 + $0x770] sm:$0xff] }
0x2a6b   :  { %7416 = vmatpush1.msra.mxu1 %v6907_v57  ;;  %7491 = vmatpush1.msra.mxu0 %v7027_v49  ;;  %v6999_v55 = vld [vmem:[#allocation2 + $0x390] sm:$0xff]  ;;  %v7120_v13 = vld [vmem:[#allocation2 + $0x758] sm:$0xff] }
0x2a6c   :  { %7417 = vmatprep.subr.mxu1 %v6904_v42  ;;  %7492 = vmatprep.subr.mxu0 %v7024_v27  ;;  %v6996_v14 = vld [vmem:[#allocation2 + $0x378] sm:$0xff]  ;;  %v7119_v51 = vld [vmem:[#allocation2 + $0x750] sm:$0xff] }
0x2a6d   :  { %7418 = vmatpush1.msra.mxu1 %v6903_v23  ;;  %7493 = vmatpush1.msra.mxu0 %v7023_v32  ;;  %v6995_v41 = vld [vmem:[#allocation2 + $0x370] sm:$0xff]  ;;  %v7116_v33 = vld [vmem:[#allocation2 + $0x738] sm:$0xff] }
0x2a6e   :  { %7419 = vmatprep.subr.mxu1 %v6900_v2  ;;  %7494 = vmatprep.subr.mxu0 %v7020_v3  ;;  %v6992_v4 = vld [vmem:[#allocation2 + $0x358] sm:$0xff]  ;;  %v7115_v17 = vld [vmem:[#allocation2 + $0x730] sm:$0xff] }
0x2a6f   :  { %7420 = vmatpush1.msra.mxu1 %v6899_v43  ;;  %7495 = vmatpush1.msra.mxu0 %v7019_v24  ;;  %v6991_v9 = vld [vmem:[#allocation2 + $0x350] sm:$0xff]  ;;  %v7112_v18 = vld [vmem:[#allocation2 + $0x718] sm:$0xff] }
0x2a70   :  { %7421 = vmatprep.subr.mxu1 %v6896_v26  ;;  %7496 = vmatprep.subr.mxu0 %v7016_v56  ;;  %v6988_v46 = vld [vmem:[#allocation2 + $0x338] sm:$0xff]  ;;  %v7111_v19 = vld [vmem:[#allocation2 + $0x710] sm:$0xff] }
0x2a71   :  { %7422 = vmatpush1.msra.mxu1 %v6895_v10  ;;  %7497 = vmatpush1.msra.mxu0 %v7015_v63  ;;  %v6987_v52 = vld [vmem:[#allocation2 + $0x330] sm:$0xff]  ;;  %v7108_v6 = vld [vmem:[#allocation2 + $0x6f8] sm:$0xff] }
0x2a72   :  { %7423 = vmatprep.subr.mxu1 %v6892_v8  ;;  %7498 = vmatprep.subr.mxu0 %v7140_v40  ;;  %v6984_v48 = vld [vmem:[#allocation2 + $0x318] sm:$0xff]  ;;  %v7107_v45 = vld [vmem:[#allocation2 + $0x6f0] sm:$0xff] }
0x2a73   :  { %7424 = vmatpush1.msra.mxu1 %v6891_v62  ;;  %7499 = vmatpush2.msra.mxu0 %v7139_v11  ;;  %v6983_v30 = vld [vmem:[#allocation2 + $0x310] sm:$0xff]  ;;  %v7104_v7 = vld [vmem:[#allocation2 + $0x6d8] sm:$0xff] }
0x2a74   :  { %7425 = vmatprep.subr.mxu1 %v6888_v35  ;;  %7500 = vmatprep.subr.mxu0 %v7136_v61  ;;  %v6980_v57 = vld [vmem:[#allocation2 + $0x2f8] sm:$0xff]  ;;  %v7103_v16 = vld [vmem:[#allocation2 + $0x6d0] sm:$0xff] }
0x2a75   :  { %7426 = vmatpush1.msra.mxu1 %v6887_v58  ;;  %7501 = vmatpush2.msra.mxu0 %v7135_v12  ;;  %v6979_v42 = vld [vmem:[#allocation2 + $0x2f0] sm:$0xff]  ;;  %v7100_v49 = vld [vmem:[#allocation2 + $0x6b8] sm:$0xff] }
0x2a76   :  { %7427 = vmatprep.subr.mxu1 %v7012_v20  ;;  %7502 = vmatprep.subr.mxu0 %v7132_v53  ;;  %v6976_v23 = vld [vmem:[#allocation2 + $0x2d8] sm:$0xff]  ;;  %v7099_v27 = vld [vmem:[#allocation2 + $0x6b0] sm:$0xff] }
0x2a77   :  { %7428 = vmatpush2.msra.mxu1 %v7011_v0  ;;  %7503 = vmatpush2.msra.mxu0 %v7131_v47  ;;  %v6975_v2 = vld [vmem:[#allocation2 + $0x2d0] sm:$0xff]  ;;  %v7096_v32 = vld [vmem:[#allocation2 + $0x698] sm:$0xff] }
0x2a78   :  { %7429 = vmatprep.subr.mxu1 %v7008_v34  ;;  %7504 = vmatprep.subr.mxu0 %v7128_v5  ;;  %v6972_v43 = vld [vmem:[#allocation2 + $0x2b8] sm:$0xff]  ;;  %v7095_v3 = vld [vmem:[#allocation2 + $0x690] sm:$0xff] }
0x2a79   :  { %7430 = vmatpush2.msra.mxu1 %v7007_v28  ;;  %7505 = vmatpush2.msra.mxu0 %v7127_v44  ;;  %v6971_v26 = vld [vmem:[#allocation2 + $0x2b0] sm:$0xff]  ;;  %v7092_v24 = vld [vmem:[#allocation2 + $0x678] sm:$0xff] }
0x2a7a   :  { %7431 = vmatprep.subr.mxu1 %v7004_v1  ;;  %7506 = vmatprep.subr.mxu0 %v7124_v50  ;;  %v6968_v10 = vld [vmem:[#allocation2 + $0x298] sm:$0xff]  ;;  %v7091_v56 = vld [vmem:[#allocation2 + $0x670] sm:$0xff] }
0x2a7b   :  { %7432 = vmatpush2.msra.mxu1 %v7003_v22  ;;  %7507 = vmatpush2.msra.mxu0 %v7123_v31  ;;  %v6967_v8 = vld [vmem:[#allocation2 + $0x290] sm:$0xff]  ;;  %v7088_v63 = vld [vmem:[#allocation2 + $0x658] sm:$0xff] }
0x2a7c   :  { %7433 = vmatprep.subr.mxu1 %v7000_v54  ;;  %7508 = vmatprep.subr.mxu0 %v7120_v13  ;;  %v6964_v62 = vld [vmem:[#allocation2 + $0x278] sm:$0xff]  ;;  %v7087_v40 = vld [vmem:[#allocation2 + $0x650] sm:$0xff] }
0x2a7d   :  { %7434 = vmatpush2.msra.mxu1 %v6999_v55  ;;  %7509 = vmatpush2.msra.mxu0 %v7119_v51  ;;  %v6963_v35 = vld [vmem:[#allocation2 + $0x270] sm:$0xff]  ;;  %v7084_v11 = vld [vmem:[#allocation2 + $0x638] sm:$0xff] }
0x2a7e   :  { %7435 = vmatprep.subr.mxu1 %v6996_v14  ;;  %7510 = vmatprep.subr.mxu0 %v7116_v33  ;;  %v6960_v58 = vld [vmem:[#allocation2 + $0x258] sm:$0xff]  ;;  %v6959_v61 = vld [vmem:[#allocation2 + $0x250] sm:$0xff] }
0x2a7f   :  { %7436 = vmatpush2.msra.mxu1 %v6995_v41  ;;  %7511 = vmatpush2.msra.mxu0 %v7115_v17  ;;  %v7083_v20 = vld [vmem:[#allocation2 + $0x630] sm:$0xff]  ;;  %v6956_v12 = vld [vmem:[#allocation2 + $0x238] sm:$0xff] }
0x2a80   :  { %7437 = vmatprep.subr.mxu1 %v6992_v4  ;;  %7512 = vmatprep.subr.mxu0 %v7112_v18  ;;  %v7080_v0 = vld [vmem:[#allocation2 + $0x618] sm:$0xff]  ;;  %v6955_v53 = vld [vmem:[#allocation2 + $0x230] sm:$0xff] }
0x2a81   :  { %7438 = vmatpush2.msra.mxu1 %v6991_v9  ;;  %7513 = vmatpush2.msra.mxu0 %v7111_v19  ;;  %v7079_v34 = vld [vmem:[#allocation2 + $0x610] sm:$0xff]  ;;  %v6952_v47 = vld [vmem:[#allocation2 + $0x218] sm:$0xff] }
0x2a82   :  { %7439 = vmatprep.subr.mxu1 %v6988_v46  ;;  %7514 = vmatprep.subr.mxu0 %v7108_v6  ;;  %v6951_v28 = vld [vmem:[#allocation2 + $0x210] sm:$0xff]  ;;  %v7156_v5 = vld [vmem:[#allocation2 + $0x878] sm:$0xff] }
0x2a83   :  { %7440 = vmatpush2.msra.mxu1 %v6987_v52  ;;  %7515 = vmatpush2.msra.mxu0 %v7107_v45  ;;  %v7155_v1 = vld [vmem:[#allocation2 + $0x870] sm:$0xff]  ;;  %v7152_v44 = vld [vmem:[#allocation2 + $0x858] sm:$0xff] }
0x2a84   :  { %7441 = vmatprep.subr.mxu1 %v6984_v48  ;;  %7516 = vmatprep.subr.mxu0 %v7104_v7  ;;  %v7148_v22 = vld [vmem:[#allocation2 + $0x838] sm:$0xff]  ;;  %v7147_v50 = vld [vmem:[#allocation2 + $0x830] sm:$0xff] }
0x2a85   :  { %7442 = vmatpush2.msra.mxu1 %v6983_v30  ;;  %7517 = vmatpush2.msra.mxu0 %v7103_v16  ;;  %v7144_v54 = vld [vmem:[#allocation2 + $0x818] sm:$0xff]  ;;  %v7143_v31 = vld [vmem:[#allocation2 + $0x810] sm:$0xff] }
0x2a86   :  { %7443 = vmatprep.subr.mxu1 %v6980_v57  ;;  %7518 = vmatprep.subr.mxu0 %v7100_v49 }
0x2a87   :  { %7444 = vmatpush2.msra.mxu1 %v6979_v42  ;;  %7519 = vmatpush2.msra.mxu0 %v7099_v27 }
0x2a88   :  { %7445 = vmatprep.subr.mxu1 %v6976_v23  ;;  %7520 = vmatprep.subr.mxu0 %v7096_v32 }
0x2a89   :  { %7446 = vmatpush2.msra.mxu1 %v6975_v2  ;;  %7521 = vmatpush2.msra.mxu0 %v7095_v3 }
0x2a8a   :  { %7447 = vmatprep.subr.mxu1 %v6972_v43  ;;  %7522 = vmatprep.subr.mxu0 %v7092_v24 }
0x2a8b   :  { %7448 = vmatpush2.msra.mxu1 %v6971_v26  ;;  %7523 = vmatpush2.msra.mxu0 %v7091_v56 }
0x2a8c   :  { %7449 = vmatprep.subr.mxu1 %v6968_v10  ;;  %7524 = vmatprep.subr.mxu0 %v7088_v63 }
0x2a8d   :  { %7450 = vmatpush2.msra.mxu1 %v6967_v8  ;;  %7525 = vmatpush2.msra.mxu0 %v7087_v40 }
0x2a8e   :  { %7451 = vmatprep.subr.mxu1 %v6964_v62  ;;  %7526 = vmatprep.subr.mxu0 %v7084_v11 }
0x2a8f   :  { %7452 = vmatpush2.msra.mxu1 %v6963_v35  ;;  %7459 = vmatprep.mubr.f32.mxu1 %v12623_v25  ;;  %v7151_v25 = vld [vmem:[#allocation2 + $0x850] sm:$0xff] }
0x2a90   :  { %7453 = vmatprep.subr.mxu1 %v6960_v58  ;;  %7527 = vmatpush2.msra.mxu0 %v7083_v20 }
0x2a91   :  { %7454 = vmatpush2.msra.mxu1 %v6959_v61  ;;  %7528 = vmatprep.subr.mxu0 %v7080_v0 }
0x2a92   :  { %7455 = vmatprep.subr.mxu1 %v6956_v12  ;;  %7529 = vmatpush2.msra.mxu0 %v7079_v34 }
0x2a93   :  { %7456 = vmatpush2.msra.mxu1 %v6955_v53  ;;  %7530 = vmatprep.mubr.f32.mxu0 %v12636_v60 }
0x2a94   :  { %7457 = vmatprep.subr.mxu1 %v6952_v47  ;;  %7531 = vmatmul.mubr.f32.vlgmr.msra.gmra.mxu0 %v12633_v38  ;;  %v7157_v38 = vld [vmem:[#allocation25] sm:$0xf] }
0x2a95   :  { %7458 = vmatpush2.msra.mxu1 %v6951_v28  ;;  %v7166_v55 = vrot.slane %v7157_v38, %v10693_v21  ;;  %v7174_v21 = vrot.slane %v7157_v38, %v11068_v15 }
0x2a96   :  { %7460 = vmatmul.mubr.f32.vlgmr.msra.gmra.mxu1 %v12620_v29  ;;  %7561 = vmatprep.subr.mxu1 %v7156_v5  ;;  %v7162_v29 = vrot.slane %v7157_v38, %v10690_v37  ;;  %v7170_v37 = vrot.slane %v7157_v38, %v11065_v39 }
0x2a97   :  { %7562 = vmatpush1.msra.mxu1 %v7155_v1  ;;  %7601 = vmatprep.mubr.f32.mxu1 %v10301_v36 }
0x2a98   :  { %7563 = vmatprep.subr.mxu1 %v7152_v44 }
0x2a99   :  { %7564 = vmatpush1.msra.mxu1 %v7151_v25 }
0x2a9a   :  { %7565 = vmatprep.subr.mxu1 %v7148_v22 }
0x2a9b   :  { %7566 = vmatpush1.msra.mxu1 %v7147_v50 }
0x2a9c   :  { %7567 = vmatprep.subr.mxu1 %v7144_v54 }
0x2a9d   :  { %7568 = vmatpush1.msra.mxu1 %v7143_v31 }
0x2a9e   :  { %8163 = vmatmul.mubr.msk.f32.vlgmr.msra.gmra.mxu1 %vm547_vm3, %v12584_v59 }
0x2b0d   :  { %v7248_v60 = vpop.f32.mrf.mxu1 }
0x2b0e   :  { %v7249_v51 = vadd.f32 %v7248_v60, %v7162_v29 }
0x2b0f   :  { %v7250_v13 = vpop.f32.mrf.mxu1  ;;  %v7319_v14 = vpop.f32.mrf.mxu0 }
0x2b10   :  { %v7251_v41 = vadd.f32 %v7250_v13, %v7166_v55  ;;  %v7320_v4 = vadd.f32 %v7319_v14, %v7249_v51 }
0x2b11   :  { %v7321_v33 = vpop.f32.mrf.mxu0 }
0x2b12   :  { %v7322_v9 = vadd.f32 %v7321_v33, %v7251_v41 }
0x2b16   :  { %v7390_v17 = vpop.f32.mrf.mxu1 }
0x2b17   :  { %v12654_v18 = vadd.f32 %v7390_v17, %v7320_v4 }
0x2b18   :  { %v7392_v46 = vpop.f32.mrf.mxu1 }
0x2b19   :  { %v7608_v19 = vmax.f32 %v12654_v18, 0.0  ;;  %v7393_v59 = vadd.f32 %v7392_v46, %v7322_v9 }
0x2b1b   :  { %v7609_v52 = vmax.f32 %v7393_v59, 0.0 }
0x2b54   :  { %v7532_v45 = vpop.f32.mrf.mxu0 }
0x2b56   :  { %v7461_v6 = vpop.f32.mrf.mxu1  ;;  %v7534_v57 = vpop.f32.mrf.mxu0 }
0x2b57   :  { %v7462_v30 = vadd.f32 %v7461_v6, %v7170_v37 }
0x2b58   :  { %v7463_v48 = vpop.f32.mrf.mxu1 }
0x2b59   :  { %v7464_v7 = vadd.f32 %v7463_v48, %v7174_v21  ;;  %v7533_v16 = vadd.f32 %v7532_v45, %v7462_v30 }
0x2b5b   :  { %v7535_v49 = vadd.f32 %v7534_v57, %v7464_v7 }
0x2b5e   :  { %v7603_v42 = vpop.f32.mrf.mxu1 }
0x2b5f   :  { %v12659_v23 = vadd.f32 %v7603_v42, %v7533_v16 }
0x2b60   :  { %v7605_v27 = vpop.f32.mrf.mxu1 }
0x2b61   :  { %v7610_v2 = vmax.f32 %v12659_v23, 0.0  ;;  %v7606_v32 = vadd.f32 %v7605_v27, %v7535_v49 }
0x2b63   :  { %v7611_v43 = vmax.f32 %v7606_v32, 0.0 }
0x2b64   :  { %10270 = dma.done.wait [#allocation4 + $0x1], 8192 }
0x2b65   :  { %10271 = vsyncadd [#allocation4 + $0x1], 4294959104  ;;  %7750 = vmatprep.mubr.f32.mxu0 %v7609_v52  ;;  %7820 = vmatprep.mubr.f32.mxu1 %v7611_v43  ;;  %v7646_v39 = vld [vmem:[#allocation3 + $0xf8] sm:$0xff]  ;;  %v7645_v24 = vld [vmem:[#allocation3 + $0xf0] sm:$0xff]  ;;  %vm7920_vm14 = vcmask 1024  }
0x2b66   :  { %v7678_v15 = vld [vmem:[#allocation3 + $0x1f8] sm:$0xff]  ;;  %8532 = vmatprep.subr.mxu0 %v7646_v39  ;;  %v7677_v10 = vld [vmem:[#allocation3 + $0x1f0] sm:$0xff]  ;;  %v7644_v63 = vld [vmem:[#allocation3 + $0xe8] sm:$0xff] }
0x2b67   :  { %v7630_v3 = vld [vmem:[#allocation3 + $0x78] sm:$0xff]  ;;  %8567 = vmatprep.subr.mxu1 %v7678_v15  ;;  %v7629_v56 = vld [vmem:[#allocation3 + $0x70] sm:$0xff]  ;;  %v7676_v62 = vld [vmem:[#allocation3 + $0x1e8] sm:$0xff] }
0x2b68   :  { %v7662_v26 = vld [vmem:[#allocation3 + $0x178] sm:$0xff]  ;;  %8533 = vmatpush3.msra.mxu0 %v7630_v3  ;;  %v7661_v8 = vld [vmem:[#allocation3 + $0x170] sm:$0xff]  ;;  %v7628_v40 = vld [vmem:[#allocation3 + $0x68] sm:$0xff] }
0x2b69   :  { %8568 = vmatpush3.msra.mxu1 %v7662_v26  ;;  %8534 = vmatprep.subr.mxu0 %v7645_v24  ;;  %v7660_v35 = vld [vmem:[#allocation3 + $0x168] sm:$0xff]  ;;  %v7643_v11 = vld [vmem:[#allocation3 + $0xe0] sm:$0xff]  ;;  %v7642_v12 = vld [vmem:[#allocation3 + $0xd8] sm:$0xff] }
0x2b6a   :  { %8569 = vmatprep.subr.mxu1 %v7677_v10  ;;  %8535 = vmatpush3.msra.mxu0 %v7629_v56  ;;  %v7675_v58 = vld [vmem:[#allocation3 + $0x1e0] sm:$0xff]  ;;  %v7674_v0 = vld [vmem:[#allocation3 + $0x1d8] sm:$0xff]  ;;  %v7641_v47 = vld [vmem:[#allocation3 + $0xd0] sm:$0xff] }
0x2b6b   :  { %8570 = vmatpush3.msra.mxu1 %v7661_v8  ;;  %8536 = vmatprep.subr.mxu0 %v7644_v63  ;;  %v7627_v61 = vld [vmem:[#allocation3 + $0x60] sm:$0xff]  ;;  %v7626_v53 = vld [vmem:[#allocation3 + $0x58] sm:$0xff]  ;;  %v7673_v28 = vld [vmem:[#allocation3 + $0x1d0] sm:$0xff] }
0x2b6c   :  { %8571 = vmatprep.subr.mxu1 %v7676_v62  ;;  %v7659_v20 = vld [vmem:[#allocation3 + $0x160] sm:$0xff]  ;;  %8537 = vmatpush3.msra.mxu0 %v7628_v40  ;;  %v7658_v34 = vld [vmem:[#allocation3 + $0x158] sm:$0xff]  ;;  %v7625_v5 = vld [vmem:[#allocation3 + $0x50] sm:$0xff] }
0x2b6d   :  { %8572 = vmatpush3.msra.mxu1 %v7660_v35  ;;  %8538 = vmatprep.subr.mxu0 %v7643_v11  ;;  %v7657_v1 = vld [vmem:[#allocation3 + $0x150] sm:$0xff]  ;;  %v7640_v44 = vld [vmem:[#allocation3 + $0xc8] sm:$0xff]  ;;  %v7639_v54 = vld [vmem:[#allocation3 + $0xc0] sm:$0xff] }
0x2b6e   :  { %8573 = vmatprep.subr.mxu1 %v7675_v58  ;;  %8539 = vmatpush3.msra.mxu0 %v7627_v61  ;;  %v7672_v25 = vld [vmem:[#allocation3 + $0x1c8] sm:$0xff]  ;;  %v7671_v31 = vld [vmem:[#allocation3 + $0x1c0] sm:$0xff]  ;;  %v7638_v60 = vld [vmem:[#allocation3 + $0xb8] sm:$0xff] }
0x2b6f   :  { %8574 = vmatpush3.msra.mxu1 %v7659_v20  ;;  %8540 = vmatprep.subr.mxu0 %v7642_v12  ;;  %v7624_v22 = vld [vmem:[#allocation3 + $0x48] sm:$0xff]  ;;  %v7623_v38 = vld [vmem:[#allocation3 + $0x40] sm:$0xff]  ;;  %v7670_v55 = vld [vmem:[#allocation3 + $0x1b8] sm:$0xff] }
0x2b70   :  { %8575 = vmatprep.subr.mxu1 %v7674_v0  ;;  %8541 = vmatpush3.msra.mxu0 %v7626_v53  ;;  %v7656_v50 = vld [vmem:[#allocation3 + $0x148] sm:$0xff]  ;;  %v7655_v29 = vld [vmem:[#allocation3 + $0x140] sm:$0xff]  ;;  %v7622_v13 = vld [vmem:[#allocation3 + $0x38] sm:$0xff] }
0x2b71   :  { %8576 = vmatpush3.msra.mxu1 %v7658_v34  ;;  %8542 = vmatprep.subr.mxu0 %v7641_v47  ;;  %v7654_v14 = vld [vmem:[#allocation3 + $0x138] sm:$0xff]  ;;  %v7637_v51 = vld [vmem:[#allocation3 + $0xb0] sm:$0xff]  ;;  %v7636_v17 = vld [vmem:[#allocation3 + $0xa8] sm:$0xff] }
0x2b72   :  { %8577 = vmatprep.subr.mxu1 %v7673_v28  ;;  %8543 = vmatpush3.msra.mxu0 %v7625_v5  ;;  %v7669_v41 = vld [vmem:[#allocation3 + $0x1b0] sm:$0xff]  ;;  %v7668_v9 = vld [vmem:[#allocation3 + $0x1a8] sm:$0xff]  ;;  %v7635_v52 = vld [vmem:[#allocation3 + $0xa0] sm:$0xff] }
0x2b73   :  { %8578 = vmatpush3.msra.mxu1 %v7657_v1  ;;  %8544 = vmatprep.subr.mxu0 %v7640_v44  ;;  %v7621_v33 = vld [vmem:[#allocation3 + $0x30] sm:$0xff]  ;;  %v7620_v46 = vld [vmem:[#allocation3 + $0x28] sm:$0xff]  ;;  %v7667_v37 = vld [vmem:[#allocation3 + $0x1a0] sm:$0xff] }
0x2b74   :  { %8579 = vmatprep.subr.mxu1 %v7672_v25  ;;  %8545 = vmatpush3.msra.mxu0 %v7624_v22  ;;  %v7653_v4 = vld [vmem:[#allocation3 + $0x130] sm:$0xff]  ;;  %v7652_v59 = vld [vmem:[#allocation3 + $0x128] sm:$0xff]  ;;  %v7619_v6 = vld [vmem:[#allocation3 + $0x20] sm:$0xff] }
0x2b75   :  { %8580 = vmatpush3.msra.mxu1 %v7656_v50  ;;  %8546 = vmatprep.subr.mxu0 %v7639_v54  ;;  %v7651_v21 = vld [vmem:[#allocation3 + $0x120] sm:$0xff]  ;;  %v7634_v48 = vld [vmem:[#allocation3 + $0x98] sm:$0xff]  ;;  %v7633_v57 = vld [vmem:[#allocation3 + $0x90] sm:$0xff] }
0x2b76   :  { %8581 = vmatprep.subr.mxu1 %v7671_v31  ;;  %8547 = vmatpush3.msra.mxu0 %v7623_v38  ;;  %v7666_v45 = vld [vmem:[#allocation3 + $0x198] sm:$0xff]  ;;  %v7665_v16 = vld [vmem:[#allocation3 + $0x190] sm:$0xff]  ;;  %v7632_v27 = vld [vmem:[#allocation3 + $0x88] sm:$0xff] }
0x2b77   :  { %8582 = vmatpush3.msra.mxu1 %v7655_v29  ;;  %8548 = vmatprep.subr.mxu0 %v7638_v60  ;;  %v7618_v30 = vld [vmem:[#allocation3 + $0x18] sm:$0xff]  ;;  %v7617_v42 = vld [vmem:[#allocation3 + $0x10] sm:$0xff]  ;;  %v7664_v32 = vld [vmem:[#allocation3 + $0x188] sm:$0xff] }
0x2b78   :  { %8583 = vmatprep.subr.mxu1 %v7670_v55  ;;  %8549 = vmatpush3.msra.mxu0 %v7622_v13  ;;  %v7650_v7 = vld [vmem:[#allocation3 + $0x118] sm:$0xff]  ;;  %v7649_v49 = vld [vmem:[#allocation3 + $0x110] sm:$0xff]  ;;  %v7616_v43 = vld [vmem:[#allocation3 + $0x8] sm:$0xff] }
0x2b79   :  { %8584 = vmatpush3.msra.mxu1 %v7654_v14  ;;  %8550 = vmatprep.subr.mxu0 %v7637_v51  ;;  %v7648_v39 = vld [vmem:[#allocation3 + $0x108] sm:$0xff]  ;;  %v7631_v15 = vld [vmem:[#allocation3 + $0x80] sm:$0xff]  ;;  %v7839_v63 = vld [vmem:[#allocation28 + $0x60] sm:$0xff] }
0x2b7a   :  { %8585 = vmatprep.subr.mxu1 %v7669_v41  ;;  %8551 = vmatpush3.msra.mxu0 %v7621_v33  ;;  %v7663_v3 = vld [vmem:[#allocation3 + $0x180] sm:$0xff]  ;;  %v7842_v10 = vld [vmem:[#allocation28 + $0x78] sm:$0xff]  ;;  %v7831_v11 = vld [vmem:[#allocation28 + $0x20] sm:$0xff] }
0x2b7b   :  { %8586 = vmatpush3.msra.mxu1 %v7653_v4  ;;  %8552 = vmatprep.subr.mxu0 %v7636_v17  ;;  %v7615_v26 = vld [vmem:[#allocation3] sm:$0xff]  ;;  %v7838_v18 = vld [vmem:[#allocation28 + $0x58] sm:$0xff]  ;;  %v7827_v12 = vld [vmem:[#allocation28] sm:$0xff] }
0x2b7c   :  { %8587 = vmatprep.subr.mxu1 %v7668_v9  ;;  %8553 = vmatpush3.msra.mxu0 %v7620_v46  ;;  %v7647_v24 = vld [vmem:[#allocation3 + $0x100] sm:$0xff]  ;;  %v7834_v62 = vld [vmem:[#allocation28 + $0x38] sm:$0xff] }
0x2b7d   :  { %8588 = vmatpush3.msra.mxu1 %v7652_v59  ;;  %8554 = vmatprep.subr.mxu0 %v7635_v52  ;;  %v7841_v56 = vld [vmem:[#allocation28 + $0x70] sm:$0xff]  ;;  %v7840_v8 = vld [vmem:[#allocation28 + $0x68] sm:$0xff]  ;;  %v7830_v58 = vld [vmem:[#allocation28 + $0x18] sm:$0xff] }
0x2b7e   :  { %8589 = vmatprep.subr.mxu1 %v7667_v37  ;;  %8555 = vmatpush3.msra.mxu0 %v7619_v6  ;;  %v7836_v23 = vld [vmem:[#allocation28 + $0x48] sm:$0xff]  ;;  %v7833_v40 = vld [vmem:[#allocation28 + $0x30] sm:$0xff]  ;;  %v8164_v34 = vld [vmem:[#allocation27] ss:$0 sm:$0xff] }
0x2b7f   :  { %8590 = vmatpush3.msra.mxu1 %v7651_v21  ;;  %8556 = vmatprep.subr.mxu0 %v7634_v48  ;;  %v7832_v35 = vld [vmem:[#allocation28 + $0x28] sm:$0xff]  ;;  %v7829_v61 = vld [vmem:[#allocation28 + $0x10] sm:$0xff] }
0x2b80   :  { %8591 = vmatprep.subr.mxu1 %v7666_v45  ;;  %8557 = vmatpush3.msra.mxu0 %v7618_v30  ;;  %v7828_v20 = vld [vmem:[#allocation28 + $0x8] sm:$0xff] }
0x2b81   :  { %8592 = vmatpush3.msra.mxu1 %v7650_v7  ;;  %8558 = vmatprep.subr.mxu0 %v7633_v57  ;;  %v8165_v50 = vld [vmem:[#allocation5] ss:$0 sm:$0xff] }
0x2b82   :  { %8593 = vmatprep.subr.mxu1 %v7665_v16  ;;  %8559 = vmatpush3.msra.mxu0 %v7617_v42 }
0x2b83   :  { %8594 = vmatpush3.msra.mxu1 %v7649_v49  ;;  %8560 = vmatprep.subr.mxu0 %v7632_v27 }
0x2b84   :  { %8595 = vmatprep.subr.mxu1 %v7664_v32  ;;  %8561 = vmatpush3.msra.mxu0 %v7616_v43 }
0x2b85   :  { %8596 = vmatpush3.msra.mxu1 %v7648_v39  ;;  %8562 = vmatprep.subr.mxu0 %v7631_v15 }
0x2b86   :  { %8597 = vmatprep.subr.mxu1 %v7663_v3  ;;  %8563 = vmatpush3.msra.mxu0 %v7615_v26 }
0x2b87   :  { %8598 = vmatpush3.msra.mxu1 %v7647_v24  ;;  %7751 = vmatmul.mubr.f32.vlgmr.msra.gmra.mxu0 %v7608_v19  ;;  %v7837_v19 = vld [vmem:[#allocation28 + $0x50] sm:$0xff] }
0x2b88   :  { %7821 = vmatmul.mubr.f32.vlgmr.msra.gmra.mxu1 %v7610_v2  ;;  %9481 = vmatprep.subr.mxu0 %v10301_v36  ;;  %v7835_v2 = vld [vmem:[#allocation28 + $0x40] sm:$0xff] }
0x2b89   :  { %9513 = vmatprep.mubr.msk.f32.mxu0 %vm10302_vm10, %v10301_v36  ;;  %9482 = vmatpush3.msra.mxu0 %v7842_v10 }
0x2b8a   :  { %9483 = vmatprep.subr.mxu0 %v10301_v36 }
0x2b8b   :  { %9484 = vmatpush3.msra.mxu0 %v7841_v56 }
0x2b8c   :  { %9485 = vmatprep.subr.mxu0 %v10301_v36 }
0x2b8d   :  { %9486 = vmatpush3.msra.mxu0 %v7840_v8 }
0x2b8e   :  { %9487 = vmatprep.subr.mxu0 %v10301_v36 }
0x2b8f   :  { %9488 = vmatpush3.msra.mxu0 %v7839_v63 }
0x2b90   :  { %9489 = vmatprep.subr.mxu0 %v10301_v36 }
0x2b91   :  { %9490 = vmatpush3.msra.mxu0 %v7838_v18 }
0x2b92   :  { %9491 = vmatprep.subr.mxu0 %v10301_v36 }
0x2b93   :  { %9492 = vmatpush3.msra.mxu0 %v7837_v19 }
0x2b94   :  { %9493 = vmatprep.subr.mxu0 %v10301_v36 }
0x2b95   :  { %9494 = vmatpush3.msra.mxu0 %v7836_v23 }
0x2b96   :  { %9495 = vmatprep.subr.mxu0 %v10301_v36 }
0x2b97   :  { %9496 = vmatpush3.msra.mxu0 %v7835_v2 }
0x2b98   :  { %9497 = vmatprep.subr.mxu0 %v10301_v36 }
0x2b99   :  { %9498 = vmatpush3.msra.mxu0 %v7834_v62 }
0x2b9a   :  { %9499 = vmatprep.subr.mxu0 %v10301_v36 }
0x2b9b   :  { %9500 = vmatpush3.msra.mxu0 %v7833_v40 }
0x2b9c   :  { %9501 = vmatprep.subr.mxu0 %v10301_v36 }
0x2b9d   :  { %9502 = vmatpush3.msra.mxu0 %v7832_v35 }
0x2b9e   :  { %9503 = vmatprep.subr.mxu0 %v10301_v36 }
0x2b9f   :  { %9504 = vmatpush3.msra.mxu0 %v7831_v11 }
0x2ba0   :  { %9505 = vmatprep.subr.mxu0 %v10301_v36 }
0x2ba1   :  { %9506 = vmatpush3.msra.mxu0 %v7830_v58 }
0x2ba2   :  { %9507 = vmatprep.subr.mxu0 %v10301_v36 }
0x2ba3   :  { %9508 = vmatpush3.msra.mxu0 %v7829_v61 }
0x2ba4   :  { %9509 = vmatprep.subr.mxu0 %v10301_v36 }
0x2ba5   :  { %9510 = vmatpush3.msra.mxu0 %v7828_v20 }
0x2ba6   :  { %9511 = vmatprep.subr.mxu0 %v10301_v36 }
0x2ba7   :  { %9512 = vmatpush3.msra.mxu0 %v7827_v12 }
0x2c47   :  { %v8564_v0 = vpop.f32.mrf.mxu0 }
0x2c48   :  { %v8599_v53 = vpop.f32.mrf.mxu1 }
0x2c49   :  { %v8565_v47 = vpop.f32.mrf.mxu0 }
0x2c4a   :  { %v8600_v28 = vpop.f32.mrf.mxu1  ;;  %v8566_v5 = vadd.f32 %v8565_v47, %v8564_v0 }
0x2c4b   :  { %v8601_v44 = vadd.f32 %v8600_v28, %v8599_v53 }
0x2c4c   :  { %v7753_v1 = vadd.f32 %v8566_v5, %v8164_v34 }
0x2c4e   :  { %v7823_v25 = vadd.f32 %v8601_v44, %v7753_v1 }
0x2c50   :  { %v7826_v22 = vmax.f32 %v7823_v25, 0.0 }
0x2c52   :  { %9514 = vmatmul.mubr.f32.vlgmr.msra.gmra.mxu0 %v7826_v22 }
0x2d12   :  { %v7916_v54 = vpop.f32.mrf.mxu0 }
0x2d13   :  { %v7917_v31 = vadd.f32 %v8165_v50, %v7916_v54 }
0x2d14   :  { %v9515_v38 = vpop.f32.mrf.mxu0 }
0x2d15   :  { %7921 = vst.msk [vmem:[%s12706_s19] sm:$0x3] %vm7920_vm14, %v7917_v31 }
0x2d16   :  { %7926 = vsyncpa [#allocation7], 1 }
0x2d17   :  { %7927 = vsyncpa [#allocation11], 1 }
0x2d18   :  { %7928 = vsyncpa [#allocation14], 1 }
0x2d19   :  { %7929 = vsyncpa [#allocation17], 1 }
0x2d1a   :  { %7930 = vsyncpa [#allocation20], 1 }
0x2d1b   :  { %7931 = vsyncpa [#allocation23], 1 }
0x2d1c   :  { %7932 = vsyncpa [#allocation26], 1 }
0x2d1d   :  { %7933 = vsyncpa [#allocation29], 1 }
0x2d1e   :  { %7934 = vsyncpa [#allocation8], 1 }
0x2d1f   :  { %7935 = vsyncmov [#allocation4] }
0x2d22   :  { %s7936_s28 = vpop.sfrf %7935 }
0x2d23   :  { %p8166_p3 = scmp.ne.s32.totalorder %s7936_s28, 0 }
0x2d25   :  { %7940 = shalt.err (%p8166_p3)  }
0x2d26   :  { %7942 = vsyncmov [#allocation4 + $0x1] }
0x2d29   :  { %s7943_s22 = vpop.sfrf %7942 }
0x2d2a   :  { %p8167_p4 = scmp.ne.s32.totalorder %s7943_s22, 0 }
0x2d2c   :  { %7947 = shalt.err (%p8167_p4)  }

</bundles_post_ra>
